<compile_context>
chip_gen: v5e
topology: v5e:2x2
jax: 0.10.0
libtpu: 0.0.40
codegen_flags: <defaults>
</compile_context>

<pallas_src>
import functools
import math

import jax
import jax.numpy as jnp
from jax.experimental import pallas as pl
from jax.experimental.pallas import tpu as pltpu


_ROW_TILE = 512          # target rows per matmul tile (multiple of 8)


# ----------------------------------------------------------------------------
# small helpers
# ----------------------------------------------------------------------------
def _gelu(x):
    # TODO(synk): PyTorch nn.GELU() uses the exact erf formulation; the tanh
    # approximation is used here for TPU-friendly lowering (|diff| ~ 1e-3).
    c = math.sqrt(2.0 / math.pi)
    return 0.5 * x * (1.0 + jnp.tanh(c * (x + 0.044715 * x * x * x)))


def _row_tile(hw):
    return hw if hw <= _ROW_TILE else _ROW_TILE


def _pick_window_batch(nw, n, target_rows=512):
    """Largest divisor of nw with wb*n <= target_rows (>=1)."""
    wb = max(1, min(nw, max(1, target_rows // max(n, 1))))
    while nw % wb:
        wb -= 1
    return wb


# ----------------------------------------------------------------------------
# fused pointwise (1x1 conv) matmul kernel:
#   o = act((x * gate?) @ W + b) + residual?
# x is laid out as (B, HW, Cin); grid = (B, row_tiles).
# ----------------------------------------------------------------------------
def _pw_kernel(*refs, act, has_gate, has_res):
    it = iter(refs)
    x_ref = next(it)
    g_ref = next(it) if has_gate else None
    w_ref = next(it)
    b_ref = next(it)
    r_ref = next(it) if has_res else None
    o_ref = next(it)

    x = x_ref[0]
    if has_gate:
        x = x.astype(jnp.float32) * g_ref[0]          # per-(batch, channel) gate
    acc = jnp.dot(x.astype(jnp.bfloat16), w_ref[...],
                  preferred_element_type=jnp.float32)
    acc = acc + b_ref[...]
    if act == "gelu":
        acc = _gelu(acc)
    if has_res:
        acc = acc + r_ref[0].astype(jnp.float32)
    o_ref[0] = acc.astype(o_ref.dtype)


def pw_block(x3, w, b, *, act="none", gate=None, residual=None, out_dtype=None):
    """x3: (B, HW, K) ; w: (K, N) (bf16) ; b: (N,) ; gate: (B, 1, K) ;
    residual: (B, HW, N).  Returns (B, HW, N)."""
    B, HW, K = x3.shape
    N = w.shape[1]
    TM = _row_tile(HW)
    grid = (B, pl.cdiv(HW, TM))

    in_specs = [pl.BlockSpec((1, TM, K), lambda bb, m: (bb, m, 0))]
    args = [x3]
    if gate is not None:
        in_specs.append(pl.BlockSpec((1, 1, K), lambda bb, m: (bb, 0, 0)))
        args.append(gate)
    in_specs += [pl.BlockSpec((K, N), lambda bb, m: (0, 0)),
                 pl.BlockSpec((1, N), lambda bb, m: (0, 0))]
    args += [w, b.reshape(1, N)]
    if residual is not None:
        in_specs.append(pl.BlockSpec((1, TM, N), lambda bb, m: (bb, m, 0)))
        args.append(residual)

    out_dtype = out_dtype or x3.dtype
    return pl.pallas_call(
        functools.partial(_pw_kernel, act=act,
                          has_gate=gate is not None, has_res=residual is not None),
        out_shape=jax.ShapeDtypeStruct((B, HW, N), out_dtype),
        grid_spec=pltpu.PrefetchScalarGridSpec(
            num_scalar_prefetch=0, grid=grid,
            in_specs=in_specs,
            out_specs=pl.BlockSpec((1, TM, N), lambda bb, m: (bb, m, 0))),
        compiler_params=pltpu.CompilerParams(
            dimension_semantics=("parallel", "parallel")),
    )(*args)


# ----------------------------------------------------------------------------
# fused proj(cat(grid,block)) + bias + residual -> FFN expand + GELU
#   t = r + g @ Wp_g + l @ Wp_l + bp ;  o = gelu(t @ W1 + b1)
# ----------------------------------------------------------------------------
def _proj_ffn_kernel(g_ref, l_ref, r_ref, wpg_ref, wpl_ref, bp_ref,
                     w1_ref, b1_ref, o_ref):
    t = jnp.dot(g_ref[0].astype(jnp.bfloat16), wpg_ref[...],
                preferred_element_type=jnp.float32)
    t = t + jnp.dot(l_ref[0].astype(jnp.bfloat16), wpl_ref[...],
                    preferred_element_type=jnp.float32)
    t = t + bp_ref[...] + r_ref[0]
    f = jnp.dot(t.astype(jnp.bfloat16), w1_ref[...],
                preferred_element_type=jnp.float32)
    f = _gelu(f + b1_ref[...])
    o_ref[0] = f.astype(o_ref.dtype)


def proj_ffn_expand(g3, l3, r3, wpg, wpl, bp, w1, b1):
    B, HW, D = g3.shape
    N1 = w1.shape[1]
    TM = _row_tile(HW)
    grid = (B, pl.cdiv(HW, TM))
    row_d = pl.BlockSpec((1, TM, D), lambda bb, m: (bb, m, 0))
    return pl.pallas_call(
        _proj_ffn_kernel,
        out_shape=jax.ShapeDtypeStruct((B, HW, N1), jnp.bfloat16),
        grid_spec=pltpu.PrefetchScalarGridSpec(
            num_scalar_prefetch=0, grid=grid,
            in_specs=[row_d, row_d, row_d,
                      pl.BlockSpec((D, D), lambda bb, m: (0, 0)),
                      pl.BlockSpec((D, D), lambda bb, m: (0, 0)),
                      pl.BlockSpec((1, D), lambda bb, m: (0, 0)),
                      pl.BlockSpec((D, N1), lambda bb, m: (0, 0)),
                      pl.BlockSpec((1, N1), lambda bb, m: (0, 0))],
            out_specs=pl.BlockSpec((1, TM, N1), lambda bb, m: (bb, m, 0))),
        compiler_params=pltpu.CompilerParams(
            dimension_semantics=("parallel", "parallel")),
    )(g3, l3, r3, wpg, wpl, bp.reshape(1, D), w1, b1.reshape(1, N1))


# ----------------------------------------------------------------------------
# depthwise KxK conv (stride 1, pre-padded input), fused bias/BN + act,
# optionally fused Squeeze-Excitation squeeze:
#   gate = sigmoid(W2 . silu(W1 . mean_hw(dwconv_out)))
# (the gating multiply itself is fused into the following 1x1 projection)
# ----------------------------------------------------------------------------
def _dwconv_kernel(*refs, act, ksize, has_se):
    it = iter(refs)
    x_ref = next(it)
    w_ref = next(it)
    b_ref = next(it)
    sew1_ref = next(it) if has_se else None
    sew2_ref = next(it) if has_se else None
    o_ref = next(it)
    g_ref = next(it) if has_se else None

    x = x_ref[0].astype(jnp.float32)          # (Hp, Wp, C)
    wts = w_ref[...]                          # (K, K, C) f32
    oh, ow, c = o_ref.shape[1], o_ref.shape[2], o_ref.shape[3]
    acc = jnp.zeros((oh, ow, c), jnp.float32)
    for kh in range(ksize):
        for kw in range(ksize):
            acc = acc + x[kh:kh + oh, kw:kw + ow, :] * wts[kh, kw].reshape(1, 1, c)
    acc = acc + b_ref[...]
    if act == "gelu":
        acc = _gelu(acc)
    o_ref[0] = acc.astype(o_ref.dtype)

    if has_se:
        pooled = jnp.mean(acc.reshape(oh * ow, c), axis=0, keepdims=True)   # (1, C)
        hid = jnp.dot(pooled, sew1_ref[...], preferred_element_type=jnp.float32)
        hid = hid * jax.nn.sigmoid(hid)                                     # SiLU
        g_ref[0] = jax.nn.sigmoid(
            jnp.dot(hid, sew2_ref[...], preferred_element_type=jnp.float32))


def depthwise_conv(x_nhwc, w, b, ksize, *, act="none", se_w1=None, se_w2=None):
    """x: (B,H,W,C), w: (K,K,C), b: (C,)  -- 'same' padding, stride 1.
    If se_w1/se_w2 are given, also returns the SE gate (B,1,C) f32."""
    B, H, W, C = x_nhwc.shape
    pad = ksize // 2
    xp = jnp.pad(x_nhwc, ((0, 0), (pad, pad), (pad, pad), (0, 0)))
    Hp, Wp = H + 2 * pad, W + 2 * pad
    has_se = se_w1 is not None

    in_specs = [pl.BlockSpec((1, Hp, Wp, C), lambda bi: (bi, 0, 0, 0)),
                pl.BlockSpec((ksize, ksize, C), lambda bi: (0, 0, 0)),
                pl.BlockSpec((1, 1, C), lambda bi: (0, 0, 0))]
    args = [xp, w, b.reshape(1, 1, C)]
    if has_se:
        Ch = se_w1.shape[1]
        in_specs += [pl.BlockSpec((C, Ch), lambda bi: (0, 0)),
                     pl.BlockSpec((Ch, C), lambda bi: (0, 0))]
        args += [se_w1, se_w2]
        out_shape = (jax.ShapeDtypeStruct((B, H, W, C), x_nhwc.dtype),
                     jax.ShapeDtypeStruct((B, 1, C), jnp.float32))
        out_specs = (pl.BlockSpec((1, H, W, C), lambda bi: (bi, 0, 0, 0)),
                     pl.BlockSpec((1, 1, C), lambda bi: (bi, 0, 0)))
    else:
        out_shape = jax.ShapeDtypeStruct((B, H, W, C), x_nhwc.dtype)
        out_specs = pl.BlockSpec((1, H, W, C), lambda bi: (bi, 0, 0, 0))

    return pl.pallas_call(
        functools.partial(_dwconv_kernel, act=act, ksize=ksize, has_se=has_se),
        out_shape=out_shape,
        grid_spec=pltpu.PrefetchScalarGridSpec(
            num_scalar_prefetch=0, grid=(B,),
            in_specs=in_specs, out_specs=out_specs),
        compiler_params=pltpu.CompilerParams(dimension_semantics=("parallel",)),
    )(*args)


# ----------------------------------------------------------------------------
# windowed multi-head attention, many windows per grid step
# ----------------------------------------------------------------------------
def _attn_kernel(x_ref, wq_ref, wk_ref, wv_ref, bias_ref, wout_ref, o_ref,
                 *, heads, dim_head):
    wb, n, d = x_ref.shape
    scale = dim_head ** -0.5
    x = x_ref[...].astype(jnp.bfloat16)                         # (WB, N, D)
    xf = x.reshape(wb * n, d)
    acc = jnp.zeros((wb * n, d), jnp.float32)
    for h in range(heads):                                      # heads is small
        q = jnp.dot(xf, wq_ref[h], preferred_element_type=jnp.float32) * scale
        k = jnp.dot(xf, wk_ref[h], preferred_element_type=jnp.float32)
        v = jnp.dot(xf, wv_ref[h], preferred_element_type=jnp.float32)
        qw = q.reshape(wb, n, dim_head).astype(jnp.bfloat16)
        kw = k.reshape(wb, n, dim_head).astype(jnp.bfloat16)
        vw = v.reshape(wb, n, dim_head).astype(jnp.bfloat16)
        sim = jnp.einsum("wik,wjk->wij", qw, kw,
                         preferred_element_type=jnp.float32)    # (WB, N, N)
        sim = sim + bias_ref[h]
        sim = sim - jnp.max(sim, axis=-1, keepdims=True)
        p = jnp.exp(sim)
        p = p * pl.reciprocal(jnp.sum(p, axis=-1, keepdims=True), approx=True)
        pv = jnp.einsum("wij,wjk->wik", p.astype(jnp.bfloat16), vw,
                        preferred_element_type=jnp.float32)     # (WB, N, dh)
        acc = acc + jnp.dot(pv.reshape(wb * n, dim_head).astype(jnp.bfloat16),
                            wout_ref[h], preferred_element_type=jnp.float32)
    o_ref[...] = acc.reshape(wb, n, d).astype(o_ref.dtype)


def window_attention(x_win, wq3, wk3, wv3, bias_hnn, wout3, heads, dim_head):
    """x_win: (NW, N, D) -> (NW, N, D).  Weights are per-head slabs."""
    NW, N, D = x_win.shape
    WB = _pick_window_batch(NW, N)           # exact divisor -> no partial blocks
    grid = (NW // WB,)
    return pl.pallas_call(
        functools.partial(_attn_kernel, heads=heads, dim_head=dim_head),
        out_shape=jax.ShapeDtypeStruct((NW, N, D), x_win.dtype),
        grid_spec=pltpu.PrefetchScalarGridSpec(
            num_scalar_prefetch=0, grid=grid,
            in_specs=[pl.BlockSpec((WB, N, D), lambda i: (i, 0, 0)),
                      pl.BlockSpec((heads, D, dim_head), lambda i: (0, 0, 0)),
                      pl.BlockSpec((heads, D, dim_head), lambda i: (0, 0, 0)),
                      pl.BlockSpec((heads, D, dim_head), lambda i: (0, 0, 0)),
                      pl.BlockSpec((heads, N, N), lambda i: (0, 0, 0)),
                      pl.BlockSpec((heads, dim_head, D), lambda i: (0, 0, 0))],
            out_specs=pl.BlockSpec((WB, N, D), lambda i: (i, 0, 0))),
        compiler_params=pltpu.CompilerParams(dimension_semantics=("parallel",)),
    )(x_win, wq3, wk3, wv3, bias_hnn, wout3)


# ----------------------------------------------------------------------------
# plain-JAX glue: parameter init, BN folding, window rearranges
# ----------------------------------------------------------------------------
def _bn_init(key, c):
    k1, k2 = jax.random.split(key)
    return {"gamma": 1.0 + 0.1 * jax.random.normal(k1, (c,), jnp.float32),
            "beta": 0.1 * jax.random.normal(k2, (c,), jnp.float32),
            "mean": jnp.zeros((c,), jnp.float32),
            "var": jnp.ones((c,), jnp.float32)}


def _fold_bn_pw(w, b, bn, eps=1e-5):
    scale = bn["gamma"] / jnp.sqrt(bn["var"] + eps)
    return w * scale[None, :], (b - bn["mean"]) * scale + bn["beta"]


def _fold_bn_dw(w, b, bn, eps=1e-5):
    scale = bn["gamma"] / jnp.sqrt(bn["var"] + eps)
    return w * scale[None, None, :], (b - bn["mean"]) * scale + bn["beta"]


def init_params(key, dim, window_size, dim_head, expansion=4, shrink=0.25):
    heads = dim // dim_head
    hidden = int(expansion * dim)
    se_hidden = int(hidden * shrink)
    keys = iter(jax.random.split(key, 40))

    def nrm(shape, s=0.05):
        return s * jax.random.normal(next(keys), shape, jnp.float32)

    p = {}
    p["mb_w1"], p["mb_b1"] = nrm((dim, hidden)), nrm((hidden,))
    p["mb_bn1"] = _bn_init(next(keys), hidden)
    p["mb_dw_w"], p["mb_dw_b"] = nrm((3, 3, hidden)), nrm((hidden,))
    p["mb_bn2"] = _bn_init(next(keys), hidden)
    p["se_w1"], p["se_w2"] = nrm((hidden, se_hidden)), nrm((se_hidden, hidden))
    p["mb_w2"], p["mb_b2"] = nrm((hidden, dim)), nrm((dim,))
    p["mb_bn3"] = _bn_init(next(keys), dim)
    for name in ("grid", "block"):
        p[f"{name}_wqkv"] = nrm((dim, 3 * dim))
        p[f"{name}_wout"] = nrm((dim, dim))
        p[f"{name}_relpos"] = nrm(((2 * window_size - 1) ** 2, heads))
    p["proj_w"], p["proj_b"] = nrm((2 * dim, dim)), nrm((dim,))
    p["ffn_w1"], p["ffn_b1"] = nrm((dim, 4 * dim)), nrm((4 * dim,))
    p["ffn_dw_w"], p["ffn_dw_b"] = nrm((5, 5, 4 * dim)), nrm((4 * dim,))
    p["ffn_w2"], p["ffn_b2"] = nrm((4 * dim, dim)), nrm((dim,))
    return p


def rel_pos_bias(table, w, heads):
    """table: ((2w-1)^2, heads) -> (heads, w*w, w*w), matching the PyTorch buffer."""
    pos = jnp.arange(w)
    gy, gx = jnp.meshgrid(pos, pos, indexing="ij")
    coords = jnp.stack([gy.reshape(-1), gx.reshape(-1)], axis=-1)
    rel = coords[:, None, :] - coords[None, :, :] + (w - 1)
    idx = rel[..., 0] * (2 * w - 1) + rel[..., 1]
    bias = table[idx]                                            # (N, N, h)
    return jnp.transpose(bias, (2, 0, 1))


def _split_qkv(wqkv, heads, dim_head):
    """(D, 3D) -> three (heads, D, dim_head) slabs (no in-kernel lane slicing)."""
    D = heads * dim_head

    def split(block):
        return jnp.transpose(block.reshape(D, heads, dim_head), (1, 0, 2))

    return split(wqkv[:, :D]), split(wqkv[:, D:2 * D]), split(wqkv[:, 2 * D:])


# grid attention: 'b d (w1 x) (w2 y) -> b x y w1 w2 d'  (NHWC equivalent)
def to_grid_windows(x, w):
    B, H, W, D = x.shape
    xb, yb = H // w, W // w
    t = x.reshape(B, w, xb, w, yb, D)
    t = jnp.transpose(t, (0, 2, 4, 1, 3, 5))
    return t.reshape(B * xb * yb, w * w, D), (B, xb, yb)


def from_grid_windows(win, meta, w, D):
    B, xb, yb = meta
    t = win.reshape(B, xb, yb, w, w, D)
    t = jnp.transpose(t, (0, 3, 1, 4, 2, 5))
    return t.reshape(B, w * xb, w * yb, D)


# block attention: 'b d (x w1) (y w2) -> b x y w1 w2 d'
def to_block_windows(x, w):
    B, H, W, D = x.shape
    xb, yb = H // w, W // w
    t = x.reshape(B, xb, w, yb, w, D)
    t = jnp.transpose(t, (0, 1, 3, 2, 4, 5))
    return t.reshape(B * xb * yb, w * w, D), (B, xb, yb)


def from_block_windows(win, meta, w, D):
    B, xb, yb = meta
    t = win.reshape(B, xb, yb, w, w, D)
    t = jnp.transpose(t, (0, 1, 3, 2, 4, 5))
    return t.reshape(B, xb * w, yb * w, D)


# ----------------------------------------------------------------------------
# MyLayer forward (inference)
# ----------------------------------------------------------------------------
def my_layer_forward(params, x_nchw, *, window_size, dim_head):
    x_nhwc = jnp.transpose(x_nchw, (0, 2, 3, 1)).astype(jnp.float32)
    B, H, W, D = x_nhwc.shape
    heads = D // dim_head
    w = window_size
    HW = H * W
    bf = jnp.bfloat16
    x3 = x_nhwc.reshape(B, HW, D)

    # ---------------- MBConv (residual, no downsample) ----------------
    w1f, b1f = _fold_bn_pw(params["mb_w1"], params["mb_b1"], params["mb_bn1"])
    h1 = pw_block(x3, w1f.astype(bf), b1f, act="gelu", out_dtype=bf)     # expand
    hid = h1.shape[-1]
    dwf, dbf = _fold_bn_dw(params["mb_dw_w"], params["mb_dw_b"], params["mb_bn2"])
    # fused: dw3x3 + BN + GELU, plus SE squeeze (gate) computed in-kernel
    h2, gate = depthwise_conv(h1.reshape(B, H, W, hid), dwf, dbf, 3, act="gelu",
                              se_w1=params["se_w1"], se_w2=params["se_w2"])
    h2_3 = h2.reshape(B, HW, hid)
    w2f, b2f = _fold_bn_pw(params["mb_w2"], params["mb_b2"], params["mb_bn3"])
    # fused: (h2 * gate) @ W2 + b2 + x   (SE gating + project + residual)
    xc3 = pw_block(h2_3, w2f.astype(bf), b2f, gate=gate, residual=x3,
                   out_dtype=jnp.float32)
    xc = xc3.reshape(B, H, W, D)

    # ---------------- grid (dilated) attention ----------------
    gwq, gwk, gwv = _split_qkv(params["grid_wqkv"], heads, dim_head)
    gwo = params["grid_wout"].reshape(heads, dim_head, D)
    gbias = rel_pos_bias(params["grid_relpos"], w, heads)
    gwin, gmeta = to_grid_windows(xc, w)
    gout = window_attention(gwin, gwq.astype(bf), gwk.astype(bf), gwv.astype(bf),
                            gbias, gwo.astype(bf), heads, dim_head)
    gout3 = from_grid_windows(gout, gmeta, w, D).reshape(B, HW, D)

    # ---------------- block (local window) attention ----------------
    bwq, bwk, bwv = _split_qkv(params["block_wqkv"], heads, dim_head)
    bwo = params["block_wout"].reshape(heads, dim_head, D)
    bbias = rel_pos_bias(params["block_relpos"], w, heads)
    bwin, bmeta = to_block_windows(xc, w)
    bout = window_attention(bwin, bwq.astype(bf), bwk.astype(bf), bwv.astype(bf),
                            bbias, bwo.astype(bf), heads, dim_head)
    bout3 = from_block_windows(bout, bmeta, w, D).reshape(B, HW, D)

    # ---------------- proj(cat) + residual fused into FFN expand ----------------
    # out1 = xc + cat(gout, bout) @ proj_w + proj_b ; f1 = gelu(out1 @ ffn_w1 + b1)
    wpg = params["proj_w"][:D].astype(bf)     # grid half of the 1x1 proj
    wpl = params["proj_w"][D:].astype(bf)     # block half
    f1 = proj_ffn_expand(gout3, bout3, xc3, wpg, wpl, params["proj_b"],
                         params["ffn_w1"].astype(bf), params["ffn_b1"])
    fhid = f1.shape[-1]

    # ---------------- ConvFFN dw5x5 + project + residual (to xc = self.ity(x)) ----
    f2 = depthwise_conv(f1.reshape(B, H, W, fhid), params["ffn_dw_w"],
                        params["ffn_dw_b"], 5)
    out3 = pw_block(f2.reshape(B, HW, fhid), params["ffn_w2"].astype(bf),
                    params["ffn_b2"], residual=xc3, out_dtype=jnp.float32)

    out = out3.reshape(B, H, W, D)
    return jnp.transpose(out, (0, 3, 1, 2))          # NHWC -> NCHW


# ----------------------------------------------------------------------------
if __name__ == "__main__":
    key = jax.random.PRNGKey(0)
    B, D, H, W = 2, 64, 8, 8          # layer_dim=64 (2 heads of 32), 8x8 spatial
    window_size, dim_head = 4, 32     # H, W divisible by window_size

    kp, kx = jax.random.split(key)
    params = init_params(kp, D, window_size, dim_head)
    x = jax.random.normal(kx, (B, D, H, W), jnp.float32)   # NCHW, like PyTorch

    fwd = jax.jit(functools.partial(my_layer_forward,
                                    window_size=window_size, dim_head=dim_head))
    y = fwd(params, x)
    jax.block_until_ready(y)
    assert y.shape == (B, D, H, W) and y.dtype == jnp.float32
    assert bool(jnp.all(jnp.isfinite(y)))
    print("KERNEL_OK")
</pallas_src>

<mosaic_0001>
module attributes {stable_mosaic.version = 11 : i64} {
  func.func @_dwconv_kernel(%arg0: i32, %arg1: memref<1x10x10x256xbf16, #tpu.memory_space<vmem>>, %arg2: memref<3x3x256xf32, #tpu.memory_space<vmem>>, %arg3: memref<1x1x256xf32, #tpu.memory_space<vmem>>, %arg4: memref<256x64xf32, #tpu.memory_space<vmem>>, %arg5: memref<64x256xf32, #tpu.memory_space<vmem>>, %arg6: memref<1x8x8x256xbf16, #tpu.memory_space<vmem>>, %arg7: memref<1x1x256xf32, #tpu.memory_space<vmem>>) attributes {dimension_semantics = [#tpu.dimension_semantics<parallel>], iteration_bounds = array<i64: 2>, scalar_prefetch = 0 : i64, scratch_operands = 0 : i64, tpu.core_type = #tpu.core_type<tc>, window_params = [{transform_indices = @transform_0, window_bounds = array<i64: 1, 10, 10, 256>}, {pipeline_mode = #tpu.pipeline_mode<synchronous>, transform_indices = @transform_1, window_bounds = array<i64: 3, 3, 256>}, {pipeline_mode = #tpu.pipeline_mode<synchronous>, transform_indices = @transform_2, window_bounds = array<i64: 1, 1, 256>}, {pipeline_mode = #tpu.pipeline_mode<synchronous>, transform_indices = @transform_3, window_bounds = array<i64: 256, 64>}, {pipeline_mode = #tpu.pipeline_mode<synchronous>, transform_indices = @transform_4, window_bounds = array<i64: 64, 256>}, {transform_indices = @transform_5, window_bounds = array<i64: 1, 8, 8, 256>}, {transform_indices = @transform_6, window_bounds = array<i64: 1, 1, 256>}]} {
    %c0 = arith.constant 0 : index
    %c0_0 = arith.constant 0 : index
    %c0_1 = arith.constant 0 : index
    %c0_2 = arith.constant 0 : index
    %0 = vector.load %arg1[%c0, %c0_0, %c0_1, %c0_2] : memref<1x10x10x256xbf16, #tpu.memory_space<vmem>>, vector<1x10x10x256xbf16>
    %1 = vector.shape_cast %0 : vector<1x10x10x256xbf16> to vector<10x10x256xbf16>
    %2 = arith.extf %1 : vector<10x10x256xbf16> to vector<10x10x256xf32>
    %c0_3 = arith.constant 0 : index
    %c0_4 = arith.constant 0 : index
    %c0_5 = arith.constant 0 : index
    %3 = vector.load %arg2[%c0_3, %c0_4, %c0_5] : memref<3x3x256xf32, #tpu.memory_space<vmem>>, vector<3x3x256xf32>
    %cst = arith.constant 0.000000e+00 : f32
    %4 = vector.broadcast %cst : f32 to vector<8x8x256xf32>
    %5 = vector.extract_strided_slice %2 {offsets = [0, 0, 0], sizes = [8, 8, 256], strides = [1, 1, 1]} : vector<10x10x256xf32> to vector<8x8x256xf32>
    %6 = vector.extract_strided_slice %3 {offsets = [0, 0, 0], sizes = [1, 1, 256], strides = [1, 1, 1]} : vector<3x3x256xf32> to vector<1x1x256xf32>
    %7 = vector.shape_cast %6 : vector<1x1x256xf32> to vector<256xf32>
    %8 = vector.shape_cast %7 : vector<256xf32> to vector<1x1x256xf32>
    %9 = vector.broadcast %8 : vector<1x1x256xf32> to vector<8x8x256xf32>
    %10 = arith.mulf %5, %9 : vector<8x8x256xf32>
    %11 = arith.addf %4, %10 : vector<8x8x256xf32>
    %12 = vector.extract_strided_slice %2 {offsets = [0, 1, 0], sizes = [8, 8, 256], strides = [1, 1, 1]} : vector<10x10x256xf32> to vector<8x8x256xf32>
    %13 = vector.extract_strided_slice %3 {offsets = [0, 1, 0], sizes = [1, 1, 256], strides = [1, 1, 1]} : vector<3x3x256xf32> to vector<1x1x256xf32>
    %14 = vector.shape_cast %13 : vector<1x1x256xf32> to vector<256xf32>
    %15 = vector.shape_cast %14 : vector<256xf32> to vector<1x1x256xf32>
    %16 = vector.broadcast %15 : vector<1x1x256xf32> to vector<8x8x256xf32>
    %17 = arith.mulf %12, %16 : vector<8x8x256xf32>
    %18 = arith.addf %11, %17 : vector<8x8x256xf32>
    %19 = vector.extract_strided_slice %2 {offsets = [0, 2, 0], sizes = [8, 8, 256], strides = [1, 1, 1]} : vector<10x10x256xf32> to vector<8x8x256xf32>
    %20 = vector.extract_strided_slice %3 {offsets = [0, 2, 0], sizes = [1, 1, 256], strides = [1, 1, 1]} : vector<3x3x256xf32> to vector<1x1x256xf32>
    %21 = vector.shape_cast %20 : vector<1x1x256xf32> to vector<256xf32>
    %22 = vector.shape_cast %21 : vector<256xf32> to vector<1x1x256xf32>
    %23 = vector.broadcast %22 : vector<1x1x256xf32> to vector<8x8x256xf32>
    %24 = arith.mulf %19, %23 : vector<8x8x256xf32>
    %25 = arith.addf %18, %24 : vector<8x8x256xf32>
    %26 = vector.extract_strided_slice %2 {offsets = [1, 0, 0], sizes = [8, 8, 256], strides = [1, 1, 1]} : vector<10x10x256xf32> to vector<8x8x256xf32>
    %27 = vector.extract_strided_slice %3 {offsets = [1, 0, 0], sizes = [1, 1, 256], strides = [1, 1, 1]} : vector<3x3x256xf32> to vector<1x1x256xf32>
    %28 = vector.shape_cast %27 : vector<1x1x256xf32> to vector<256xf32>
    %29 = vector.shape_cast %28 : vector<256xf32> to vector<1x1x256xf32>
    %30 = vector.broadcast %29 : vector<1x1x256xf32> to vector<8x8x256xf32>
    %31 = arith.mulf %26, %30 : vector<8x8x256xf32>
    %32 = arith.addf %25, %31 : vector<8x8x256xf32>
    %33 = vector.extract_strided_slice %2 {offsets = [1, 1, 0], sizes = [8, 8, 256], strides = [1, 1, 1]} : vector<10x10x256xf32> to vector<8x8x256xf32>
    %34 = vector.extract_strided_slice %3 {offsets = [1, 1, 0], sizes = [1, 1, 256], strides = [1, 1, 1]} : vector<3x3x256xf32> to vector<1x1x256xf32>
    %35 = vector.shape_cast %34 : vector<1x1x256xf32> to vector<256xf32>
    %36 = vector.shape_cast %35 : vector<256xf32> to vector<1x1x256xf32>
    %37 = vector.broadcast %36 : vector<1x1x256xf32> to vector<8x8x256xf32>
    %38 = arith.mulf %33, %37 : vector<8x8x256xf32>
    %39 = arith.addf %32, %38 : vector<8x8x256xf32>
    %40 = vector.extract_strided_slice %2 {offsets = [1, 2, 0], sizes = [8, 8, 256], strides = [1, 1, 1]} : vector<10x10x256xf32> to vector<8x8x256xf32>
    %41 = vector.extract_strided_slice %3 {offsets = [1, 2, 0], sizes = [1, 1, 256], strides = [1, 1, 1]} : vector<3x3x256xf32> to vector<1x1x256xf32>
    %42 = vector.shape_cast %41 : vector<1x1x256xf32> to vector<256xf32>
    %43 = vector.shape_cast %42 : vector<256xf32> to vector<1x1x256xf32>
    %44 = vector.broadcast %43 : vector<1x1x256xf32> to vector<8x8x256xf32>
    %45 = arith.mulf %40, %44 : vector<8x8x256xf32>
    %46 = arith.addf %39, %45 : vector<8x8x256xf32>
    %47 = vector.extract_strided_slice %2 {offsets = [2, 0, 0], sizes = [8, 8, 256], strides = [1, 1, 1]} : vector<10x10x256xf32> to vector<8x8x256xf32>
    %48 = vector.extract_strided_slice %3 {offsets = [2, 0, 0], sizes = [1, 1, 256], strides = [1, 1, 1]} : vector<3x3x256xf32> to vector<1x1x256xf32>
    %49 = vector.shape_cast %48 : vector<1x1x256xf32> to vector<256xf32>
    %50 = vector.shape_cast %49 : vector<256xf32> to vector<1x1x256xf32>
    %51 = vector.broadcast %50 : vector<1x1x256xf32> to vector<8x8x256xf32>
    %52 = arith.mulf %47, %51 : vector<8x8x256xf32>
    %53 = arith.addf %46, %52 : vector<8x8x256xf32>
    %54 = vector.extract_strided_slice %2 {offsets = [2, 1, 0], sizes = [8, 8, 256], strides = [1, 1, 1]} : vector<10x10x256xf32> to vector<8x8x256xf32>
    %55 = vector.extract_strided_slice %3 {offsets = [2, 1, 0], sizes = [1, 1, 256], strides = [1, 1, 1]} : vector<3x3x256xf32> to vector<1x1x256xf32>
    %56 = vector.shape_cast %55 : vector<1x1x256xf32> to vector<256xf32>
    %57 = vector.shape_cast %56 : vector<256xf32> to vector<1x1x256xf32>
    %58 = vector.broadcast %57 : vector<1x1x256xf32> to vector<8x8x256xf32>
    %59 = arith.mulf %54, %58 : vector<8x8x256xf32>
    %60 = arith.addf %53, %59 : vector<8x8x256xf32>
    %61 = vector.extract_strided_slice %2 {offsets = [2, 2, 0], sizes = [8, 8, 256], strides = [1, 1, 1]} : vector<10x10x256xf32> to vector<8x8x256xf32>
    %62 = vector.extract_strided_slice %3 {offsets = [2, 2, 0], sizes = [1, 1, 256], strides = [1, 1, 1]} : vector<3x3x256xf32> to vector<1x1x256xf32>
    %63 = vector.shape_cast %62 : vector<1x1x256xf32> to vector<256xf32>
    %64 = vector.shape_cast %63 : vector<256xf32> to vector<1x1x256xf32>
    %65 = vector.broadcast %64 : vector<1x1x256xf32> to vector<8x8x256xf32>
    %66 = arith.mulf %61, %65 : vector<8x8x256xf32>
    %67 = arith.addf %60, %66 : vector<8x8x256xf32>
    %c0_6 = arith.constant 0 : index
    %c0_7 = arith.constant 0 : index
    %c0_8 = arith.constant 0 : index
    %68 = vector.load %arg3[%c0_6, %c0_7, %c0_8] : memref<1x1x256xf32, #tpu.memory_space<vmem>>, vector<1x1x256xf32>
    %69 = vector.broadcast %68 : vector<1x1x256xf32> to vector<8x8x256xf32>
    %70 = arith.addf %67, %69 : vector<8x8x256xf32>
    %cst_9 = arith.constant 5.000000e-01 : f32
    %71 = vector.broadcast %cst_9 : f32 to vector<8x8x256xf32>
    %72 = arith.mulf %71, %70 : vector<8x8x256xf32>
    %cst_10 = arith.constant 4.471500e-02 : f32
    %73 = vector.broadcast %cst_10 : f32 to vector<8x8x256xf32>
    %74 = arith.mulf %73, %70 : vector<8x8x256xf32>
    %75 = arith.mulf %74, %70 : vector<8x8x256xf32>
    %76 = arith.mulf %75, %70 : vector<8x8x256xf32>
    %77 = arith.addf %70, %76 : vector<8x8x256xf32>
    %cst_11 = arith.constant 0.797884583 : f32
    %78 = vector.broadcast %cst_11 : f32 to vector<8x8x256xf32>
    %79 = arith.mulf %78, %77 : vector<8x8x256xf32>
    %80 = math.tanh %79 : vector<8x8x256xf32>
    %cst_12 = arith.constant 1.000000e+00 : f32
    %81 = vector.broadcast %cst_12 : f32 to vector<8x8x256xf32>
    %82 = arith.addf %81, %80 : vector<8x8x256xf32>
    %83 = arith.mulf %72, %82 : vector<8x8x256xf32>
    %84 = arith.truncf %83 : vector<8x8x256xf32> to vector<8x8x256xbf16>
    %c0_13 = arith.constant 0 : index
    %c0_14 = arith.constant 0 : index
    %c0_15 = arith.constant 0 : index
    %c0_16 = arith.constant 0 : index
    %85 = vector.load %arg6[%c0_13, %c0_14, %c0_15, %c0_16] : memref<1x8x8x256xbf16, #tpu.memory_space<vmem>>, vector<1x8x8x256xbf16>
    %86 = vector.shape_cast %85 : vector<1x8x8x256xbf16> to vector<8x8x256xbf16>
    %87 = vector.shape_cast %84 : vector<8x8x256xbf16> to vector<1x8x8x256xbf16>
    tpu.vector_store %arg6[%c0_13, %c0_14, %c0_15, %c0_16], %87 {strides = array<i32>} : memref<1x8x8x256xbf16, #tpu.memory_space<vmem>>, vector<1x8x8x256xbf16>,
    %88 = vector.shape_cast %83 : vector<8x8x256xf32> to vector<64x256xf32>
    %cst_17 = arith.constant dense<0.000000e+00> : vector<256xf32>
    %89 = vector.multi_reduction <add>, %88, %cst_17 [0] : vector<64x256xf32> to vector<256xf32>
    %90 = vector.shape_cast %89 : vector<256xf32> to vector<1x256xf32>
    %cst_18 = arith.constant 6.400000e+01 : f32
    %91 = vector.broadcast %cst_18 : f32 to vector<1x256xf32>
    %92 = arith.divf %90, %91 : vector<1x256xf32>
    %c0_19 = arith.constant 0 : index
    %c0_20 = arith.constant 0 : index
    %93 = vector.load %arg4[%c0_19, %c0_20] : memref<256x64xf32, #tpu.memory_space<vmem>>, vector<256x64xf32>
    %cst_21 = arith.constant dense<0.000000e+00> : vector<1x64xf32>
    %94 = tpu.matmul %92, %93, %cst_21 {dimension_numbers = #tpu.dot_dimension_numbers<[1], [0], [0], [1], [0, 0, 1, 1], [], []>} : vector<1x256xf32>, vector<256x64xf32>, vector<1x64xf32> -> vector<1x64xf32>
    %95 = arith.negf %94 : vector<1x64xf32>
    %96 = math.exp %95 : vector<1x64xf32>
    %cst_22 = arith.constant 1.000000e+00 : f32
    %97 = vector.broadcast %cst_22 : f32 to vector<1x64xf32>
    %98 = arith.addf %97, %96 : vector<1x64xf32>
    %99 = arith.divf %97, %98 : vector<1x64xf32>
    %100 = arith.mulf %94, %99 : vector<1x64xf32>
    %c0_23 = arith.constant 0 : index
    %c0_24 = arith.constant 0 : index
    %101 = vector.load %arg5[%c0_23, %c0_24] : memref<64x256xf32, #tpu.memory_space<vmem>>, vector<64x256xf32>
    %cst_25 = arith.constant dense<0.000000e+00> : vector<1x256xf32>
    %102 = tpu.matmul %100, %101, %cst_25 {dimension_numbers = #tpu.dot_dimension_numbers<[1], [0], [0], [1], [0, 0, 1, 1], [], []>} : vector<1x64xf32>, vector<64x256xf32>, vector<1x256xf32> -> vector<1x256xf32>
    %103 = arith.negf %102 : vector<1x256xf32>
    %104 = math.exp %103 : vector<1x256xf32>
    %cst_26 = arith.constant 1.000000e+00 : f32
    %105 = vector.broadcast %cst_26 : f32 to vector<1x256xf32>
    %106 = arith.addf %105, %104 : vector<1x256xf32>
    %107 = arith.divf %105, %106 : vector<1x256xf32>
    %c0_27 = arith.constant 0 : index
    %c0_28 = arith.constant 0 : index
    %c0_29 = arith.constant 0 : index
    %108 = vector.load %arg7[%c0_27, %c0_28, %c0_29] : memref<1x1x256xf32, #tpu.memory_space<vmem>>, vector<1x1x256xf32>
    %109 = vector.shape_cast %108 : vector<1x1x256xf32> to vector<1x256xf32>
    %110 = vector.shape_cast %107 : vector<1x256xf32> to vector<1x1x256xf32>
    tpu.vector_store %arg7[%c0_27, %c0_28, %c0_29], %110 {strides = array<i32>} : memref<1x1x256xf32, #tpu.memory_space<vmem>>, vector<1x1x256xf32>,
    return
  }
  func.func @transform_0(%arg0: i32) -> (i32, i32, i32, i32) {
    %c0_i32 = arith.constant 0 : i32
    %c0_i32_0 = arith.constant 0 : i32
    %c0_i32_1 = arith.constant 0 : i32
    %c0_i32_2 = arith.constant 0 : i32
    return %arg0, %c0_i32, %c0_i32_0, %c0_i32_1 : i32, i32, i32, i32
  }
  func.func @transform_1(%arg0: i32) -> (i32, i32, i32) {
    %c0_i32 = arith.constant 0 : i32
    %c0_i32_0 = arith.constant 0 : i32
    %c0_i32_1 = arith.constant 0 : i32
    %c0_i32_2 = arith.constant 0 : i32
    return %c0_i32, %c0_i32_0, %c0_i32_1 : i32, i32, i32
  }
  func.func @transform_2(%arg0: i32) -> (i32, i32, i32) {
    %c0_i32 = arith.constant 0 : i32
    %c0_i32_0 = arith.constant 0 : i32
    %c0_i32_1 = arith.constant 0 : i32
    %c0_i32_2 = arith.constant 0 : i32
    return %c0_i32, %c0_i32_0, %c0_i32_1 : i32, i32, i32
  }
  func.func @transform_3(%arg0: i32) -> (i32, i32) {
    %c0_i32 = arith.constant 0 : i32
    %c0_i32_0 = arith.constant 0 : i32
    %c0_i32_1 = arith.constant 0 : i32
    return %c0_i32, %c0_i32_0 : i32, i32
  }
  func.func @transform_4(%arg0: i32) -> (i32, i32) {
    %c0_i32 = arith.constant 0 : i32
    %c0_i32_0 = arith.constant 0 : i32
    %c0_i32_1 = arith.constant 0 : i32
    return %c0_i32, %c0_i32_0 : i32, i32
  }
  func.func @transform_5(%arg0: i32) -> (i32, i32, i32, i32) {
    %c0_i32 = arith.constant 0 : i32
    %c0_i32_0 = arith.constant 0 : i32
    %c0_i32_1 = arith.constant 0 : i32
    %c0_i32_2 = arith.constant 0 : i32
    return %arg0, %c0_i32, %c0_i32_0, %c0_i32_1 : i32, i32, i32, i32
  }
  func.func @transform_6(%arg0: i32) -> (i32, i32, i32) {
    %c0_i32 = arith.constant 0 : i32
    %c0_i32_0 = arith.constant 0 : i32
    %c0_i32_1 = arith.constant 0 : i32
    return %arg0, %c0_i32, %c0_i32_0 : i32, i32, i32
  }
}

module attributes {stable_mosaic.version = 11 : i64} {
  func.func @_pw_kernel(%arg0: i32, %arg1: i32, %arg2: memref<1x64x64xf32, #tpu.memory_space<vmem>>, %arg3: memref<64x256xbf16, #tpu.memory_space<vmem>>, %arg4: memref<1x256xf32, #tpu.memory_space<vmem>>, %arg5: memref<1x64x256xbf16, #tpu.memory_space<vmem>>) attributes {dimension_semantics = [#tpu.dimension_semantics<parallel>, #tpu.dimension_semantics<parallel>], iteration_bounds = array<i64: 2, 1>, scalar_prefetch = 0 : i64, scratch_operands = 0 : i64, tpu.core_type = #tpu.core_type<tc>, window_params = [{transform_indices = @transform_0, window_bounds = array<i64: 1, 64, 64>}, {pipeline_mode = #tpu.pipeline_mode<synchronous>, transform_indices = @transform_1, window_bounds = array<i64: 64, 256>}, {pipeline_mode = #tpu.pipeline_mode<synchronous>, transform_indices = @transform_2, window_bounds = array<i64: 1, 256>}, {transform_indices = @transform_3, window_bounds = array<i64: 1, 64, 256>}]} {
    %c0 = arith.constant 0 : index
    %c0_0 = arith.constant 0 : index
    %c0_1 = arith.constant 0 : index
    %0 = vector.load %arg2[%c0, %c0_0, %c0_1] : memref<1x64x64xf32, #tpu.memory_space<vmem>>, vector<1x64x64xf32>
    %1 = vector.shape_cast %0 : vector<1x64x64xf32> to vector<64x64xf32>
    %2 = arith.truncf %1 : vector<64x64xf32> to vector<64x64xbf16>
    %c0_2 = arith.constant 0 : index
    %c0_3 = arith.constant 0 : index
    %3 = vector.load %arg3[%c0_2, %c0_3] : memref<64x256xbf16, #tpu.memory_space<vmem>>, vector<64x256xbf16>
    %cst = arith.constant dense<0.000000e+00> : vector<64x256xf32>
    %4 = tpu.matmul %2, %3, %cst {dimension_numbers = #tpu.dot_dimension_numbers<[1], [0], [0], [1], [0, 0, 1, 1], [], []>} : vector<64x64xbf16>, vector<64x256xbf16>, vector<64x256xf32> -> vector<64x256xf32>
    %c0_4 = arith.constant 0 : index
    %c0_5 = arith.constant 0 : index
    %5 = vector.load %arg4[%c0_4, %c0_5] : memref<1x256xf32, #tpu.memory_space<vmem>>, vector<1x256xf32>
    %6 = vector.broadcast %5 : vector<1x256xf32> to vector<64x256xf32>
    %7 = arith.addf %4, %6 : vector<64x256xf32>
    %cst_6 = arith.constant 5.000000e-01 : f32
    %8 = vector.broadcast %cst_6 : f32 to vector<64x256xf32>
    %9 = arith.mulf %8, %7 : vector<64x256xf32>
    %cst_7 = arith.constant 4.471500e-02 : f32
    %10 = vector.broadcast %cst_7 : f32 to vector<64x256xf32>
    %11 = arith.mulf %10, %7 : vector<64x256xf32>
    %12 = arith.mulf %11, %7 : vector<64x256xf32>
    %13 = arith.mulf %12, %7 : vector<64x256xf32>
    %14 = arith.addf %7, %13 : vector<64x256xf32>
    %cst_8 = arith.constant 0.797884583 : f32
    %15 = vector.broadcast %cst_8 : f32 to vector<64x256xf32>
    %16 = arith.mulf %15, %14 : vector<64x256xf32>
    %17 = math.tanh %16 : vector<64x256xf32>
    %cst_9 = arith.constant 1.000000e+00 : f32
    %18 = vector.broadcast %cst_9 : f32 to vector<64x256xf32>
    %19 = arith.addf %18, %17 : vector<64x256xf32>
    %20 = arith.mulf %9, %19 : vector<64x256xf32>
    %21 = arith.truncf %20 : vector<64x256xf32> to vector<64x256xbf16>
    %c0_10 = arith.constant 0 : index
    %c0_11 = arith.constant 0 : index
    %c0_12 = arith.constant 0 : index
    %22 = vector.load %arg5[%c0_10, %c0_11, %c0_12] : memref<1x64x256xbf16, #tpu.memory_space<vmem>>, vector<1x64x256xbf16>
    %23 = vector.shape_cast %22 : vector<1x64x256xbf16> to vector<64x256xbf16>
    %24 = vector.shape_cast %21 : vector<64x256xbf16> to vector<1x64x256xbf16>
    tpu.vector_store %arg5[%c0_10, %c0_11, %c0_12], %24 {strides = array<i32>} : memref<1x64x256xbf16, #tpu.memory_space<vmem>>, vector<1x64x256xbf16>,
    return
  }
  func.func @transform_0(%arg0: i32, %arg1: i32) -> (i32, i32, i32) {
    %c0_i32 = arith.constant 0 : i32
    %c0_i32_0 = arith.constant 0 : i32
    return %arg0, %arg1, %c0_i32 : i32, i32, i32
  }
  func.func @transform_1(%arg0: i32, %arg1: i32) -> (i32, i32) {
    %c0_i32 = arith.constant 0 : i32
    %c0_i32_0 = arith.constant 0 : i32
    %c0_i32_1 = arith.constant 0 : i32
    return %c0_i32, %c0_i32_0 : i32, i32
  }
  func.func @transform_2(%arg0: i32, %arg1: i32) -> (i32, i32) {
    %c0_i32 = arith.constant 0 : i32
    %c0_i32_0 = arith.constant 0 : i32
    %c0_i32_1 = arith.constant 0 : i32
    return %c0_i32, %c0_i32_0 : i32, i32
  }
  func.func @transform_3(%arg0: i32, %arg1: i32) -> (i32, i32, i32) {
    %c0_i32 = arith.constant 0 : i32
    %c0_i32_0 = arith.constant 0 : i32
    return %arg0, %arg1, %c0_i32 : i32, i32, i32
  }
}

module attributes {stable_mosaic.version = 11 : i64} {
  func.func @_pw_kernel(%arg0: i32, %arg1: i32, %arg2: memref<1x64x256xbf16, #tpu.memory_space<vmem>>, %arg3: memref<1x1x256xf32, #tpu.memory_space<vmem>>, %arg4: memref<256x64xbf16, #tpu.memory_space<vmem>>, %arg5: memref<1x64xf32, #tpu.memory_space<vmem>>, %arg6: memref<1x64x64xf32, #tpu.memory_space<vmem>>, %arg7: memref<1x64x64xf32, #tpu.memory_space<vmem>>) attributes {dimension_semantics = [#tpu.dimension_semantics<parallel>, #tpu.dimension_semantics<parallel>], iteration_bounds = array<i64: 2, 1>, scalar_prefetch = 0 : i64, scratch_operands = 0 : i64, tpu.core_type = #tpu.core_type<tc>, window_params = [{transform_indices = @transform_0, window_bounds = array<i64: 1, 64, 256>}, {transform_indices = @transform_1, window_bounds = array<i64: 1, 1, 256>}, {pipeline_mode = #tpu.pipeline_mode<synchronous>, transform_indices = @transform_2, window_bounds = array<i64: 256, 64>}, {pipeline_mode = #tpu.pipeline_mode<synchronous>, transform_indices = @transform_3, window_bounds = array<i64: 1, 64>}, {transform_indices = @transform_4, window_bounds = array<i64: 1, 64, 64>}, {transform_indices = @transform_5, window_bounds = array<i64: 1, 64, 64>}]} {
    %c0 = arith.constant 0 : index
    %c0_0 = arith.constant 0 : index
    %c0_1 = arith.constant 0 : index
    %0 = vector.load %arg2[%c0, %c0_0, %c0_1] : memref<1x64x256xbf16, #tpu.memory_space<vmem>>, vector<1x64x256xbf16>
    %1 = vector.shape_cast %0 : vector<1x64x256xbf16> to vector<64x256xbf16>
    %2 = arith.extf %1 : vector<64x256xbf16> to vector<64x256xf32>
    %c0_2 = arith.constant 0 : index
    %c0_3 = arith.constant 0 : index
    %c0_4 = arith.constant 0 : index
    %3 = vector.load %arg3[%c0_2, %c0_3, %c0_4] : memref<1x1x256xf32, #tpu.memory_space<vmem>>, vector<1x1x256xf32>
    %4 = vector.shape_cast %3 : vector<1x1x256xf32> to vector<1x256xf32>
    %5 = vector.broadcast %4 : vector<1x256xf32> to vector<64x256xf32>
    %6 = arith.mulf %2, %5 : vector<64x256xf32>
    %7 = arith.truncf %6 : vector<64x256xf32> to vector<64x256xbf16>
    %c0_5 = arith.constant 0 : index
    %c0_6 = arith.constant 0 : index
    %8 = vector.load %arg4[%c0_5, %c0_6] : memref<256x64xbf16, #tpu.memory_space<vmem>>, vector<256x64xbf16>
    %cst = arith.constant dense<0.000000e+00> : vector<64x64xf32>
    %9 = tpu.matmul %7, %8, %cst {dimension_numbers = #tpu.dot_dimension_numbers<[1], [0], [0], [1], [0, 0, 1, 1], [], []>} : vector<64x256xbf16>, vector<256x64xbf16>, vector<64x64xf32> -> vector<64x64xf32>
    %c0_7 = arith.constant 0 : index
    %c0_8 = arith.constant 0 : index
    %10 = vector.load %arg5[%c0_7, %c0_8] : memref<1x64xf32, #tpu.memory_space<vmem>>, vector<1x64xf32>
    %11 = vector.broadcast %10 : vector<1x64xf32> to vector<64x64xf32>
    %12 = arith.addf %9, %11 : vector<64x64xf32>
    %c0_9 = arith.constant 0 : index
    %c0_10 = arith.constant 0 : index
    %c0_11 = arith.constant 0 : index
    %13 = vector.load %arg6[%c0_9, %c0_10, %c0_11] : memref<1x64x64xf32, #tpu.memory_space<vmem>>, vector<1x64x64xf32>
    %14 = vector.shape_cast %13 : vector<1x64x64xf32> to vector<64x64xf32>
    %15 = arith.addf %12, %14 : vector<64x64xf32>
    %c0_12 = arith.constant 0 : index
    %c0_13 = arith.constant 0 : index
    %c0_14 = arith.constant 0 : index
    %16 = vector.load %arg7[%c0_12, %c0_13, %c0_14] : memref<1x64x64xf32, #tpu.memory_space<vmem>>, vector<1x64x64xf32>
    %17 = vector.shape_cast %16 : vector<1x64x64xf32> to vector<64x64xf32>
    %18 = vector.shape_cast %15 : vector<64x64xf32> to vector<1x64x64xf32>
    tpu.vector_store %arg7[%c0_12, %c0_13, %c0_14], %18 {strides = array<i32>} : memref<1x64x64xf32, #tpu.memory_space<vmem>>, vector<1x64x64xf32>,
    return
  }
  func.func @transform_0(%arg0: i32, %arg1: i32) -> (i32, i32, i32) {
    %c0_i32 = arith.constant 0 : i32
    %c0_i32_0 = arith.constant 0 : i32
    return %arg0, %arg1, %c0_i32 : i32, i32, i32
  }
  func.func @transform_1(%arg0: i32, %arg1: i32) -> (i32, i32, i32) {
    %c0_i32 = arith.constant 0 : i32
    %c0_i32_0 = arith.constant 0 : i32
    %c0_i32_1 = arith.constant 0 : i32
    return %arg0, %c0_i32, %c0_i32_0 : i32, i32, i32
  }
  func.func @transform_2(%arg0: i32, %arg1: i32) -> (i32, i32) {
    %c0_i32 = arith.constant 0 : i32
    %c0_i32_0 = arith.constant 0 : i32
    %c0_i32_1 = arith.constant 0 : i32
    return %c0_i32, %c0_i32_0 : i32, i32
  }
  func.func @transform_3(%arg0: i32, %arg1: i32) -> (i32, i32) {
    %c0_i32 = arith.constant 0 : i32
    %c0_i32_0 = arith.constant 0 : i32
    %c0_i32_1 = arith.constant 0 : i32
    return %c0_i32, %c0_i32_0 : i32, i32
  }
  func.func @transform_4(%arg0: i32, %arg1: i32) -> (i32, i32, i32) {
    %c0_i32 = arith.constant 0 : i32
    %c0_i32_0 = arith.constant 0 : i32
    return %arg0, %arg1, %c0_i32 : i32, i32, i32
  }
  func.func @transform_5(%arg0: i32, %arg1: i32) -> (i32, i32, i32) {
    %c0_i32 = arith.constant 0 : i32
    %c0_i32_0 = arith.constant 0 : i32
    return %arg0, %arg1, %c0_i32 : i32, i32, i32
  }
}

module attributes {stable_mosaic.version = 11 : i64} {
  func.func @_attn_kernel(%arg0: i32, %arg1: memref<8x16x64xf32, #tpu.memory_space<vmem>>, %arg2: memref<2x64x32xbf16, #tpu.memory_space<vmem>>, %arg3: memref<2x64x32xbf16, #tpu.memory_space<vmem>>, %arg4: memref<2x64x32xbf16, #tpu.memory_space<vmem>>, %arg5: memref<2x16x16xf32, #tpu.memory_space<vmem>>, %arg6: memref<2x32x64xbf16, #tpu.memory_space<vmem>>, %arg7: memref<8x16x64xf32, #tpu.memory_space<vmem>>) attributes {dimension_semantics = [#tpu.dimension_semantics<parallel>], iteration_bounds = array<i64: 1>, scalar_prefetch = 0 : i64, scratch_operands = 0 : i64, tpu.core_type = #tpu.core_type<tc>, window_params = [{transform_indices = @transform_0, window_bounds = array<i64: 8, 16, 64>}, {pipeline_mode = #tpu.pipeline_mode<synchronous>, transform_indices = @transform_1, window_bounds = array<i64: 2, 64, 32>}, {pipeline_mode = #tpu.pipeline_mode<synchronous>, transform_indices = @transform_2, window_bounds = array<i64: 2, 64, 32>}, {pipeline_mode = #tpu.pipeline_mode<synchronous>, transform_indices = @transform_3, window_bounds = array<i64: 2, 64, 32>}, {pipeline_mode = #tpu.pipeline_mode<synchronous>, transform_indices = @transform_4, window_bounds = array<i64: 2, 16, 16>}, {pipeline_mode = #tpu.pipeline_mode<synchronous>, transform_indices = @transform_5, window_bounds = array<i64: 2, 32, 64>}, {transform_indices = @transform_6, window_bounds = array<i64: 8, 16, 64>}]} {
    %c0 = arith.constant 0 : index
    %c0_0 = arith.constant 0 : index
    %c0_1 = arith.constant 0 : index
    %0 = vector.load %arg1[%c0, %c0_0, %c0_1] : memref<8x16x64xf32, #tpu.memory_space<vmem>>, vector<8x16x64xf32>
    %1 = arith.truncf %0 : vector<8x16x64xf32> to vector<8x16x64xbf16>
    %2 = vector.shape_cast %1 : vector<8x16x64xbf16> to vector<128x64xbf16>
    %cst = arith.constant 0.000000e+00 : f32
    %3 = vector.broadcast %cst : f32 to vector<128x64xf32>
    %c0_2 = arith.constant 0 : index
    %c0_3 = arith.constant 0 : index
    %c0_4 = arith.constant 0 : index
    %4 = vector.load %arg2[%c0_2, %c0_3, %c0_4] : memref<2x64x32xbf16, #tpu.memory_space<vmem>>, vector<1x64x32xbf16>
    %5 = vector.shape_cast %4 : vector<1x64x32xbf16> to vector<64x32xbf16>
    %cst_5 = arith.constant dense<0.000000e+00> : vector<128x32xf32>
    %6 = tpu.matmul %2, %5, %cst_5 {dimension_numbers = #tpu.dot_dimension_numbers<[1], [0], [0], [1], [0, 0, 1, 1], [], []>} : vector<128x64xbf16>, vector<64x32xbf16>, vector<128x32xf32> -> vector<128x32xf32>
    %cst_6 = arith.constant 0.176776692 : f32
    %7 = vector.broadcast %cst_6 : f32 to vector<128x32xf32>
    %8 = arith.mulf %6, %7 : vector<128x32xf32>
    %c0_7 = arith.constant 0 : index
    %c0_8 = arith.constant 0 : index
    %c0_9 = arith.constant 0 : index
    %9 = vector.load %arg3[%c0_7, %c0_8, %c0_9] : memref<2x64x32xbf16, #tpu.memory_space<vmem>>, vector<1x64x32xbf16>
    %10 = vector.shape_cast %9 : vector<1x64x32xbf16> to vector<64x32xbf16>
    %cst_10 = arith.constant dense<0.000000e+00> : vector<128x32xf32>
    %11 = tpu.matmul %2, %10, %cst_10 {dimension_numbers = #tpu.dot_dimension_numbers<[1], [0], [0], [1], [0, 0, 1, 1], [], []>} : vector<128x64xbf16>, vector<64x32xbf16>, vector<128x32xf32> -> vector<128x32xf32>
    %c0_11 = arith.constant 0 : index
    %c0_12 = arith.constant 0 : index
    %c0_13 = arith.constant 0 : index
    %12 = vector.load %arg4[%c0_11, %c0_12, %c0_13] : memref<2x64x32xbf16, #tpu.memory_space<vmem>>, vector<1x64x32xbf16>
    %13 = vector.shape_cast %12 : vector<1x64x32xbf16> to vector<64x32xbf16>
    %cst_14 = arith.constant dense<0.000000e+00> : vector<128x32xf32>
    %14 = tpu.matmul %2, %13, %cst_14 {dimension_numbers = #tpu.dot_dimension_numbers<[1], [0], [0], [1], [0, 0, 1, 1], [], []>} : vector<128x64xbf16>, vector<64x32xbf16>, vector<128x32xf32> -> vector<128x32xf32>
    %15 = vector.shape_cast %8 : vector<128x32xf32> to vector<8x16x32xf32>
    %16 = arith.truncf %15 : vector<8x16x32xf32> to vector<8x16x32xbf16>
    %17 = vector.shape_cast %11 : vector<128x32xf32> to vector<8x16x32xf32>
    %18 = arith.truncf %17 : vector<8x16x32xf32> to vector<8x16x32xbf16>
    %19 = vector.shape_cast %14 : vector<128x32xf32> to vector<8x16x32xf32>
    %20 = arith.truncf %19 : vector<8x16x32xf32> to vector<8x16x32xbf16>
    "tpu.trace_start"() <{level = 10 : i32, message = "wik,wjk->wij"}> : () -> ()
    %cst_15 = arith.constant dense<0.000000e+00> : vector<8x16x16xf32>
    %21 = tpu.matmul %16, %18, %cst_15 {dimension_numbers = #tpu.dot_dimension_numbers<[2], [2], [1], [1], [0, 0, 0, 1, 1, 1], [0], [0]>} : vector<8x16x32xbf16>, vector<8x16x32xbf16>, vector<8x16x16xf32> -> vector<8x16x16xf32>
    "tpu.trace_stop"() : () -> ()
    %c0_16 = arith.constant 0 : index
    %c0_17 = arith.constant 0 : index
    %c0_18 = arith.constant 0 : index
    %22 = vector.load %arg5[%c0_16, %c0_17, %c0_18] : memref<2x16x16xf32, #tpu.memory_space<vmem>>, vector<1x16x16xf32>
    %23 = vector.shape_cast %22 : vector<1x16x16xf32> to vector<16x16xf32>
    %24 = vector.shape_cast %23 : vector<16x16xf32> to vector<1x16x16xf32>
    %25 = vector.broadcast %24 : vector<1x16x16xf32> to vector<8x16x16xf32>
    %26 = arith.addf %21, %25 : vector<8x16x16xf32>
    %cst_19 = arith.constant dense<0xFF800000> : vector<8x16xf32>
    %27 = vector.multi_reduction <maximumf>, %26, %cst_19 [2] : vector<8x16x16xf32> to vector<8x16xf32>
    %28 = vector.shape_cast %27 : vector<8x16xf32> to vector<8x16x1xf32>
    %29 = vector.broadcast %28 : vector<8x16x1xf32> to vector<8x16x16xf32>
    %30 = arith.subf %26, %29 : vector<8x16x16xf32>
    %31 = math.exp %30 : vector<8x16x16xf32>
    %cst_20 = arith.constant dense<0.000000e+00> : vector<8x16xf32>
    %32 = vector.multi_reduction <add>, %31, %cst_20 [2] : vector<8x16x16xf32> to vector<8x16xf32>
    %33 = vector.shape_cast %32 : vector<8x16xf32> to vector<8x16x1xf32>
    %34 = tpu.reciprocal %33 {approx = true} : vector<8x16x1xf32> -> vector<8x16x1xf32>
    %35 = vector.broadcast %34 : vector<8x16x1xf32> to vector<8x16x16xf32>
    %36 = arith.mulf %31, %35 : vector<8x16x16xf32>
    %37 = arith.truncf %36 : vector<8x16x16xf32> to vector<8x16x16xbf16>
    "tpu.trace_start"() <{level = 10 : i32, message = "wij,wjk->wik"}> : () -> ()
    %cst_21 = arith.constant dense<0.000000e+00> : vector<8x16x32xf32>
    %38 = tpu.matmul %37, %20, %cst_21 {dimension_numbers = #tpu.dot_dimension_numbers<[2], [1], [1], [2], [0, 0, 0, 1, 1, 2], [0], [0]>} : vector<8x16x16xbf16>, vector<8x16x32xbf16>, vector<8x16x32xf32> -> vector<8x16x32xf32>
    "tpu.trace_stop"() : () -> ()
    %39 = vector.shape_cast %38 : vector<8x16x32xf32> to vector<128x32xf32>
    %40 = arith.truncf %39 : vector<128x32xf32> to vector<128x32xbf16>
    %c0_22 = arith.constant 0 : index
    %c0_23 = arith.constant 0 : index
    %c0_24 = arith.constant 0 : index
    %41 = vector.load %arg6[%c0_22, %c0_23, %c0_24] : memref<2x32x64xbf16, #tpu.memory_space<vmem>>, vector<1x32x64xbf16>
    %42 = vector.shape_cast %41 : vector<1x32x64xbf16> to vector<32x64xbf16>
    %cst_25 = arith.constant dense<0.000000e+00> : vector<128x64xf32>
    %43 = tpu.matmul %40, %42, %cst_25 {dimension_numbers = #tpu.dot_dimension_numbers<[1], [0], [0], [1], [0, 0, 1, 1], [], []>} : vector<128x32xbf16>, vector<32x64xbf16>, vector<128x64xf32> -> vector<128x64xf32>
    %44 = arith.addf %3, %43 : vector<128x64xf32>
    %c1 = arith.constant 1 : index
    %c0_26 = arith.constant 0 : index
    %c0_27 = arith.constant 0 : index
    %45 = vector.load %arg2[%c1, %c0_26, %c0_27] : memref<2x64x32xbf16, #tpu.memory_space<vmem>>, vector<1x64x32xbf16>
    %46 = vector.shape_cast %45 : vector<1x64x32xbf16> to vector<64x32xbf16>
    %cst_28 = arith.constant dense<0.000000e+00> : vector<128x32xf32>
    %47 = tpu.matmul %2, %46, %cst_28 {dimension_numbers = #tpu.dot_dimension_numbers<[1], [0], [0], [1], [0, 0, 1, 1], [], []>} : vector<128x64xbf16>, vector<64x32xbf16>, vector<128x32xf32> -> vector<128x32xf32>
    %cst_29 = arith.constant 0.176776692 : f32
    %48 = vector.broadcast %cst_29 : f32 to vector<128x32xf32>
    %49 = arith.mulf %47, %48 : vector<128x32xf32>
    %c1_30 = arith.constant 1 : index
    %c0_31 = arith.constant 0 : index
    %c0_32 = arith.constant 0 : index
    %50 = vector.load %arg3[%c1_30, %c0_31, %c0_32] : memref<2x64x32xbf16, #tpu.memory_space<vmem>>, vector<1x64x32xbf16>
    %51 = vector.shape_cast %50 : vector<1x64x32xbf16> to vector<64x32xbf16>
    %cst_33 = arith.constant dense<0.000000e+00> : vector<128x32xf32>
    %52 = tpu.matmul %2, %51, %cst_33 {dimension_numbers = #tpu.dot_dimension_numbers<[1], [0], [0], [1], [0, 0, 1, 1], [], []>} : vector<128x64xbf16>, vector<64x32xbf16>, vector<128x32xf32> -> vector<128x32xf32>
    %c1_34 = arith.constant 1 : index
    %c0_35 = arith.constant 0 : index
    %c0_36 = arith.constant 0 : index
    %53 = vector.load %arg4[%c1_34, %c0_35, %c0_36] : memref<2x64x32xbf16, #tpu.memory_space<vmem>>, vector<1x64x32xbf16>
    %54 = vector.shape_cast %53 : vector<1x64x32xbf16> to vector<64x32xbf16>
    %cst_37 = arith.constant dense<0.000000e+00> : vector<128x32xf32>
    %55 = tpu.matmul %2, %54, %cst_37 {dimension_numbers = #tpu.dot_dimension_numbers<[1], [0], [0], [1], [0, 0, 1, 1], [], []>} : vector<128x64xbf16>, vector<64x32xbf16>, vector<128x32xf32> -> vector<128x32xf32>
    %56 = vector.shape_cast %49 : vector<128x32xf32> to vector<8x16x32xf32>
    %57 = arith.truncf %56 : vector<8x16x32xf32> to vector<8x16x32xbf16>
    %58 = vector.shape_cast %52 : vector<128x32xf32> to vector<8x16x32xf32>
    %59 = arith.truncf %58 : vector<8x16x32xf32> to vector<8x16x32xbf16>
    %60 = vector.shape_cast %55 : vector<128x32xf32> to vector<8x16x32xf32>
    %61 = arith.truncf %60 : vector<8x16x32xf32> to vector<8x16x32xbf16>
    "tpu.trace_start"() <{level = 10 : i32, message = "wik,wjk->wij"}> : () -> ()
    %cst_38 = arith.constant dense<0.000000e+00> : vector<8x16x16xf32>
    %62 = tpu.matmul %57, %59, %cst_38 {dimension_numbers = #tpu.dot_dimension_numbers<[2], [2], [1], [1], [0, 0, 0, 1, 1, 1], [0], [0]>} : vector<8x16x32xbf16>, vector<8x16x32xbf16>, vector<8x16x16xf32> -> vector<8x16x16xf32>
    "tpu.trace_stop"() : () -> ()
    %c1_39 = arith.constant 1 : index
    %c0_40 = arith.constant 0 : index
    %c0_41 = arith.constant 0 : index
    %63 = vector.load %arg5[%c1_39, %c0_40, %c0_41] : memref<2x16x16xf32, #tpu.memory_space<vmem>>, vector<1x16x16xf32>
    %64 = vector.shape_cast %63 : vector<1x16x16xf32> to vector<16x16xf32>
    %65 = vector.shape_cast %64 : vector<16x16xf32> to vector<1x16x16xf32>
    %66 = vector.broadcast %65 : vector<1x16x16xf32> to vector<8x16x16xf32>
    %67 = arith.addf %62, %66 : vector<8x16x16xf32>
    %cst_42 = arith.constant dense<0xFF800000> : vector<8x16xf32>
    %68 = vector.multi_reduction <maximumf>, %67, %cst_42 [2] : vector<8x16x16xf32> to vector<8x16xf32>
    %69 = vector.shape_cast %68 : vector<8x16xf32> to vector<8x16x1xf32>
    %70 = vector.broadcast %69 : vector<8x16x1xf32> to vector<8x16x16xf32>
    %71 = arith.subf %67, %70 : vector<8x16x16xf32>
    %72 = math.exp %71 : vector<8x16x16xf32>
    %cst_43 = arith.constant dense<0.000000e+00> : vector<8x16xf32>
    %73 = vector.multi_reduction <add>, %72, %cst_43 [2] : vector<8x16x16xf32> to vector<8x16xf32>
    %74 = vector.shape_cast %73 : vector<8x16xf32> to vector<8x16x1xf32>
    %75 = tpu.reciprocal %74 {approx = true} : vector<8x16x1xf32> -> vector<8x16x1xf32>
    %76 = vector.broadcast %75 : vector<8x16x1xf32> to vector<8x16x16xf32>
    %77 = arith.mulf %72, %76 : vector<8x16x16xf32>
    %78 = arith.truncf %77 : vector<8x16x16xf32> to vector<8x16x16xbf16>
    "tpu.trace_start"() <{level = 10 : i32, message = "wij,wjk->wik"}> : () -> ()
    %cst_44 = arith.constant dense<0.000000e+00> : vector<8x16x32xf32>
    %79 = tpu.matmul %78, %61, %cst_44 {dimension_numbers = #tpu.dot_dimension_numbers<[2], [1], [1], [2], [0, 0, 0, 1, 1, 2], [0], [0]>} : vector<8x16x16xbf16>, vector<8x16x32xbf16>, vector<8x16x32xf32> -> vector<8x16x32xf32>
    "tpu.trace_stop"() : () -> ()
    %80 = vector.shape_cast %79 : vector<8x16x32xf32> to vector<128x32xf32>
    %81 = arith.truncf %80 : vector<128x32xf32> to vector<128x32xbf16>
    %c1_45 = arith.constant 1 : index
    %c0_46 = arith.constant 0 : index
    %c0_47 = arith.constant 0 : index
    %82 = vector.load %arg6[%c1_45, %c0_46, %c0_47] : memref<2x32x64xbf16, #tpu.memory_space<vmem>>, vector<1x32x64xbf16>
    %83 = vector.shape_cast %82 : vector<1x32x64xbf16> to vector<32x64xbf16>
    %cst_48 = arith.constant dense<0.000000e+00> : vector<128x64xf32>
    %84 = tpu.matmul %81, %83, %cst_48 {dimension_numbers = #tpu.dot_dimension_numbers<[1], [0], [0], [1], [0, 0, 1, 1], [], []>} : vector<128x32xbf16>, vector<32x64xbf16>, vector<128x64xf32> -> vector<128x64xf32>
    %85 = arith.addf %44, %84 : vector<128x64xf32>
    %86 = vector.shape_cast %85 : vector<128x64xf32> to vector<8x16x64xf32>
    %c0_49 = arith.constant 0 : index
    %c0_50 = arith.constant 0 : index
    %c0_51 = arith.constant 0 : index
    %87 = vector.load %arg7[%c0_49, %c0_50, %c0_51] : memref<8x16x64xf32, #tpu.memory_space<vmem>>, vector<8x16x64xf32>
    tpu.vector_store %arg7[%c0_49, %c0_50, %c0_51], %86 {strides = array<i32>} : memref<8x16x64xf32, #tpu.memory_space<vmem>>, vector<8x16x64xf32>,
    return
  }
  func.func @transform_0(%arg0: i32) -> (i32, i32, i32) {
    %c0_i32 = arith.constant 0 : i32
    %c0_i32_0 = arith.constant 0 : i32
    %c0_i32_1 = arith.constant 0 : i32
    return %arg0, %c0_i32, %c0_i32_0 : i32, i32, i32
  }
  func.func @transform_1(%arg0: i32) -> (i32, i32, i32) {
    %c0_i32 = arith.constant 0 : i32
    %c0_i32_0 = arith.constant 0 : i32
    %c0_i32_1 = arith.constant 0 : i32
    %c0_i32_2 = arith.constant 0 : i32
    return %c0_i32, %c0_i32_0, %c0_i32_1 : i32, i32, i32
  }
  func.func @transform_2(%arg0: i32) -> (i32, i32, i32) {
    %c0_i32 = arith.constant 0 : i32
    %c0_i32_0 = arith.constant 0 : i32
    %c0_i32_1 = arith.constant 0 : i32
    %c0_i32_2 = arith.constant 0 : i32
    return %c0_i32, %c0_i32_0, %c0_i32_1 : i32, i32, i32
  }
  func.func @transform_3(%arg0: i32) -> (i32, i32, i32) {
    %c0_i32 = arith.constant 0 : i32
    %c0_i32_0 = arith.constant 0 : i32
    %c0_i32_1 = arith.constant 0 : i32
    %c0_i32_2 = arith.constant 0 : i32
    return %c0_i32, %c0_i32_0, %c0_i32_1 : i32, i32, i32
  }
  func.func @transform_4(%arg0: i32) -> (i32, i32, i32) {
    %c0_i32 = arith.constant 0 : i32
    %c0_i32_0 = arith.constant 0 : i32
    %c0_i32_1 = arith.constant 0 : i32
    %c0_i32_2 = arith.constant 0 : i32
    return %c0_i32, %c0_i32_0, %c0_i32_1 : i32, i32, i32
  }
  func.func @transform_5(%arg0: i32) -> (i32, i32, i32) {
    %c0_i32 = arith.constant 0 : i32
    %c0_i32_0 = arith.constant 0 : i32
    %c0_i32_1 = arith.constant 0 : i32
    %c0_i32_2 = arith.constant 0 : i32
    return %c0_i32, %c0_i32_0, %c0_i32_1 : i32, i32, i32
  }
  func.func @transform_6(%arg0: i32) -> (i32, i32, i32) {
    %c0_i32 = arith.constant 0 : i32
    %c0_i32_0 = arith.constant 0 : i32
    %c0_i32_1 = arith.constant 0 : i32
    return %arg0, %c0_i32, %c0_i32_0 : i32, i32, i32
  }
}

module attributes {stable_mosaic.version = 11 : i64} {
  func.func @_dwconv_kernel(%arg0: i32, %arg1: memref<1x12x12x256xbf16, #tpu.memory_space<vmem>>, %arg2: memref<5x5x256xf32, #tpu.memory_space<vmem>>, %arg3: memref<1x1x256xf32, #tpu.memory_space<vmem>>, %arg4: memref<1x8x8x256xbf16, #tpu.memory_space<vmem>>) attributes {dimension_semantics = [#tpu.dimension_semantics<parallel>], iteration_bounds = array<i64: 2>, scalar_prefetch = 0 : i64, scratch_operands = 0 : i64, tpu.core_type = #tpu.core_type<tc>, window_params = [{transform_indices = @transform_0, window_bounds = array<i64: 1, 12, 12, 256>}, {pipeline_mode = #tpu.pipeline_mode<synchronous>, transform_indices = @transform_1, window_bounds = array<i64: 5, 5, 256>}, {pipeline_mode = #tpu.pipeline_mode<synchronous>, transform_indices = @transform_2, window_bounds = array<i64: 1, 1, 256>}, {transform_indices = @transform_3, window_bounds = array<i64: 1, 8, 8, 256>}]} {
    %c0 = arith.constant 0 : index
    %c0_0 = arith.constant 0 : index
    %c0_1 = arith.constant 0 : index
    %c0_2 = arith.constant 0 : index
    %0 = vector.load %arg1[%c0, %c0_0, %c0_1, %c0_2] : memref<1x12x12x256xbf16, #tpu.memory_space<vmem>>, vector<1x12x12x256xbf16>
    %1 = vector.shape_cast %0 : vector<1x12x12x256xbf16> to vector<12x12x256xbf16>
    %2 = arith.extf %1 : vector<12x12x256xbf16> to vector<12x12x256xf32>
    %c0_3 = arith.constant 0 : index
    %c0_4 = arith.constant 0 : index
    %c0_5 = arith.constant 0 : index
    %3 = vector.load %arg2[%c0_3, %c0_4, %c0_5] : memref<5x5x256xf32, #tpu.memory_space<vmem>>, vector<5x5x256xf32>
    %cst = arith.constant 0.000000e+00 : f32
    %4 = vector.broadcast %cst : f32 to vector<8x8x256xf32>
    %5 = vector.extract_strided_slice %2 {offsets = [0, 0, 0], sizes = [8, 8, 256], strides = [1, 1, 1]} : vector<12x12x256xf32> to vector<8x8x256xf32>
    %6 = vector.extract_strided_slice %3 {offsets = [0, 0, 0], sizes = [1, 1, 256], strides = [1, 1, 1]} : vector<5x5x256xf32> to vector<1x1x256xf32>
    %7 = vector.shape_cast %6 : vector<1x1x256xf32> to vector<256xf32>
    %8 = vector.shape_cast %7 : vector<256xf32> to vector<1x1x256xf32>
    %9 = vector.broadcast %8 : vector<1x1x256xf32> to vector<8x8x256xf32>
    %10 = arith.mulf %5, %9 : vector<8x8x256xf32>
    %11 = arith.addf %4, %10 : vector<8x8x256xf32>
    %12 = vector.extract_strided_slice %2 {offsets = [0, 1, 0], sizes = [8, 8, 256], strides = [1, 1, 1]} : vector<12x12x256xf32> to vector<8x8x256xf32>
    %13 = vector.extract_strided_slice %3 {offsets = [0, 1, 0], sizes = [1, 1, 256], strides = [1, 1, 1]} : vector<5x5x256xf32> to vector<1x1x256xf32>
    %14 = vector.shape_cast %13 : vector<1x1x256xf32> to vector<256xf32>
    %15 = vector.shape_cast %14 : vector<256xf32> to vector<1x1x256xf32>
    %16 = vector.broadcast %15 : vector<1x1x256xf32> to vector<8x8x256xf32>
    %17 = arith.mulf %12, %16 : vector<8x8x256xf32>
    %18 = arith.addf %11, %17 : vector<8x8x256xf32>
    %19 = vector.extract_strided_slice %2 {offsets = [0, 2, 0], sizes = [8, 8, 256], strides = [1, 1, 1]} : vector<12x12x256xf32> to vector<8x8x256xf32>
    %20 = vector.extract_strided_slice %3 {offsets = [0, 2, 0], sizes = [1, 1, 256], strides = [1, 1, 1]} : vector<5x5x256xf32> to vector<1x1x256xf32>
    %21 = vector.shape_cast %20 : vector<1x1x256xf32> to vector<256xf32>
    %22 = vector.shape_cast %21 : vector<256xf32> to vector<1x1x256xf32>
    %23 = vector.broadcast %22 : vector<1x1x256xf32> to vector<8x8x256xf32>
    %24 = arith.mulf %19, %23 : vector<8x8x256xf32>
    %25 = arith.addf %18, %24 : vector<8x8x256xf32>
    %26 = vector.extract_strided_slice %2 {offsets = [0, 3, 0], sizes = [8, 8, 256], strides = [1, 1, 1]} : vector<12x12x256xf32> to vector<8x8x256xf32>
    %27 = vector.extract_strided_slice %3 {offsets = [0, 3, 0], sizes = [1, 1, 256], strides = [1, 1, 1]} : vector<5x5x256xf32> to vector<1x1x256xf32>
    %28 = vector.shape_cast %27 : vector<1x1x256xf32> to vector<256xf32>
    %29 = vector.shape_cast %28 : vector<256xf32> to vector<1x1x256xf32>
    %30 = vector.broadcast %29 : vector<1x1x256xf32> to vector<8x8x256xf32>
    %31 = arith.mulf %26, %30 : vector<8x8x256xf32>
    %32 = arith.addf %25, %31 : vector<8x8x256xf32>
    %33 = vector.extract_strided_slice %2 {offsets = [0, 4, 0], sizes = [8, 8, 256], strides = [1, 1, 1]} : vector<12x12x256xf32> to vector<8x8x256xf32>
    %34 = vector.extract_strided_slice %3 {offsets = [0, 4, 0], sizes = [1, 1, 256], strides = [1, 1, 1]} : vector<5x5x256xf32> to vector<1x1x256xf32>
    %35 = vector.shape_cast %34 : vector<1x1x256xf32> to vector<256xf32>
    %36 = vector.shape_cast %35 : vector<256xf32> to vector<1x1x256xf32>
    %37 = vector.broadcast %36 : vector<1x1x256xf32> to vector<8x8x256xf32>
    %38 = arith.mulf %33, %37 : vector<8x8x256xf32>
    %39 = arith.addf %32, %38 : vector<8x8x256xf32>
    %40 = vector.extract_strided_slice %2 {offsets = [1, 0, 0], sizes = [8, 8, 256], strides = [1, 1, 1]} : vector<12x12x256xf32> to vector<8x8x256xf32>
    %41 = vector.extract_strided_slice %3 {offsets = [1, 0, 0], sizes = [1, 1, 256], strides = [1, 1, 1]} : vector<5x5x256xf32> to vector<1x1x256xf32>
    %42 = vector.shape_cast %41 : vector<1x1x256xf32> to vector<256xf32>
    %43 = vector.shape_cast %42 : vector<256xf32> to vector<1x1x256xf32>
    %44 = vector.broadcast %43 : vector<1x1x256xf32> to vector<8x8x256xf32>
    %45 = arith.mulf %40, %44 : vector<8x8x256xf32>
    %46 = arith.addf %39, %45 : vector<8x8x256xf32>
    %47 = vector.extract_strided_slice %2 {offsets = [1, 1, 0], sizes = [8, 8, 256], strides = [1, 1, 1]} : vector<12x12x256xf32> to vector<8x8x256xf32>
    %48 = vector.extract_strided_slice %3 {offsets = [1, 1, 0], sizes = [1, 1, 256], strides = [1, 1, 1]} : vector<5x5x256xf32> to vector<1x1x256xf32>
    %49 = vector.shape_cast %48 : vector<1x1x256xf32> to vector<256xf32>
    %50 = vector.shape_cast %49 : vector<256xf32> to vector<1x1x256xf32>
    %51 = vector.broadcast %50 : vector<1x1x256xf32> to vector<8x8x256xf32>
    %52 = arith.mulf %47, %51 : vector<8x8x256xf32>
    %53 = arith.addf %46, %52 : vector<8x8x256xf32>
    %54 = vector.extract_strided_slice %2 {offsets = [1, 2, 0], sizes = [8, 8, 256], strides = [1, 1, 1]} : vector<12x12x256xf32> to vector<8x8x256xf32>
    %55 = vector.extract_strided_slice %3 {offsets = [1, 2, 0], sizes = [1, 1, 256], strides = [1, 1, 1]} : vector<5x5x256xf32> to vector<1x1x256xf32>
    %56 = vector.shape_cast %55 : vector<1x1x256xf32> to vector<256xf32>
    %57 = vector.shape_cast %56 : vector<256xf32> to vector<1x1x256xf32>
    %58 = vector.broadcast %57 : vector<1x1x256xf32> to vector<8x8x256xf32>
    %59 = arith.mulf %54, %58 : vector<8x8x256xf32>
    %60 = arith.addf %53, %59 : vector<8x8x256xf32>
    %61 = vector.extract_strided_slice %2 {offsets = [1, 3, 0], sizes = [8, 8, 256], strides = [1, 1, 1]} : vector<12x12x256xf32> to vector<8x8x256xf32>
    %62 = vector.extract_strided_slice %3 {offsets = [1, 3, 0], sizes = [1, 1, 256], strides = [1, 1, 1]} : vector<5x5x256xf32> to vector<1x1x256xf32>
    %63 = vector.shape_cast %62 : vector<1x1x256xf32> to vector<256xf32>
    %64 = vector.shape_cast %63 : vector<256xf32> to vector<1x1x256xf32>
    %65 = vector.broadcast %64 : vector<1x1x256xf32> to vector<8x8x256xf32>
    %66 = arith.mulf %61, %65 : vector<8x8x256xf32>
    %67 = arith.addf %60, %66 : vector<8x8x256xf32>
    %68 = vector.extract_strided_slice %2 {offsets = [1, 4, 0], sizes = [8, 8, 256], strides = [1, 1, 1]} : vector<12x12x256xf32> to vector<8x8x256xf32>
    %69 = vector.extract_strided_slice %3 {offsets = [1, 4, 0], sizes = [1, 1, 256], strides = [1, 1, 1]} : vector<5x5x256xf32> to vector<1x1x256xf32>
    %70 = vector.shape_cast %69 : vector<1x1x256xf32> to vector<256xf32>
    %71 = vector.shape_cast %70 : vector<256xf32> to vector<1x1x256xf32>
    %72 = vector.broadcast %71 : vector<1x1x256xf32> to vector<8x8x256xf32>
    %73 = arith.mulf %68, %72 : vector<8x8x256xf32>
    %74 = arith.addf %67, %73 : vector<8x8x256xf32>
    %75 = vector.extract_strided_slice %2 {offsets = [2, 0, 0], sizes = [8, 8, 256], strides = [1, 1, 1]} : vector<12x12x256xf32> to vector<8x8x256xf32>
    %76 = vector.extract_strided_slice %3 {offsets = [2, 0, 0], sizes = [1, 1, 256], strides = [1, 1, 1]} : vector<5x5x256xf32> to vector<1x1x256xf32>
    %77 = vector.shape_cast %76 : vector<1x1x256xf32> to vector<256xf32>
    %78 = vector.shape_cast %77 : vector<256xf32> to vector<1x1x256xf32>
    %79 = vector.broadcast %78 : vector<1x1x256xf32> to vector<8x8x256xf32>
    %80 = arith.mulf %75, %79 : vector<8x8x256xf32>
    %81 = arith.addf %74, %80 : vector<8x8x256xf32>
    %82 = vector.extract_strided_slice %2 {offsets = [2, 1, 0], sizes = [8, 8, 256], strides = [1, 1, 1]} : vector<12x12x256xf32> to vector<8x8x256xf32>
    %83 = vector.extract_strided_slice %3 {offsets = [2, 1, 0], sizes = [1, 1, 256], strides = [1, 1, 1]} : vector<5x5x256xf32> to vector<1x1x256xf32>
    %84 = vector.shape_cast %83 : vector<1x1x256xf32> to vector<256xf32>
    %85 = vector.shape_cast %84 : vector<256xf32> to vector<1x1x256xf32>
    %86 = vector.broadcast %85 : vector<1x1x256xf32> to vector<8x8x256xf32>
    %87 = arith.mulf %82, %86 : vector<8x8x256xf32>
    %88 = arith.addf %81, %87 : vector<8x8x256xf32>
    %89 = vector.extract_strided_slice %2 {offsets = [2, 2, 0], sizes = [8, 8, 256], strides = [1, 1, 1]} : vector<12x12x256xf32> to vector<8x8x256xf32>
    %90 = vector.extract_strided_slice %3 {offsets = [2, 2, 0], sizes = [1, 1, 256], strides = [1, 1, 1]} : vector<5x5x256xf32> to vector<1x1x256xf32>
    %91 = vector.shape_cast %90 : vector<1x1x256xf32> to vector<256xf32>
    %92 = vector.shape_cast %91 : vector<256xf32> to vector<1x1x256xf32>
    %93 = vector.broadcast %92 : vector<1x1x256xf32> to vector<8x8x256xf32>
    %94 = arith.mulf %89, %93 : vector<8x8x256xf32>
    %95 = arith.addf %88, %94 : vector<8x8x256xf32>
    %96 = vector.extract_strided_slice %2 {offsets = [2, 3, 0], sizes = [8, 8, 256], strides = [1, 1, 1]} : vector<12x12x256xf32> to vector<8x8x256xf32>
    %97 = vector.extract_strided_slice %3 {offsets = [2, 3, 0], sizes = [1, 1, 256], strides = [1, 1, 1]} : vector<5x5x256xf32> to vector<1x1x256xf32>
    %98 = vector.shape_cast %97 : vector<1x1x256xf32> to vector<256xf32>
    %99 = vector.shape_cast %98 : vector<256xf32> to vector<1x1x256xf32>
    %100 = vector.broadcast %99 : vector<1x1x256xf32> to vector<8x8x256xf32>
    %101 = arith.mulf %96, %100 : vector<8x8x256xf32>
    %102 = arith.addf %95, %101 : vector<8x8x256xf32>
    %103 = vector.extract_strided_slice %2 {offsets = [2, 4, 0], sizes = [8, 8, 256], strides = [1, 1, 1]} : vector<12x12x256xf32> to vector<8x8x256xf32>
    %104 = vector.extract_strided_slice %3 {offsets = [2, 4, 0], sizes = [1, 1, 256], strides = [1, 1, 1]} : vector<5x5x256xf32> to vector<1x1x256xf32>
    %105 = vector.shape_cast %104 : vector<1x1x256xf32> to vector<256xf32>
    %106 = vector.shape_cast %105 : vector<256xf32> to vector<1x1x256xf32>
    %107 = vector.broadcast %106 : vector<1x1x256xf32> to vector<8x8x256xf32>
    %108 = arith.mulf %103, %107 : vector<8x8x256xf32>
    %109 = arith.addf %102, %108 : vector<8x8x256xf32>
    %110 = vector.extract_strided_slice %2 {offsets = [3, 0, 0], sizes = [8, 8, 256], strides = [1, 1, 1]} : vector<12x12x256xf32> to vector<8x8x256xf32>
    %111 = vector.extract_strided_slice %3 {offsets = [3, 0, 0], sizes = [1, 1, 256], strides = [1, 1, 1]} : vector<5x5x256xf32> to vector<1x1x256xf32>
    %112 = vector.shape_cast %111 : vector<1x1x256xf32> to vector<256xf32>
    %113 = vector.shape_cast %112 : vector<256xf32> to vector<1x1x256xf32>
    %114 = vector.broadcast %113 : vector<1x1x256xf32> to vector<8x8x256xf32>
    %115 = arith.mulf %110, %114 : vector<8x8x256xf32>
    %116 = arith.addf %109, %115 : vector<8x8x256xf32>
    %117 = vector.extract_strided_slice %2 {offsets = [3, 1, 0], sizes = [8, 8, 256], strides = [1, 1, 1]} : vector<12x12x256xf32> to vector<8x8x256xf32>
    %118 = vector.extract_strided_slice %3 {offsets = [3, 1, 0], sizes = [1, 1, 256], strides = [1, 1, 1]} : vector<5x5x256xf32> to vector<1x1x256xf32>
    %119 = vector.shape_cast %118 : vector<1x1x256xf32> to vector<256xf32>
    %120 = vector.shape_cast %119 : vector<256xf32> to vector<1x1x256xf32>
    %121 = vector.broadcast %120 : vector<1x1x256xf32> to vector<8x8x256xf32>
    %122 = arith.mulf %117, %121 : vector<8x8x256xf32>
    %123 = arith.addf %116, %122 : vector<8x8x256xf32>
    %124 = vector.extract_strided_slice %2 {offsets = [3, 2, 0], sizes = [8, 8, 256], strides = [1, 1, 1]} : vector<12x12x256xf32> to vector<8x8x256xf32>
    %125 = vector.extract_strided_slice %3 {offsets = [3, 2, 0], sizes = [1, 1, 256], strides = [1, 1, 1]} : vector<5x5x256xf32> to vector<1x1x256xf32>
    %126 = vector.shape_cast %125 : vector<1x1x256xf32> to vector<256xf32>
    %127 = vector.shape_cast %126 : vector<256xf32> to vector<1x1x256xf32>
    %128 = vector.broadcast %127 : vector<1x1x256xf32> to vector<8x8x256xf32>
    %129 = arith.mulf %124, %128 : vector<8x8x256xf32>
    %130 = arith.addf %123, %129 : vector<8x8x256xf32>
    %131 = vector.extract_strided_slice %2 {offsets = [3, 3, 0], sizes = [8, 8, 256], strides = [1, 1, 1]} : vector<12x12x256xf32> to vector<8x8x256xf32>
    %132 = vector.extract_strided_slice %3 {offsets = [3, 3, 0], sizes = [1, 1, 256], strides = [1, 1, 1]} : vector<5x5x256xf32> to vector<1x1x256xf32>
    %133 = vector.shape_cast %132 : vector<1x1x256xf32> to vector<256xf32>
    %134 = vector.shape_cast %133 : vector<256xf32> to vector<1x1x256xf32>
    %135 = vector.broadcast %134 : vector<1x1x256xf32> to vector<8x8x256xf32>
    %136 = arith.mulf %131, %135 : vector<8x8x256xf32>
    %137 = arith.addf %130, %136 : vector<8x8x256xf32>
    %138 = vector.extract_strided_slice %2 {offsets = [3, 4, 0], sizes = [8, 8, 256], strides = [1, 1, 1]} : vector<12x12x256xf32> to vector<8x8x256xf32>
    %139 = vector.extract_strided_slice %3 {offsets = [3, 4, 0], sizes = [1, 1, 256], strides = [1, 1, 1]} : vector<5x5x256xf32> to vector<1x1x256xf32>
    %140 = vector.shape_cast %139 : vector<1x1x256xf32> to vector<256xf32>
    %141 = vector.shape_cast %140 : vector<256xf32> to vector<1x1x256xf32>
    %142 = vector.broadcast %141 : vector<1x1x256xf32> to vector<8x8x256xf32>
    %143 = arith.mulf %138, %142 : vector<8x8x256xf32>
    %144 = arith.addf %137, %143 : vector<8x8x256xf32>
    %145 = vector.extract_strided_slice %2 {offsets = [4, 0, 0], sizes = [8, 8, 256], strides = [1, 1, 1]} : vector<12x12x256xf32> to vector<8x8x256xf32>
    %146 = vector.extract_strided_slice %3 {offsets = [4, 0, 0], sizes = [1, 1, 256], strides = [1, 1, 1]} : vector<5x5x256xf32> to vector<1x1x256xf32>
    %147 = vector.shape_cast %146 : vector<1x1x256xf32> to vector<256xf32>
    %148 = vector.shape_cast %147 : vector<256xf32> to vector<1x1x256xf32>
    %149 = vector.broadcast %148 : vector<1x1x256xf32> to vector<8x8x256xf32>
    %150 = arith.mulf %145, %149 : vector<8x8x256xf32>
    %151 = arith.addf %144, %150 : vector<8x8x256xf32>
    %152 = vector.extract_strided_slice %2 {offsets = [4, 1, 0], sizes = [8, 8, 256], strides = [1, 1, 1]} : vector<12x12x256xf32> to vector<8x8x256xf32>
    %153 = vector.extract_strided_slice %3 {offsets = [4, 1, 0], sizes = [1, 1, 256], strides = [1, 1, 1]} : vector<5x5x256xf32> to vector<1x1x256xf32>
    %154 = vector.shape_cast %153 : vector<1x1x256xf32> to vector<256xf32>
    %155 = vector.shape_cast %154 : vector<256xf32> to vector<1x1x256xf32>
    %156 = vector.broadcast %155 : vector<1x1x256xf32> to vector<8x8x256xf32>
    %157 = arith.mulf %152, %156 : vector<8x8x256xf32>
    %158 = arith.addf %151, %157 : vector<8x8x256xf32>
    %159 = vector.extract_strided_slice %2 {offsets = [4, 2, 0], sizes = [8, 8, 256], strides = [1, 1, 1]} : vector<12x12x256xf32> to vector<8x8x256xf32>
    %160 = vector.extract_strided_slice %3 {offsets = [4, 2, 0], sizes = [1, 1, 256], strides = [1, 1, 1]} : vector<5x5x256xf32> to vector<1x1x256xf32>
    %161 = vector.shape_cast %160 : vector<1x1x256xf32> to vector<256xf32>
    %162 = vector.shape_cast %161 : vector<256xf32> to vector<1x1x256xf32>
    %163 = vector.broadcast %162 : vector<1x1x256xf32> to vector<8x8x256xf32>
    %164 = arith.mulf %159, %163 : vector<8x8x256xf32>
    %165 = arith.addf %158, %164 : vector<8x8x256xf32>
    %166 = vector.extract_strided_slice %2 {offsets = [4, 3, 0], sizes = [8, 8, 256], strides = [1, 1, 1]} : vector<12x12x256xf32> to vector<8x8x256xf32>
    %167 = vector.extract_strided_slice %3 {offsets = [4, 3, 0], sizes = [1, 1, 256], strides = [1, 1, 1]} : vector<5x5x256xf32> to vector<1x1x256xf32>
    %168 = vector.shape_cast %167 : vector<1x1x256xf32> to vector<256xf32>
    %169 = vector.shape_cast %168 : vector<256xf32> to vector<1x1x256xf32>
    %170 = vector.broadcast %169 : vector<1x1x256xf32> to vector<8x8x256xf32>
    %171 = arith.mulf %166, %170 : vector<8x8x256xf32>
    %172 = arith.addf %165, %171 : vector<8x8x256xf32>
    %173 = vector.extract_strided_slice %2 {offsets = [4, 4, 0], sizes = [8, 8, 256], strides = [1, 1, 1]} : vector<12x12x256xf32> to vector<8x8x256xf32>
    %174 = vector.extract_strided_slice %3 {offsets = [4, 4, 0], sizes = [1, 1, 256], strides = [1, 1, 1]} : vector<5x5x256xf32> to vector<1x1x256xf32>
    %175 = vector.shape_cast %174 : vector<1x1x256xf32> to vector<256xf32>
    %176 = vector.shape_cast %175 : vector<256xf32> to vector<1x1x256xf32>
    %177 = vector.broadcast %176 : vector<1x1x256xf32> to vector<8x8x256xf32>
    %178 = arith.mulf %173, %177 : vector<8x8x256xf32>
    %179 = arith.addf %172, %178 : vector<8x8x256xf32>
    %c0_6 = arith.constant 0 : index
    %c0_7 = arith.constant 0 : index
    %c0_8 = arith.constant 0 : index
    %180 = vector.load %arg3[%c0_6, %c0_7, %c0_8] : memref<1x1x256xf32, #tpu.memory_space<vmem>>, vector<1x1x256xf32>
    %181 = vector.broadcast %180 : vector<1x1x256xf32> to vector<8x8x256xf32>
    %182 = arith.addf %179, %181 : vector<8x8x256xf32>
    %183 = arith.truncf %182 : vector<8x8x256xf32> to vector<8x8x256xbf16>
    %c0_9 = arith.constant 0 : index
    %c0_10 = arith.constant 0 : index
    %c0_11 = arith.constant 0 : index
    %c0_12 = arith.constant 0 : index
    %184 = vector.load %arg4[%c0_9, %c0_10, %c0_11, %c0_12] : memref<1x8x8x256xbf16, #tpu.memory_space<vmem>>, vector<1x8x8x256xbf16>
    %185 = vector.shape_cast %184 : vector<1x8x8x256xbf16> to vector<8x8x256xbf16>
    %186 = vector.shape_cast %183 : vector<8x8x256xbf16> to vector<1x8x8x256xbf16>
    tpu.vector_store %arg4[%c0_9, %c0_10, %c0_11, %c0_12], %186 {strides = array<i32>} : memref<1x8x8x256xbf16, #tpu.memory_space<vmem>>, vector<1x8x8x256xbf16>,
    return
  }
  func.func @transform_0(%arg0: i32) -> (i32, i32, i32, i32) {
    %c0_i32 = arith.constant 0 : i32
    %c0_i32_0 = arith.constant 0 : i32
    %c0_i32_1 = arith.constant 0 : i32
    %c0_i32_2 = arith.constant 0 : i32
    return %arg0, %c0_i32, %c0_i32_0, %c0_i32_1 : i32, i32, i32, i32
  }
  func.func @transform_1(%arg0: i32) -> (i32, i32, i32) {
    %c0_i32 = arith.constant 0 : i32
    %c0_i32_0 = arith.constant 0 : i32
    %c0_i32_1 = arith.constant 0 : i32
    %c0_i32_2 = arith.constant 0 : i32
    return %c0_i32, %c0_i32_0, %c0_i32_1 : i32, i32, i32
  }
  func.func @transform_2(%arg0: i32) -> (i32, i32, i32) {
    %c0_i32 = arith.constant 0 : i32
    %c0_i32_0 = arith.constant 0 : i32
    %c0_i32_1 = arith.constant 0 : i32
    %c0_i32_2 = arith.constant 0 : i32
    return %c0_i32, %c0_i32_0, %c0_i32_1 : i32, i32, i32
  }
  func.func @transform_3(%arg0: i32) -> (i32, i32, i32, i32) {
    %c0_i32 = arith.constant 0 : i32
    %c0_i32_0 = arith.constant 0 : i32
    %c0_i32_1 = arith.constant 0 : i32
    %c0_i32_2 = arith.constant 0 : i32
    return %arg0, %c0_i32, %c0_i32_0, %c0_i32_1 : i32, i32, i32, i32
  }
}

module attributes {stable_mosaic.version = 11 : i64} {
  func.func @_proj_ffn_kernel(%arg0: i32, %arg1: i32, %arg2: memref<1x64x64xf32, #tpu.memory_space<vmem>>, %arg3: memref<1x64x64xf32, #tpu.memory_space<vmem>>, %arg4: memref<1x64x64xf32, #tpu.memory_space<vmem>>, %arg5: memref<64x64xbf16, #tpu.memory_space<vmem>>, %arg6: memref<64x64xbf16, #tpu.memory_space<vmem>>, %arg7: memref<1x64xf32, #tpu.memory_space<vmem>>, %arg8: memref<64x256xbf16, #tpu.memory_space<vmem>>, %arg9: memref<1x256xf32, #tpu.memory_space<vmem>>, %arg10: memref<1x64x256xbf16, #tpu.memory_space<vmem>>) attributes {dimension_semantics = [#tpu.dimension_semantics<parallel>, #tpu.dimension_semantics<parallel>], iteration_bounds = array<i64: 2, 1>, scalar_prefetch = 0 : i64, scratch_operands = 0 : i64, tpu.core_type = #tpu.core_type<tc>, window_params = [{transform_indices = @transform_0, window_bounds = array<i64: 1, 64, 64>}, {transform_indices = @transform_1, window_bounds = array<i64: 1, 64, 64>}, {transform_indices = @transform_2, window_bounds = array<i64: 1, 64, 64>}, {pipeline_mode = #tpu.pipeline_mode<synchronous>, transform_indices = @transform_3, window_bounds = array<i64: 64, 64>}, {pipeline_mode = #tpu.pipeline_mode<synchronous>, transform_indices = @transform_4, window_bounds = array<i64: 64, 64>}, {pipeline_mode = #tpu.pipeline_mode<synchronous>, transform_indices = @transform_5, window_bounds = array<i64: 1, 64>}, {pipeline_mode = #tpu.pipeline_mode<synchronous>, transform_indices = @transform_6, window_bounds = array<i64: 64, 256>}, {pipeline_mode = #tpu.pipeline_mode<synchronous>, transform_indices = @transform_7, window_bounds = array<i64: 1, 256>}, {transform_indices = @transform_8, window_bounds = array<i64: 1, 64, 256>}]} {
    %c0 = arith.constant 0 : index
    %c0_0 = arith.constant 0 : index
    %c0_1 = arith.constant 0 : index
    %0 = vector.load %arg2[%c0, %c0_0, %c0_1] : memref<1x64x64xf32, #tpu.memory_space<vmem>>, vector<1x64x64xf32>
    %1 = vector.shape_cast %0 : vector<1x64x64xf32> to vector<64x64xf32>
    %2 = arith.truncf %1 : vector<64x64xf32> to vector<64x64xbf16>
    %c0_2 = arith.constant 0 : index
    %c0_3 = arith.constant 0 : index
    %3 = vector.load %arg5[%c0_2, %c0_3] : memref<64x64xbf16, #tpu.memory_space<vmem>>, vector<64x64xbf16>
    %cst = arith.constant dense<0.000000e+00> : vector<64x64xf32>
    %4 = tpu.matmul %2, %3, %cst {dimension_numbers = #tpu.dot_dimension_numbers<[1], [0], [0], [1], [0, 0, 1, 1], [], []>} : vector<64x64xbf16>, vector<64x64xbf16>, vector<64x64xf32> -> vector<64x64xf32>
    %c0_4 = arith.constant 0 : index
    %c0_5 = arith.constant 0 : index
    %c0_6 = arith.constant 0 : index
    %5 = vector.load %arg3[%c0_4, %c0_5, %c0_6] : memref<1x64x64xf32, #tpu.memory_space<vmem>>, vector<1x64x64xf32>
    %6 = vector.shape_cast %5 : vector<1x64x64xf32> to vector<64x64xf32>
    %7 = arith.truncf %6 : vector<64x64xf32> to vector<64x64xbf16>
    %c0_7 = arith.constant 0 : index
    %c0_8 = arith.constant 0 : index
    %8 = vector.load %arg6[%c0_7, %c0_8] : memref<64x64xbf16, #tpu.memory_space<vmem>>, vector<64x64xbf16>
    %cst_9 = arith.constant dense<0.000000e+00> : vector<64x64xf32>
    %9 = tpu.matmul %7, %8, %cst_9 {dimension_numbers = #tpu.dot_dimension_numbers<[1], [0], [0], [1], [0, 0, 1, 1], [], []>} : vector<64x64xbf16>, vector<64x64xbf16>, vector<64x64xf32> -> vector<64x64xf32>
    %10 = arith.addf %4, %9 : vector<64x64xf32>
    %c0_10 = arith.constant 0 : index
    %c0_11 = arith.constant 0 : index
    %11 = vector.load %arg7[%c0_10, %c0_11] : memref<1x64xf32, #tpu.memory_space<vmem>>, vector<1x64xf32>
    %12 = vector.broadcast %11 : vector<1x64xf32> to vector<64x64xf32>
    %13 = arith.addf %10, %12 : vector<64x64xf32>
    %c0_12 = arith.constant 0 : index
    %c0_13 = arith.constant 0 : index
    %c0_14 = arith.constant 0 : index
    %14 = vector.load %arg4[%c0_12, %c0_13, %c0_14] : memref<1x64x64xf32, #tpu.memory_space<vmem>>, vector<1x64x64xf32>
    %15 = vector.shape_cast %14 : vector<1x64x64xf32> to vector<64x64xf32>
    %16 = arith.addf %13, %15 : vector<64x64xf32>
    %17 = arith.truncf %16 : vector<64x64xf32> to vector<64x64xbf16>
    %c0_15 = arith.constant 0 : index
    %c0_16 = arith.constant 0 : index
    %18 = vector.load %arg8[%c0_15, %c0_16] : memref<64x256xbf16, #tpu.memory_space<vmem>>, vector<64x256xbf16>
    %cst_17 = arith.constant dense<0.000000e+00> : vector<64x256xf32>
    %19 = tpu.matmul %17, %18, %cst_17 {dimension_numbers = #tpu.dot_dimension_numbers<[1], [0], [0], [1], [0, 0, 1, 1], [], []>} : vector<64x64xbf16>, vector<64x256xbf16>, vector<64x256xf32> -> vector<64x256xf32>
    %c0_18 = arith.constant 0 : index
    %c0_19 = arith.constant 0 : index
    %20 = vector.load %arg9[%c0_18, %c0_19] : memref<1x256xf32, #tpu.memory_space<vmem>>, vector<1x256xf32>
    %21 = vector.broadcast %20 : vector<1x256xf32> to vector<64x256xf32>
    %22 = arith.addf %19, %21 : vector<64x256xf32>
    %cst_20 = arith.constant 5.000000e-01 : f32
    %23 = vector.broadcast %cst_20 : f32 to vector<64x256xf32>
    %24 = arith.mulf %23, %22 : vector<64x256xf32>
    %cst_21 = arith.constant 4.471500e-02 : f32
    %25 = vector.broadcast %cst_21 : f32 to vector<64x256xf32>
    %26 = arith.mulf %25, %22 : vector<64x256xf32>
    %27 = arith.mulf %26, %22 : vector<64x256xf32>
    %28 = arith.mulf %27, %22 : vector<64x256xf32>
    %29 = arith.addf %22, %28 : vector<64x256xf32>
    %cst_22 = arith.constant 0.797884583 : f32
    %30 = vector.broadcast %cst_22 : f32 to vector<64x256xf32>
    %31 = arith.mulf %30, %29 : vector<64x256xf32>
    %32 = math.tanh %31 : vector<64x256xf32>
    %cst_23 = arith.constant 1.000000e+00 : f32
    %33 = vector.broadcast %cst_23 : f32 to vector<64x256xf32>
    %34 = arith.addf %33, %32 : vector<64x256xf32>
    %35 = arith.mulf %24, %34 : vector<64x256xf32>
    %36 = arith.truncf %35 : vector<64x256xf32> to vector<64x256xbf16>
    %c0_24 = arith.constant 0 : index
    %c0_25 = arith.constant 0 : index
    %c0_26 = arith.constant 0 : index
    %37 = vector.load %arg10[%c0_24, %c0_25, %c0_26] : memref<1x64x256xbf16, #tpu.memory_space<vmem>>, vector<1x64x256xbf16>
    %38 = vector.shape_cast %37 : vector<1x64x256xbf16> to vector<64x256xbf16>
    %39 = vector.shape_cast %36 : vector<64x256xbf16> to vector<1x64x256xbf16>
    tpu.vector_store %arg10[%c0_24, %c0_25, %c0_26], %39 {strides = array<i32>} : memref<1x64x256xbf16, #tpu.memory_space<vmem>>, vector<1x64x256xbf16>,
    return
  }
  func.func @transform_0(%arg0: i32, %arg1: i32) -> (i32, i32, i32) {
    %c0_i32 = arith.constant 0 : i32
    %c0_i32_0 = arith.constant 0 : i32
    return %arg0, %arg1, %c0_i32 : i32, i32, i32
  }
  func.func @transform_1(%arg0: i32, %arg1: i32) -> (i32, i32, i32) {
    %c0_i32 = arith.constant 0 : i32
    %c0_i32_0 = arith.constant 0 : i32
    return %arg0, %arg1, %c0_i32 : i32, i32, i32
  }
  func.func @transform_2(%arg0: i32, %arg1: i32) -> (i32, i32, i32) {
    %c0_i32 = arith.constant 0 : i32
    %c0_i32_0 = arith.constant 0 : i32
    return %arg0, %arg1, %c0_i32 : i32, i32, i32
  }
  func.func @transform_3(%arg0: i32, %arg1: i32) -> (i32, i32) {
    %c0_i32 = arith.constant 0 : i32
    %c0_i32_0 = arith.constant 0 : i32
    %c0_i32_1 = arith.constant 0 : i32
    return %c0_i32, %c0_i32_0 : i32, i32
  }
  func.func @transform_4(%arg0: i32, %arg1: i32) -> (i32, i32) {
    %c0_i32 = arith.constant 0 : i32
    %c0_i32_0 = arith.constant 0 : i32
    %c0_i32_1 = arith.constant 0 : i32
    return %c0_i32, %c0_i32_0 : i32, i32
  }
  func.func @transform_5(%arg0: i32, %arg1: i32) -> (i32, i32) {
    %c0_i32 = arith.constant 0 : i32
    %c0_i32_0 = arith.constant 0 : i32
    %c0_i32_1 = arith.constant 0 : i32
    return %c0_i32, %c0_i32_0 : i32, i32
  }
  func.func @transform_6(%arg0: i32, %arg1: i32) -> (i32, i32) {
    %c0_i32 = arith.constant 0 : i32
    %c0_i32_0 = arith.constant 0 : i32
    %c0_i32_1 = arith.constant 0 : i32
    return %c0_i32, %c0_i32_0 : i32, i32
  }
  func.func @transform_7(%arg0: i32, %arg1: i32) -> (i32, i32) {
    %c0_i32 = arith.constant 0 : i32
    %c0_i32_0 = arith.constant 0 : i32
    %c0_i32_1 = arith.constant 0 : i32
    return %c0_i32, %c0_i32_0 : i32, i32
  }
  func.func @transform_8(%arg0: i32, %arg1: i32) -> (i32, i32, i32) {
    %c0_i32 = arith.constant 0 : i32
    %c0_i32_0 = arith.constant 0 : i32
    return %arg0, %arg1, %c0_i32 : i32, i32, i32
  }
}

module attributes {stable_mosaic.version = 11 : i64} {
  func.func @_pw_kernel(%arg0: i32, %arg1: i32, %arg2: memref<1x64x256xbf16, #tpu.memory_space<vmem>>, %arg3: memref<256x64xbf16, #tpu.memory_space<vmem>>, %arg4: memref<1x64xf32, #tpu.memory_space<vmem>>, %arg5: memref<1x64x64xf32, #tpu.memory_space<vmem>>, %arg6: memref<1x64x64xf32, #tpu.memory_space<vmem>>) attributes {dimension_semantics = [#tpu.dimension_semantics<parallel>, #tpu.dimension_semantics<parallel>], iteration_bounds = array<i64: 2, 1>, scalar_prefetch = 0 : i64, scratch_operands = 0 : i64, tpu.core_type = #tpu.core_type<tc>, window_params = [{transform_indices = @transform_0, window_bounds = array<i64: 1, 64, 256>}, {pipeline_mode = #tpu.pipeline_mode<synchronous>, transform_indices = @transform_1, window_bounds = array<i64: 256, 64>}, {pipeline_mode = #tpu.pipeline_mode<synchronous>, transform_indices = @transform_2, window_bounds = array<i64: 1, 64>}, {transform_indices = @transform_3, window_bounds = array<i64: 1, 64, 64>}, {transform_indices = @transform_4, window_bounds = array<i64: 1, 64, 64>}]} {
    %c0 = arith.constant 0 : index
    %c0_0 = arith.constant 0 : index
    %c0_1 = arith.constant 0 : index
    %0 = vector.load %arg2[%c0, %c0_0, %c0_1] : memref<1x64x256xbf16, #tpu.memory_space<vmem>>, vector<1x64x256xbf16>
    %1 = vector.shape_cast %0 : vector<1x64x256xbf16> to vector<64x256xbf16>
    %c0_2 = arith.constant 0 : index
    %c0_3 = arith.constant 0 : index
    %2 = vector.load %arg3[%c0_2, %c0_3] : memref<256x64xbf16, #tpu.memory_space<vmem>>, vector<256x64xbf16>
    %cst = arith.constant dense<0.000000e+00> : vector<64x64xf32>
    %3 = tpu.matmul %1, %2, %cst {dimension_numbers = #tpu.dot_dimension_numbers<[1], [0], [0], [1], [0, 0, 1, 1], [], []>} : vector<64x256xbf16>, vector<256x64xbf16>, vector<64x64xf32> -> vector<64x64xf32>
    %c0_4 = arith.constant 0 : index
    %c0_5 = arith.constant 0 : index
    %4 = vector.load %arg4[%c0_4, %c0_5] : memref<1x64xf32, #tpu.memory_space<vmem>>, vector<1x64xf32>
    %5 = vector.broadcast %4 : vector<1x64xf32> to vector<64x64xf32>
    %6 = arith.addf %3, %5 : vector<64x64xf32>
    %c0_6 = arith.constant 0 : index
    %c0_7 = arith.constant 0 : index
    %c0_8 = arith.constant 0 : index
    %7 = vector.load %arg5[%c0_6, %c0_7, %c0_8] : memref<1x64x64xf32, #tpu.memory_space<vmem>>, vector<1x64x64xf32>
    %8 = vector.shape_cast %7 : vector<1x64x64xf32> to vector<64x64xf32>
    %9 = arith.addf %6, %8 : vector<64x64xf32>
    %c0_9 = arith.constant 0 : index
    %c0_10 = arith.constant 0 : index
    %c0_11 = arith.constant 0 : index
    %10 = vector.load %arg6[%c0_9, %c0_10, %c0_11] : memref<1x64x64xf32, #tpu.memory_space<vmem>>, vector<1x64x64xf32>
    %11 = vector.shape_cast %10 : vector<1x64x64xf32> to vector<64x64xf32>
    %12 = vector.shape_cast %9 : vector<64x64xf32> to vector<1x64x64xf32>
    tpu.vector_store %arg6[%c0_9, %c0_10, %c0_11], %12 {strides = array<i32>} : memref<1x64x64xf32, #tpu.memory_space<vmem>>, vector<1x64x64xf32>,
    return
  }
  func.func @transform_0(%arg0: i32, %arg1: i32) -> (i32, i32, i32) {
    %c0_i32 = arith.constant 0 : i32
    %c0_i32_0 = arith.constant 0 : i32
    return %arg0, %arg1, %c0_i32 : i32, i32, i32
  }
  func.func @transform_1(%arg0: i32, %arg1: i32) -> (i32, i32) {
    %c0_i32 = arith.constant 0 : i32
    %c0_i32_0 = arith.constant 0 : i32
    %c0_i32_1 = arith.constant 0 : i32
    return %c0_i32, %c0_i32_0 : i32, i32
  }
  func.func @transform_2(%arg0: i32, %arg1: i32) -> (i32, i32) {
    %c0_i32 = arith.constant 0 : i32
    %c0_i32_0 = arith.constant 0 : i32
    %c0_i32_1 = arith.constant 0 : i32
    return %c0_i32, %c0_i32_0 : i32, i32
  }
  func.func @transform_3(%arg0: i32, %arg1: i32) -> (i32, i32, i32) {
    %c0_i32 = arith.constant 0 : i32
    %c0_i32_0 = arith.constant 0 : i32
    return %arg0, %arg1, %c0_i32 : i32, i32, i32
  }
  func.func @transform_4(%arg0: i32, %arg1: i32) -> (i32, i32, i32) {
    %c0_i32 = arith.constant 0 : i32
    %c0_i32_0 = arith.constant 0 : i32
    return %arg0, %arg1, %c0_i32 : i32, i32, i32
  }
}

</mosaic_0001>

<bundles_post_ra>
// kernel: my_layer_forward.8
= control target key start
LH: loop header
LB: loop body
LE: loop exit
PB: predicated region body
PF: predicated region fallthrough
CT: control target
= control target key end

     0   :  { %s772_s12 = smov 0   ;;  %s774_s13 = smov 0   ;;  %s975_s0 = inlined_call_operand.vmem [shape: f32[2,64,64], index: 0, kind: input, shape index: {}]   ;;  %s976_s1 = inlined_call_operand.vmem [shape: bf16[64,256], index: 1, kind: input, shape index: {}]   ;;  %s977_s2 = inlined_call_operand.vmem [shape: f32[1,256], index: 2, kind: input, shape index: {}]   ;;  %s978_s3 = inlined_call_operand.vmem [shape: bf16[2,64,256], index: 3, kind: output, shape index: {}]  }
   0x1   :  { %s776_s14 = smov 0  }
   0x2 LB: > { %s25_s15 = sadd.s32 1, %s746_s13  ;;  %p607_p0 = scmp.ge.s32.totalorder %s750_s14, 1  ;;  %s750_s14 = sphi %s776_s14, %s13_s14   ;;  %s746_s13 = sphi %s774_s13, %s980_s13   ;;  %s742_s12 = sphi %s772_s12, %s979_s12  }
   0x3   : > { %p27_p1 = scmp.ge.s32.totalorder %s25_s15, 2  ;;  %p158_p2 = scmp.lt.s32.totalorder %s750_s14, 3 }
   0x5   : > { %s982_s15 = smov (%p27_p1, %s25_s15), 0  ;;  %p159_p3 = pnand %p607_p0, %p158_p2 }
   0x6   : > { %p192_p4 = scmp.lt.s32.totalorder (!%p159_p3), %s742_s12, 1 }
   0x7   : > { %162 = sbr.rel (%p159_p3) target bundleno = 217 (0xd9), region = 32 }
   0xc   : > { %v638_v0 = vld [vmem:[%s976_s1 + $0x30] sm:$0xf]  ;;  %v663_v1 = vld [vmem:[%s976_s1 + $0x34] sm:$0xf0]  ;;  %v662_v2 = vld [vmem:[%s976_s1 + $0x34] sm:$0xf] }
   0xd   : > { %v639_v3 = vor.u32 %v663_v1, %v638_v0  ;;  %v640_v4 = vld [vmem:[%s976_s1 + $0x38] sm:$0xf0]  ;;  %v630_v5 = vld [vmem:[%s976_s1 + $0x20] sm:$0xf]  ;;  %v661_v6 = vld [vmem:[%s976_s1 + $0x24] sm:$0xf0] }
   0xe   : > { %v643_v7 = vor.u32 %v662_v2, %v640_v4  ;;  %v660_v8 = vld [vmem:[%s976_s1 + $0x24] sm:$0xf]  ;;  %v632_v9 = vld [vmem:[%s976_s1 + $0x28] sm:$0xf0]  ;;  %v631_v10 = vor.u32 %v661_v6, %v630_v5  ;;  %v622_v12 = vld [vmem:[%s976_s1 + $0x10] sm:$0xf] }
   0xf   : > { %296 = vmatpush.bf16.msra.mxu0 %v639_v3  ;;  %664 = vmatpush.bf16.msra.mxu2 %v639_v3  ;;  %v635_v11 = vor.u32 %v660_v8, %v632_v9  ;;  %v659_v13 = vld [vmem:[%s976_s1 + $0x14] sm:$0xf0]  ;;  %v658_v14 = vld [vmem:[%s976_s1 + $0x14] sm:$0xf]  ;;  %v624_v15 = vld [vmem:[%s976_s1 + $0x18] sm:$0xf0] }
  0x10   : > { %325 = vmatpush.bf16.msra.mxu1 %v643_v7  ;;  %668 = vmatpush.bf16.msra.mxu3 %v643_v7  ;;  %v623_v16 = vor.u32 %v659_v13, %v622_v12  ;;  %s984_s12 = smov (!%p192_p4, %s742_s12), 1  ;;  %v627_v17 = vor.u32 %v658_v14, %v624_v15  ;;  %v614_v18 = vld [vmem:[%s976_s1] sm:$0xf]  ;;  %v657_v19 = vld [vmem:[%s976_s1 + $0x4] sm:$0xf0]  ;;  %vm279_vm0 = vcmask 523264  }
  0x11   : > { %v656_v20 = vld [vmem:[%s976_s1 + $0x4] sm:$0xf]  ;;  %v616_v21 = vld [vmem:[%s976_s1 + $0x8] sm:$0xf0]  ;;  %s654_s25 = sshll.u32 %s984_s12, 6  ;;  %v615_v22 = vor.u32 %v657_v19, %v614_v18 }
  0x12   : > { %s199_s28 = scalar_lea.vmem %s975_s0, %s654_s25  ;;  %v619_v26 = vor.u32 %v656_v20, %v616_v21  ;;  %v233_v36 = vld [vmem:[%s977_s2] sm:$0x3]  ;;  %s905_s6 = scalar_lea.vmem %s978_s3, %s654_s25 }
  0x13   : > { %297 = vmatpush.bf16.msra.mxu0 %v631_v10  ;;  %665 = vmatpush.bf16.msra.mxu2 %v631_v10  ;;  %v213_v23 = vld [vmem:[%s199_s28] sm:$0xff]  ;;  %v214_v24 = vld [vmem:[%s199_s28 + $0x8] sm:$0xff]  ;;  %v215_v30 = vld [vmem:[%s199_s28 + $0x10] sm:$0xff]  ;;  %v861_v37 = vperm.slane %v233_v36, 0  ;;  %v863_v38 = vperm.slane %v233_v36, 1 }
  0x14   : > { %326 = vmatpush.bf16.msra.mxu1 %v635_v11  ;;  %669 = vmatpush.bf16.msra.mxu3 %v635_v11  ;;  %v217_v25 = vld [vmem:[%s199_s28 + $0x20] sm:$0xff]  ;;  %v218_v27 = vld [vmem:[%s199_s28 + $0x28] sm:$0xff]  ;;  %v221_v28 = vpack.c.bf16 %v214_v24, %v213_v23  ;;  %v216_v31 = vld [vmem:[%s199_s28 + $0x18] sm:$0xff] }
  0x15   : > { %v223_v29 = vpack.c.bf16 %v218_v27, %v217_v25  ;;  %v219_v32 = vld [vmem:[%s199_s28 + $0x30] sm:$0xff]  ;;  %v220_v33 = vld [vmem:[%s199_s28 + $0x38] sm:$0xff]  ;;  %v222_v34 = vpack.c.bf16 %v216_v31, %v215_v30 }
  0x16   : > { %v224_v35 = vpack.c.bf16 %v220_v33, %v219_v32 }
  0x17   : > { %298 = vmatpush.bf16.msra.mxu0 %v623_v16  ;;  %666 = vmatpush.bf16.msra.mxu2 %v623_v16 }
  0x18   : > { %327 = vmatpush.bf16.msra.mxu1 %v627_v17  ;;  %670 = vmatpush.bf16.msra.mxu3 %v627_v17 }
  0x1b   : > { %299 = vmatpush.bf16.msra.mxu0 %v615_v22  ;;  %667 = vmatpush.bf16.msra.mxu2 %v615_v22 }
  0x1c   : > { %328 = vmatpush.bf16.msra.mxu1 %v619_v26  ;;  %671 = vmatpush.bf16.msra.mxu3 %v619_v26 }
  0x1e   : > { %644 = vmatmul.msk.bf16.vlgmr.msra.gmra.mxu0 %vm279_vm0, %v221_v28  ;;  %646 = vmatmul.msk.bf16.vlgmr.msra.gmra.mxu2 %vm279_vm0, %v223_v29 }
  0x1f   : > { %648 = vmatmul.msk.bf16.vlgmr.msra.gmra.mxu1 %vm279_vm0, %v221_v28  ;;  %650 = vmatmul.msk.bf16.vlgmr.msra.gmra.mxu3 %vm279_vm0, %v223_v29 }
  0x2e   : > { %645 = vmatmul.msk.bf16.gmra.mxu0 %vm279_vm0, %v222_v34  ;;  %647 = vmatmul.msk.bf16.gmra.mxu2 %vm279_vm0, %v224_v35 }
  0x2f   : > { %649 = vmatmul.msk.bf16.gmra.mxu1 %vm279_vm0, %v222_v34  ;;  %651 = vmatmul.msk.bf16.gmra.mxu3 %vm279_vm0, %v224_v35 }
  0x9b   : > { %v301_v39 = vpop.f32.mrf.mxu0 }
  0x9c   : > { %v302_v40 = vadd.f32 %v301_v39, %v861_v37  ;;  %v330_v41 = vpop.f32.mrf.mxu1 }
  0x9d   : > { %v331_v42 = vadd.f32 %v330_v41, %v863_v38 }
  0x9e   : > { %v366_v43 = vmul.f32 0.044715, %v302_v40  ;;  %v350_v16 = vmul.f32 0.5, %v302_v40 }
  0x9f   : > { %v367_v44 = vmul.f32 0.044715, %v331_v42  ;;  %v351_v20 = vmul.f32 0.5, %v331_v42 }
  0xa0   : > { %v382_v45 = vmul.f32 %v366_v43, %v302_v40 }
  0xa1   : > { %v383_v46 = vmul.f32 %v367_v44, %v331_v42  ;;  %v311_v47 = vpop.f32.mrf.mxu2 }
  0xa2   : > { %v398_v48 = vmul.f32 %v382_v45, %v302_v40  ;;  %v312_v49 = vadd.f32 %v311_v47, %v861_v37  ;;  %v340_v50 = vpop.f32.mrf.mxu3 }
  0xa3   : > { %v399_v51 = vmul.f32 %v383_v46, %v331_v42  ;;  %v869_v52 = vadd.f32 %v340_v50, %v863_v38  ;;  %v303_v53 = vpop.f32.mrf.mxu0 }
  0xa4   : > { %v414_v54 = vadd.f32 %v398_v48, %v302_v40  ;;  %v374_v55 = vmul.f32 0.044715, %v312_v49  ;;  %v304_v56 = vadd.f32 %v303_v53, %v861_v37  ;;  %v332_v57 = vpop.f32.mrf.mxu1  ;;  %v358_v34 = vmul.f32 0.5, %v312_v49 }
  0xa5   : > { %v415_v58 = vadd.f32 %v399_v51, %v331_v42  ;;  %v375_v59 = vmul.f32 0.044715, %v869_v52  ;;  %v333_v60 = vadd.f32 %v332_v57, %v863_v38  ;;  %v359_v47 = vmul.f32 0.5, %v869_v52 }
  0xa6   : > { %v430_v61 = vmul.f32 0.7978846, %v414_v54  ;;  %v390_v62 = vmul.f32 %v374_v55, %v312_v49  ;;  %v368_v63 = vmul.f32 0.044715, %v304_v56  ;;  %v352_v48 = vmul.f32 0.5, %v304_v56 }
  0xa7   : > { %v431_v0 = vmul.f32 0.7978846, %v415_v58  ;;  %v391_v1 = vmul.f32 %v375_v59, %v869_v52  ;;  %v369_v2 = vmul.f32 0.044715, %v333_v60  ;;  %v353_v54 = vmul.f32 0.5, %v333_v60 }
  0xa8   : > { %696 = vtanh.f32 %v430_v61  ;;  %v406_v3 = vmul.f32 %v390_v62, %v312_v49  ;;  %v384_v4 = vmul.f32 %v368_v63, %v304_v56 }
  0xa9   : > { %698 = vtanh.f32 %v431_v0  ;;  %v407_v5 = vmul.f32 %v391_v1, %v869_v52  ;;  %v385_v6 = vmul.f32 %v369_v2, %v333_v60  ;;  %v313_v7 = vpop.f32.mrf.mxu2 }
  0xaa   : > { %v422_v8 = vadd.f32 %v406_v3, %v312_v49  ;;  %v400_v9 = vmul.f32 %v384_v4, %v304_v56  ;;  %v877_v10 = vadd.f32 %v313_v7, %v861_v37  ;;  %v342_v11 = vpop.f32.mrf.mxu3 }
  0xab   : > { %v423_v12 = vadd.f32 %v407_v5, %v869_v52  ;;  %v401_v13 = vmul.f32 %v385_v6, %v333_v60  ;;  %v881_v14 = vadd.f32 %v342_v11, %v863_v38  ;;  %v306_v15 = vpop.f32.mrf.mxu0 }
  0xac   : > { %v438_v17 = vmul.f32 0.7978846, %v422_v8  ;;  %v416_v18 = vadd.f32 %v400_v9, %v304_v56  ;;  %v376_v19 = vmul.f32 0.044715, %v877_v10  ;;  %v887_v27 = vadd.f32 %v306_v15, %v861_v37  ;;  %v335_v28 = vpop.f32.mrf.mxu1 }
  0xad   : > { %v439_v21 = vmul.f32 0.7978846, %v423_v12  ;;  %v417_v22 = vadd.f32 %v401_v13, %v333_v60  ;;  %v377_v23 = vmul.f32 0.044715, %v881_v14  ;;  %v895_v44 = vadd.f32 %v335_v28, %v863_v38 }
  0xae   : > { %v697_v24 = vpop.eup %696  ;;  %700 = vtanh.f32 %v438_v17  ;;  %v432_v25 = vmul.f32 0.7978846, %v416_v18  ;;  %v392_v26 = vmul.f32 %v376_v19, %v877_v10  ;;  %v370_v40 = vmul.f32 0.044715, %v887_v27 }
  0xaf   : > { %v699_v29 = vpop.eup %698  ;;  %v462_v30 = vadd.f32 1.0, %v697_v24  ;;  %702 = vtanh.f32 %v439_v21  ;;  %v433_v31 = vmul.f32 0.7978846, %v417_v22  ;;  %v393_v32 = vmul.f32 %v377_v23, %v881_v14 }
  0xb0   : > { %v463_v33 = vadd.f32 1.0, %v699_v29  ;;  %704 = vtanh.f32 %v432_v25  ;;  %v408_v35 = vmul.f32 %v392_v26, %v877_v10  ;;  %v386_v50 = vmul.f32 %v370_v40, %v887_v27 }
  0xb1   : > { %v478_v36 = vmul.f32 %v462_v30, %v350_v16  ;;  %706 = vtanh.f32 %v433_v31  ;;  %v409_v39 = vmul.f32 %v393_v32, %v881_v14  ;;  %v316_v41 = vpop.f32.mrf.mxu2  ;;  %v371_v57 = vmul.f32 0.044715, %v895_v44 }
  0xb2   : > { %v479_v42 = vmul.f32 %v463_v33, %v351_v20  ;;  %v424_v43 = vadd.f32 %v408_v35, %v877_v10  ;;  %v898_v45 = vadd.f32 %v316_v41, %v861_v37  ;;  %v345_v46 = vpop.f32.mrf.mxu3  ;;  %v402_v62 = vmul.f32 %v386_v50, %v887_v27 }
  0xb3   : > { %v425_v49 = vadd.f32 %v409_v39, %v881_v14  ;;  %v913_v63 = vadd.f32 %v345_v46, %v863_v38  ;;  %v387_v0 = vmul.f32 %v371_v57, %v895_v44  ;;  %v308_v9 = vpop.f32.mrf.mxu0  ;;  %v360_v31 = vmul.f32 0.5, %v877_v10 }
  0xb4   : > { %v701_v51 = vpop.eup %700  ;;  %v494_v53 = vpack.c.bf16 %v479_v42, %v478_v36  ;;  %v440_v55 = vmul.f32 0.7978846, %v424_v43  ;;  %v378_v1 = vmul.f32 0.044715, %v898_v45  ;;  %v418_v4 = vadd.f32 %v402_v62, %v887_v27  ;;  %v337_v11 = vpop.f32.mrf.mxu1 }
  0xb5   : > { %v703_v58 = vpop.eup %702  ;;  %v470_v59 = vadd.f32 1.0, %v701_v51  ;;  %v441_v61 = vmul.f32 0.7978846, %v425_v49  ;;  %v403_v7 = vmul.f32 %v387_v0, %v895_v44  ;;  %v379_v15 = vmul.f32 0.044715, %v913_v63 }
  0xb6   : > { %v705_v52 = vpop.eup %704  ;;  %502 = vst [vmem:[%s905_s6] sm:$0xff] %v494_v53  ;;  %v471_v56 = vadd.f32 1.0, %v703_v58  ;;  %708 = vtanh.f32 %v440_v55  ;;  %v394_v8 = vmul.f32 %v378_v1, %v898_v45  ;;  %v434_v13 = vmul.f32 0.7978846, %v418_v4 }
  0xb7   : > { %v707_v60 = vpop.eup %706  ;;  %v486_v2 = vmul.f32 %v470_v59, %v358_v34  ;;  %v464_v3 = vadd.f32 1.0, %v705_v52  ;;  %710 = vtanh.f32 %v441_v61  ;;  %v419_v19 = vadd.f32 %v403_v7, %v895_v44 }
  0xb8   : > { %v487_v5 = vmul.f32 %v471_v56, %v359_v47  ;;  %v465_v6 = vadd.f32 1.0, %v707_v60  ;;  %v410_v20 = vmul.f32 %v394_v8, %v898_v45  ;;  %712 = vtanh.f32 %v434_v13 }
  0xb9   : > { %v480_v12 = vmul.f32 %v464_v3, %v352_v48  ;;  %v318_v16 = vpop.f32.mrf.mxu2  ;;  %v395_v21 = vmul.f32 %v379_v15, %v913_v63  ;;  %v926_v22 = vadd.f32 %v308_v9, %v861_v37  ;;  %v929_v23 = vadd.f32 %v337_v11, %v863_v38 }
  0xba   : > { %v498_v17 = vpack.c.bf16 %v487_v5, %v486_v2  ;;  %v481_v18 = vmul.f32 %v465_v6, %v353_v54  ;;  %v435_v26 = vmul.f32 0.7978846, %v419_v19  ;;  %v426_v28 = vadd.f32 %v410_v20, %v898_v45  ;;  %v347_v40 = vpop.f32.mrf.mxu3 }
  0xbb   : > { %v934_v29 = vadd.f32 %v318_v16, %v861_v37  ;;  %v411_v33 = vmul.f32 %v395_v21, %v913_v63  ;;  %v372_v34 = vmul.f32 0.044715, %v926_v22  ;;  %v361_v35 = vmul.f32 0.5, %v881_v14 }
  0xbc   : > { %v709_v24 = vpop.eup %708  ;;  %506 = vst [vmem:[%s905_s6 + $0x20] sm:$0xff] %v498_v17  ;;  %v495_v25 = vpack.c.bf16 %v481_v18, %v480_v12  ;;  %714 = vtanh.f32 %v435_v26  ;;  %v442_v39 = vmul.f32 0.7978846, %v426_v28  ;;  %v373_v43 = vmul.f32 0.044715, %v929_v23 }
  0xbd   : > { %v711_v30 = vpop.eup %710  ;;  %v472_v32 = vadd.f32 1.0, %v709_v24  ;;  %v427_v42 = vadd.f32 %v411_v33, %v913_v63  ;;  %v388_v37 = vmul.f32 %v372_v34, %v926_v22  ;;  %v380_v46 = vmul.f32 0.044715, %v934_v29 }
  0xbe   : > { %503 = vst [vmem:[%s905_s6 + $0x8] sm:$0xff] %v495_v25  ;;  %v473_v36 = vadd.f32 1.0, %v711_v30  ;;  %716 = vtanh.f32 %v442_v39  ;;  %v713_v47 = vpop.eup %712  ;;  %v389_v49 = vmul.f32 %v373_v43, %v929_v23  ;;  %v348_v50 = vadd.f32 %v347_v40, %v863_v38 }
  0xbf   : > { %v488_v41 = vmul.f32 %v472_v32, %v360_v31  ;;  %v443_v48 = vmul.f32 0.7978846, %v427_v42  ;;  %v404_v14 = vmul.f32 %v388_v37, %v926_v22  ;;  %v466_v53 = vadd.f32 1.0, %v713_v47 }
  0xc0   : > { %v489_v10 = vmul.f32 %v473_v36, %v361_v35  ;;  %v396_v54 = vmul.f32 %v380_v46, %v934_v29  ;;  %v354_v55 = vmul.f32 0.5, %v887_v27  ;;  %v405_v58 = vmul.f32 %v389_v49, %v929_v23 }
  0xc1   : > { %718 = vtanh.f32 %v443_v48  ;;  %v420_v57 = vadd.f32 %v404_v14, %v926_v22  ;;  %v355_v61 = vmul.f32 0.5, %v895_v44  ;;  %v381_v52 = vmul.f32 0.044715, %v348_v50 }
  0xc2   : > { %v499_v51 = vpack.c.bf16 %v489_v10, %v488_v41  ;;  %v715_v59 = vpop.eup %714  ;;  %v412_v62 = vmul.f32 %v396_v54, %v934_v29  ;;  %v482_v56 = vmul.f32 %v466_v53, %v354_v55  ;;  %v421_v1 = vadd.f32 %v405_v58, %v929_v23 }
  0xc3   : > { %v467_v38 = vadd.f32 1.0, %v715_v59  ;;  %v436_v0 = vmul.f32 0.7978846, %v420_v57  ;;  %v397_v2 = vmul.f32 %v381_v52, %v348_v50  ;;  %v362_v6 = vmul.f32 0.5, %v898_v45 }
  0xc4   : > { %507 = vst [vmem:[%s905_s6 + $0x28] sm:$0xff] %v499_v51  ;;  %v717_v60 = vpop.eup %716  ;;  %v428_v27 = vadd.f32 %v412_v62, %v934_v29  ;;  %v437_v5 = vmul.f32 0.7978846, %v421_v1  ;;  %v363_v11 = vmul.f32 0.5, %v913_v63  ;;  %v356_v20 = vmul.f32 0.5, %v926_v22 }
  0xc5   : > { %v483_v3 = vmul.f32 %v467_v38, %v355_v61  ;;  %v474_v4 = vadd.f32 1.0, %v717_v60  ;;  %720 = vtanh.f32 %v436_v0  ;;  %v413_v7 = vmul.f32 %v397_v2, %v348_v50 }
  0xc6   : > { %v444_v44 = vmul.f32 0.7978846, %v428_v27  ;;  %722 = vtanh.f32 %v437_v5  ;;  %v357_v25 = vmul.f32 0.5, %v929_v23  ;;  %v364_v31 = vmul.f32 0.5, %v934_v29 }
  0xc7   : > { %v719_v8 = vpop.eup %718  ;;  %v496_v9 = vpack.c.bf16 %v483_v3, %v482_v56  ;;  %v490_v12 = vmul.f32 %v474_v4, %v362_v6  ;;  %v429_v15 = vadd.f32 %v413_v7, %v348_v50  ;;  %v365_v35 = vmul.f32 0.5, %v348_v50 }
  0xc8   : > { %v475_v13 = vadd.f32 1.0, %v719_v8  ;;  %724 = vtanh.f32 %v444_v44 }
  0xc9   : > { %504 = vst [vmem:[%s905_s6 + $0x10] sm:$0xff] %v496_v9  ;;  %v445_v17 = vmul.f32 0.7978846, %v429_v15 }
  0xca   : > { %v491_v16 = vmul.f32 %v475_v13, %v363_v11 }
  0xcb   : > { %v721_v18 = vpop.eup %720  ;;  %726 = vtanh.f32 %v445_v17 }
  0xcc   : > { %v500_v19 = vpack.c.bf16 %v491_v16, %v490_v12  ;;  %v468_v45 = vadd.f32 1.0, %v721_v18  ;;  %v723_v21 = vpop.eup %722 }
  0xcd   : > { %v469_v26 = vadd.f32 1.0, %v723_v21 }
  0xce   : > { %v725_v24 = vpop.eup %724  ;;  %508 = vst [vmem:[%s905_s6 + $0x30] sm:$0xff] %v500_v19  ;;  %v484_v63 = vmul.f32 %v468_v45, %v356_v20 }
  0xcf   : > { %v476_v28 = vadd.f32 1.0, %v725_v24  ;;  %v485_v30 = vmul.f32 %v469_v26, %v357_v25 }
  0xd1   : > { %v727_v32 = vpop.eup %726  ;;  %v497_v33 = vpack.c.bf16 %v485_v30, %v484_v63  ;;  %v492_v34 = vmul.f32 %v476_v28, %v364_v31 }
  0xd2   : > { %v477_v22 = vadd.f32 1.0, %v727_v32 }
  0xd3   : > { %505 = vst [vmem:[%s905_s6 + $0x18] sm:$0xff] %v497_v33 }
  0xd4   : > { %v493_v36 = vmul.f32 %v477_v22, %v365_v35 }
  0xd6   : > { %v501_v39 = vpack.c.bf16 %v493_v36, %v492_v34 }
  0xd8   : > { %509 = vst [vmem:[%s905_s6 + $0x38] sm:$0xff] %v501_v39 }
  0xd9 PF: > { %s13_s14 = sadd.s32 1, %s750_s14   ;;  %s979_s12 = smov %s746_s13 }
  0xda   : > { %p10_p5 = scmp.ge.s32.totalorder %s13_s14, 4   ;;  %s980_s13 = smov %s982_s15 }
  0xdc   :  { %12 = sbr.rel (!%p10_p5) target bundleno = 2 (0x2), region = 62 }

// kernel: my_layer_forward.10
= control target key start
LH: loop header
LB: loop body
LE: loop exit
PB: predicated region body
PF: predicated region fallthrough
CT: control target
= control target key end

     0   :  { %s901_s18 = smov 0   ;;  %s903_s19 = smov 0   ;;  %s1034_s0 = inlined_call_operand.vmem [shape: bf16[2,64,256], index: 0, kind: input, shape index: {}]   ;;  %s1035_s1 = inlined_call_operand.vmem [shape: f32[2,1,256], index: 1, kind: input, shape index: {}]   ;;  %s1036_s2 = inlined_call_operand.vmem [shape: bf16[256,64], index: 2, kind: input, shape index: {}]   ;;  %s1037_s3 = inlined_call_operand.vmem [shape: f32[1,64], index: 3, kind: input, shape index: {}]   ;;  %s1038_s4 = inlined_call_operand.vmem [shape: f32[2,64,64], index: 4, kind: input, shape index: {}]   ;;  %s1039_s5 = inlined_call_operand.vmem [shape: f32[2,64,64], index: 5, kind: output, shape index: {}]  }
   0x1   :  { %s905_s20 = smov 0  }
   0x2 LB: > { %s27_s21 = sadd.s32 1, %s865_s19  ;;  %p713_p0 = scmp.ge.s32.totalorder %s869_s20, 1  ;;  %s869_s20 = sphi %s905_s20, %s15_s20   ;;  %s865_s19 = sphi %s903_s19, %s1041_s19   ;;  %s861_s18 = sphi %s901_s18, %s1040_s18  }
   0x3   : > { %p29_p1 = scmp.ge.s32.totalorder %s27_s21, 2  ;;  %p235_p2 = scmp.lt.s32.totalorder %s869_s20, 3 }
   0x5   : > { %s1043_s21 = smov (%p29_p1, %s27_s21), 0  ;;  %p236_p3 = pnand %p713_p0, %p235_p2 }
   0x6   : > { %p286_p4 = scmp.lt.s32.totalorder (!%p236_p3), %s861_s18, 1 }
   0x7   : > { %239 = sbr.rel (%p236_p3) target bundleno = 207 (0xcf), region = 40 }
   0xc   : > { %v797_v0 = vld [vmem:[%s1036_s2 + $0x38] sm:$0xff]  ;;  %v796_v2 = vld [vmem:[%s1036_s2 + $0x30] sm:$0xff]  ;;  %v795_v4 = vld [vmem:[%s1036_s2 + $0x28] sm:$0xff]  ;;  %s1045_s18 = smov (!%p286_p4, %s861_s18), 1  ;;  %vm580_vm0 = vcmask 523264  }
   0xd   : > { %v805_v1 = vld [vmem:[%s1036_s2 + $0x78] sm:$0xff]  ;;  %506 = vmatpush.bf16.msra.mxu0 %v797_v0  ;;  %806 = vmatpush.bf16.msra.mxu2 %v797_v0  ;;  %v804_v3 = vld [vmem:[%s1036_s2 + $0x70] sm:$0xff]  ;;  %v803_v5 = vld [vmem:[%s1036_s2 + $0x68] sm:$0xff]  ;;  %s943_s13 = sshll.u32 %s1045_s18, 6  ;;  %s716_s14 = sshll.u32 %s1045_s18, 1 }
   0xe   : > { %535 = vmatpush.bf16.msra.mxu1 %v805_v1  ;;  %814 = vmatpush.bf16.msra.mxu3 %v805_v1  ;;  %v794_v6 = vld [vmem:[%s1036_s2 + $0x20] sm:$0xff]  ;;  %v793_v8 = vld [vmem:[%s1036_s2 + $0x18] sm:$0xff]  ;;  %s952_s23 = scalar_lea.vmem %s1034_s0, %s943_s13  ;;  %s299_s26 = scalar_lea.vmem %s1035_s1, %s716_s14  ;;  %v792_v13 = vld [vmem:[%s1036_s2 + $0x10] sm:$0xff] }
   0xf   : > { %v802_v7 = vld [vmem:[%s1036_s2 + $0x60] sm:$0xff]  ;;  %v801_v9 = vld [vmem:[%s1036_s2 + $0x58] sm:$0xff]  ;;  %v321_v11 = vld [vmem:[%s952_s23 + $0x8] sm:$0xff]  ;;  %s993_s24 = scalar_lea.vmem %s1038_s4, %s943_s13  ;;  %s1000_s18 = scalar_lea.vmem %s1039_s5, %s943_s13 }
  0x10   : > { %v320_v10 = vld [vmem:[%s952_s23] sm:$0xff]  ;;  %v325_v15 = vld [vmem:[%s952_s23 + $0x28] sm:$0xff]  ;;  %v800_v16 = vld [vmem:[%s1036_s2 + $0x50] sm:$0xff]  ;;  %v330_v18 = vunpack.c.l.bf16 %v321_v11  ;;  %v331_v25 = vunpack.c.h.bf16 %v321_v11 }
  0x11   : > { %507 = vmatpush.bf16.msra.mxu0 %v796_v2  ;;  %807 = vmatpush.bf16.msra.mxu2 %v796_v2  ;;  %v344_v12 = vld [vmem:[%s299_s26] sm:$0x3]  ;;  %v328_v17 = vunpack.c.l.bf16 %v320_v10  ;;  %v338_v22 = vunpack.c.l.bf16 %v325_v15  ;;  %v329_v23 = vunpack.c.h.bf16 %v320_v10  ;;  %v791_v24 = vld [vmem:[%s1036_s2 + $0x8] sm:$0xff]  ;;  %v339_v27 = vunpack.c.h.bf16 %v325_v15  ;;  %v322_v43 = vld [vmem:[%s952_s23 + $0x10] sm:$0xff] }
  0x12   : > { %536 = vmatpush.bf16.msra.mxu1 %v804_v3  ;;  %815 = vmatpush.bf16.msra.mxu3 %v804_v3  ;;  %v324_v14 = vld [vmem:[%s952_s23 + $0x20] sm:$0xff]  ;;  %v346_v19 = vperm.slane %v344_v12, 0  ;;  %v347_v20 = vperm.slane %v344_v12, 1  ;;  %v799_v28 = vld [vmem:[%s1036_s2 + $0x48] sm:$0xff]  ;;  %v323_v44 = vld [vmem:[%s952_s23 + $0x18] sm:$0xff]  ;;  %v332_v47 = vunpack.c.l.bf16 %v322_v43  ;;  %v333_v51 = vunpack.c.h.bf16 %v322_v43 }
  0x13   : > { %v336_v21 = vunpack.c.l.bf16 %v324_v14  ;;  %v337_v26 = vunpack.c.h.bf16 %v324_v14  ;;  %v790_v34 = vld [vmem:[%s1036_s2] sm:$0xff]  ;;  %v326_v45 = vld [vmem:[%s952_s23 + $0x30] sm:$0xff]  ;;  %v327_v46 = vld [vmem:[%s952_s23 + $0x38] sm:$0xff]  ;;  %v334_v48 = vunpack.c.l.bf16 %v323_v44  ;;  %v335_v52 = vunpack.c.h.bf16 %v323_v44 }
  0x14   : > { %v350_v29 = vmul.f32 %v346_v19, %v328_v17  ;;  %v352_v30 = vmul.f32 %v346_v19, %v330_v18  ;;  %v360_v32 = vmul.f32 %v346_v19, %v338_v22  ;;  %v351_v33 = vmul.f32 %v347_v20, %v329_v23  ;;  %v798_v38 = vld [vmem:[%s1036_s2 + $0x40] sm:$0xff]  ;;  %v565_v18 = vld [vmem:[%s993_s24 + $0x8] sm:$0xff] }
  0x15   : > { %508 = vmatpush.bf16.msra.mxu0 %v795_v4  ;;  %808 = vmatpush.bf16.msra.mxu2 %v795_v4  ;;  %v358_v31 = vmul.f32 %v346_v19, %v336_v21  ;;  %v353_v35 = vmul.f32 %v347_v20, %v331_v25  ;;  %v359_v36 = vmul.f32 %v347_v20, %v337_v26  ;;  %v340_v49 = vunpack.c.l.bf16 %v326_v45  ;;  %v846_v3 = vld [vmem:[%s1037_s3] ss:$0 sm:$0xff]  ;;  %v569_v25 = vld [vmem:[%s993_s24 + $0x28] sm:$0xff] }
  0x16   : > { %537 = vmatpush.bf16.msra.mxu1 %v803_v5  ;;  %816 = vmatpush.bf16.msra.mxu3 %v803_v5  ;;  %v361_v37 = vmul.f32 %v347_v20, %v339_v27  ;;  %v366_v39 = vpack.c.bf16 %v352_v30, %v350_v29  ;;  %v342_v50 = vunpack.c.l.bf16 %v327_v46  ;;  %v341_v53 = vunpack.c.h.bf16 %v326_v45  ;;  %v566_v30 = vld [vmem:[%s993_s24 + $0x10] sm:$0xff] }
  0x17   : > { %v370_v40 = vpack.c.bf16 %v360_v32, %v358_v31  ;;  %v367_v41 = vpack.c.bf16 %v353_v35, %v351_v33  ;;  %v343_v54 = vunpack.c.h.bf16 %v327_v46  ;;  %v354_v55 = vmul.f32 %v346_v19, %v332_v47 }
  0x18   : > { %v371_v42 = vpack.c.bf16 %v361_v37, %v359_v36  ;;  %v356_v56 = vmul.f32 %v346_v19, %v334_v48  ;;  %v362_v57 = vmul.f32 %v346_v19, %v340_v49  ;;  %v364_v58 = vmul.f32 %v346_v19, %v342_v50  ;;  %v570_v37 = vld [vmem:[%s993_s24 + $0x30] sm:$0xff]  ;;  %v571_v49 = vld [vmem:[%s993_s24 + $0x38] sm:$0xff] }
  0x19   : > { %509 = vmatpush.bf16.msra.mxu0 %v794_v6  ;;  %809 = vmatpush.bf16.msra.mxu2 %v794_v6  ;;  %v355_v59 = vmul.f32 %v347_v20, %v333_v51  ;;  %v357_v60 = vmul.f32 %v347_v20, %v335_v52  ;;  %v363_v61 = vmul.f32 %v347_v20, %v341_v53 }
  0x1a   : > { %538 = vmatpush.bf16.msra.mxu1 %v802_v7  ;;  %817 = vmatpush.bf16.msra.mxu3 %v802_v7  ;;  %v365_v62 = vmul.f32 %v347_v20, %v343_v54  ;;  %v368_v63 = vpack.c.bf16 %v356_v56, %v354_v55  ;;  %v372_v0 = vpack.c.bf16 %v364_v58, %v362_v57  ;;  %v564_v7 = vld [vmem:[%s993_s24] sm:$0xff] }
  0x1b   : > { %v369_v1 = vpack.c.bf16 %v357_v60, %v355_v59 }
  0x1c   : > { %v373_v2 = vpack.c.bf16 %v365_v62, %v363_v61 }
  0x1d   : > { %510 = vmatpush.bf16.msra.mxu0 %v793_v8  ;;  %810 = vmatpush.bf16.msra.mxu2 %v793_v8 }
  0x1e   : > { %539 = vmatpush.bf16.msra.mxu1 %v801_v9  ;;  %818 = vmatpush.bf16.msra.mxu3 %v801_v9 }
  0x21   : > { %511 = vmatpush.bf16.msra.mxu0 %v792_v13  ;;  %811 = vmatpush.bf16.msra.mxu2 %v792_v13  ;;  %v568_v13 = vld [vmem:[%s993_s24 + $0x20] sm:$0xff] }
  0x22   : > { %540 = vmatpush.bf16.msra.mxu1 %v800_v16  ;;  %819 = vmatpush.bf16.msra.mxu3 %v800_v16 }
  0x25   : > { %512 = vmatpush.bf16.msra.mxu0 %v791_v24  ;;  %812 = vmatpush.bf16.msra.mxu2 %v791_v24 }
  0x26   : > { %541 = vmatpush.bf16.msra.mxu1 %v799_v28  ;;  %820 = vmatpush.bf16.msra.mxu3 %v799_v28 }
  0x29   : > { %513 = vmatpush.bf16.msra.mxu0 %v790_v34  ;;  %813 = vmatpush.bf16.msra.mxu2 %v790_v34 }
  0x2a   : > { %542 = vmatpush.bf16.msra.mxu1 %v798_v38  ;;  %821 = vmatpush.bf16.msra.mxu3 %v798_v38 }
  0x2c   : > { %514 = vmatmul.bf16.vlgmr.msra.gmra.mxu0 %v366_v39  ;;  %524 = vmatmul.bf16.vlgmr.msra.gmra.mxu2 %v370_v40 }
  0x2d   : > { %543 = vmatmul.bf16.vlgmr.msra.gmra.mxu1 %v367_v41  ;;  %553 = vmatmul.bf16.vlgmr.msra.gmra.mxu3 %v371_v42  ;;  %v567_v42 = vld [vmem:[%s993_s24 + $0x18] sm:$0xff] }
  0x3c   : > { %519 = vmatmul.bf16.gmra.mxu0 %v368_v63  ;;  %529 = vmatmul.bf16.gmra.mxu2 %v372_v0 }
  0x3d   : > { %548 = vmatmul.bf16.gmra.mxu1 %v369_v1  ;;  %558 = vmatmul.bf16.gmra.mxu3 %v373_v2 }
  0xa9   : > { %v515_v4 = vpop.f32.mrf.mxu0 }
  0xaa   : > { %v516_v5 = vadd.f32 %v846_v3, %v515_v4  ;;  %v544_v6 = vpop.f32.mrf.mxu1 }
  0xac   : > { %v545_v8 = vadd.f32 %v544_v6, %v516_v5 }
  0xae   : > { %v572_v9 = vadd.f32 %v564_v7, %v545_v8 }
  0xaf   : > { %v525_v10 = vpop.f32.mrf.mxu2 }
  0xb0   : > { %581 = vst.msk [vmem:[%s1000_s18] sm:$0xff] %vm580_vm0, %v572_v9  ;;  %v526_v11 = vadd.f32 %v846_v3, %v525_v10  ;;  %v554_v12 = vpop.f32.mrf.mxu3 }
  0xb1   : > { %v517_v14 = vpop.f32.mrf.mxu0 }
  0xb2   : > { %v555_v15 = vadd.f32 %v554_v12, %v526_v11  ;;  %v518_v16 = vadd.f32 %v846_v3, %v517_v14  ;;  %v546_v17 = vpop.f32.mrf.mxu1 }
  0xb4   : > { %v576_v19 = vadd.f32 %v568_v13, %v555_v15  ;;  %v547_v20 = vadd.f32 %v546_v17, %v518_v16 }
  0xb6   : > { %585 = vst.msk [vmem:[%s1000_s18 + $0x20] sm:$0xff] %vm580_vm0, %v576_v19  ;;  %v573_v21 = vadd.f32 %v565_v18, %v547_v20 }
  0xb7   : > { %v527_v22 = vpop.f32.mrf.mxu2 }
  0xb8   : > { %582 = vst.msk [vmem:[%s1000_s18 + $0x8] sm:$0xff] %vm580_vm0, %v573_v21  ;;  %v528_v23 = vadd.f32 %v846_v3, %v527_v22  ;;  %v556_v24 = vpop.f32.mrf.mxu3 }
  0xb9   : > { %v520_v26 = vpop.f32.mrf.mxu0 }
  0xba   : > { %v557_v27 = vadd.f32 %v556_v24, %v528_v23  ;;  %v521_v28 = vadd.f32 %v846_v3, %v520_v26  ;;  %v549_v29 = vpop.f32.mrf.mxu1 }
  0xbc   : > { %v577_v31 = vadd.f32 %v569_v25, %v557_v27  ;;  %v550_v32 = vadd.f32 %v549_v29, %v521_v28 }
  0xbe   : > { %586 = vst.msk [vmem:[%s1000_s18 + $0x28] sm:$0xff] %vm580_vm0, %v577_v31  ;;  %v574_v33 = vadd.f32 %v566_v30, %v550_v32 }
  0xbf   : > { %v530_v34 = vpop.f32.mrf.mxu2 }
  0xc0   : > { %583 = vst.msk [vmem:[%s1000_s18 + $0x10] sm:$0xff] %vm580_vm0, %v574_v33  ;;  %v531_v35 = vadd.f32 %v846_v3, %v530_v34  ;;  %v559_v36 = vpop.f32.mrf.mxu3 }
  0xc1   : > { %v522_v38 = vpop.f32.mrf.mxu0 }
  0xc2   : > { %v560_v39 = vadd.f32 %v559_v36, %v531_v35  ;;  %v523_v40 = vadd.f32 %v846_v3, %v522_v38  ;;  %v551_v41 = vpop.f32.mrf.mxu1 }
  0xc4   : > { %v578_v43 = vadd.f32 %v570_v37, %v560_v39  ;;  %v552_v44 = vadd.f32 %v551_v41, %v523_v40 }
  0xc6   : > { %587 = vst.msk [vmem:[%s1000_s18 + $0x30] sm:$0xff] %vm580_vm0, %v578_v43  ;;  %v575_v45 = vadd.f32 %v567_v42, %v552_v44 }
  0xc7   : > { %v532_v46 = vpop.f32.mrf.mxu2 }
  0xc8   : > { %584 = vst.msk [vmem:[%s1000_s18 + $0x18] sm:$0xff] %vm580_vm0, %v575_v45  ;;  %v533_v47 = vadd.f32 %v846_v3, %v532_v46  ;;  %v561_v48 = vpop.f32.mrf.mxu3 }
  0xca   : > { %v562_v50 = vadd.f32 %v561_v48, %v533_v47 }
  0xcc   : > { %v579_v51 = vadd.f32 %v571_v49, %v562_v50 }
  0xce   : > { %588 = vst.msk [vmem:[%s1000_s18 + $0x38] sm:$0xff] %vm580_vm0, %v579_v51 }
  0xcf PF: > { %s15_s20 = sadd.s32 1, %s869_s20   ;;  %s1040_s18 = smov %s865_s19 }
  0xd0   : > { %p12_p5 = scmp.ge.s32.totalorder %s15_s20, 4   ;;  %s1041_s19 = smov %s1043_s21 }
  0xd2   :  { %14 = sbr.rel (!%p12_p5) target bundleno = 2 (0x2), region = 76 }

// kernel: my_layer_forward.9
= control target key start
LH: loop header
LB: loop body
LE: loop exit
PB: predicated region body
PF: predicated region fallthrough
CT: control target
= control target key end

     0   :  { %s1969_s21 = smov 0   ;;  %s3004_s0 = inlined_call_operand.vmem [shape: bf16[2,10,10,256], index: 0, kind: input, shape index: {}]   ;;  %s3005_s1 = inlined_call_operand.vmem [shape: f32[3,3,256], index: 1, kind: input, shape index: {}]   ;;  %s3006_s2 = inlined_call_operand.vmem [shape: f32[1,1,256], index: 2, kind: input, shape index: {}]   ;;  %s3007_s3 = inlined_call_operand.vmem [shape: f32[256,64], index: 3, kind: input, shape index: {}]   ;;  %s3008_s4 = inlined_call_operand.vmem [shape: f32[64,256], index: 4, kind: input, shape index: {}]   ;;  %s3009_s5 = inlined_call_operand.vmem [shape: bf16[2,8,8,256], index: 5, kind: output, shape index: {0}]   ;;  %s3010_s6 = inlined_call_operand.vmem [shape: f32[2,1,256], index: 6, kind: output, shape index: {1}]  }
   0x1 LB: > { %s1849_s22 = sadd.s32 4294967295, %s1931_s21   ;;  %p1853_p0 = scmp.ge.s32.totalorder %s1931_s21, 1  ;;  %s1931_s21 = sphi %s1969_s21, %s17_s21  }
   0x2   : > { %p215_p1 = scmp.lt.s32.totalorder %s1931_s21, 3 }
   0x4   : > { %p216_p2 = pnand %p1853_p0, %p215_p1 }
   0x6   : > { %219 = sbr.rel (%p216_p2) target bundleno = 610 (0x262), region = 40 }
   0xb   : > { %v1577_v0 = vld [vmem:[%s3007_s3 + $0x78] sm:$0xff]  ;;  %v1576_v2 = vld [vmem:[%s3007_s3 + $0x70] sm:$0xff]  ;;  %p249_p3 = scmp.lt.s32.totalorder %s1849_s22, 1  ;;  %v1575_v4 = vld [vmem:[%s3007_s3 + $0x68] sm:$0xff]  ;;  %vm435_vm0 = vcmask 1046528   ;;  %vm586_vm1 = vcmask 1045504  }
   0xc   : > { %v1593_v1 = vld [vmem:[%s3007_s3 + $0xf8] sm:$0xff]  ;;  %1594 = vmatpush.msra.mxu0 %v1577_v0  ;;  %v1592_v3 = vld [vmem:[%s3007_s3 + $0xf0] sm:$0xff]  ;;  %v1591_v5 = vld [vmem:[%s3007_s3 + $0xe8] sm:$0xff]  ;;  %vm1670_vm7 = vcmask 523264   ;;  %vm1755_vm15 = vcmask 1040384  }
   0xd   : > { %1614 = vmatpush.msra.mxu1 %v1593_v1  ;;  %s3117_s22 = smov (!%p249_p3, %s1849_s22), 1  ;;  %v1574_v6 = vld [vmem:[%s3007_s3 + $0x60] sm:$0xff]  ;;  %v1573_v8 = vld [vmem:[%s3007_s3 + $0x58] sm:$0xff]  ;;  %v1572_v10 = vld [vmem:[%s3007_s3 + $0x50] sm:$0xff] }
   0xe   : > { %1595 = vmatpush.msra.mxu0 %v1576_v2  ;;  %v1590_v7 = vld [vmem:[%s3007_s3 + $0xe0] sm:$0xff]  ;;  %s1866_s15 = smul.u32 160, %s3117_s22  ;;  %v1589_v9 = vld [vmem:[%s3007_s3 + $0xd8] sm:$0xff]  ;;  %v1588_v11 = vld [vmem:[%s3007_s3 + $0xd0] sm:$0xff]  ;;  %s1857_s7 = sshll.u32 %s3117_s22, 1 }
   0xf   : > { %1615 = vmatpush.msra.mxu1 %v1592_v3  ;;  %v1571_v12 = vld [vmem:[%s3007_s3 + $0x48] sm:$0xff]  ;;  %v1570_v14 = vld [vmem:[%s3007_s3 + $0x40] sm:$0xff]  ;;  %v1569_v20 = vld [vmem:[%s3007_s3 + $0x38] sm:$0xff]  ;;  %s262_s10 = scalar_lea.vmem %s3010_s6, %s1857_s7 }
  0x10   : > { %1596 = vmatpush.msra.mxu0 %v1575_v4  ;;  %s2013_s24 = scalar_lea.vmem %s3004_s0, %s1866_s15  ;;  %v1587_v13 = vld [vmem:[%s3007_s3 + $0xc8] sm:$0xff]  ;;  %v1586_v15 = vld [vmem:[%s3007_s3 + $0xc0] sm:$0xff]  ;;  %v1585_v21 = vld [vmem:[%s3007_s3 + $0xb8] sm:$0xff]  ;;  %s1865_s15 = sshll.u32 %s3117_s22, 6 }
  0x11   : > { %1616 = vmatpush.msra.mxu1 %v1591_v5  ;;  %v2034_v16 = vld [vmem:[%s2013_s24] sm:$0xff]  ;;  %v2037_v17 = vld [vmem:[%s2013_s24 + $0x8] sm:$0x11]  ;;  %v2040_v18 = vld [vmem:[%s2013_s24 + $0x10] sm:$0xff]  ;;  %s2921_s18 = scalar_lea.vmem %s3009_s5, %s1865_s15 }
  0x12   : > { %1597 = vmatpush.msra.mxu0 %v1574_v6  ;;  %3045 = vst [vmem:[#allocation2_spill] sm:$0xff] %v2040_v18  ;;  %v2043_v19 = vld [vmem:[%s2013_s24 + $0x18] sm:$0x11]  ;;  %v2052_v22 = vld [vmem:[%s2013_s24 + $0x20] sm:$0xff]  ;;  %v2055_v23 = vld [vmem:[%s2013_s24 + $0x28] sm:$0x11]  ;;  %v2070_v28 = vunpack.c.l.bf16 %v2034_v16  ;;  %v3015_v29 = vunpack.c.l.bf16 %v2037_v17  ;;  %v2074_v30 = vunpack.c.l.bf16 %v2040_v18 }
  0x13   : > { %1617 = vmatpush.msra.mxu1 %v1590_v7  ;;  %3046 = vst [vmem:[#allocation3_spill] sm:$0xff] %v2043_v19  ;;  %v2058_v24 = vld [vmem:[%s2013_s24 + $0x30] sm:$0xff]  ;;  %v2061_v25 = vld [vmem:[%s2013_s24 + $0x38] sm:$0x11]  ;;  %v2064_v26 = vld [vmem:[%s2013_s24 + $0x40] sm:$0xff]  ;;  %v2092_v36 = vunpack.c.l.bf16 %v2043_v19  ;;  %v2095_v37 = vunpack.c.l.bf16 %v2052_v22  ;;  %v2098_v38 = vunpack.c.l.bf16 %v2055_v23 }
  0x14   : > { %1598 = vmatpush.msra.mxu0 %v1573_v8  ;;  %3047 = vst [vmem:[#allocation4_spill] sm:$0xff] %v2052_v22  ;;  %v2067_v27 = vld [vmem:[%s2013_s24 + $0x48] sm:$0x11]  ;;  %v1568_v31 = vld [vmem:[%s3007_s3 + $0x30] sm:$0xff]  ;;  %v2086_v34 = vld [vmem:[%s2013_s24 + $0x58] sm:$0x11]  ;;  %v2101_v39 = vunpack.c.l.bf16 %v2058_v24  ;;  %v2113_v43 = vunpack.c.l.bf16 %v2061_v25  ;;  %v2116_v44 = vunpack.c.l.bf16 %v2064_v26 }
  0x15   : > { %1618 = vmatpush.msra.mxu1 %v1589_v9  ;;  %3048 = vst [vmem:[#allocation5_spill] sm:$0xff] %v2055_v23  ;;  %v1584_v32 = vld [vmem:[%s3007_s3 + $0xb0] sm:$0xff]  ;;  %v2089_v35 = vld [vmem:[%s2013_s24 + $0x60] sm:$0xff]  ;;  %v2104_v40 = vld [vmem:[%s2013_s24 + $0x68] sm:$0x11]  ;;  %v2119_v45 = vunpack.c.l.bf16 %v2067_v27  ;;  %v2134_v50 = vunpack.c.l.bf16 %v2086_v34 }
  0x16   : > { %1599 = vmatpush.msra.mxu0 %v1572_v10  ;;  %3049 = vst [vmem:[#allocation6_spill] sm:$0xff] %v2058_v24  ;;  %v2083_v33 = vld [vmem:[%s2013_s24 + $0x50] sm:$0xff]  ;;  %v2110_v42 = vld [vmem:[%s2013_s24 + $0x78] sm:$0x11]  ;;  %v2125_v47 = vld [vmem:[%s2013_s24 + $0x80] sm:$0xff]  ;;  %v2137_v51 = vunpack.c.l.bf16 %v2089_v35  ;;  %v2140_v52 = vunpack.c.l.bf16 %v2104_v40 }
  0x17   : > { %1619 = vmatpush.msra.mxu1 %v1588_v11  ;;  %3050 = vst [vmem:[#allocation7_spill] sm:$0xff] %v2061_v25  ;;  %v2107_v41 = vld [vmem:[%s2013_s24 + $0x70] sm:$0xff]  ;;  %v2122_v46 = vunpack.c.l.bf16 %v2083_v33  ;;  %v2128_v48 = vld [vmem:[%s2013_s24 + $0x88] sm:$0x11]  ;;  %v2146_v54 = vld [vmem:[%s2013_s24 + $0x98] sm:$0x11]  ;;  %v2149_v55 = vunpack.c.l.bf16 %v2110_v42  ;;  %v2152_v56 = vunpack.c.l.bf16 %v2125_v47 }
  0x18   : > { %1600 = vmatpush.msra.mxu0 %v1571_v12  ;;  %3051 = vst [vmem:[#allocation8_spill] sm:$0xff] %v2064_v26  ;;  %v2131_v49 = vld [vmem:[%s2013_s24 + $0x90] sm:$0xff]  ;;  %v2143_v53 = vunpack.c.l.bf16 %v2107_v41  ;;  %v2155_v57 = vunpack.c.l.bf16 %v2128_v48  ;;  %v2163_v59 = vld [vmem:[%s3005_s1] sm:$0x77]  ;;  %v2168_v60 = vld [vmem:[%s3005_s1 + $0x8] sm:$0x77] }
  0x19   : > { %1620 = vmatpush.msra.mxu1 %v1587_v13  ;;  %3052 = vst [vmem:[#allocation9_spill] sm:$0xff] %v2067_v27  ;;  %v2158_v58 = vunpack.c.l.bf16 %v2131_v49  ;;  %v1567_v61 = vld [vmem:[%s3007_s3 + $0x28] sm:$0xff]  ;;  %v327_v0 = vperm.slane %v2163_v59, 0  ;;  %v365_v1 = vperm.slane %v2163_v59, 1  ;;  %v366_v2 = vperm.slane %v2163_v59, 5  ;;  %v1566_v7 = vld [vmem:[%s3007_s3 + $0x20] sm:$0xff] }
  0x1a   : > { %3053 = vst [vmem:[#allocation10_spill] sm:$0xff] %v2083_v33  ;;  %1601 = vmatpush.msra.mxu0 %v1570_v14  ;;  %v1583_v62 = vld [vmem:[%s3007_s3 + $0xa8] sm:$0xff]  ;;  %v516_v3 = vperm.slane %v2163_v59, 2  ;;  %v517_v4 = vperm.slane %v2163_v59, 6  ;;  %v668_v5 = vperm.slane %v2168_v60, 0  ;;  %v706_v6 = vperm.slane %v2168_v60, 1 }
  0x1b   : > { %3054 = vst [vmem:[#allocation11_spill] sm:$0xff] %v2086_v34  ;;  %1621 = vmatpush.msra.mxu1 %v1586_v15  ;;  %v1582_v8 = vld [vmem:[%s3007_s3 + $0xa0] sm:$0xff]  ;;  %v331_v9 = vperm.slane %v327_v0, 0  ;;  %v369_v10 = vperm.slane %v365_v1, 1  ;;  %v2190_v11 = vperm.slane %v366_v2, 1  ;;  %v707_v12 = vperm.slane %v2168_v60, 5 }
  0x1c   : > { %3055 = vst [vmem:[#allocation12_spill] sm:$0xff] %v2089_v35  ;;  %1602 = vmatpush.msra.mxu0 %v1569_v20  ;;  %v2193_v13 = vperm.slane %v516_v3, 2  ;;  %v2195_v14 = vperm.slane %v517_v4, 2  ;;  %v2197_v15 = vperm.slane %v668_v5, 0  ;;  %v2199_v20 = vperm.slane %v706_v6, 1  ;;  %v1564_v5 = vld [vmem:[%s3007_s3 + $0x10] sm:$0xff] }
  0x1d   : > { %3056 = vst [vmem:[#allocation13_spill] sm:$0xff] %v2104_v40  ;;  %1622 = vmatpush.msra.mxu1 %v1585_v21  ;;  %v1565_v21 = vld [vmem:[%s3007_s3 + $0x18] sm:$0xff]  ;;  %v2217_v0 = vmul.f32 %v331_v9, %v2101_v39  ;;  %v2220_v1 = vmul.f32 %v331_v9, %v2116_v44  ;;  %v2223_v2 = vmul.f32 %v331_v9, %v2122_v46  ;;  %v2228_v4 = vperm.slane %v707_v12, 1  ;;  %v1580_v6 = vld [vmem:[%s3007_s3 + $0x90] sm:$0xff]  ;;  %v1562_v40 = vld [vmem:[%s3007_s3] sm:$0xff] }
  0x1e   : > { %3057 = vst [vmem:[#allocation14_spill] sm:$0xff] %v2107_v41  ;;  %1603 = vmatpush.msra.mxu0 %v1568_v31  ;;  %v1581_v31 = vld [vmem:[%s3007_s3 + $0x98] sm:$0xff]  ;;  %v2226_v3 = vmul.f32 %v331_v9, %v2137_v51  ;;  %v373_v63 = vmul.f32 %v369_v10, %v3015_v29  ;;  %v377_v12 = vmul.f32 %v369_v10, %v2092_v36  ;;  %v1579_v29 = vld [vmem:[%s3007_s3 + $0x88] sm:$0xff]  ;;  %v1578_v35 = vld [vmem:[%s3007_s3 + $0x80] sm:$0xff] }
  0x1f   : > { %3058 = vst [vmem:[#allocation15_spill] sm:$0xff] %v2110_v42  ;;  %1623 = vmatpush.msra.mxu1 %v1584_v32  ;;  %v2208_v32 = vmul.f32 %v331_v9, %v2070_v28  ;;  %v395_v42 = vmul.f32 %v369_v10, %v2137_v51  ;;  %v397_v34 = vmul.f32 %v369_v10, %v2140_v52 }
  0x20   : > { %3059 = vst [vmem:[#allocation16_spill] sm:$0xff] %v2125_v47  ;;  %1604 = vmatpush.msra.mxu0 %v1567_v61  ;;  %v2211_v61 = vmul.f32 %v331_v9, %v2074_v30  ;;  %v393_v47 = vmul.f32 %v369_v10, %v2134_v50  ;;  %v437_v33 = vrot.slane %v373_v63, 1  ;;  %v443_v26 = vrot.slane %v377_v12, 1 }
  0x21   : > { %3060 = vst [vmem:[#allocation17_spill] sm:$0xff] %v2128_v48  ;;  %1624 = vmatpush.msra.mxu1 %v1583_v62  ;;  %v2214_v62 = vmul.f32 %v331_v9, %v2095_v37  ;;  %v389_v48 = vmul.f32 %v369_v10, %v2119_v45  ;;  %v552_v12 = vmul.f32 %v2193_v13, %v2149_v55 }
  0x22   : > { %3061 = vst [vmem:[#allocation18_spill] sm:$0xff] %v2131_v49  ;;  %1605 = vmatpush.msra.mxu0 %v1566_v7  ;;  %v347_v7 = vmul.f32 %v331_v9, %v2143_v53  ;;  %v1563_v9 = vld [vmem:[%s3007_s3 + $0x8] sm:$0xff]  ;;  %v383_v49 = vmul.f32 %v369_v10, %v2101_v39  ;;  %v467_v63 = vrot.slane %v393_v47, 1  ;;  %v3068_v47 = vunpack.c.l.bf16 %v2037_v17 }
  0x23   : > { %3062 = vst [vmem:[#allocation19_spill] sm:$0xff] %v2146_v54  ;;  %1625 = vmatpush.msra.mxu1 %v1582_v8  ;;  %v371_v8 = vmul.f32 %v369_v10, %v2070_v28 }
  0x24   : > { %3063 = vst [vmem:[#allocation20_spill] sm:$0xff] %v2158_v58  ;;  %1606 = vmatpush.msra.mxu0 %v1565_v21  ;;  %v385_v21 = vmul.f32 %v369_v10, %v2113_v43  ;;  %v454_v23 = vrot.slane %v383_v49, 1  ;;  %v461_v58 = vrot.slane %v389_v48, 1  ;;  %v526_v48 = vmul.f32 %v2193_v13, %v2074_v30 }
  0x25   : > { %3064 = vst [vmem:[#allocation21_spill] sm:$0xff] %v2163_v59  ;;  %1626 = vmatpush.msra.mxu1 %v1581_v31  ;;  %v387_v31 = vmul.f32 %v369_v10, %v2116_v44  ;;  %v391_v59 = vmul.f32 %v369_v10, %v2122_v46  ;;  %v436_v41 = vrot.slane %v371_v8, 1 }
  0x26   : > { %3065 = vst [vmem:[#allocation22_spill] sm:$0xff] %v2190_v11  ;;  %v381_v11 = vmul.f32 %v369_v10, %v2098_v38  ;;  %1607 = vmatpush.msra.mxu0 %v1564_v5  ;;  %v399_v5 = vmul.f32 %v369_v10, %v2143_v53  ;;  %v455_v22 = vrot.slane %v385_v21, 1 }
  0x27   : > { %3066 = vst [vmem:[#allocation23_spill] sm:$0xff] %v2195_v14  ;;  %v375_v14 = vmul.f32 %v369_v10, %v2074_v30  ;;  %1627 = vmatpush.msra.mxu1 %v1580_v6  ;;  %v401_v6 = vmul.f32 %v369_v10, %v2149_v55  ;;  %v438_v24 = vsel %vm435_vm0, %v436_v41, %v437_v33  ;;  %v460_v19 = vrot.slane %v387_v31, 1 }
  0x28   : > { %3067 = vst [vmem:[#allocation24_spill] sm:$0xff] %v2228_v4  ;;  %v379_v4 = vmul.f32 %v369_v10, %v2095_v37  ;;  %1608 = vmatpush.msra.mxu0 %v1563_v9  ;;  %v449_v25 = vrot.slane %v381_v11, 1  ;;  %v466_v10 = vrot.slane %v391_v59, 1  ;;  %v478_v33 = vrot.slane %v399_v5, 1 }
  0x29   : > { %1628 = vmatpush.msra.mxu1 %v1579_v29  ;;  %v442_v27 = vrot.slane %v375_v14, 1  ;;  %v456_v29 = vsel %vm435_vm0, %v454_v23, %v455_v22  ;;  %v472_v14 = vrot.slane %v395_v42, 1  ;;  %v462_v11 = vsel %vm435_vm0, %v460_v19, %v461_v58 }
  0x2a   : > { %v448_v8 = vrot.slane %v379_v4, 1  ;;  %1609 = vmatpush.msra.mxu0 %v1562_v40  ;;  %v473_v4 = vrot.slane %v397_v34, 1  ;;  %v479_v41 = vrot.slane %v401_v6, 1  ;;  %v500_v49 = vadd.f32 %v438_v24, %v2208_v32 }
  0x2b   : > { %1629 = vmatpush.msra.mxu1 %v1578_v35  ;;  %v444_v18 = vsel %vm435_vm0, %v442_v27, %v443_v26  ;;  %v468_v35 = vsel %vm435_vm0, %v466_v10, %v467_v63  ;;  %v506_v22 = vadd.f32 %v456_v29, %v2217_v0  ;;  %v508_v23 = vadd.f32 %v462_v11, %v2220_v1 }
  0x2c   : > { %v450_v54 = vsel %vm435_vm0, %v448_v8, %v449_v25  ;;  %v474_v26 = vsel %vm435_vm0, %v472_v14, %v473_v4  ;;  %v502_v25 = vadd.f32 %v444_v18, %v2211_v61  ;;  %v480_v40 = vsel %vm435_vm0, %v478_v33, %v479_v41 }
  0x2d   : > { %v504_v27 = vadd.f32 %v450_v54, %v2214_v62  ;;  %v510_v19 = vadd.f32 %v468_v35, %v2223_v2  ;;  %v512_v34 = vadd.f32 %v474_v26, %v2226_v3  ;;  %v514_v42 = vadd.f32 %v480_v40, %v347_v7 }
  0x2e   : > { %v522_v24 = vmul.f32 %v2193_v13, %v2070_v28  ;;  %v524_v18 = vmul.f32 %v2193_v13, %v3068_v47  ;;  %v528_v54 = vmul.f32 %v2193_v13, %v2092_v36  ;;  %v530_v58 = vmul.f32 %v2193_v13, %v2095_v37 }
  0x2f   : > { %v532_v59 = vmul.f32 %v2193_v13, %v2098_v38  ;;  %v534_v32 = vmul.f32 %v2193_v13, %v2101_v39  ;;  %v536_v28 = vmul.f32 %v2193_v13, %v2113_v43  ;;  %v538_v61 = vmul.f32 %v2193_v13, %v2116_v44 }
  0x30   : > { %v540_v62 = vmul.f32 %v2193_v13, %v2119_v45  ;;  %v542_v0 = vmul.f32 %v2193_v13, %v2122_v46  ;;  %v544_v1 = vmul.f32 %v2193_v13, %v2134_v50  ;;  %v546_v2 = vmul.f32 %v2193_v13, %v2137_v51 }
  0x31   : > { %v548_v3 = vmul.f32 %v2193_v13, %v2140_v52  ;;  %v550_v7 = vmul.f32 %v2193_v13, %v2143_v53  ;;  %v587_v9 = vrot.slane %v522_v24, 2  ;;  %v588_v21 = vrot.slane %v524_v18, 2 }
  0x32   : > { %v593_v31 = vrot.slane %v526_v48, 2  ;;  %v594_v5 = vrot.slane %v528_v54, 2  ;;  %v599_v6 = vrot.slane %v530_v58, 2  ;;  %v600_v8 = vrot.slane %v532_v59, 2 }
  0x33   : > { %v589_v10 = vsel %vm586_vm1, %v587_v9, %v588_v21  ;;  %v605_v29 = vrot.slane %v534_v32, 2  ;;  %v606_v63 = vrot.slane %v536_v28, 2  ;;  %v611_v14 = vrot.slane %v538_v61, 2 }
  0x34   : > { %v595_v4 = vsel %vm586_vm1, %v593_v31, %v594_v5  ;;  %v601_v11 = vsel %vm586_vm1, %v599_v6, %v600_v8  ;;  %v612_v33 = vrot.slane %v540_v62, 2  ;;  %v617_v41 = vrot.slane %v542_v0, 2 }
  0x35   : > { %v607_v35 = vsel %vm586_vm1, %v605_v29, %v606_v63  ;;  %v618_v13 = vrot.slane %v544_v1, 2  ;;  %v623_v26 = vrot.slane %v546_v2, 2  ;;  %v624_v40 = vrot.slane %v548_v3, 2 }
  0x36   : > { %v613_v24 = vsel %vm586_vm1, %v611_v14, %v612_v33  ;;  %v629_v47 = vrot.slane %v550_v7, 2  ;;  %v630_v18 = vrot.slane %v552_v12, 2  ;;  %v651_v48 = vadd.f32 %v589_v10, %v500_v49 }
  0x37   : > { %v619_v54 = vsel %vm586_vm1, %v617_v41, %v618_v13  ;;  %v625_v58 = vsel %vm586_vm1, %v623_v26, %v624_v40  ;;  %v653_v59 = vadd.f32 %v595_v4, %v502_v25  ;;  %v655_v32 = vadd.f32 %v601_v11, %v504_v27 }
  0x38   : > { %v631_v28 = vsel %vm586_vm1, %v629_v47, %v630_v18  ;;  %v657_v61 = vadd.f32 %v607_v35, %v506_v22  ;;  %v659_v62 = vadd.f32 %v613_v24, %v508_v23  ;;  %v661_v0 = vadd.f32 %v619_v54, %v510_v19 }
  0x39   : > { %v663_v9 = vadd.f32 %v625_v58, %v512_v34  ;;  %v665_v1 = vadd.f32 %v631_v28, %v514_v42  ;;  %v674_v2 = vmul.f32 %v2197_v15, %v2074_v30  ;;  %v676_v3 = vmul.f32 %v2197_v15, %v2095_v37 }
  0x3a   : > { %v678_v49 = vmul.f32 %v2197_v15, %v2101_v39  ;;  %v680_v25 = vmul.f32 %v2197_v15, %v2116_v44  ;;  %v682_v27 = vmul.f32 %v2197_v15, %v2122_v46  ;;  %v684_v22 = vmul.f32 %v2197_v15, %v2137_v51 }
  0x3b   : > { %v686_v23 = vmul.f32 %v2197_v15, %v2143_v53  ;;  %v688_v19 = vmul.f32 %v2197_v15, %v2152_v56  ;;  %v690_v34 = vadd.f32 %v674_v2, %v651_v48  ;;  %v692_v42 = vadd.f32 %v676_v3, %v653_v59 }
  0x3c   : > { %v694_v7 = vadd.f32 %v678_v49, %v655_v32  ;;  %v696_v12 = vadd.f32 %v680_v25, %v657_v61  ;;  %v698_v21 = vadd.f32 %v682_v27, %v659_v62  ;;  %v700_v31 = vadd.f32 %v684_v22, %v661_v0 }
  0x3d   : > { %v702_v5 = vadd.f32 %v686_v23, %v663_v9  ;;  %v704_v6 = vadd.f32 %v688_v19, %v665_v1  ;;  %v712_v8 = vmul.f32 %v2199_v20, %v2074_v30  ;;  %v714_v10 = vmul.f32 %v2199_v20, %v2092_v36 }
  0x3e   : > { %v716_v29 = vmul.f32 %v2199_v20, %v2095_v37  ;;  %v718_v15 = vmul.f32 %v2199_v20, %v2098_v38  ;;  %v720_v63 = vmul.f32 %v2199_v20, %v2101_v39  ;;  %v722_v14 = vmul.f32 %v2199_v20, %v2113_v43 }
  0x3f   : > { %v724_v4 = vmul.f32 %v2199_v20, %v2116_v44  ;;  %v726_v11 = vmul.f32 %v2199_v20, %v2119_v45  ;;  %v728_v33 = vmul.f32 %v2199_v20, %v2122_v46  ;;  %v730_v41 = vmul.f32 %v2199_v20, %v2134_v50 }
  0x40   : > { %v732_v35 = vmul.f32 %v2199_v20, %v2137_v51  ;;  %v734_v13 = vmul.f32 %v2199_v20, %v2140_v52  ;;  %v736_v26 = vmul.f32 %v2199_v20, %v2143_v53  ;;  %v738_v40 = vmul.f32 %v2199_v20, %v2149_v55 }
  0x41   : > { %v740_v24 = vmul.f32 %v2199_v20, %v2152_v56  ;;  %v742_v47 = vmul.f32 %v2199_v20, %v2155_v57  ;;  %v776_v18 = vrot.slane %v712_v8, 1  ;;  %v777_v48 = vrot.slane %v714_v10, 1  ;;  %v2379_v10 = vld [vmem:[%s3005_s1 + $0x10] sm:$0x77] }
  0x42   : > { %v782_v54 = vrot.slane %v716_v29, 1  ;;  %v783_v58 = vrot.slane %v718_v15, 1  ;;  %v788_v59 = vrot.slane %v720_v63, 1  ;;  %v789_v32 = vrot.slane %v722_v14, 1 }
  0x43   : > { %v778_v28 = vsel %vm435_vm0, %v776_v18, %v777_v48  ;;  %v794_v61 = vrot.slane %v724_v4, 1  ;;  %v795_v62 = vrot.slane %v726_v11, 1  ;;  %v800_v0 = vrot.slane %v728_v33, 1 }
  0x44   : > { %v784_v9 = vsel %vm435_vm0, %v782_v54, %v783_v58  ;;  %v790_v1 = vsel %vm435_vm0, %v788_v59, %v789_v32  ;;  %v801_v2 = vrot.slane %v730_v41, 1  ;;  %v806_v3 = vrot.slane %v732_v35, 1 }
  0x45   : > { %v796_v49 = vsel %vm435_vm0, %v794_v61, %v795_v62  ;;  %v807_v20 = vrot.slane %v734_v13, 1  ;;  %v812_v25 = vrot.slane %v736_v26, 1  ;;  %v813_v27 = vrot.slane %v738_v40, 1 }
  0x46   : > { %v802_v22 = vsel %vm435_vm0, %v800_v0, %v801_v2  ;;  %v818_v23 = vrot.slane %v740_v24, 1  ;;  %v819_v19 = vrot.slane %v742_v47, 1  ;;  %v840_v8 = vadd.f32 %v778_v28, %v690_v34 }
  0x47   : > { %v808_v29 = vsel %vm435_vm0, %v806_v3, %v807_v20  ;;  %v814_v15 = vsel %vm435_vm0, %v812_v25, %v813_v27  ;;  %v842_v63 = vadd.f32 %v784_v9, %v692_v42  ;;  %v844_v14 = vadd.f32 %v790_v1, %v694_v7 }
  0x48   : > { %v820_v4 = vsel %vm435_vm0, %v818_v23, %v819_v19  ;;  %v846_v11 = vadd.f32 %v796_v49, %v696_v12  ;;  %v848_v33 = vadd.f32 %v802_v22, %v698_v21  ;;  %v850_v41 = vadd.f32 %v808_v29, %v700_v31 }
  0x49   : > { %v852_v35 = vadd.f32 %v814_v15, %v702_v5  ;;  %v854_v13 = vadd.f32 %v820_v4, %v704_v6  ;;  %v857_v34 = vperm.slane %v2168_v60, 6  ;;  %v3069_v26 = vperm.slane %v2168_v60, 2 }
  0x4a   : > { %v1007_v24 = vperm.slane %v2379_v10, 0  ;;  %v1045_v47 = vperm.slane %v2379_v10, 1  ;;  %v1046_v18 = vperm.slane %v2379_v10, 5  ;;  %v1195_v42 = vperm.slane %v2379_v10, 2 }
  0x4b   : > { %v860_v40 = vperm.slane %v3069_v26, 2  ;;  %v2391_v7 = vperm.slane %v857_v34, 2 }
  0x4d   : > { %v862_v12 = vmul.f32 %v860_v40, %v2074_v30  ;;  %v864_v21 = vmul.f32 %v860_v40, %v2092_v36  ;;  %v866_v31 = vmul.f32 %v860_v40, %v2095_v37  ;;  %v868_v5 = vmul.f32 %v860_v40, %v2098_v38 }
  0x4e   : > { %v870_v60 = vmul.f32 %v860_v40, %v2101_v39  ;;  %v872_v6 = vmul.f32 %v860_v40, %v2113_v43  ;;  %v874_v48 = vmul.f32 %v860_v40, %v2116_v44  ;;  %v876_v54 = vmul.f32 %v860_v40, %v2119_v45 }
  0x4f   : > { %v878_v58 = vmul.f32 %v860_v40, %v2122_v46  ;;  %v880_v59 = vmul.f32 %v860_v40, %v2134_v50  ;;  %v882_v30 = vmul.f32 %v860_v40, %v2137_v51  ;;  %v884_v36 = vmul.f32 %v860_v40, %v2140_v52 }
  0x50   : > { %v886_v32 = vmul.f32 %v860_v40, %v2143_v53  ;;  %v888_v28 = vmul.f32 %v860_v40, %v2149_v55  ;;  %v890_v61 = vmul.f32 %v860_v40, %v2152_v56  ;;  %v892_v62 = vmul.f32 %v860_v40, %v2155_v57 }
  0x51   : > { %v926_v0 = vrot.slane %v862_v12, 2  ;;  %v927_v9 = vrot.slane %v864_v21, 2  ;;  %v932_v1 = vrot.slane %v866_v31, 2  ;;  %v933_v2 = vrot.slane %v868_v5, 2 }
  0x52   : > { %v938_v3 = vrot.slane %v870_v60, 2  ;;  %v939_v49 = vrot.slane %v872_v6, 2  ;;  %v944_v20 = vrot.slane %v874_v48, 2  ;;  %v945_v27 = vrot.slane %v876_v54, 2 }
  0x53   : > { %v928_v25 = vsel %vm586_vm1, %v926_v0, %v927_v9  ;;  %v950_v22 = vrot.slane %v878_v58, 2  ;;  %v951_v23 = vrot.slane %v880_v59, 2  ;;  %v934_v19 = vsel %vm586_vm1, %v932_v1, %v933_v2  ;;  %v1345_v59 = vld [vmem:[%s3006_s2] sm:$0x3] }
  0x54   : > { %v940_v29 = vsel %vm586_vm1, %v938_v3, %v939_v49  ;;  %v956_v15 = vrot.slane %v882_v30, 2  ;;  %v957_v4 = vrot.slane %v884_v36, 2  ;;  %v946_v34 = vsel %vm586_vm1, %v944_v20, %v945_v27 }
  0x55   : > { %v952_v26 = vsel %vm586_vm1, %v950_v22, %v951_v23  ;;  %v962_v40 = vrot.slane %v886_v32, 2  ;;  %v963_v12 = vrot.slane %v888_v28, 2  ;;  %v968_v31 = vrot.slane %v890_v61, 2 }
  0x56   : > { %v958_v21 = vsel %vm586_vm1, %v956_v15, %v957_v4  ;;  %v969_v5 = vrot.slane %v892_v62, 2  ;;  %v990_v60 = vadd.f32 %v928_v25, %v840_v8  ;;  %v992_v48 = vadd.f32 %v934_v19, %v842_v63 }
  0x57   : > { %v964_v6 = vsel %vm586_vm1, %v962_v40, %v963_v12  ;;  %v994_v54 = vadd.f32 %v940_v29, %v844_v14  ;;  %v996_v58 = vadd.f32 %v946_v34, %v846_v11  ;;  %v998_v36 = vadd.f32 %v952_v26, %v848_v33 }
  0x58   : > { %v970_v30 = vsel %vm586_vm1, %v968_v31, %v969_v5  ;;  %v1000_v0 = vadd.f32 %v958_v21, %v850_v41  ;;  %v1002_v32 = vadd.f32 %v964_v6, %v852_v35  ;;  %v1011_v9 = vperm.slane %v1007_v24, 0 }
  0x59   : > { %v1004_v28 = vadd.f32 %v970_v30, %v854_v13  ;;  %v1049_v1 = vperm.slane %v1045_v47, 1  ;;  %v2420_v61 = vperm.slane %v1046_v18, 1  ;;  %v2423_v62 = vperm.slane %v1195_v42, 2  ;;  %v3070_v18 = vld [vmem:[#allocation20_spill] sm:$0xff] }
  0x5a   : > { %v2425_v63 = vperm.slane %v1345_v59, 0  ;;  %v2428_v14 = vunpack.c.h.bf16 %v2034_v16  ;;  %v1013_v11 = vmul.f32 %v1011_v9, %v2095_v37  ;;  %v1015_v33 = vmul.f32 %v1011_v9, %v2101_v39 }
  0x5b   : > { %v1017_v41 = vmul.f32 %v1011_v9, %v2116_v44  ;;  %v1019_v35 = vmul.f32 %v1011_v9, %v2122_v46  ;;  %v1021_v13 = vmul.f32 %v1011_v9, %v2137_v51  ;;  %v1023_v24 = vmul.f32 %v1011_v9, %v2143_v53 }
  0x5c   : > { %v1025_v47 = vmul.f32 %v1011_v9, %v2152_v56  ;;  %v1027_v42 = vmul.f32 %v1011_v9, %v3070_v18  ;;  %v1029_v2 = vadd.f32 %v1013_v11, %v990_v60  ;;  %v1031_v3 = vadd.f32 %v1015_v33, %v992_v48 }
  0x5d   : > { %v1033_v16 = vadd.f32 %v1017_v41, %v994_v54  ;;  %v1035_v49 = vadd.f32 %v1019_v35, %v996_v58  ;;  %v1037_v20 = vadd.f32 %v1021_v13, %v998_v36  ;;  %v1039_v25 = vadd.f32 %v1023_v24, %v1000_v0  ;;  %v3071_v54 = vld [vmem:[#allocation19_spill] sm:$0xff] }
  0x5e   : > { %v1041_v27 = vadd.f32 %v1025_v47, %v1002_v32  ;;  %v1043_v22 = vadd.f32 %v1027_v42, %v1004_v28  ;;  %v1051_v23 = vmul.f32 %v1049_v1, %v2095_v37  ;;  %v1053_v19 = vmul.f32 %v1049_v1, %v2098_v38 }
  0x5f   : > { %v1055_v29 = vmul.f32 %v1049_v1, %v2101_v39  ;;  %v1057_v15 = vmul.f32 %v1049_v1, %v2113_v43  ;;  %v1059_v4 = vmul.f32 %v1049_v1, %v2116_v44  ;;  %v1061_v34 = vmul.f32 %v1049_v1, %v2119_v45 }
  0x60   : > { %v1063_v26 = vmul.f32 %v1049_v1, %v2122_v46  ;;  %v1065_v40 = vmul.f32 %v1049_v1, %v2134_v50  ;;  %v1067_v12 = vmul.f32 %v1049_v1, %v2137_v51  ;;  %v1069_v21 = vmul.f32 %v1049_v1, %v2140_v52 }
  0x61   : > { %v1071_v31 = vmul.f32 %v1049_v1, %v2143_v53  ;;  %v1073_v5 = vmul.f32 %v1049_v1, %v2149_v55  ;;  %v1075_v60 = vmul.f32 %v1049_v1, %v2152_v56  ;;  %v1077_v6 = vmul.f32 %v1049_v1, %v2155_v57 }
  0x62   : > { %v1079_v48 = vmul.f32 %v1049_v1, %v3070_v18  ;;  %v3072_v58 = vunpack.c.l.bf16 %v3071_v54  ;;  %v1115_v30 = vrot.slane %v1051_v23, 1  ;;  %v1116_v36 = vrot.slane %v1053_v19, 1 }
  0x63   : > { %v1121_v0 = vrot.slane %v1055_v29, 1  ;;  %v1122_v32 = vrot.slane %v1057_v15, 1  ;;  %v1127_v28 = vrot.slane %v1059_v4, 1  ;;  %v1128_v9 = vrot.slane %v1061_v34, 1 }
  0x64   : > { %v1081_v59 = vmul.f32 %v1049_v1, %v3072_v58  ;;  %v1133_v11 = vrot.slane %v1063_v26, 1  ;;  %v1134_v33 = vrot.slane %v1065_v40, 1  ;;  %v1117_v41 = vsel %vm435_vm0, %v1115_v30, %v1116_v36 }
  0x65   : > { %v1123_v35 = vsel %vm435_vm0, %v1121_v0, %v1122_v32  ;;  %v1139_v13 = vrot.slane %v1067_v12, 1  ;;  %v1140_v24 = vrot.slane %v1069_v21, 1  ;;  %v1129_v47 = vsel %vm435_vm0, %v1127_v28, %v1128_v9 }
  0x66   : > { %v1135_v42 = vsel %vm435_vm0, %v1133_v11, %v1134_v33  ;;  %v1145_v8 = vrot.slane %v1071_v31, 1  ;;  %v1146_v1 = vrot.slane %v1073_v5, 1  ;;  %v1151_v19 = vrot.slane %v1075_v60, 1 }
  0x67   : > { %v1141_v23 = vsel %vm435_vm0, %v1139_v13, %v1140_v24  ;;  %v1152_v29 = vrot.slane %v1077_v6, 1  ;;  %v1157_v15 = vrot.slane %v1079_v48, 1  ;;  %v1158_v34 = vrot.slane %v1081_v59, 1 }
  0x68   : > { %v1147_v4 = vsel %vm435_vm0, %v1145_v8, %v1146_v1  ;;  %v1179_v26 = vadd.f32 %v1117_v41, %v1029_v2  ;;  %v1181_v40 = vadd.f32 %v1123_v35, %v1031_v3  ;;  %v1183_v12 = vadd.f32 %v1129_v47, %v1033_v16 }
  0x69   : > { %v1153_v58 = vsel %vm435_vm0, %v1151_v19, %v1152_v29  ;;  %v1185_v21 = vadd.f32 %v1135_v42, %v1035_v49  ;;  %v1187_v30 = vadd.f32 %v1141_v23, %v1037_v20  ;;  %v1159_v36 = vsel %vm435_vm0, %v1157_v15, %v1158_v34 }
  0x6a   : > { %v1189_v0 = vadd.f32 %v1147_v4, %v1039_v25  ;;  %v1191_v31 = vadd.f32 %v1153_v58, %v1041_v27  ;;  %v3073_v5 = vperm.slane %v2379_v10, 6  ;;  %v1193_v60 = vadd.f32 %v1159_v36, %v1043_v22 }
  0x6b   : > { %v1201_v8 = vmul.f32 %v2423_v62, %v2095_v37  ;;  %v1203_v2 = vmul.f32 %v2423_v62, %v2098_v38  ;;  %v1205_v3 = vmul.f32 %v2423_v62, %v2101_v39  ;;  %v1207_v16 = vmul.f32 %v2423_v62, %v2113_v43 }
  0x6c   : > { %v2465_v32 = vperm.slane %v3073_v5, 2  ;;  %v1209_v49 = vmul.f32 %v2423_v62, %v2116_v44  ;;  %v1211_v10 = vmul.f32 %v2423_v62, %v2119_v45  ;;  %v1213_v20 = vmul.f32 %v2423_v62, %v2122_v46 }
  0x6d   : > { %v1215_v37 = vmul.f32 %v2423_v62, %v2134_v50  ;;  %v1217_v38 = vmul.f32 %v2423_v62, %v2137_v51  ;;  %v1219_v39 = vmul.f32 %v2423_v62, %v2140_v52  ;;  %v1221_v43 = vmul.f32 %v2423_v62, %v2143_v53 }
  0x6e   : > { %3074 = vst [vmem:[#allocation20_spill] sm:$0xff] %v2465_v32  ;;  %v1223_v44 = vmul.f32 %v2423_v62, %v2149_v55  ;;  %v1225_v45 = vmul.f32 %v2423_v62, %v2152_v56  ;;  %v1227_v46 = vmul.f32 %v2423_v62, %v2155_v57  ;;  %v1229_v50 = vmul.f32 %v2423_v62, %v3070_v18 }
  0x6f   : > { %v3075_v51 = vunpack.c.l.bf16 %v3071_v54  ;;  %v1265_v52 = vrot.slane %v1201_v8, 2  ;;  %v1266_v27 = vrot.slane %v1203_v2, 2  ;;  %v1271_v22 = vrot.slane %v1205_v3, 2 }
  0x70   : > { %v1272_v53 = vrot.slane %v1207_v16, 2  ;;  %v1277_v6 = vrot.slane %v1209_v49, 2  ;;  %v1278_v48 = vrot.slane %v1211_v10, 2  ;;  %v1283_v55 = vrot.slane %v1213_v20, 2 }
  0x71   : > { %v1231_v25 = vmul.f32 %v2423_v62, %v3075_v51  ;;  %v1267_v59 = vsel %vm586_vm1, %v1265_v52, %v1266_v27  ;;  %v1284_v56 = vrot.slane %v1215_v37, 2  ;;  %v1289_v28 = vrot.slane %v1217_v38, 2 }
  0x72   : > { %v1290_v9 = vrot.slane %v1219_v39, 2  ;;  %v1273_v57 = vsel %vm586_vm1, %v1271_v22, %v1272_v53  ;;  %v1279_v18 = vsel %vm586_vm1, %v1277_v6, %v1278_v48  ;;  %v1295_v11 = vrot.slane %v1221_v43, 2 }
  0x73   : > { %v1296_v33 = vrot.slane %v1223_v44, 2  ;;  %v1285_v62 = vsel %vm586_vm1, %v1283_v55, %v1284_v56  ;;  %v1301_v35 = vrot.slane %v1225_v45, 2  ;;  %v1302_v13 = vrot.slane %v1227_v46, 2 }
  0x74   : > { %v1291_v41 = vsel %vm586_vm1, %v1289_v28, %v1290_v9  ;;  %v1307_v47 = vrot.slane %v1229_v50, 2  ;;  %v1308_v42 = vrot.slane %v1231_v25, 2  ;;  %v1329_v1 = vadd.f32 %v1267_v59, %v1179_v26 }
  0x75   : > { %v1297_v24 = vsel %vm586_vm1, %v1295_v11, %v1296_v33  ;;  %v1303_v23 = vsel %vm586_vm1, %v1301_v35, %v1302_v13  ;;  %v1331_v19 = vadd.f32 %v1273_v57, %v1181_v40  ;;  %v1333_v29 = vadd.f32 %v1279_v18, %v1183_v12 }
  0x76   : > { %v1335_v15 = vadd.f32 %v1285_v62, %v1185_v21  ;;  %v1309_v4 = vsel %vm586_vm1, %v1307_v47, %v1308_v42  ;;  %v1337_v34 = vadd.f32 %v1291_v41, %v1187_v30  ;;  %v1339_v58 = vadd.f32 %v1297_v24, %v1189_v0 }
  0x77   : > { %v1341_v36 = vadd.f32 %v1303_v23, %v1191_v31  ;;  %v1343_v5 = vadd.f32 %v1309_v4, %v1193_v60  ;;  %v1351_v8 = vadd.f32 %v2425_v63, %v1329_v1  ;;  %v1353_v2 = vadd.f32 %v2425_v63, %v1331_v19 }
  0x78   : > { %v1355_v3 = vadd.f32 %v2425_v63, %v1333_v29  ;;  %v1357_v16 = vadd.f32 %v2425_v63, %v1335_v15  ;;  %v1359_v26 = vadd.f32 %v2425_v63, %v1337_v34  ;;  %v1361_v40 = vadd.f32 %v2425_v63, %v1339_v58 }
  0x79   : > { %v1363_v12 = vadd.f32 %v2425_v63, %v1341_v36  ;;  %v1365_v21 = vadd.f32 %v2425_v63, %v1343_v5  ;;  %v2516_v30 = vmul.f32 0.5, %v1351_v8  ;;  %v2518_v0 = vmul.f32 0.5, %v1353_v2 }
  0x7a   : > { %v2520_v31 = vmul.f32 0.5, %v1355_v3  ;;  %v2522_v60 = vmul.f32 0.5, %v1357_v16  ;;  %v2524_v49 = vmul.f32 0.5, %v1359_v26  ;;  %v2526_v10 = vmul.f32 0.5, %v1361_v40 }
  0x7b   : > { %v2528_v20 = vmul.f32 0.5, %v1363_v12  ;;  %v2530_v37 = vmul.f32 0.5, %v1365_v21  ;;  %v1383_v38 = vmul.f32 0.044715, %v1351_v8  ;;  %v1385_v39 = vmul.f32 0.044715, %v1353_v2 }
  0x7c   : > { %v1387_v43 = vmul.f32 0.044715, %v1355_v3  ;;  %v1389_v63 = vmul.f32 0.044715, %v1357_v16  ;;  %v1391_v44 = vmul.f32 0.044715, %v1359_v26  ;;  %v3036_v34 = vunpack.c.h.bf16 %v2037_v17 }
  0x7d   : > { %v1933_v45 = vmov 64.0   ;;  %v1393_v46 = vmul.f32 0.044715, %v1361_v40  ;;  %v1395_v50 = vmul.f32 0.044715, %v1363_v12  ;;  %v1399_v25 = vmul.f32 %v1383_v38, %v1351_v8 }
  0x7e   : > { %1876 = vrcp.f32 %v1933_v45  ;;  %v1397_v51 = vmul.f32 0.044715, %v1365_v21  ;;  %v1401_v52 = vmul.f32 %v1385_v39, %v1353_v2  ;;  %v1403_v27 = vmul.f32 %v1387_v43, %v1355_v3  ;;  %v3081_v45 = vld [vmem:[#allocation7_spill] sm:$0xff] }
  0x7f   : > { %v1405_v22 = vmul.f32 %v1389_v63, %v1357_v16  ;;  %v1407_v53 = vmul.f32 %v1391_v44, %v1359_v26  ;;  %v1409_v6 = vmul.f32 %v1393_v46, %v1361_v40  ;;  %v1411_v48 = vmul.f32 %v1395_v50, %v1363_v12  ;;  %v3080_v63 = vld [vmem:[#allocation6_spill] sm:$0xff]  ;;  %v3082_v50 = vld [vmem:[#allocation8_spill] sm:$0xff] }
  0x80   : > { %v1413_v55 = vmul.f32 %v1397_v51, %v1365_v21  ;;  %v1415_v59 = vmul.f32 %v1399_v25, %v1351_v8  ;;  %v1417_v56 = vmul.f32 %v1401_v52, %v1353_v2  ;;  %v1419_v28 = vmul.f32 %v1403_v27, %v1355_v3  ;;  %v3083_v25 = vld [vmem:[#allocation9_spill] sm:$0xff] }
  0x81   : > { %v1421_v9 = vmul.f32 %v1405_v22, %v1357_v16  ;;  %v1423_v57 = vmul.f32 %v1407_v53, %v1359_v26  ;;  %v1425_v18 = vmul.f32 %v1409_v6, %v1361_v40  ;;  %v1427_v11 = vmul.f32 %v1411_v48, %v1363_v12  ;;  %v3084_v22 = vld [vmem:[#allocation10_spill] sm:$0xff]  ;;  %v3085_v6 = vld [vmem:[#allocation11_spill] sm:$0xff] }
  0x82   : > { %v1429_v33 = vmul.f32 %v1413_v55, %v1365_v21  ;;  %v1431_v62 = vadd.f32 %v1415_v59, %v1351_v8  ;;  %v1433_v35 = vadd.f32 %v1417_v56, %v1353_v2  ;;  %v1435_v13 = vadd.f32 %v1419_v28, %v1355_v3  ;;  %v3076_v2 = vld [vmem:[#allocation2_spill] sm:$0xff]  ;;  %v3086_v59 = vld [vmem:[#allocation12_spill] sm:$0xff]  ;;  %v3087_v28 = vld [vmem:[#allocation13_spill] sm:$0xff] }
  0x83   : > { %v1437_v24 = vadd.f32 %v1421_v9, %v1357_v16  ;;  %v1439_v47 = vadd.f32 %v1423_v57, %v1359_v26  ;;  %v1441_v42 = vadd.f32 %v1425_v18, %v1361_v40  ;;  %v1443_v1 = vadd.f32 %v1427_v11, %v1363_v12  ;;  %v3077_v16 = vld [vmem:[#allocation3_spill] sm:$0xff]  ;;  %v3078_v40 = vld [vmem:[#allocation4_spill] sm:$0xff]  ;;  %v3088_v57 = vld [vmem:[#allocation14_spill] sm:$0xff] }
  0x84   : > { %v1877_v41 = vpop.eup %1876  ;;  %v1445_v23 = vadd.f32 %v1429_v33, %v1365_v21  ;;  %v1447_v19 = vmul.f32 0.7978846, %v1431_v62  ;;  %v1449_v29 = vmul.f32 0.7978846, %v1433_v35  ;;  %v1451_v15 = vmul.f32 0.7978846, %v1435_v13 }
  0x85   : > { %v1453_v4 = vmul.f32 0.7978846, %v1437_v24  ;;  %v1455_v58 = vmul.f32 0.7978846, %v1439_v47  ;;  %v1457_v36 = vmul.f32 0.7978846, %v1441_v42  ;;  %v2534_v3 = vunpack.c.h.bf16 %v3076_v2 }
  0x86   : > { %v1459_v5 = vmul.f32 0.7978846, %v1443_v1  ;;  %1878 = vtanh.f32 %v1447_v19  ;;  %v1461_v38 = vmul.f32 0.7978846, %v1445_v23  ;;  %v1554_v8 = vmul.f32 64.0, %v1877_v41  ;;  %v3079_v21 = vld [vmem:[#allocation5_spill] sm:$0xff] }
  0x87   : > { %1880 = vtanh.f32 %v1449_v29  ;;  %v2537_v26 = vunpack.c.h.bf16 %v3077_v16  ;;  %v2540_v12 = vunpack.c.h.bf16 %v3078_v40  ;;  %v2543_v39 = vunpack.c.h.bf16 %v3079_v21  ;;  %v3089_v35 = vld [vmem:[#allocation15_spill] sm:$0xff]  ;;  %v3090_v42 = vld [vmem:[#allocation16_spill] sm:$0xff]  ;;  %v3091_v23 = vld [vmem:[#allocation17_spill] sm:$0xff] }
  0x88   : > { %1882 = vtanh.f32 %v1451_v15  ;;  %v1555_v43 = vsub.f32 1.0, %v1554_v8  ;;  %v2546_v44 = vunpack.c.h.bf16 %v3080_v63  ;;  %v2549_v46 = vunpack.c.h.bf16 %v3081_v45  ;;  %v3092_v29 = vld [vmem:[#allocation18_spill] sm:$0xff]  ;;  %v3095_v40 = vld [vmem:[#allocation21_spill] sm:$0xff] }
  0x89   : > { %1884 = vtanh.f32 %v1453_v4  ;;  %vm1558_vm2 = vweird.f32 %v1877_v41  ;;  %v2552_v51 = vunpack.c.h.bf16 %v3082_v50  ;;  %v2555_v52 = vunpack.c.h.bf16 %v3083_v25 }
  0x8a   : > { %1886 = vtanh.f32 %v1455_v58  ;;  %v1556_v27 = vmul.f32 %v1877_v41, %v1555_v43  ;;  %v2558_v53 = vunpack.c.h.bf16 %v3084_v22  ;;  %v2561_v48 = vunpack.c.h.bf16 %v3085_v6  ;;  %v3096_v43 = vld [vmem:[#allocation22_spill] sm:$0xff] }
  0x8b   : > { %1888 = vtanh.f32 %v1457_v36  ;;  %v2564_v56 = vunpack.c.h.bf16 %v3086_v59  ;;  %v2567_v9 = vunpack.c.h.bf16 %v3087_v28  ;;  %v2570_v18 = vunpack.c.h.bf16 %v3088_v57 }
  0x8c   : > { %v1879_v55 = vpop.eup %1878  ;;  %1890 = vtanh.f32 %v1459_v5  ;;  %v1557_v62 = vadd.f32 %v1877_v41, %v1556_v27  ;;  %v2573_v13 = vunpack.c.h.bf16 %v3089_v35  ;;  %v2576_v1 = vunpack.c.h.bf16 %v3090_v42 }
  0x8d   : > { %v1881_v11 = vpop.eup %1880  ;;  %1892 = vtanh.f32 %v1461_v38  ;;  %v1479_v33 = vadd.f32 1.0, %v1879_v55  ;;  %v2579_v19 = vunpack.c.h.bf16 %v3091_v23  ;;  %v2582_v15 = vunpack.c.h.bf16 %v3092_v29 }
  0x8e   : > { %v1883_v24 = vpop.eup %1882  ;;  %v1481_v47 = vadd.f32 1.0, %v1881_v11  ;;  %v2588_v5 = vsel %vm1558_vm2, %v1877_v41, %v1557_v62  ;;  %v328_v21 = vperm.slane %v3095_v40, 4  ;;  %v372_v63 = vmul.f32 %v3096_v43, %v2428_v14 }
  0x8f   : > { %v1885_v4 = vpop.eup %1884  ;;  %v1483_v58 = vadd.f32 1.0, %v1883_v24  ;;  %v2585_v36 = vmul.f32 %v1479_v33, %v2516_v30  ;;  %v374_v41 = vmul.f32 %v3096_v43, %v3036_v34  ;;  %v376_v25 = vmul.f32 %v3096_v43, %v2534_v3 }
  0x90   : > { %v1887_v8 = vpop.eup %1886  ;;  %v1485_v2 = vadd.f32 1.0, %v1885_v4  ;;  %v2592_v16 = vmul.f32 %v1481_v47, %v2518_v0  ;;  %v332_v55 = vperm.slane %v328_v21, 0  ;;  %v378_v57 = vmul.f32 %v3096_v43, %v2537_v26 }
  0x91   : > { %3093 = vst [vmem:[#allocation2_spill] sm:$0xff] %v2585_v36  ;;  %v1889_v45 = vpop.eup %1888  ;;  %v1487_v50 = vadd.f32 1.0, %v1887_v8  ;;  %v2598_v30 = vmul.f32 %v1483_v58, %v2520_v31  ;;  %v380_v11 = vmul.f32 %v3096_v43, %v2540_v12  ;;  %v382_v8 = vmul.f32 %v3096_v43, %v2543_v39 }
  0x92   : > { %3094 = vst [vmem:[#allocation3_spill] sm:$0xff] %v2592_v16  ;;  %v1891_v27 = vpop.eup %1890  ;;  %v1489_v0 = vadd.f32 1.0, %v1889_v45  ;;  %v2606_v22 = vmul.f32 %v1485_v2, %v2522_v60  ;;  %v1527_v6 = vadd.f32 %v2592_v16, %v2585_v36  ;;  %v334_v35 = vmul.f32 %v332_v55, %v2428_v14 }
  0x93   : > { %3097 = vst [vmem:[#allocation4_spill] sm:$0xff] %v2598_v30  ;;  %v1893_v59 = vpop.eup %1892  ;;  %v1491_v28 = vadd.f32 1.0, %v1891_v27  ;;  %v2611_v31 = vmul.f32 %v1487_v50, %v2524_v49  ;;  %v336_v49 = vmul.f32 %v332_v55, %v2534_v3  ;;  %v338_v47 = vmul.f32 %v332_v55, %v2540_v12 }
  0x94   : > { %3098 = vst [vmem:[#allocation5_spill] sm:$0xff] %v2606_v22  ;;  %v1493_v33 = vadd.f32 1.0, %v1893_v59  ;;  %v2618_v62 = vmul.f32 %v1489_v0, %v2526_v10  ;;  %v1528_v60 = vadd.f32 %v1527_v6, %v2598_v30  ;;  %v340_v42 = vmul.f32 %v332_v55, %v2546_v44 }
  0x95   : > { %3099 = vst [vmem:[#allocation6_spill] sm:$0xff] %v2611_v31  ;;  %v2623_v24 = vmul.f32 %v1491_v28, %v2528_v20  ;;  %v342_v10 = vmul.f32 %v332_v55, %v2552_v51  ;;  %v344_v4 = vmul.f32 %v332_v55, %v2558_v53  ;;  %v346_v58 = vmul.f32 %v332_v55, %v2564_v56 }
  0x96   : > { %3100 = vst [vmem:[#allocation7_spill] sm:$0xff] %v2618_v62  ;;  %v2629_v23 = vmul.f32 %v1493_v33, %v2530_v37  ;;  %v1529_v29 = vadd.f32 %v1528_v60, %v2606_v22  ;;  %v348_v20 = vmul.f32 %v332_v55, %v2570_v18  ;;  %v384_v2 = vmul.f32 %v3096_v43, %v2546_v44 }
  0x97   : > { %v386_v37 = vmul.f32 %v3096_v43, %v2549_v46  ;;  %v388_v21 = vmul.f32 %v3096_v43, %v2552_v51  ;;  %v390_v45 = vmul.f32 %v3096_v43, %v2555_v52  ;;  %v392_v50 = vmul.f32 %v3096_v43, %v2558_v53 }
  0x98   : > { %v1530_v40 = vadd.f32 %v1529_v29, %v2611_v31  ;;  %v394_v27 = vmul.f32 %v3096_v43, %v2561_v48  ;;  %v396_v0 = vmul.f32 %v3096_v43, %v2564_v56  ;;  %v398_v6 = vmul.f32 %v3096_v43, %v2567_v9 }
  0x99   : > { %v400_v59 = vmul.f32 %v3096_v43, %v2570_v18  ;;  %v402_v28 = vmul.f32 %v3096_v43, %v2573_v13  ;;  %v439_v33 = vrot.slane %v372_v63, 1  ;;  %v440_v60 = vrot.slane %v374_v41, 1 }
  0x9a   : > { %v1531_v55 = vadd.f32 %v1530_v40, %v2618_v62  ;;  %v445_v29 = vrot.slane %v376_v25, 1  ;;  %v446_v38 = vrot.slane %v378_v57, 1  ;;  %v451_v34 = vrot.slane %v380_v11, 1 }
  0x9b   : > { %v452_v22 = vrot.slane %v382_v8, 1  ;;  %v457_v30 = vrot.slane %v384_v2, 1  ;;  %v458_v16 = vrot.slane %v386_v37, 1  ;;  %v441_v36 = vsel %vm435_vm0, %v439_v33, %v440_v60 }
  0x9c   : > { %v1532_v31 = vadd.f32 %v1531_v55, %v2623_v24  ;;  %v447_v40 = vsel %vm435_vm0, %v445_v29, %v446_v38  ;;  %v463_v62 = vrot.slane %v388_v21, 1  ;;  %v464_v32 = vrot.slane %v390_v45, 1 }
  0x9d   : > { %v453_v43 = vsel %vm435_vm0, %v451_v34, %v452_v22  ;;  %v459_v63 = vsel %vm435_vm0, %v457_v30, %v458_v16  ;;  %v469_v41 = vrot.slane %v392_v50, 1  ;;  %v470_v57 = vrot.slane %v394_v27, 1  ;;  %v3101_v50 = vld [vmem:[#allocation23_spill] sm:$0xff] }
  0x9e   : > { %v1533_v54 = vadd.f32 %v1532_v31, %v2629_v23  ;;  %v465_v25 = vsel %vm435_vm0, %v463_v62, %v464_v32  ;;  %v475_v11 = vrot.slane %v396_v0, 1  ;;  %v476_v8 = vrot.slane %v398_v6, 1 }
  0x9f   : > { %v481_v37 = vrot.slane %v400_v59, 1  ;;  %v482_v55 = vrot.slane %v402_v28, 1  ;;  %v501_v33 = vadd.f32 %v441_v36, %v334_v35  ;;  %v471_v38 = vsel %vm435_vm0, %v469_v41, %v470_v57 }
  0xa0   : > { %v1534_v2 = vrot.slane %v1533_v54, 4  ;;  %v477_v21 = vsel %vm435_vm0, %v475_v11, %v476_v8  ;;  %v503_v45 = vadd.f32 %v447_v40, %v336_v49  ;;  %v505_v31 = vadd.f32 %v453_v43, %v338_v47 }
  0xa1   : > { %v483_v34 = vsel %vm435_vm0, %v481_v37, %v482_v55  ;;  %v507_v16 = vadd.f32 %v459_v63, %v340_v42  ;;  %v509_v30 = vadd.f32 %v465_v25, %v342_v10  ;;  %v511_v22 = vadd.f32 %v471_v38, %v344_v4 }
  0xa2   : > { %v1535_v60 = vadd.f32 %v1534_v2, %v1533_v54  ;;  %v513_v32 = vadd.f32 %v477_v21, %v346_v58  ;;  %v515_v62 = vadd.f32 %v483_v34, %v348_v20  ;;  %v523_v27 = vmul.f32 %v3101_v50, %v2428_v14 }
  0xa3   : > { %v3102_v36 = vunpack.c.h.bf16 %v2037_v17  ;;  %v527_v49 = vmul.f32 %v3101_v50, %v2534_v3  ;;  %v529_v54 = vmul.f32 %v3101_v50, %v2537_v26  ;;  %v531_v47 = vmul.f32 %v3101_v50, %v2540_v12 }
  0xa4   : > { %v1536_v0 = vrot.slane %v1535_v60, 2  ;;  %v533_v42 = vmul.f32 %v3101_v50, %v2543_v39  ;;  %v535_v14 = vmul.f32 %v3101_v50, %v2546_v44  ;;  %v537_v17 = vmul.f32 %v3101_v50, %v2549_v46 }
  0xa5   : > { %v525_v35 = vmul.f32 %v3101_v50, %v3102_v36  ;;  %v539_v4 = vmul.f32 %v3101_v50, %v2552_v51  ;;  %v541_v58 = vmul.f32 %v3101_v50, %v2555_v52  ;;  %v543_v20 = vmul.f32 %v3101_v50, %v2558_v53 }
  0xa6   : > { %v1537_v10 = vadd.f32 %v1536_v0, %v1535_v60  ;;  %v545_v6 = vmul.f32 %v3101_v50, %v2561_v48  ;;  %v547_v59 = vmul.f32 %v3101_v50, %v2564_v56  ;;  %v549_v28 = vmul.f32 %v3101_v50, %v2567_v9 }
  0xa7   : > { %v551_v29 = vmul.f32 %v3101_v50, %v2570_v18  ;;  %v553_v43 = vmul.f32 %v3101_v50, %v2573_v13  ;;  %v590_v63 = vrot.slane %v523_v27, 2  ;;  %v591_v41 = vrot.slane %v525_v35, 2 }
  0xa8   : > { %v1538_v40 = vrot.slane %v1537_v10, 1  ;;  %v596_v25 = vrot.slane %v527_v49, 2  ;;  %v597_v57 = vrot.slane %v529_v54, 2  ;;  %v602_v11 = vrot.slane %v531_v47, 2 }
  0xa9   : > { %v603_v8 = vrot.slane %v533_v42, 2  ;;  %v592_v37 = vsel %vm586_vm1, %v590_v63, %v591_v41  ;;  %v608_v55 = vrot.slane %v535_v14, 2  ;;  %v609_v38 = vrot.slane %v537_v17, 2 }
  0xaa   : > { %v1539_v2 = vadd.f32 %v1538_v40, %v1537_v10  ;;  %v598_v21 = vsel %vm586_vm1, %v596_v25, %v597_v57  ;;  %v614_v34 = vrot.slane %v539_v4, 2  ;;  %v615_v0 = vrot.slane %v541_v58, 2  ;;  %v3103_v57 = vld [vmem:[#allocation24_spill] sm:$0xff] }
  0xab   : > { %v604_v60 = vsel %vm586_vm1, %v602_v11, %v603_v8  ;;  %v610_v50 = vsel %vm586_vm1, %v608_v55, %v609_v38  ;;  %v620_v27 = vrot.slane %v543_v20, 2  ;;  %v621_v35 = vrot.slane %v545_v6, 2 }
  0xac   : > { %v1560_v36 = vmul.f32 %v2588_v5, %v1539_v2  ;;  %v616_v49 = vsel %vm586_vm1, %v614_v34, %v615_v0  ;;  %v626_v54 = vrot.slane %v547_v59, 2  ;;  %v627_v47 = vrot.slane %v549_v28, 2  ;;  %v1922_v59 = vld [vmem:[%s3005_s1 + $0x8] sm:$0x77] }
  0xad   : > { %v632_v42 = vrot.slane %v551_v29, 2  ;;  %v622_v14 = vsel %vm586_vm1, %v620_v27, %v621_v35  ;;  %v633_v17 = vrot.slane %v553_v43, 2  ;;  %v652_v10 = vadd.f32 %v592_v37, %v501_v33 }
  0xae   : > { %1610 = vmatmul.f32.vlgmr.msra.gmra.mxu0 %v1560_v36  ;;  %v654_v40 = vadd.f32 %v598_v21, %v503_v45  ;;  %v628_v4 = vsel %vm586_vm1, %v626_v54, %v627_v47  ;;  %v656_v58 = vadd.f32 %v604_v60, %v505_v31  ;;  %v658_v63 = vadd.f32 %v610_v50, %v507_v16 }
  0xaf   : > { %v660_v41 = vadd.f32 %v616_v49, %v509_v30  ;;  %v634_v25 = vsel %vm586_vm1, %v632_v42, %v633_v17  ;;  %v662_v20 = vadd.f32 %v622_v14, %v511_v22  ;;  %v664_v6 = vadd.f32 %v628_v4, %v513_v32 }
  0xb0   : > { %v669_v28 = vperm.slane %v1922_v59, 4  ;;  %v666_v29 = vadd.f32 %v634_v25, %v515_v62  ;;  %v713_v43 = vmul.f32 %v3103_v57, %v2534_v3  ;;  %v715_v33 = vmul.f32 %v3103_v57, %v2537_v26 }
  0xb1   : > { %v717_v45 = vmul.f32 %v3103_v57, %v2540_v12  ;;  %v719_v16 = vmul.f32 %v3103_v57, %v2543_v39  ;;  %v721_v30 = vmul.f32 %v3103_v57, %v2546_v44  ;;  %v723_v22 = vmul.f32 %v3103_v57, %v2549_v46 }
  0xb2   : > { %v673_v31 = vperm.slane %v669_v28, 0  ;;  %v725_v32 = vmul.f32 %v3103_v57, %v2552_v51  ;;  %v727_v62 = vmul.f32 %v3103_v57, %v2555_v52  ;;  %v729_v11 = vmul.f32 %v3103_v57, %v2558_v53 }
  0xb3   : > { %v731_v8 = vmul.f32 %v3103_v57, %v2561_v48  ;;  %v733_v14 = vmul.f32 %v3103_v57, %v2564_v56  ;;  %v735_v17 = vmul.f32 %v3103_v57, %v2567_v9  ;;  %v737_v4 = vmul.f32 %v3103_v57, %v2570_v18 }
  0xb4   : > { %v675_v2 = vmul.f32 %v673_v31, %v2534_v3  ;;  %v677_v37 = vmul.f32 %v673_v31, %v2540_v12  ;;  %v679_v55 = vmul.f32 %v673_v31, %v2546_v44  ;;  %v681_v38 = vmul.f32 %v673_v31, %v2552_v51 }
  0xb5   : > { %v683_v21 = vmul.f32 %v673_v31, %v2558_v53  ;;  %v685_v60 = vmul.f32 %v673_v31, %v2564_v56  ;;  %v687_v34 = vmul.f32 %v673_v31, %v2570_v18  ;;  %v689_v0 = vmul.f32 %v673_v31, %v2576_v1 }
  0xb6   : > { %v691_v36 = vadd.f32 %v675_v2, %v652_v10  ;;  %v693_v50 = vadd.f32 %v677_v37, %v654_v40  ;;  %v695_v27 = vadd.f32 %v679_v55, %v656_v58  ;;  %v697_v35 = vadd.f32 %v681_v38, %v658_v63 }
  0xb7   : > { %v699_v49 = vadd.f32 %v683_v21, %v660_v41  ;;  %v701_v54 = vadd.f32 %v685_v60, %v662_v20  ;;  %v703_v47 = vadd.f32 %v687_v34, %v664_v6  ;;  %v705_v42 = vadd.f32 %v689_v0, %v666_v29 }
  0xb8   : > { %v739_v25 = vmul.f32 %v3103_v57, %v2573_v13  ;;  %v741_v10 = vmul.f32 %v3103_v57, %v2576_v1  ;;  %v743_v40 = vmul.f32 %v3103_v57, %v2579_v19  ;;  %v779_v58 = vrot.slane %v713_v43, 1 }
  0xb9   : > { %v780_v63 = vrot.slane %v715_v33, 1  ;;  %v785_v41 = vrot.slane %v717_v45, 1  ;;  %v786_v20 = vrot.slane %v719_v16, 1  ;;  %v791_v6 = vrot.slane %v721_v30, 1 }
  0xba   : > { %v792_v59 = vrot.slane %v723_v22, 1  ;;  %v797_v29 = vrot.slane %v725_v32, 1  ;;  %v798_v31 = vrot.slane %v727_v62, 1  ;;  %v803_v2 = vrot.slane %v729_v11, 1 }
  0xbb   : > { %v781_v28 = vsel %vm435_vm0, %v779_v58, %v780_v63  ;;  %v787_v37 = vsel %vm435_vm0, %v785_v41, %v786_v20  ;;  %v804_v38 = vrot.slane %v731_v8, 1  ;;  %v809_v21 = vrot.slane %v733_v14, 1 }
  0xbc   : > { %v793_v55 = vsel %vm435_vm0, %v791_v6, %v792_v59  ;;  %v799_v60 = vsel %vm435_vm0, %v797_v29, %v798_v31  ;;  %v810_v57 = vrot.slane %v735_v17, 1  ;;  %v815_v43 = vrot.slane %v737_v4, 1 }
  0xbd   : > { %v816_v33 = vrot.slane %v739_v25, 1  ;;  %v805_v45 = vsel %vm435_vm0, %v803_v2, %v804_v38  ;;  %v821_v16 = vrot.slane %v741_v10, 1  ;;  %v822_v30 = vrot.slane %v743_v40, 1 }
  0xbe   : > { %v841_v22 = vadd.f32 %v781_v28, %v691_v36  ;;  %v811_v32 = vsel %vm435_vm0, %v809_v21, %v810_v57  ;;  %v843_v11 = vadd.f32 %v787_v37, %v693_v50  ;;  %v845_v34 = vadd.f32 %v793_v55, %v695_v27 }
  0xbf   : > { %v817_v62 = vsel %vm435_vm0, %v815_v43, %v816_v33  ;;  %v823_v0 = vsel %vm435_vm0, %v821_v16, %v822_v30  ;;  %v847_v8 = vadd.f32 %v799_v60, %v697_v35  ;;  %v849_v14 = vadd.f32 %v805_v45, %v699_v49 }
  0xc0   : > { %v851_v58 = vadd.f32 %v811_v32, %v701_v54  ;;  %v853_v63 = vadd.f32 %v817_v62, %v703_v47  ;;  %v855_v17 = vadd.f32 %v823_v0, %v705_v42  ;;  %v863_v4 = vmul.f32 %v2391_v7, %v2534_v3 }
  0xc1   : > { %v865_v25 = vmul.f32 %v2391_v7, %v2537_v26  ;;  %v867_v36 = vmul.f32 %v2391_v7, %v2540_v12  ;;  %v869_v50 = vmul.f32 %v2391_v7, %v2543_v39  ;;  %v871_v27 = vmul.f32 %v2391_v7, %v2546_v44 }
  0xc2   : > { %v873_v35 = vmul.f32 %v2391_v7, %v2549_v46  ;;  %v875_v49 = vmul.f32 %v2391_v7, %v2552_v51  ;;  %v877_v3 = vmul.f32 %v2391_v7, %v2555_v52  ;;  %v879_v26 = vmul.f32 %v2391_v7, %v2558_v53 }
  0xc3   : > { %v881_v54 = vmul.f32 %v2391_v7, %v2561_v48  ;;  %v883_v47 = vmul.f32 %v2391_v7, %v2564_v56  ;;  %v885_v42 = vmul.f32 %v2391_v7, %v2567_v9  ;;  %v887_v10 = vmul.f32 %v2391_v7, %v2570_v18 }
  0xc4   : > { %v889_v40 = vmul.f32 %v2391_v7, %v2573_v13  ;;  %v891_v41 = vmul.f32 %v2391_v7, %v2576_v1  ;;  %v893_v20 = vmul.f32 %v2391_v7, %v2579_v19  ;;  %v929_v6 = vrot.slane %v863_v4, 2 }
  0xc5   : > { %v930_v59 = vrot.slane %v865_v25, 2  ;;  %v935_v28 = vrot.slane %v867_v36, 2  ;;  %v936_v29 = vrot.slane %v869_v50, 2  ;;  %v941_v31 = vrot.slane %v871_v27, 2 }
  0xc6   : > { %v942_v2 = vrot.slane %v873_v35, 2  ;;  %v947_v55 = vrot.slane %v875_v49, 2  ;;  %v948_v38 = vrot.slane %v877_v3, 2  ;;  %v953_v21 = vrot.slane %v879_v26, 2 }
  0xc7   : > { %v931_v37 = vsel %vm586_vm1, %v929_v6, %v930_v59  ;;  %v937_v60 = vsel %vm586_vm1, %v935_v28, %v936_v29  ;;  %v954_v43 = vrot.slane %v881_v54, 2  ;;  %v959_v33 = vrot.slane %v883_v47, 2 }
  0xc8   : > { %v943_v57 = vsel %vm586_vm1, %v941_v31, %v942_v2  ;;  %v949_v45 = vsel %vm586_vm1, %v947_v55, %v948_v38  ;;  %v960_v7 = vrot.slane %v885_v42, 2  ;;  %v965_v16 = vrot.slane %v887_v10, 2  ;;  %v1923_v42 = vld [vmem:[%s3005_s1 + $0x10] sm:$0x77] }
  0xc9   : > { %v966_v30 = vrot.slane %v889_v40, 2  ;;  %v955_v32 = vsel %vm586_vm1, %v953_v21, %v954_v43  ;;  %v971_v62 = vrot.slane %v891_v41, 2  ;;  %v972_v0 = vrot.slane %v893_v20, 2 }
  0xca   : > { %v991_v4 = vadd.f32 %v931_v37, %v841_v22  ;;  %v961_v25 = vsel %vm586_vm1, %v959_v33, %v960_v7  ;;  %v993_v50 = vadd.f32 %v937_v60, %v843_v11  ;;  %v995_v27 = vadd.f32 %v943_v57, %v845_v34 }
  0xcb   : > { %v967_v36 = vsel %vm586_vm1, %v965_v16, %v966_v30  ;;  %v973_v35 = vsel %vm586_vm1, %v971_v62, %v972_v0  ;;  %v997_v49 = vadd.f32 %v949_v45, %v847_v8  ;;  %v999_v3 = vadd.f32 %v955_v32, %v849_v14 }
  0xcc   : > { %v1001_v26 = vadd.f32 %v961_v25, %v851_v58  ;;  %v1003_v54 = vadd.f32 %v967_v36, %v853_v63  ;;  %v1005_v47 = vadd.f32 %v973_v35, %v855_v17  ;;  %v1008_v10 = vperm.slane %v1923_v42, 4  ;;  %v3104_v25 = vld [vmem:[#allocation19_spill] sm:$0xff] }
  0xcd   : > { %v1052_v22 = vmul.f32 %v2420_v61, %v2540_v12  ;;  %v1054_v40 = vmul.f32 %v2420_v61, %v2543_v39  ;;  %v1056_v11 = vmul.f32 %v2420_v61, %v2546_v44  ;;  %v1058_v34 = vmul.f32 %v2420_v61, %v2549_v46 }
  0xce   : > { %v1060_v8 = vmul.f32 %v2420_v61, %v2552_v51  ;;  %v1012_v14 = vperm.slane %v1008_v10, 0  ;;  %v1062_v58 = vmul.f32 %v2420_v61, %v2555_v52  ;;  %v1064_v63 = vmul.f32 %v2420_v61, %v2558_v53 }
  0xcf   : > { %v1066_v17 = vmul.f32 %v2420_v61, %v2561_v48  ;;  %v1068_v41 = vmul.f32 %v2420_v61, %v2564_v56  ;;  %v1070_v20 = vmul.f32 %v2420_v61, %v2567_v9  ;;  %v1072_v6 = vmul.f32 %v2420_v61, %v2570_v18 }
  0xd0   : > { %v1074_v59 = vmul.f32 %v2420_v61, %v2573_v13  ;;  %v1014_v28 = vmul.f32 %v1012_v14, %v2540_v12  ;;  %v1016_v29 = vmul.f32 %v1012_v14, %v2546_v44  ;;  %v1018_v31 = vmul.f32 %v1012_v14, %v2552_v51 }
  0xd1   : > { %v1020_v2 = vmul.f32 %v1012_v14, %v2558_v53  ;;  %v1022_v37 = vmul.f32 %v1012_v14, %v2564_v56  ;;  %v1024_v55 = vmul.f32 %v1012_v14, %v2570_v18  ;;  %v1026_v38 = vmul.f32 %v1012_v14, %v2576_v1 }
  0xd2   : > { %v1028_v21 = vmul.f32 %v1012_v14, %v2582_v15  ;;  %v1030_v60 = vadd.f32 %v1014_v28, %v991_v4  ;;  %v1032_v57 = vadd.f32 %v1016_v29, %v993_v50  ;;  %v1034_v43 = vadd.f32 %v1018_v31, %v995_v27 }
  0xd3   : > { %v1036_v33 = vadd.f32 %v1020_v2, %v997_v49  ;;  %v1038_v45 = vadd.f32 %v1022_v37, %v999_v3  ;;  %v1040_v7 = vadd.f32 %v1024_v55, %v1001_v26  ;;  %v1042_v16 = vadd.f32 %v1026_v38, %v1003_v54 }
  0xd4   : > { %v1044_v30 = vadd.f32 %v1028_v21, %v1005_v47  ;;  %v1076_v32 = vmul.f32 %v2420_v61, %v2576_v1  ;;  %v1078_v62 = vmul.f32 %v2420_v61, %v2579_v19  ;;  %v1080_v0 = vmul.f32 %v2420_v61, %v2582_v15 }
  0xd5   : > { %v3105_v36 = vunpack.c.h.bf16 %v3104_v25  ;;  %v1118_v50 = vrot.slane %v1052_v22, 1  ;;  %v1119_v27 = vrot.slane %v1054_v40, 1  ;;  %v1124_v35 = vrot.slane %v1056_v11, 1 }
  0xd6   : > { %v1125_v49 = vrot.slane %v1058_v34, 1  ;;  %v1130_v3 = vrot.slane %v1060_v8, 1  ;;  %v1131_v26 = vrot.slane %v1062_v58, 1  ;;  %v1136_v54 = vrot.slane %v1064_v63, 1 }
  0xd7   : > { %v1082_v4 = vmul.f32 %v2420_v61, %v3105_v36  ;;  %v1137_v47 = vrot.slane %v1066_v17, 1  ;;  %v1120_v42 = vsel %vm435_vm0, %v1118_v50, %v1119_v27  ;;  %v1142_v14 = vrot.slane %v1068_v41, 1 }
  0xd8   : > { %v1126_v10 = vsel %vm435_vm0, %v1124_v35, %v1125_v49  ;;  %v1143_v28 = vrot.slane %v1070_v20, 1  ;;  %v1132_v29 = vsel %vm435_vm0, %v1130_v3, %v1131_v26  ;;  %v1148_v2 = vrot.slane %v1072_v6, 1 }
  0xd9   : > { %v1138_v31 = vsel %vm435_vm0, %v1136_v54, %v1137_v47  ;;  %v1149_v61 = vrot.slane %v1074_v59, 1  ;;  %v1154_v40 = vrot.slane %v1076_v32, 1  ;;  %v1155_v11 = vrot.slane %v1078_v62, 1  ;;  %v3106_v59 = vld [vmem:[#allocation20_spill] sm:$0xff] }
  0xda   : > { %v1144_v22 = vsel %vm435_vm0, %v1142_v14, %v1143_v28  ;;  %v1160_v34 = vrot.slane %v1080_v0, 1  ;;  %v1161_v58 = vrot.slane %v1082_v4, 1  ;;  %v1180_v63 = vadd.f32 %v1120_v42, %v1030_v60 }
  0xdb   : > { %v1150_v8 = vsel %vm435_vm0, %v1148_v2, %v1149_v61  ;;  %v1182_v17 = vadd.f32 %v1126_v10, %v1032_v57  ;;  %v1156_v37 = vsel %vm435_vm0, %v1154_v40, %v1155_v11  ;;  %v1184_v41 = vadd.f32 %v1132_v29, %v1034_v43 }
  0xdc   : > { %v1186_v20 = vadd.f32 %v1138_v31, %v1036_v33  ;;  %v1188_v55 = vadd.f32 %v1144_v22, %v1038_v45  ;;  %v1162_v38 = vsel %vm435_vm0, %v1160_v34, %v1161_v58  ;;  %v1190_v21 = vadd.f32 %v1150_v8, %v1040_v7  ;;  %v1924_v8 = vld [vmem:[%s3006_s2] sm:$0x3] }
  0xdd   : > { %v1192_v6 = vadd.f32 %v1156_v37, %v1042_v16  ;;  %v1202_v36 = vmul.f32 %v3106_v59, %v2540_v12  ;;  %v1194_v32 = vadd.f32 %v1162_v38, %v1044_v30  ;;  %v1204_v62 = vmul.f32 %v3106_v59, %v2543_v39 }
  0xde   : > { %v1206_v60 = vmul.f32 %v3106_v59, %v2546_v44  ;;  %v1208_v57 = vmul.f32 %v3106_v59, %v2549_v46  ;;  %v1210_v43 = vmul.f32 %v3106_v59, %v2552_v51  ;;  %v1212_v33 = vmul.f32 %v3106_v59, %v2555_v52 }
  0xdf   : > { %v1214_v45 = vmul.f32 %v3106_v59, %v2558_v53  ;;  %v1216_v12 = vmul.f32 %v3106_v59, %v2561_v48  ;;  %v1218_v39 = vmul.f32 %v3106_v59, %v2564_v56  ;;  %v1220_v44 = vmul.f32 %v3106_v59, %v2567_v9 }
  0xe0   : > { %v1222_v46 = vmul.f32 %v3106_v59, %v2570_v18  ;;  %v1224_v51 = vmul.f32 %v3106_v59, %v2573_v13  ;;  %v1226_v52 = vmul.f32 %v3106_v59, %v2576_v1  ;;  %v1228_v53 = vmul.f32 %v3106_v59, %v2579_v19 }
  0xe1   : > { %v1230_v48 = vmul.f32 %v3106_v59, %v2582_v15  ;;  %v3107_v56 = vunpack.c.h.bf16 %v3104_v25  ;;  %v1268_v9 = vrot.slane %v1202_v36, 2  ;;  %v1269_v16 = vrot.slane %v1204_v62, 2 }
  0xe2   : > { %v1274_v30 = vrot.slane %v1206_v60, 2  ;;  %v1275_v18 = vrot.slane %v1208_v57, 2  ;;  %v1280_v0 = vrot.slane %v1210_v43, 2  ;;  %v1281_v4 = vrot.slane %v1212_v33, 2 }
  0xe3   : > { %v1232_v7 = vmul.f32 %v3106_v59, %v3107_v56  ;;  %v1286_v13 = vrot.slane %v1214_v45, 2  ;;  %v1287_v50 = vrot.slane %v1216_v12, 2  ;;  %v1270_v1 = vsel %vm586_vm1, %v1268_v9, %v1269_v16 }
  0xe4   : > { %v1276_v27 = vsel %vm586_vm1, %v1274_v30, %v1275_v18  ;;  %v1292_v19 = vrot.slane %v1218_v39, 2  ;;  %v1293_v35 = vrot.slane %v1220_v44, 2  ;;  %v1282_v15 = vsel %vm586_vm1, %v1280_v0, %v1281_v4 }
  0xe5   : > { %v1288_v25 = vsel %vm586_vm1, %v1286_v13, %v1287_v50  ;;  %v1298_v49 = vrot.slane %v1222_v46, 2  ;;  %v1299_v3 = vrot.slane %v1224_v51, 2  ;;  %v1304_v54 = vrot.slane %v1226_v52, 2 }
  0xe6   : > { %v1294_v26 = vsel %vm586_vm1, %v1292_v19, %v1293_v35  ;;  %v1305_v47 = vrot.slane %v1228_v53, 2  ;;  %v1310_v42 = vrot.slane %v1230_v48, 2  ;;  %v1311_v14 = vrot.slane %v1232_v7, 2 }
  0xe7   : > { %v1300_v10 = vsel %vm586_vm1, %v1298_v49, %v1299_v3  ;;  %v1330_v28 = vadd.f32 %v1270_v1, %v1180_v63  ;;  %v1332_v29 = vadd.f32 %v1276_v27, %v1182_v17  ;;  %v1334_v2 = vadd.f32 %v1282_v15, %v1184_v41 }
  0xe8   : > { %v1306_v31 = vsel %vm586_vm1, %v1304_v54, %v1305_v47  ;;  %v1336_v61 = vadd.f32 %v1288_v25, %v1186_v20  ;;  %v1338_v22 = vadd.f32 %v1294_v26, %v1188_v55  ;;  %v1312_v40 = vsel %vm586_vm1, %v1310_v42, %v1311_v14 }
  0xe9   : > { %v1340_v11 = vadd.f32 %v1300_v10, %v1190_v21  ;;  %v1342_v34 = vadd.f32 %v1306_v31, %v1192_v6  ;;  %v1348_v58 = vperm.slane %v1924_v8, 1  ;;  %v1344_v37 = vadd.f32 %v1312_v40, %v1194_v32 }
  0xeb   : > { %v1352_v38 = vadd.f32 %v1348_v58, %v1330_v28  ;;  %v1354_v59 = vadd.f32 %v1348_v58, %v1332_v29  ;;  %v1356_v36 = vadd.f32 %v1348_v58, %v1334_v2  ;;  %v1358_v63 = vadd.f32 %v1348_v58, %v1336_v61 }
  0xec   : > { %v1360_v17 = vadd.f32 %v1348_v58, %v1338_v22  ;;  %v2899_v62 = vadd.f32 %v1348_v58, %v1340_v11  ;;  %v2901_v41 = vadd.f32 %v1348_v58, %v1342_v34  ;;  %v2903_v20 = vadd.f32 %v1348_v58, %v1344_v37 }
  0xed   : > { %v1384_v55 = vmul.f32 0.044715, %v1352_v38  ;;  %v1386_v21 = vmul.f32 0.044715, %v1354_v59  ;;  %v1388_v6 = vmul.f32 0.044715, %v1356_v36 }
  0xee   : > { %v1390_v60 = vmul.f32 0.044715, %v1358_v63  ;;  %v1392_v57 = vmul.f32 0.044715, %v1360_v17  ;;  %v1394_v43 = vmul.f32 0.044715, %v2899_v62 }
  0xef   : > { %v1396_v32 = vmul.f32 0.044715, %v2901_v41  ;;  %v1398_v33 = vmul.f32 0.044715, %v2903_v20  ;;  %v1400_v45 = vmul.f32 %v1384_v55, %v1352_v38  ;;  %v1402_v12 = vmul.f32 %v1386_v21, %v1354_v59 }
  0xf0   : > { %v1404_v39 = vmul.f32 %v1388_v6, %v1356_v36  ;;  %v1406_v44 = vmul.f32 %v1390_v60, %v1358_v63  ;;  %v1408_v46 = vmul.f32 %v1392_v57, %v1360_v17  ;;  %v1410_v51 = vmul.f32 %v1394_v43, %v2899_v62  ;;  %v3108_v57 = vld [vmem:[#allocation2_spill] sm:$0xff] }
  0xf1   : > { %v1412_v52 = vmul.f32 %v1396_v32, %v2901_v41  ;;  %v1414_v53 = vmul.f32 %v1398_v33, %v2903_v20  ;;  %v1416_v48 = vmul.f32 %v1400_v45, %v1352_v38  ;;  %v1418_v56 = vmul.f32 %v1402_v12, %v1354_v59  ;;  %v3109_v12 = vld [vmem:[#allocation3_spill] sm:$0xff] }
  0xf2   : > { %v1420_v7 = vmul.f32 %v1404_v39, %v1356_v36  ;;  %v1422_v9 = vmul.f32 %v1406_v44, %v1358_v63  ;;  %v1424_v16 = vmul.f32 %v1408_v46, %v1360_v17  ;;  %v1426_v30 = vmul.f32 %v1410_v51, %v2899_v62  ;;  %v3110_v51 = vld [vmem:[#allocation4_spill] sm:$0xff] }
  0xf3   : > { %v1428_v18 = vmul.f32 %v1412_v52, %v2901_v41  ;;  %v1430_v0 = vmul.f32 %v1414_v53, %v2903_v20  ;;  %v1432_v4 = vadd.f32 %v1416_v48, %v1352_v38  ;;  %v1434_v13 = vadd.f32 %v1418_v56, %v1354_v59  ;;  %v3111_v48 = vld [vmem:[#allocation5_spill] sm:$0xff] }
  0xf4   : > { %v1436_v50 = vadd.f32 %v1420_v7, %v1356_v36  ;;  %v1438_v1 = vadd.f32 %v1422_v9, %v1358_v63  ;;  %v1440_v27 = vadd.f32 %v1424_v16, %v1360_v17  ;;  %v1442_v19 = vadd.f32 %v1426_v30, %v2899_v62  ;;  %v3112_v16 = vld [vmem:[#allocation6_spill] sm:$0xff] }
  0xf5   : > { %v1444_v35 = vadd.f32 %v1428_v18, %v2901_v41  ;;  %v1448_v15 = vmul.f32 0.7978846, %v1432_v4  ;;  %v1450_v25 = vmul.f32 0.7978846, %v1434_v13  ;;  %v1446_v49 = vadd.f32 %v1430_v0, %v2903_v20  ;;  %v3113_v0 = vld [vmem:[#allocation7_spill] sm:$0xff] }
  0xf6   : > { %v1452_v3 = vmul.f32 0.7978846, %v1436_v50  ;;  %v1454_v26 = vmul.f32 0.7978846, %v1438_v1  ;;  %v1456_v54 = vmul.f32 0.7978846, %v1440_v27 }
  0xf7   : > { %1894 = vtanh.f32 %v1448_v15  ;;  %v1458_v47 = vmul.f32 0.7978846, %v1442_v19  ;;  %v1460_v42 = vmul.f32 0.7978846, %v1444_v35  ;;  %v1462_v10 = vmul.f32 0.7978846, %v1446_v49 }
  0xf8   : > { %1896 = vtanh.f32 %v1450_v25  ;;  %v1368_v14 = vmul.f32 0.5, %v1352_v38  ;;  %v1370_v29 = vmul.f32 0.5, %v1354_v59  ;;  %v1372_v2 = vmul.f32 0.5, %v1356_v36 }
  0xf9   : > { %1898 = vtanh.f32 %v1452_v3  ;;  %v1374_v40 = vmul.f32 0.5, %v1358_v63  ;;  %v1376_v8 = vmul.f32 0.5, %v1360_v17  ;;  %v1378_v38 = vmul.f32 0.5, %v2899_v62 }
  0xfa   : > { %1900 = vtanh.f32 %v1454_v26  ;;  %v1380_v59 = vmul.f32 0.5, %v2901_v41  ;;  %v1382_v63 = vmul.f32 0.5, %v2903_v20 }
  0xfb   : > { %1902 = vtanh.f32 %v1456_v54 }
  0xfc   : > { %1904 = vtanh.f32 %v1458_v47 }
  0xfd   : > { %v1895_v28 = vpop.eup %1894  ;;  %1906 = vtanh.f32 %v1460_v42 }
  0xfe   : > { %v1897_v31 = vpop.eup %1896  ;;  %1908 = vtanh.f32 %v1462_v10  ;;  %v1480_v61 = vadd.f32 1.0, %v1895_v28  ;;  %v1666_v10 = vld [vmem:[%s3008_s4 + $0x60] sm:$0xff]  ;;  %v1665_v28 = vld [vmem:[%s3008_s4 + $0x58] sm:$0xff] }
  0xff   : > { %v1899_v22 = vpop.eup %1898  ;;  %v1482_v11 = vadd.f32 1.0, %v1897_v31  ;;  %v1663_v31 = vld [vmem:[%s3008_s4 + $0x48] sm:$0xff] }
 0x100   : > { %v1901_v34 = vpop.eup %1900  ;;  %v1484_v58 = vadd.f32 1.0, %v1899_v22  ;;  %v1496_v37 = vmul.f32 %v1480_v61, %v1368_v14  ;;  %v1667_v14 = vld [vmem:[%s3008_s4 + $0x68] sm:$0xff]  ;;  %v1661_v61 = vld [vmem:[%s3008_s4 + $0x38] sm:$0xff]  ;;  %v1658_v22 = vld [vmem:[%s3008_s4 + $0x20] sm:$0xff] }
 0x101   : > { %v1903_v55 = vpop.eup %1902  ;;  %v1486_v36 = vadd.f32 1.0, %v1901_v34  ;;  %v1498_v21 = vmul.f32 %v1482_v11, %v1370_v29  ;;  %v1662_v29 = vld [vmem:[%s3008_s4 + $0x40] sm:$0xff]  ;;  %v1656_v11 = vld [vmem:[%s3008_s4 + $0x10] sm:$0xff]  ;;  %v1657_v34 = vld [vmem:[%s3008_s4 + $0x18] sm:$0xff] }
 0x102   : > { %v1905_v6 = vpop.eup %1904  ;;  %v1488_v60 = vadd.f32 1.0, %v1903_v55  ;;  %v1500_v17 = vmul.f32 %v1484_v58, %v1372_v2  ;;  %v1511_v43 = vpack.c.bf16 %v1496_v37, %v3108_v57  ;;  %v1660_v2 = vld [vmem:[%s3008_s4 + $0x30] sm:$0xff]  ;;  %v1654_v58 = vld [vmem:[%s3008_s4] sm:$0xff] }
 0x103   : > { %v1907_v32 = vpop.eup %1906  ;;  %v1490_v33 = vadd.f32 1.0, %v1905_v6  ;;  %v1502_v45 = vmul.f32 %v1486_v36, %v1374_v40  ;;  %v1512_v39 = vpack.c.bf16 %v1498_v21, %v3109_v12  ;;  %v1540_v62 = vadd.f32 %v1498_v21, %v1496_v37  ;;  %v1659_v40 = vld [vmem:[%s3008_s4 + $0x28] sm:$0xff] }
 0x104   : > { %v1909_v41 = vpop.eup %1908  ;;  %v1492_v44 = vadd.f32 1.0, %v1907_v32  ;;  %v1504_v46 = vmul.f32 %v1488_v60, %v1376_v8  ;;  %v1513_v52 = vpack.c.bf16 %v1500_v17, %v3110_v51  ;;  %1519 = vst [vmem:[%s2921_s18] sm:$0xff] %v1511_v43  ;;  %v1655_v37 = vld [vmem:[%s3008_s4 + $0x8] sm:$0xff] }
 0x105   : > { %v1494_v20 = vadd.f32 1.0, %v1909_v41  ;;  %v1506_v53 = vmul.f32 %v1490_v33, %v1378_v38  ;;  %v1514_v56 = vpack.c.bf16 %v1502_v45, %v3111_v48  ;;  %1520 = vst [vmem:[%s2921_s18 + $0x8] sm:$0xff] %v1512_v39  ;;  %v1541_v7 = vadd.f32 %v1540_v62, %v1500_v17 }
 0x106   : > { %v1508_v9 = vmul.f32 %v1492_v44, %v1380_v59  ;;  %v1515_v30 = vpack.c.bf16 %v1504_v46, %v3112_v16  ;;  %1521 = vst [vmem:[%s2921_s18 + $0x10] sm:$0xff] %v1513_v52 }
 0x107   : > { %v1510_v18 = vmul.f32 %v1494_v20, %v1382_v63  ;;  %v1516_v4 = vpack.c.bf16 %v1506_v53, %v3113_v0  ;;  %1522 = vst [vmem:[%s2921_s18 + $0x18] sm:$0xff] %v1514_v56  ;;  %v1542_v13 = vadd.f32 %v1541_v7, %v1502_v45 }
 0x108   : > { %v1517_v50 = vpack.c.bf16 %v1508_v9, %v2623_v24  ;;  %1523 = vst [vmem:[%s2921_s18 + $0x20] sm:$0xff] %v1515_v30  ;;  %v1668_v24 = vld [vmem:[%s3008_s4 + $0x70] sm:$0xff] }
 0x109   : > { %v1518_v1 = vpack.c.bf16 %v1510_v18, %v2629_v23  ;;  %1524 = vst [vmem:[%s2921_s18 + $0x28] sm:$0xff] %v1516_v4  ;;  %v1543_v27 = vadd.f32 %v1542_v13, %v1504_v46  ;;  %v1669_v23 = vld [vmem:[%s3008_s4 + $0x78] sm:$0xff]  ;;  %1682 = vmatpush.msra.mxu2 %v1668_v24 }
 0x10a   : > { %1525 = vst [vmem:[%s2921_s18 + $0x30] sm:$0xff] %v1517_v50  ;;  %1702 = vmatpush.msra.mxu3 %v1669_v23 }
 0x10b   : > { %1526 = vst [vmem:[%s2921_s18 + $0x38] sm:$0xff] %v1518_v1  ;;  %v1544_v19 = vadd.f32 %v1543_v27, %v1506_v53  ;;  %1683 = vmatpush.msra.mxu2 %v1666_v10 }
 0x10c   : > { %1703 = vmatpush.msra.mxu3 %v1667_v14 }
 0x10d   : > { %v1545_v35 = vadd.f32 %v1544_v19, %v1508_v9 }
 0x10e   : > { %1704 = vmatpush.msra.mxu3 %v1665_v28 }
 0x10f   : > { %v1546_v15 = vadd.f32 %v1545_v35, %v1510_v18 }
 0x110   : > { %1705 = vmatpush.msra.mxu3 %v1663_v31 }
 0x111   : > { %v1547_v25 = vrot.slane %v1546_v15, 4 }
 0x112   : > { %1706 = vmatpush.msra.mxu3 %v1661_v61 }
 0x113   : > { %v1548_v49 = vadd.f32 %v1547_v25, %v1546_v15  ;;  %v1758_v15 = vlaneseq }
 0x114   : > { %1707 = vmatpush.msra.mxu3 %v1659_v40 }
 0x115   : > { %v1549_v3 = vrot.slane %v1548_v49, 2  ;;  %vm1760_vm1 = vcmp.lt.s32.totalorder %v1758_v15, 256 }
 0x116   : > { %1708 = vmatpush.msra.mxu3 %v1657_v34 }
 0x117   : > { %v1550_v26 = vadd.f32 %v1549_v3, %v1548_v49 }
 0x118   : > { %1709 = vmatpush.msra.mxu3 %v1655_v37 }
 0x119   : > { %v1551_v54 = vrot.slane %v1550_v26, 1 }
 0x11b   : > { %v1552_v47 = vadd.f32 %v1551_v54, %v1550_v26 }
 0x11d   : > { %v1561_v42 = vmul.f32 %v2588_v5, %v1552_v47  ;;  %v1664_v5 = vld [vmem:[%s3008_s4 + $0x50] sm:$0xff] }
 0x11e   : > { %1684 = vmatpush.msra.mxu2 %v1664_v5 }
 0x11f   : > { %1630 = vmatmul.f32.vlgmr.msra.gmra.mxu1 %v1561_v42 }
 0x120   : > { %1685 = vmatpush.msra.mxu2 %v1662_v29 }
 0x122   : > { %1686 = vmatpush.msra.mxu2 %v1660_v2 }
 0x124   : > { %1687 = vmatpush.msra.mxu2 %v1658_v22 }
 0x126   : > { %1688 = vmatpush.msra.mxu2 %v1656_v11 }
 0x128   : > { %1689 = vmatpush.msra.mxu2 %v1654_v58 }
 0x12b   : > { %v1611_v8 = vpop.f32.mrf.mxu0 }
 0x19c   : > { %v1631_v55 = vpop.f32.mrf.mxu1 }
 0x19d   : > { %v1632_v38 = vadd.f32 %v1631_v55, %v1611_v8 }
 0x19f   : > { %v1858_v59 = vmul.f32 -1.442695, %v1632_v38 }
 0x1a1   : > { %1910 = vpow2.f32 %v1858_v59 }
 0x1a7   : > { %v1911_v36 = vpop.eup %1910 }
 0x1a8   : > { %v1637_v21 = vadd.f32 1.0, %v1911_v36 }
 0x1aa   : > { %1912 = vrcp.f32 %v1637_v21  ;;  %v1649_v17 = vand.u32 2147483648, %v1637_v21  ;;  %v1647_v43 = vand.u32 2147483647, %v1637_v21  ;;  %vm1643_vm4 = vweird.f32 %v1637_v21 }
 0x1ac   : > { %v1650_v33 = vor.u32 1.1754944e-38, %v1649_v17  ;;  %vm1648_vm6 = vcmp.eq.f32.partialorder %v1647_v43, 8.507059e+37 }
 0x1b0   : > { %v1913_v6 = vpop.eup %1912 }
 0x1b1   : > { %v1639_v63 = vmul.f32 %v1913_v6, %v1637_v21  ;;  %vm1644_vm3 = vweird.f32 %v1913_v6 }
 0x1b2   : > { %vm1645_vm5 = vmor %vm1643_vm4, %vm1644_vm3 }
 0x1b3   : > { %v1640_v60 = vsub.f32 1.0, %v1639_v63 }
 0x1b5   : > { %v1641_v57 = vmul.f32 %v1913_v6, %v1640_v60 }
 0x1b7   : > { %v1642_v32 = vadd.f32 %v1913_v6, %v1641_v57 }
 0x1b9   : > { %v1646_v45 = vsel %vm1645_vm5, %v1913_v6, %v1642_v32 }
 0x1ba   : > { %v1651_v12 = vsel %vm1648_vm6, %v1650_v33, %v1646_v45 }
 0x1bb   : > { %v1653_v39 = vmul.f32 %v1651_v12, %v1632_v38 }
 0x1bd   : > { %1859 = vmatmul.msk.f32.vlgmr.msra.gmra.mxu2 %vm1670_vm7, %v1653_v39  ;;  %1860 = vmatmul.msk.f32.vlgmr.msra.gmra.mxu3 %vm1670_vm7, %v1653_v39 }
 0x240   : > { %v1691_v62 = vpop.f32.mrf.mxu2  ;;  %v1711_v41 = vpop.f32.mrf.mxu3 }
 0x241   : > { %v1861_v44 = vmul.f32 -1.442695, %v1691_v62  ;;  %v1862_v46 = vmul.f32 -1.442695, %v1711_v41 }
 0x243   : > { %1914 = vpow2.f32 %v1861_v44 }
 0x244   : > { %1916 = vpow2.f32 %v1862_v46 }
 0x249   : > { %v1915_v51 = vpop.eup %1914 }
 0x24a   : > { %v1917_v52 = vpop.eup %1916  ;;  %v1720_v20 = vadd.f32 1.0, %v1915_v51 }
 0x24b   : > { %v1721_v53 = vadd.f32 1.0, %v1917_v52 }
 0x24c   : > { %1918 = vrcp.f32 %v1720_v20  ;;  %vm1727_vm10 = vweird.f32 %v1720_v20  ;;  %v1733_v1 = vand.u32 2147483648, %v1720_v20  ;;  %v1731_v19 = vand.u32 2147483647, %v1720_v20 }
 0x24d   : > { %1920 = vrcp.f32 %v1721_v53  ;;  %v1748_v0 = vand.u32 2147483648, %v1721_v53  ;;  %v1746_v13 = vand.u32 2147483647, %v1721_v53  ;;  %vm1742_vm12 = vweird.f32 %v1721_v53 }
 0x24e   : > { %v1734_v26 = vor.u32 1.1754944e-38, %v1733_v1  ;;  %vm1732_vm0 = vcmp.eq.f32.partialorder %v1731_v19, 8.507059e+37 }
 0x24f   : > { %v1749_v25 = vor.u32 1.1754944e-38, %v1748_v0  ;;  %vm1747_vm14 = vcmp.eq.f32.partialorder %v1746_v13, 8.507059e+37 }
 0x252   : > { %v1919_v48 = vpop.eup %1918 }
 0x253   : > { %v1921_v56 = vpop.eup %1920  ;;  %v1723_v7 = vmul.f32 %v1919_v48, %v1720_v20  ;;  %vm1728_vm8 = vweird.f32 %v1919_v48 }
 0x254   : > { %v1738_v9 = vmul.f32 %v1921_v56, %v1721_v53  ;;  %vm1743_vm9 = vweird.f32 %v1921_v56  ;;  %vm2991_vm11 = vmor %vm1727_vm10, %vm1728_vm8 }
 0x255   : > { %v1724_v16 = vsub.f32 1.0, %v1723_v7  ;;  %vm1744_vm13 = vmor %vm1742_vm12, %vm1743_vm9 }
 0x256   : > { %v1739_v30 = vsub.f32 1.0, %v1738_v9 }
 0x257   : > { %v1725_v18 = vmul.f32 %v1919_v48, %v1724_v16 }
 0x258   : > { %v1740_v4 = vmul.f32 %v1921_v56, %v1739_v30 }
 0x259   : > { %v1726_v50 = vadd.f32 %v1919_v48, %v1725_v18 }
 0x25a   : > { %v1741_v35 = vadd.f32 %v1921_v56, %v1740_v4 }
 0x25b   : > { %v1730_v49 = vsel %vm2991_vm11, %v1919_v48, %v1726_v50 }
 0x25c   : > { %v1745_v3 = vsel %vm1744_vm13, %v1921_v56, %v1741_v35  ;;  %v1735_v42 = vsel %vm1732_vm0, %v1734_v26, %v1730_v49 }
 0x25d   : > { %v1750_v54 = vsel %vm1747_vm14, %v1749_v25, %v1745_v3 }
 0x25e   : > { %v1754_v47 = vrot.slane %v1750_v54, 7 }
 0x260   : > { %v1756_v24 = vsel %vm1755_vm15, %v1735_v42, %v1754_v47 }
 0x261   : > { %1762 = vst.msk [vmem:[%s262_s10] sm:$0x3] %vm1760_vm1, %v1756_v24 }
 0x262 PF: > { %s17_s21 = sadd.s32 1, %s1931_s21  }
 0x263   : > { %p14_p4 = scmp.ge.s32.totalorder %s17_s21, 4  }
 0x265   :  { %16 = sbr.rel (!%p14_p4) target bundleno = 1 (0x1), region = 82 }

// kernel: my_layer_forward.12
= control target key start
LH: loop header
LB: loop body
LE: loop exit
PB: predicated region body
PF: predicated region fallthrough
CT: control target
= control target key end

     0   :  { %vm128_vm0 = vcmask 523264   ;;  %vm440_vm1 = vcmask 261120   ;;  %vm671_vm2 = vcmask 130048   ;;  %s3540_s1 = inlined_call_operand.vmem [shape: bf16[2,64,32], index: 1, kind: input, shape index: {}]   ;;  %s3541_s0 = inlined_call_operand.vmem [shape: f32[8,16,64], index: 0, kind: input, shape index: {}]   ;;  %s3542_s2 = inlined_call_operand.vmem [shape: bf16[2,64,32], index: 2, kind: input, shape index: {}]   ;;  %s3543_s3 = inlined_call_operand.vmem [shape: bf16[2,64,32], index: 3, kind: input, shape index: {}]   ;;  %s3544_s4 = inlined_call_operand.vmem [shape: f32[2,16,16], index: 4, kind: input, shape index: {}]   ;;  %s3545_s5 = inlined_call_operand.vmem [shape: bf16[2,32,64], index: 5, kind: input, shape index: {}]   ;;  %s3546_s6 = inlined_call_operand.vmem [shape: f32[8,16,64], index: 6, kind: output, shape index: {}]  }
   0x1   :  { %v2513_v0 = vld [vmem:[%s3540_s1 + $0x18] sm:$0xff]  ;;  %v2512_v1 = vld [vmem:[%s3540_s1 + $0x10] sm:$0xff]  ;;  %v32_v2 = vld [vmem:[%s3541_s0 + $0x40] sm:$0xff] }
   0x2   :  { %2538 = vmatpush.bf16.msra.mxu1 %v2513_v0  ;;  %v33_v3 = vld [vmem:[%s3541_s0 + $0x48] sm:$0xff]  ;;  %157 = vmatpush.bf16.msra.mxu0 %v2513_v0  ;;  %v48_v4 = vpack.c.bf16 %v32_v2, %v32_v2  ;;  %v2510_v9 = vld [vmem:[%s3540_s1] sm:$0xff]  ;;  %v2517_v10 = vld [vmem:[%s3542_s2 + $0x18] sm:$0xff] }
   0x3   :  { %v49_v5 = vpack.c.bf16 %v33_v3, %v33_v3  ;;  %v2511_v6 = vld [vmem:[%s3540_s1 + $0x8] sm:$0xff]  ;;  %v2516_v12 = vld [vmem:[%s3542_s2 + $0x10] sm:$0xff]  ;;  %v35_v14 = vld [vmem:[%s3541_s0 + $0x58] sm:$0xff] }
   0x4   :  { %v88_v7 = vunpack.c.l.b16 %v48_v4  ;;  %v34_v13 = vld [vmem:[%s3541_s0 + $0x50] sm:$0xff]  ;;  %v2515_v15 = vld [vmem:[%s3542_s2 + $0x8] sm:$0xff]  ;;  %v51_v17 = vpack.c.bf16 %v35_v14, %v35_v14  ;;  %v2514_v21 = vld [vmem:[%s3542_s2] sm:$0xff] }
   0x5   :  { %v89_v8 = vunpack.c.l.b16 %v49_v5  ;;  %v50_v16 = vpack.c.bf16 %v34_v13, %v34_v13  ;;  %v24_v22 = vld [vmem:[%s3541_s0] sm:$0xff]  ;;  %v25_v23 = vld [vmem:[%s3541_s0 + $0x8] sm:$0xff]  ;;  %v38_v36 = vld [vmem:[%s3541_s0 + $0x70] sm:$0xff] }
   0x6   :  { %2539 = vmatpush.bf16.msra.mxu1 %v2512_v1  ;;  %158 = vmatpush.bf16.msra.mxu0 %v2512_v1  ;;  %v91_v19 = vunpack.c.l.b16 %v51_v17  ;;  %v36_v24 = vld [vmem:[%s3541_s0 + $0x60] sm:$0xff]  ;;  %v37_v25 = vld [vmem:[%s3541_s0 + $0x68] sm:$0xff]  ;;  %v40_v26 = vpack.c.bf16 %v24_v22, %v24_v22  ;;  %v41_v27 = vpack.c.bf16 %v25_v23, %v25_v23  ;;  %v2521_v37 = vld [vmem:[%s3543_s3 + $0x18] sm:$0xff]  ;;  %v54_v44 = vpack.c.bf16 %v38_v36, %v38_v36 }
   0x7   :  { %v2730_v11 = vpack.c.b16 %v89_v8, %v88_v7  ;;  %v90_v18 = vunpack.c.l.b16 %v50_v16  ;;  %v52_v30 = vpack.c.bf16 %v36_v24, %v36_v24  ;;  %v53_v31 = vpack.c.bf16 %v37_v25, %v37_v25  ;;  %v39_v38 = vld [vmem:[%s3541_s0 + $0x78] sm:$0xff]  ;;  %v26_v39 = vld [vmem:[%s3541_s0 + $0x10] sm:$0xff]  ;;  %335 = vmatpush.bf16.msra.mxu2 %v2521_v37  ;;  %v2519_v48 = vld [vmem:[%s3543_s3 + $0x8] sm:$0xff] }
   0x8   :  { %v80_v28 = vunpack.c.l.b16 %v40_v26  ;;  %v81_v29 = vunpack.c.l.b16 %v41_v27  ;;  %v27_v40 = vld [vmem:[%s3541_s0 + $0x18] sm:$0xff]  ;;  %v2520_v41 = vld [vmem:[%s3543_s3 + $0x10] sm:$0xff]  ;;  %v42_v42 = vpack.c.bf16 %v26_v39, %v26_v39  ;;  %v55_v45 = vpack.c.bf16 %v39_v38, %v39_v38  ;;  %v2518_v53 = vld [vmem:[%s3543_s3] sm:$0xff] }
   0x9   :  { %v2746_v20 = vpack.c.b16 %v91_v19, %v90_v18  ;;  %v92_v33 = vunpack.c.l.b16 %v52_v30  ;;  %v93_v34 = vunpack.c.l.b16 %v53_v31  ;;  %v43_v43 = vpack.c.bf16 %v27_v40, %v27_v40  ;;  %v28_v54 = vld [vmem:[%s3541_s0 + $0x20] sm:$0xff]  ;;  %v29_v55 = vld [vmem:[%s3541_s0 + $0x28] sm:$0xff]  ;;  %v30_v61 = vld [vmem:[%s3541_s0 + $0x30] sm:$0xff] }
   0xa   :  { %2540 = vmatpush.bf16.msra.mxu1 %v2511_v6  ;;  %159 = vmatpush.bf16.msra.mxu0 %v2511_v6  ;;  %v2765_v32 = vpack.c.b16 %v81_v29, %v80_v28  ;;  %v82_v46 = vunpack.c.l.b16 %v42_v42  ;;  %v94_v50 = vunpack.c.l.b16 %v54_v44  ;;  %v95_v51 = vunpack.c.l.b16 %v55_v45  ;;  %v31_v62 = vld [vmem:[%s3541_s0 + $0x38] sm:$0xff] }
   0xb   :  { %v2769_v35 = vpack.c.b16 %v93_v34, %v92_v33  ;;  %v83_v47 = vunpack.c.l.b16 %v43_v43  ;;  %336 = vmatpush.bf16.msra.mxu2 %v2520_v41  ;;  %v44_v56 = vpack.c.bf16 %v28_v54, %v28_v54  ;;  %v45_v57 = vpack.c.bf16 %v29_v55, %v29_v55 }
   0xc   :  { %v2798_v52 = vpack.c.b16 %v95_v51, %v94_v50  ;;  %v46_v63 = vpack.c.bf16 %v30_v61, %v30_v61  ;;  %v47_v0 = vpack.c.bf16 %v31_v62, %v31_v62 }
   0xd   :  { %v2794_v49 = vpack.c.b16 %v83_v47, %v82_v46  ;;  %v84_v58 = vunpack.c.l.b16 %v44_v56  ;;  %v85_v59 = vunpack.c.l.b16 %v45_v57 }
   0xe   :  { %2541 = vmatpush.bf16.msra.mxu1 %v2510_v9  ;;  %160 = vmatpush.bf16.msra.mxu0 %v2510_v9  ;;  %v86_v1 = vunpack.c.l.b16 %v46_v63  ;;  %v87_v2 = vunpack.c.l.b16 %v47_v0 }
   0xf   :  { %337 = vmatpush.bf16.msra.mxu2 %v2519_v48  ;;  %v2813_v60 = vpack.c.b16 %v85_v59, %v84_v58 }
  0x10   :  { %v2827_v3 = vpack.c.b16 %v87_v2, %v86_v1 }
  0x11   :  { %2292 = vmatmul.msk.bf16.vlgmr.msra.gmra.mxu1 %vm128_vm0, %v2730_v11  ;;  %2288 = vmatmul.msk.bf16.vlgmr.msra.gmra.mxu0 %vm128_vm0, %v2765_v32 }
  0x12   :  { %254 = vmatpush.bf16.msrb.mxu1 %v2517_v10 }
  0x13   :  { %338 = vmatpush.bf16.msra.mxu2 %v2518_v53 }
  0x16   :  { %255 = vmatpush.bf16.msrb.mxu1 %v2516_v12  ;;  %2336 = vmatmul.msk.bf16.vlgmr.msra.gmra.mxu2 %vm128_vm0, %v2765_v32 }
  0x1a   :  { %256 = vmatpush.bf16.msrb.mxu1 %v2515_v15 }
  0x1e   :  { %257 = vmatpush.bf16.msrb.mxu1 %v2514_v21 }
  0x21   :  { %2293 = vmatmul.msk.bf16.gmra.mxu1 %vm128_vm0, %v2746_v20  ;;  %2289 = vmatmul.msk.bf16.gmra.mxu0 %vm128_vm0, %v2794_v49 }
  0x26   :  { %2337 = vmatmul.msk.bf16.gmra.mxu2 %vm128_vm0, %v2794_v49 }
  0x31   :  { %2294 = vmatmul.msk.bf16.gmra.mxu1 %vm128_vm0, %v2769_v35  ;;  %2290 = vmatmul.msk.bf16.gmra.mxu0 %vm128_vm0, %v2813_v60 }
  0x36   :  { %2338 = vmatmul.msk.bf16.gmra.mxu2 %vm128_vm0, %v2813_v60 }
  0x41   :  { %2295 = vmatmul.msk.bf16.gmra.mxu1 %vm128_vm0, %v2798_v52  ;;  %2291 = vmatmul.msk.bf16.gmra.mxu0 %vm128_vm0, %v2827_v3 }
  0x46   :  { %2339 = vmatmul.msk.bf16.gmra.mxu2 %vm128_vm0, %v2827_v3 }
  0x51   :  { %2312 = vmatmul.msk.bf16.vlgmr.msrb.gmra.mxu1 %vm128_vm0, %v2765_v32 }
  0x56   :  { %2340 = vmatmul.msk.bf16.gmra.mxu2 %vm128_vm0, %v2730_v11 }
  0x61   :  { %2313 = vmatmul.msk.bf16.gmra.mxu1 %vm128_vm0, %v2794_v49 }
  0x66   :  { %2341 = vmatmul.msk.bf16.gmra.mxu2 %vm128_vm0, %v2746_v20 }
  0x71   :  { %2314 = vmatmul.msk.bf16.gmra.mxu1 %vm128_vm0, %v2813_v60 }
  0x76   :  { %2342 = vmatmul.msk.bf16.gmra.mxu2 %vm128_vm0, %v2769_v35 }
  0x81   :  { %2315 = vmatmul.msk.bf16.gmra.mxu1 %vm128_vm0, %v2827_v3 }
  0x86   :  { %2343 = vmatmul.msk.bf16.gmra.mxu2 %vm128_vm0, %v2798_v52 }
  0x8e   :  { %v2843_v4 = vpop.f32.mrf.mxu1  ;;  %v162_v12 = vpop.f32.mrf.mxu0 }
  0x8f   :  { %v202_v22 = vmul.f32 0.17677669, %v162_v12 }
  0x91   :  { %2316 = vmatmul.msk.bf16.gmra.mxu1 %vm128_vm0, %v2730_v11  ;;  %v380_v28 = vpack.c.bf16 %v202_v22, %v202_v22 }
  0x93   :  { %v432_v36 = vunpack.c.l.b16 %v380_v28 }
  0x96   :  { %v2849_v5 = vpop.f32.mrf.mxu1  ;;  %v164_v14 = vpop.f32.mrf.mxu0 }
  0x97   :  { %v203_v24 = vmul.f32 0.17677669, %v164_v14 }
  0x99   :  { %v2873_v15 = vpop.f32.mrf.mxu2  ;;  %v381_v29 = vpack.c.bf16 %v203_v24, %v203_v24 }
  0x9b   :  { %v433_v37 = vunpack.c.l.b16 %v381_v29 }
  0x9d   :  { %v434_v39 = vpack.c.b16 %v433_v37, %v432_v36 }
  0x9e   :  { %v2851_v6 = vpop.f32.mrf.mxu1  ;;  %v167_v18 = vpop.f32.mrf.mxu0 }
  0x9f   :  { %v204_v43 = vmul.f32 0.17677669, %v167_v18 }
  0xa1   :  { %2317 = vmatmul.msk.bf16.gmra.mxu1 %vm128_vm0, %v2746_v20  ;;  %v2875_v17 = vpop.f32.mrf.mxu2  ;;  %v382_v50 = vpack.c.bf16 %v204_v43, %v204_v43 }
  0xa3   :  { %v463_v57 = vunpack.c.l.b16 %v382_v50 }
  0xa6   :  { %v2857_v7 = vpop.f32.mrf.mxu1  ;;  %v169_v31 = vpop.f32.mrf.mxu0 }
  0xa7   :  { %v205_v45 = vmul.f32 0.17677669, %v169_v31 }
  0xa9   :  { %v2877_v25 = vpop.f32.mrf.mxu2  ;;  %v383_v51 = vpack.c.bf16 %v205_v45, %v205_v45 }
  0xab   :  { %v464_v58 = vunpack.c.l.b16 %v383_v51 }
  0xad   :  { %v465_v0 = vpack.c.b16 %v464_v58, %v463_v57 }
  0xae   :  { %v2859_v8 = vpop.f32.mrf.mxu1  ;;  %v172_v42 = vpop.f32.mrf.mxu0 }
  0xb1   :  { %2318 = vmatmul.msk.bf16.gmra.mxu1 %vm128_vm0, %v2769_v35  ;;  %v2880_v38 = vpop.f32.mrf.mxu2 }
  0xb6   :  { %v2865_v9 = vpop.f32.mrf.mxu1  ;;  %v174_v59 = vpop.f32.mrf.mxu0 }
  0xb9   :  { %v350_v46 = vpop.f32.mrf.mxu2 }
  0xba   :  { %v416_v55 = vpack.c.bf16 %v350_v46, %v350_v46 }
  0xbc   :  { %v927_v62 = vunpack.c.l.b16 %v416_v55 }
  0xbe   :  { %v2867_v10 = vpop.f32.mrf.mxu1  ;;  %v177_v24 = vpop.f32.mrf.mxu0 }
  0xbf   :  { %v208_v46 = vmul.f32 0.17677669, %v177_v24 }
  0xc1   :  { %2319 = vmatmul.msk.bf16.gmra.mxu1 %vm128_vm0, %v2798_v52  ;;  %v352_v61 = vpop.f32.mrf.mxu2 }
  0xc2   :  { %v417_v63 = vpack.c.bf16 %v352_v61, %v352_v61 }
  0xc4   :  { %v928_v1 = vunpack.c.l.b16 %v417_v63 }
  0xc6   :  { %v2871_v13 = vpop.f32.mrf.mxu1  ;;  %v929_v12 = vpack.c.b16 %v928_v1, %v927_v62 }
  0xc8   :  { %941 = vmatpush.bf16.msra.mxu1 %v929_v12 }
  0xce   :  { %v259_v16 = vpop.f32.mrf.mxu1 }
  0xcf   :  { %v396_v19 = vpack.c.bf16 %v259_v16, %v259_v16  ;;  %v206_v16 = vmul.f32 0.17677669, %v172_v42  ;;  %v179_v42 = vpop.f32.mrf.mxu0 }
  0xd1   :  { %v437_v26 = vunpack.c.l.b16 %v396_v19  ;;  %v207_v19 = vmul.f32 0.17677669, %v174_v59 }
  0xd6   :  { %v261_v21 = vpop.f32.mrf.mxu1 }
  0xd7   :  { %v397_v23 = vpack.c.bf16 %v261_v21, %v261_v21  ;;  %v355_v21 = vpop.f32.mrf.mxu2 }
  0xd9   :  { %v438_v27 = vunpack.c.l.b16 %v397_v23 }
  0xdb   :  { %v439_v30 = vpack.c.b16 %v438_v27, %v437_v26  ;;  %v384_v26 = vpack.c.bf16 %v206_v16, %v206_v16  ;;  %v385_v27 = vpack.c.bf16 %v207_v19, %v207_v19 }
  0xdd   :  { %v445_v33 = vsel %vm440_vm1, %v439_v30, 0  ;;  %v418_v30 = vpack.c.bf16 %v355_v21, %v355_v21 }
  0xde   :  { %v264_v34 = vpop.f32.mrf.mxu1  ;;  %454 = vmatpush.bf16.xpose.msrb.mxu2 %v445_v33  ;;  %v493_v33 = vunpack.c.l.b16 %v384_v26 }
  0xdf   :  { %v398_v40 = vpack.c.bf16 %v264_v34, %v264_v34  ;;  %v494_v34 = vunpack.c.l.b16 %v385_v27  ;;  %v357_v36 = vpop.f32.mrf.mxu2  ;;  %v955_v37 = vunpack.c.l.b16 %v418_v30 }
  0xe1   :  { %v468_v47 = vunpack.c.l.b16 %v398_v40  ;;  %v495_v40 = vpack.c.b16 %v494_v34, %v493_v33  ;;  %v213_v33 = vmul.f32 0.17677669, %v2857_v7 }
  0xe5   :  { %2344 = vmatmul.msk.bf16.vlgmr.msrb.gmra.mxu2 %vm440_vm1, %v434_v39  ;;  %v419_v39 = vpack.c.bf16 %v357_v36, %v357_v36 }
  0xe6   :  { %v266_v41 = vpop.f32.mrf.mxu1 }
  0xe7   :  { %v399_v44 = vpack.c.bf16 %v266_v41, %v266_v41  ;;  %v956_v41 = vunpack.c.l.b16 %v419_v39  ;;  %v2887_v50 = vpop.f32.mrf.mxu2 }
  0xe9   :  { %v469_v48 = vunpack.c.l.b16 %v399_v44  ;;  %v957_v44 = vpack.c.b16 %v956_v41, %v955_v37  ;;  %v212_v37 = vmul.f32 0.17677669, %v2851_v6 }
  0xeb   :  { %v470_v53 = vpack.c.b16 %v469_v48, %v468_v47  ;;  %v209_v48 = vmul.f32 0.17677669, %v179_v42  ;;  %969 = vmatpush.bf16.msra.mxu2 %v957_v44  ;;  %v390_v42 = vpack.c.bf16 %v212_v37, %v212_v37 }
  0xed   :  { %v475_v54 = vsel %vm440_vm1, %v470_v53, 0 }
  0xee   :  { %v269_v56 = vpop.f32.mrf.mxu1  ;;  %484 = vmatpush.bf16.xpose.msra.mxu3 %v475_v54  ;;  %v386_v54 = vpack.c.bf16 %v208_v46, %v208_v46 }
  0xef   :  { %v400_v2 = vpack.c.bf16 %v269_v56, %v269_v56  ;;  %v387_v56 = vpack.c.bf16 %v209_v48, %v209_v48  ;;  %v2890_v62 = vpop.f32.mrf.mxu2  ;;  %v583_v48 = vunpack.c.l.b16 %v390_v42 }
  0xf0   :  { %v523_v59 = vunpack.c.l.b16 %v386_v54 }
  0xf1   :  { %v498_v22 = vunpack.c.l.b16 %v400_v2  ;;  %v524_v61 = vunpack.c.l.b16 %v387_v56  ;;  %v211_v2 = vmul.f32 0.17677669, %v2849_v5  ;;  %v215_v56 = vmul.f32 0.17677669, %v2865_v9 }
  0xf3   :  { %v525_v63 = vpack.c.b16 %v524_v61, %v523_v59  ;;  %v389_v21 = vpack.c.bf16 %v211_v2, %v211_v2  ;;  %v214_v61 = vmul.f32 0.17677669, %v2859_v8  ;;  %v413_v8 = vpack.c.bf16 %v2875_v17, %v2875_v17 }
  0xf4   :  { %v421_v17 = vpack.c.bf16 %v2890_v62, %v2890_v62 }
  0xf5   :  { %2345 = vmatmul.msk.bf16.vlgmr.msra.gmra.mxu3 %vm440_vm1, %v465_v0  ;;  %v554_v27 = vunpack.c.l.b16 %v389_v21 }
  0xf6   :  { %v271_v14 = vpop.f32.mrf.mxu1 }
  0xf7   :  { %v401_v18 = vpack.c.bf16 %v271_v14, %v271_v14  ;;  %v2894_v16 = vpop.f32.mrf.mxu2 }
  0xf9   :  { %v499_v23 = vunpack.c.l.b16 %v401_v18  ;;  %v210_v18 = vmul.f32 0.17677669, %v2843_v4 }
  0xfb   :  { %v500_v28 = vpack.c.b16 %v499_v23, %v498_v22  ;;  %v388_v23 = vpack.c.bf16 %v210_v18, %v210_v18 }
  0xfd   :  { %v505_v29 = vsel %vm440_vm1, %v500_v28, 0 }
  0xfe   :  { %v274_v31 = vpop.f32.mrf.mxu1  ;;  %514 = vmatpush.bf16.xpose.msrb.mxu3 %v505_v29  ;;  %v553_v29 = vunpack.c.l.b16 %v388_v23 }
  0xff   :  { %v402_v43 = vpack.c.bf16 %v274_v31, %v274_v31  ;;  %v2898_v28 = vpop.f32.mrf.mxu2 }
 0x100   :  { %v555_v30 = vpack.c.b16 %v554_v27, %v553_v29  ;;  %v412_v27 = vpack.c.bf16 %v2873_v15, %v2873_v15  ;;  %v420_v15 = vpack.c.bf16 %v2887_v50, %v2887_v50  ;;  %v422_v50 = vpack.c.bf16 %v2894_v16, %v2894_v16 }
 0x101   :  { %v528_v51 = vunpack.c.l.b16 %v402_v43  ;;  %v423_v62 = vpack.c.bf16 %v2898_v28, %v2898_v28 }
 0x105   :  { %2346 = vmatmul.msk.bf16.vlgmr.msrb.gmra.mxu3 %vm440_vm1, %v495_v40  ;;  %v391_v40 = vpack.c.bf16 %v213_v33, %v213_v33 }
 0x106   :  { %v276_v45 = vpop.f32.mrf.mxu1 }
 0x107   :  { %v403_v47 = vpack.c.bf16 %v276_v45, %v276_v45  ;;  %v370_v36 = vpop.f32.mrf.mxu2  ;;  %v584_v46 = vunpack.c.l.b16 %v391_v40 }
 0x108   :  { %v424_v44 = vpack.c.bf16 %v370_v36, %v370_v36 }
 0x109   :  { %v529_v53 = vunpack.c.l.b16 %v403_v47  ;;  %v585_v7 = vpack.c.b16 %v584_v46, %v583_v48  ;;  %v984_v46 = vunpack.c.l.b16 %v421_v17 }
 0x10b   :  { %v530_v55 = vpack.c.b16 %v529_v53, %v528_v51  ;;  %v1039_v51 = vunpack.c.l.b16 %v424_v44 }
 0x10d   :  { %v535_v57 = vsel %vm440_vm1, %v530_v55, 0 }
 0x10e   :  { %v279_v58 = vpop.f32.mrf.mxu1  ;;  %544 = vmatpush.bf16.xpose.msra.mxu3 %v535_v57 }
 0x10f   :  { %v404_v0 = vpack.c.bf16 %v279_v58, %v279_v58  ;;  %v372_v47 = vpop.f32.mrf.mxu2 }
 0x110   :  { %v425_v53 = vpack.c.bf16 %v372_v47, %v372_v47 }
 0x111   :  { %v558_v12 = vunpack.c.l.b16 %v404_v0 }
 0x112   :  { %v1040_v55 = vunpack.c.l.b16 %v425_v53  ;;  %v414_v53 = vpack.c.bf16 %v2877_v25, %v2877_v25 }
 0x114   :  { %v1041_v6 = vpack.c.b16 %v1040_v55, %v1039_v51  ;;  %v1012_v55 = vunpack.c.l.b16 %v423_v62 }
 0x115   :  { %2347 = vmatmul.msk.bf16.vlgmr.msra.gmra.mxu3 %vm440_vm1, %v525_v63 }
 0x116   :  { %v281_v1 = vpop.f32.mrf.mxu1  ;;  %1053 = vmatpush.bf16.msrb.mxu1 %v1041_v6  ;;  %v2932_v6 = vld [vmem:[%s3544_s4] sm:$0xff] }
 0x117   :  { %v405_v14 = vpack.c.bf16 %v281_v1, %v281_v1  ;;  %v375_v63 = vpop.f32.mrf.mxu2  ;;  %v393_v1 = vpack.c.bf16 %v215_v56, %v215_v56 }
 0x118   :  { %v426_v18 = vpack.c.bf16 %v375_v63, %v375_v63 }
 0x119   :  { %v559_v19 = vunpack.c.l.b16 %v405_v14 }
 0x11a   :  { %v1067_v9 = vunpack.c.l.b16 %v426_v18 }
 0x11b   :  { %v560_v22 = vpack.c.b16 %v559_v19, %v558_v12  ;;  %v392_v12 = vpack.c.bf16 %v214_v61, %v214_v61  ;;  %v614_v19 = vunpack.c.l.b16 %v393_v1 }
 0x11d   :  { %v565_v24 = vsel %vm440_vm1, %v560_v22, 0  ;;  %v613_v22 = vunpack.c.l.b16 %v392_v12 }
 0x11e   :  { %v284_v26 = vpop.f32.mrf.mxu1  ;;  %574 = vmatpush.bf16.xpose.msrb.mxu3 %v565_v24 }
 0x11f   :  { %v406_v5 = vpack.c.bf16 %v284_v26, %v284_v26  ;;  %v377_v23 = vpop.f32.mrf.mxu2  ;;  %v615_v26 = vpack.c.b16 %v614_v19, %v613_v22 }
 0x120   :  { %v427_v24 = vpack.c.bf16 %v377_v23, %v377_v23 }
 0x121   :  { %v588_v4 = vunpack.c.l.b16 %v406_v5 }
 0x125   :  { %2348 = vmatmul.msk.bf16.vlgmr.msrb.gmra.mxu3 %vm440_vm1, %v555_v30  ;;  %v1068_v30 = vunpack.c.l.b16 %v427_v24 }
 0x126   :  { %v286_v31 = vpop.f32.mrf.mxu1 }
 0x127   :  { %v407_v34 = vpack.c.bf16 %v286_v31, %v286_v31  ;;  %v1069_v5 = vpack.c.b16 %v1068_v30, %v1067_v9  ;;  %v217_v31 = vmul.f32 0.17677669, %v2871_v13 }
 0x129   :  { %v589_v39 = vunpack.c.l.b16 %v407_v34  ;;  %v872_v34 = vunpack.c.l.b16 %v413_v8  ;;  %1081 = vmatpush.bf16.msrb.mxu2 %v1069_v5 }
 0x12b   :  { %v590_v41 = vpack.c.b16 %v589_v39, %v588_v4  ;;  %v871_v4 = vunpack.c.l.b16 %v412_v27  ;;  %v216_v39 = vmul.f32 0.17677669, %v2867_v10 }
 0x12d   :  { %v595_v43 = vsel %vm440_vm1, %v590_v41, 0  ;;  %v395_v41 = vpack.c.bf16 %v217_v31, %v217_v31  ;;  %v873_v42 = vpack.c.b16 %v872_v34, %v871_v4  ;;  %v394_v44 = vpack.c.bf16 %v216_v39, %v216_v39 }
 0x12e   :  { %v289_v45 = vpop.f32.mrf.mxu1  ;;  %604 = vmatpush.bf16.xpose.msra.mxu3 %v595_v43 }
 0x12f   :  { %v408_v54 = vpack.c.bf16 %v289_v45, %v289_v45  ;;  %v983_v45 = vunpack.c.l.b16 %v420_v15  ;;  %v644_v47 = vunpack.c.l.b16 %v395_v41  ;;  %v643_v48 = vunpack.c.l.b16 %v394_v44 }
 0x131   :  { %v618_v58 = vunpack.c.l.b16 %v408_v54  ;;  %v985_v10 = vpack.c.b16 %v984_v46, %v983_v45  ;;  %v645_v51 = vpack.c.b16 %v644_v47, %v643_v48  ;;  %v1011_v54 = vunpack.c.l.b16 %v422_v50 }
 0x135   :  { %2349 = vmatmul.msk.bf16.vlgmr.msra.gmra.mxu3 %vm440_vm1, %v585_v7  ;;  %v415_v7 = vpack.c.bf16 %v2880_v38, %v2880_v38  ;;  %v2939_v38 = vld [vmem:[%s3544_s4 + $0x8] sm:$0xff] }
 0x136   :  { %v291_v57 = vpop.f32.mrf.mxu1 }
 0x137   :  { %v409_v59 = vpack.c.bf16 %v291_v57, %v291_v57  ;;  %v899_v57 = vunpack.c.l.b16 %v414_v53 }
 0x139   :  { %v619_v0 = vunpack.c.l.b16 %v409_v59  ;;  %v1013_v59 = vpack.c.b16 %v1012_v55, %v1011_v54 }
 0x13b   :  { %v620_v2 = vpack.c.b16 %v619_v0, %v618_v58  ;;  %v900_v58 = vunpack.c.l.b16 %v415_v7 }
 0x13d   :  { %v625_v14 = vsel %vm440_vm1, %v620_v2, 0  ;;  %v901_v25 = vpack.c.b16 %v900_v58, %v899_v57 }
 0x13e   :  { %v294_v21 = vpop.f32.mrf.mxu1  ;;  %634 = vmatpush.bf16.xpose.msrb.mxu3 %v625_v14 }
 0x13f   :  { %v410_v29 = vpack.c.bf16 %v294_v21, %v294_v21  ;;  %913 = vmatpush.bf16.msrb.mxu0 %v901_v25 }
 0x141   :  { %v648_v36 = vunpack.c.l.b16 %v410_v29 }
 0x143   :  { %1025 = vmatpush.bf16.msra.mxu0 %v1013_v59 }
 0x145   :  { %2350 = vmatmul.msk.bf16.vlgmr.msrb.gmra.mxu3 %vm440_vm1, %v615_v26 }
 0x146   :  { %v296_v33 = vpop.f32.mrf.mxu1 }
 0x147   :  { %v411_v37 = vpack.c.bf16 %v296_v33, %v296_v33 }
 0x149   :  { %v649_v40 = vunpack.c.l.b16 %v411_v37 }
 0x14b   :  { %v650_v43 = vpack.c.b16 %v649_v40, %v648_v36 }
 0x14d   :  { %v655_v13 = vsel %vm440_vm1, %v650_v43, 0 }
 0x14e   :  { %664 = vmatpush.bf16.xpose.msra.mxu3 %v655_v13 }
 0x155   :  { %2351 = vmatmul.msk.bf16.vlgmr.msra.gmra.mxu3 %vm440_vm1, %v645_v51 }
 0x156   :  { %885 = vmatpush.bf16.msrb.mxu3 %v873_v42 }
 0x15a   :  { %997 = vmatpush.bf16.msra.mxu3 %v985_v10 }
 0x168   :  { %v456_v5 = vpop.f32.mrf.mxu2 }
 0x169   :  { %v2956_v31 = vadd.f32 %v456_v5, %v2932_v6 }
 0x16b   :  { %v672_v4 = vsel %vm671_vm2, %v2956_v31, -inf }
 0x170   :  { %v458_v40 = vpop.f32.mrf.mxu2 }
 0x171   :  { %v2970_v15 = vadd.f32 %v458_v40, %v2939_v38 }
 0x173   :  { %v675_v42 = vsel %vm671_vm2, %v2970_v15, -inf }
 0x178   :  { %v486_v56 = vpop.f32.mrf.mxu3 }
 0x179   :  { %v487_v16 = vadd.f32 %v486_v56, %v2932_v6 }
 0x17b   :  { %v678_v28 = vsel %vm671_vm2, %v487_v16, -inf }
 0x17c   :  { %679 = vmax.xlane.f32.xlu0 %v678_v28 }
 0x180   :  { %v488_v61 = vpop.f32.mrf.mxu3 }
 0x181   :  { %v489_v63 = vadd.f32 %v488_v61, %v2939_v38 }
 0x183   :  { %v681_v0 = vsel %vm671_vm2, %v489_v63, -inf }
 0x184   :  { %682 = vmax.xlane.f32.xlu0 %v681_v0 }
 0x188   :  { %v2943_v1 = vpop.f32.mrf.mxu3 }
 0x190   :  { %v2945_v2 = vpop.f32.mrf.mxu3 }
 0x198   :  { %v546_v12 = vpop.f32.mrf.mxu3 }
 0x199   :  { %v547_v14 = vadd.f32 %v546_v12, %v2932_v6 }
 0x19b   :  { %v690_v18 = vsel %vm671_vm2, %v547_v14, -inf }
 0x19c   :  { %691 = vmax.xlane.f32.xlu1 %v690_v18 }
 0x1a0   :  { %v548_v19 = vpop.f32.mrf.mxu3 }
 0x1a1   :  { %v549_v21 = vadd.f32 %v548_v19, %v2939_v38 }
 0x1a3   :  { %v693_v22 = vsel %vm671_vm2, %v549_v21, -inf }
 0x1a4   :  { %694 = vmax.xlane.f32.xlu1 %v693_v22 }
 0x1a8   :  { %v576_v23 = vpop.f32.mrf.mxu3 }
 0x1a9   :  { %v2988_v53 = vadd.f32 %v576_v23, %v2932_v6 }
 0x1ab   :  { %v696_v7 = vsel %vm671_vm2, %v2988_v53, -inf }
 0x1b0   :  { %v578_v9 = vpop.f32.mrf.mxu3 }
 0x1b1   :  { %v2997_v25 = vadd.f32 %v578_v9, %v2939_v38 }
 0x1b8   :  { %v606_v24 = vpop.f32.mrf.mxu3 }
 0x1b9   :  { %v607_v26 = vadd.f32 %v606_v24, %v2932_v6 }
 0x1bb   :  { %v702_v27 = vsel %vm671_vm2, %v607_v26, -inf }
 0x1bc   :  { %703 = vmax.xlane.f32.xlu2 %v702_v27 }
 0x1c0   :  { %v608_v8 = vpop.f32.mrf.mxu3 }
 0x1c1   :  { %v609_v29 = vadd.f32 %v608_v8, %v2939_v38 }
 0x1c3   :  { %v705_v30 = vsel %vm671_vm2, %v609_v29, -inf }
 0x1c4   :  { %706 = vmax.xlane.f32.xlu2 %v705_v30 }
 0x1c8   :  { %v2958_v33 = vpop.f32.mrf.mxu3 }
 0x1cc   :  { %673 = vmax.xlane.f32.xlu2 %v672_v4 }
 0x1d0   :  { %v2962_v34 = vpop.f32.mrf.mxu3 }
 0x1d8   :  { %v666_v36 = vpop.f32.mrf.mxu3 }
 0x1d9   :  { %v2965_v37 = vadd.f32 %v666_v36, %v2932_v6 }
 0x1db   :  { %v714_v39 = vsel %vm671_vm2, %v2965_v37, -inf }
 0x1dc   :  { %715 = vmax.xlane.f32.xlu0 %v714_v39 }
 0x1e0   :  { %v668_v17 = vpop.f32.mrf.mxu3 }
 0x1e1   :  { %v2973_v41 = vadd.f32 %v668_v17, %v2939_v38 }
 0x1e3   :  { %v717_v43 = vsel %vm671_vm2, %v2973_v41, -inf }
 0x1e4   :  { %676 = vmax.xlane.f32.xlu0 %v675_v42  ;;  %718 = vmax.xlane.f32.xlu1 %v717_v43 }
 0x1ef   :  { %v680_v44 = vpop.xlane.xlu0 %679 }
 0x1f0   :  { %v722_v13 = vsub.f32 %v487_v16, %v680_v44 }
 0x1f2   :  { %v740_v45 = vmul.f32 1.442695, %v722_v13 }
 0x1f4   :  { %2546 = vpow2.f32 %v740_v45 }
 0x1f7   :  { %v683_v46 = vpop.xlane.xlu0 %682 }
 0x1f8   :  { %v723_v47 = vsub.f32 %v489_v63, %v683_v46  ;;  %v699_v63 = vsel %vm671_vm2, %v2997_v25, -inf }
 0x1fa   :  { %v2979_v48 = vpop.eup %2546  ;;  %v742_v10 = vmul.f32 1.442695, %v723_v47 }
 0x1fb   :  { %v774_v51 = vsel %vm671_vm2, %v2979_v48, 0.0 }
 0x1fc   :  { %2548 = vpow2.f32 %v742_v10  ;;  %775 = vadd.xlane.f32.xlu1 %v774_v51  ;;  %v3041_v51 = vadd.f32 %v2962_v34, %v2939_v38 }
 0x202   :  { %v2983_v50 = vpop.eup %2548 }
 0x203   :  { %v777_v62 = vsel %vm671_vm2, %v2983_v50, 0.0 }
 0x204   :  { %778 = vadd.xlane.f32.xlu2 %v777_v62 }
 0x20c   :  { %697 = vmax.xlane.f32.xlu2 %v696_v7  ;;  %v711_v7 = vsel %vm671_vm2, %v3041_v51, -inf }
 0x20f   :  { %v692_v54 = vpop.xlane.xlu1 %691 }
 0x210   :  { %v726_v55 = vsub.f32 %v547_v14, %v692_v54 }
 0x212   :  { %v748_v56 = vmul.f32 1.442695, %v726_v55 }
 0x214   :  { %2550 = vpow2.f32 %v748_v56 }
 0x217   :  { %v695_v57 = vpop.xlane.xlu1 %694 }
 0x218   :  { %v727_v58 = vsub.f32 %v549_v21, %v695_v57 }
 0x21a   :  { %v2992_v16 = vpop.eup %2550  ;;  %v750_v28 = vmul.f32 1.442695, %v727_v58 }
 0x21b   :  { %v786_v59 = vsel %vm671_vm2, %v2992_v16, 0.0 }
 0x21c   :  { %2552 = vpow2.f32 %v750_v28  ;;  %787 = vadd.xlane.f32.xlu0 %v786_v59 }
 0x222   :  { %v2999_v61 = vpop.eup %2552 }
 0x223   :  { %v789_v0 = vsel %vm671_vm2, %v2999_v61, 0.0 }
 0x224   :  { %700 = vmax.xlane.f32.xlu0 %v699_v63  ;;  %790 = vadd.xlane.f32.xlu1 %v789_v0 }
 0x22f   :  { %v704_v12 = vpop.xlane.xlu2 %703 }
 0x230   :  { %v730_v14 = vsub.f32 %v607_v26, %v704_v12 }
 0x232   :  { %v756_v18 = vmul.f32 1.442695, %v730_v14 }
 0x234   :  { %2554 = vpow2.f32 %v756_v18 }
 0x237   :  { %v707_v19 = vpop.xlane.xlu2 %706 }
 0x238   :  { %v731_v21 = vsub.f32 %v609_v29, %v707_v19 }
 0x23a   :  { %v3005_v22 = vpop.eup %2554  ;;  %v758_v23 = vmul.f32 1.442695, %v731_v21 }
 0x23b   :  { %v798_v9 = vsel %vm671_vm2, %v3005_v22, 0.0 }
 0x23c   :  { %2556 = vpow2.f32 %v758_v23  ;;  %799 = vadd.xlane.f32.xlu1 %v798_v9 }
 0x23f   :  { %v674_v24 = vpop.xlane.xlu2 %673 }
 0x240   :  { %v720_v27 = vsub.f32 %v2956_v31, %v674_v24 }
 0x242   :  { %v3010_v8 = vpop.eup %2556  ;;  %v736_v30 = vmul.f32 1.442695, %v720_v27 }
 0x243   :  { %v801_v26 = vsel %vm671_vm2, %v3010_v8, 0.0 }
 0x244   :  { %2558 = vpow2.f32 %v736_v30  ;;  %802 = vadd.xlane.f32.xlu2 %v801_v26 }
 0x24a   :  { %v3014_v29 = vpop.eup %2558 }
 0x24b   :  { %v768_v5 = vsel %vm671_vm2, %v3014_v29, 0.0 }
 0x24c   :  { %769 = vadd.xlane.f32.xlu2 %v768_v5 }
 0x24f   :  { %v716_v4 = vpop.xlane.xlu0 %715 }
 0x250   :  { %v734_v36 = vsub.f32 %v2965_v37, %v716_v4 }
 0x252   :  { %v764_v39 = vmul.f32 1.442695, %v734_v36 }
 0x254   :  { %2560 = vpow2.f32 %v764_v39 }
 0x257   :  { %v677_v31 = vpop.xlane.xlu0 %676  ;;  %v719_v40 = vpop.xlane.xlu1 %718 }
 0x258   :  { %v721_v17 = vsub.f32 %v2970_v15, %v677_v31  ;;  %v735_v42 = vsub.f32 %v2973_v41, %v719_v40  ;;  %v3035_v41 = vadd.f32 %v2943_v1, %v2932_v6 }
 0x25a   :  { %v3021_v43 = vpop.eup %2560  ;;  %v738_v44 = vmul.f32 1.442695, %v721_v17  ;;  %v766_v13 = vmul.f32 1.442695, %v735_v42  ;;  %v684_v10 = vsel %vm671_vm2, %v3035_v41, -inf }
 0x25b   :  { %v810_v45 = vsel %vm671_vm2, %v3021_v43, 0.0 }
 0x25c   :  { %2562 = vpow2.f32 %v738_v44  ;;  %811 = vadd.xlane.f32.xlu0 %v810_v45 }
 0x25d   :  { %2564 = vpow2.f32 %v766_v13  ;;  %v2531_v13 = vld [vmem:[%s3542_s2 + $0x38] sm:$0xff] }
 0x262   :  { %v3025_v46 = vpop.eup %2562 }
 0x263   :  { %v3027_v37 = vpop.eup %2564  ;;  %v771_v47 = vsel %vm671_vm2, %v3025_v46, 0.0 }
 0x264   :  { %772 = vadd.xlane.f32.xlu0 %v771_v47  ;;  %v813_v15 = vsel %vm671_vm2, %v3027_v37, 0.0 }
 0x265   :  { %814 = vadd.xlane.f32.xlu1 %v813_v15 }
 0x26c   :  { %685 = vmax.xlane.f32.xlu0 %v684_v10 }
 0x26f   :  { %v776_v62 = vpop.xlane.xlu1 %775 }
 0x270   :  { %2566 = vrcp.f32 %v776_v62 }
 0x274   :  { %712 = vmax.xlane.f32.xlu0 %v711_v7 }
 0x276   :  { %v2567_v55 = vpop.eup %2566 }
 0x277   :  { %v779_v54 = vpop.xlane.xlu2 %778  ;;  %v834_v1 = vmul.f32 %v2567_v55, %v2979_v48  ;;  %v2526_v55 = vld [vmem:[%s3540_s1 + $0x30] sm:$0xff] }
 0x278   :  { %2568 = vrcp.f32 %v779_v54  ;;  %v2527_v54 = vld [vmem:[%s3540_s1 + $0x38] sm:$0xff] }
 0x279   :  { %v850_v57 = vpack.c.bf16 %v834_v1, %v834_v1  ;;  %v2525_v1 = vld [vmem:[%s3540_s1 + $0x28] sm:$0xff] }
 0x27b   :  { %v894_v0 = vunpack.c.l.b16 %v850_v57 }
 0x27e   :  { %v2569_v56 = vpop.eup %2568 }
 0x27f   :  { %v835_v58 = vmul.f32 %v2569_v56, %v2983_v50  ;;  %v698_v28 = vpop.xlane.xlu2 %697  ;;  %v3055_v50 = vadd.f32 %v2945_v2, %v2939_v38 }
 0x280   :  { %v728_v59 = vsub.f32 %v2988_v53, %v698_v28 }
 0x281   :  { %v851_v34 = vpack.c.bf16 %v835_v58, %v835_v58  ;;  %v687_v53 = vsel %vm671_vm2, %v3055_v50, -inf  ;;  %v2524_v58 = vld [vmem:[%s3540_s1 + $0x20] sm:$0xff] }
 0x282   :  { %v752_v63 = vmul.f32 1.442695, %v728_v59 }
 0x283   :  { %v895_v12 = vunpack.c.l.b16 %v851_v34 }
 0x284   :  { %2570 = vpow2.f32 %v752_v63 }
 0x285   :  { %v896_v14 = vpack.c.b16 %v895_v12, %v894_v0 }
 0x287   :  { %2353 = vmatmul.msk.bf16.vlgmr.msrb.gmra.mxu0 %vm671_vm2, %v896_v14 }
 0x288   :  { %1235 = vmatpush.bf16.msrb.mxu0 %v2531_v13 }
 0x28a   :  { %v3049_v18 = vpop.eup %2570 }
 0x28b   :  { %v792_v48 = vsel %vm671_vm2, %v3049_v18, 0.0 }
 0x28c   :  { %793 = vadd.xlane.f32.xlu1 %v792_v48 }
 0x28f   :  { %v788_v19 = vpop.xlane.xlu0 %787 }
 0x290   :  { %2572 = vrcp.f32 %v788_v19 }
 0x294   :  { %688 = vmax.xlane.f32.xlu1 %v687_v53 }
 0x296   :  { %v2573_v9 = vpop.eup %2572 }
 0x297   :  { %v701_v21 = vpop.xlane.xlu0 %700  ;;  %v791_v23 = vpop.xlane.xlu1 %790  ;;  %v838_v30 = vmul.f32 %v2573_v9, %v2992_v16 }
 0x298   :  { %v729_v24 = vsub.f32 %v2997_v25, %v701_v21  ;;  %2574 = vrcp.f32 %v791_v23  ;;  %v3068_v25 = vadd.f32 %v2958_v33, %v2932_v6  ;;  %v2530_v6 = vld [vmem:[%s3542_s2 + $0x30] sm:$0xff] }
 0x299   :  { %v854_v5 = vpack.c.bf16 %v838_v30, %v838_v30  ;;  %1236 = vmatpush.bf16.msrb.mxu0 %v2530_v6 }
 0x29a   :  { %v754_v27 = vmul.f32 1.442695, %v729_v24  ;;  %v708_v16 = vsel %vm671_vm2, %v3068_v25, -inf }
 0x29b   :  { %v950_v36 = vunpack.c.l.b16 %v854_v5 }
 0x29c   :  { %2576 = vpow2.f32 %v754_v27 }
 0x29e   :  { %v2575_v26 = vpop.eup %2574 }
 0x29f   :  { %v839_v38 = vmul.f32 %v2575_v26, %v2999_v61 }
 0x2a1   :  { %v855_v2 = vpack.c.bf16 %v839_v38, %v839_v38 }
 0x2a2   :  { %v3062_v4 = vpop.eup %2576 }
 0x2a3   :  { %v951_v39 = vunpack.c.l.b16 %v855_v2  ;;  %v795_v31 = vsel %vm671_vm2, %v3062_v4, 0.0 }
 0x2a4   :  { %796 = vadd.xlane.f32.xlu2 %v795_v31 }
 0x2a5   :  { %v952_v40 = vpack.c.b16 %v951_v39, %v950_v36 }
 0x2a7   :  { %2355 = vmatmul.msk.bf16.vlgmr.msra.gmra.mxu2 %vm671_vm2, %v952_v40 }
 0x2a8   :  { %1137 = vmatpush.bf16.msra.mxu2 %v2527_v54 }
 0x2ac   :  { %709 = vmax.xlane.f32.xlu2 %v708_v16  ;;  %1138 = vmatpush.bf16.msra.mxu2 %v2526_v55 }
 0x2af   :  { %v800_v61 = vpop.xlane.xlu1 %799 }
 0x2b0   :  { %2578 = vrcp.f32 %v800_v61  ;;  %1139 = vmatpush.bf16.msra.mxu2 %v2525_v1 }
 0x2b4   :  { %1140 = vmatpush.bf16.msra.mxu2 %v2524_v58 }
 0x2b6   :  { %v2579_v42 = vpop.eup %2578 }
 0x2b7   :  { %v803_v17 = vpop.xlane.xlu2 %802  ;;  %v842_v44 = vmul.f32 %v2579_v42, %v3005_v22  ;;  %v2529_v22 = vld [vmem:[%s3542_s2 + $0x28] sm:$0xff] }
 0x2b8   :  { %2580 = vrcp.f32 %v803_v17  ;;  %1237 = vmatpush.bf16.msrb.mxu0 %v2529_v22 }
 0x2b9   :  { %v858_v45 = vpack.c.bf16 %v842_v44, %v842_v44 }
 0x2bb   :  { %v1006_v10 = vunpack.c.l.b16 %v858_v45 }
 0x2be   :  { %v2581_v33 = vpop.eup %2580 }
 0x2bf   :  { %v843_v47 = vmul.f32 %v2581_v33, %v3010_v8  ;;  %v2528_v8 = vld [vmem:[%s3542_s2 + $0x20] sm:$0xff]  ;;  %v770_v56 = vpop.xlane.xlu2 %769 }
 0x2c0   :  { %1238 = vmatpush.bf16.msrb.mxu0 %v2528_v8  ;;  %2582 = vrcp.f32 %v770_v56 }
 0x2c1   :  { %v859_v15 = vpack.c.bf16 %v843_v47, %v843_v47 }
 0x2c3   :  { %v1007_v62 = vunpack.c.l.b16 %v859_v15 }
 0x2c5   :  { %v1008_v7 = vpack.c.b16 %v1007_v62, %v1006_v10 }
 0x2c6   :  { %v2583_v59 = vpop.eup %2582 }
 0x2c7   :  { %2357 = vmatmul.msk.bf16.vlgmr.msra.gmra.mxu0 %vm671_vm2, %v1008_v7  ;;  %v832_v0 = vmul.f32 %v2583_v59, %v3014_v29 }
 0x2c9   :  { %v848_v19 = vpack.c.bf16 %v832_v0, %v832_v0 }
 0x2cb   :  { %v866_v5 = vunpack.c.l.b16 %v848_v19 }
 0x2cf   :  { %v812_v57 = vpop.xlane.xlu0 %811 }
 0x2d0   :  { %2584 = vrcp.f32 %v812_v57 }
 0x2d6   :  { %v2585_v63 = vpop.eup %2584 }
 0x2d7   :  { %v773_v28 = vpop.xlane.xlu0 %772  ;;  %2416 = vmatmul.msk.bf16.vlgmr.msrb.gmra.mxu0 %vm128_vm0, %v2765_v32  ;;  %v846_v12 = vmul.f32 %v2585_v63, %v3021_v43 }
 0x2d8   :  { %2586 = vrcp.f32 %v773_v28  ;;  %v815_v34 = vpop.xlane.xlu1 %814 }
 0x2d9   :  { %2588 = vrcp.f32 %v815_v34  ;;  %v862_v23 = vpack.c.bf16 %v846_v12, %v846_v12 }
 0x2db   :  { %v1062_v2 = vunpack.c.l.b16 %v862_v23 }
 0x2de   :  { %v2587_v14 = vpop.eup %2586 }
 0x2df   :  { %v2589_v48 = vpop.eup %2588  ;;  %v833_v53 = vmul.f32 %v2587_v14, %v3025_v46  ;;  %v686_v21 = vpop.xlane.xlu0 %685 }
 0x2e0   :  { %v847_v9 = vmul.f32 %v2589_v48, %v3027_v37  ;;  %v724_v24 = vsub.f32 %v3035_v41, %v686_v21 }
 0x2e1   :  { %v849_v27 = vpack.c.bf16 %v833_v53, %v833_v53 }
 0x2e2   :  { %v863_v30 = vpack.c.bf16 %v847_v9, %v847_v9  ;;  %v744_v26 = vmul.f32 1.442695, %v724_v24 }
 0x2e3   :  { %v867_v38 = vunpack.c.l.b16 %v849_v27 }
 0x2e4   :  { %v1063_v29 = vunpack.c.l.b16 %v863_v30  ;;  %2590 = vpow2.f32 %v744_v26 }
 0x2e5   :  { %v868_v43 = vpack.c.b16 %v867_v38, %v866_v5 }
 0x2e6   :  { %v1064_v36 = vpack.c.b16 %v1063_v29, %v1062_v2 }
 0x2e7   :  { %2352 = vmatmul.msk.bf16.vlgmr.msrb.gmra.mxu3 %vm671_vm2, %v868_v43  ;;  %v713_v39 = vpop.xlane.xlu0 %712  ;;  %2417 = vmatmul.msk.bf16.gmra.mxu0 %vm128_vm0, %v2794_v49 }
 0x2e8   :  { %v733_v46 = vsub.f32 %v3041_v51, %v713_v39  ;;  %2359 = vmatmul.msk.bf16.vlgmr.msrb.gmra.mxu2 %vm671_vm2, %v1064_v36  ;;  %2542 = vmatpush.bf16.msrb.mxu3 %v2527_v54 }
 0x2ea   :  { %v3112_v37 = vpop.eup %2590  ;;  %v762_v41 = vmul.f32 1.442695, %v733_v46 }
 0x2eb   :  { %v780_v31 = vsel %vm671_vm2, %v3112_v37, 0.0 }
 0x2ec   :  { %2592 = vpow2.f32 %v762_v41  ;;  %781 = vadd.xlane.f32.xlu1 %v780_v31  ;;  %2543 = vmatpush.bf16.msrb.mxu3 %v2526_v55 }
 0x2f0   :  { %2544 = vmatpush.bf16.msrb.mxu3 %v2525_v1 }
 0x2f2   :  { %v3116_v40 = vpop.eup %2592 }
 0x2f3   :  { %v807_v16 = vsel %vm671_vm2, %v3116_v40, 0.0 }
 0x2f4   :  { %808 = vadd.xlane.f32.xlu1 %v807_v16  ;;  %2545 = vmatpush.bf16.msrb.mxu3 %v2524_v58 }
 0x2f7   :  { %2418 = vmatmul.msk.bf16.gmra.mxu0 %vm128_vm0, %v2813_v60 }
 0x2f8   :  { %2384 = vmatmul.msk.bf16.vlgmr.msra.gmra.mxu2 %vm128_vm0, %v2765_v32 }
 0x2ff   :  { %v794_v51 = vpop.xlane.xlu1 %793 }
 0x307   :  { %v689_v61 = vpop.xlane.xlu1 %688  ;;  %2419 = vmatmul.msk.bf16.gmra.mxu0 %vm128_vm0, %v2827_v3 }
 0x308   :  { %2385 = vmatmul.msk.bf16.gmra.mxu2 %vm128_vm0, %v2794_v49  ;;  %v725_v17 = vsub.f32 %v3055_v50, %v689_v61 }
 0x30a   :  { %v746_v42 = vmul.f32 1.442695, %v725_v17 }
 0x30c   :  { %2594 = vpow2.f32 %v746_v42 }
 0x30d   :  { %2596 = vrcp.f32 %v794_v51 }
 0x312   :  { %v3129_v44 = vpop.eup %2594 }
 0x313   :  { %v783_v13 = vsel %vm671_vm2, %v3129_v44, 0.0  ;;  %v2597_v33 = vpop.eup %2596 }
 0x314   :  { %784 = vadd.xlane.f32.xlu2 %v783_v13  ;;  %v840_v50 = vmul.f32 %v2597_v33, %v3049_v18 }
 0x316   :  { %v856_v47 = vpack.c.bf16 %v840_v50, %v840_v50 }
 0x317   :  { %v797_v6 = vpop.xlane.xlu2 %796  ;;  %2420 = vmatmul.msk.bf16.gmra.mxu0 %vm128_vm0, %v2730_v11 }
 0x318   :  { %2598 = vrcp.f32 %v797_v6  ;;  %2386 = vmatmul.msk.bf16.gmra.mxu2 %vm128_vm0, %v2813_v60  ;;  %v978_v54 = vunpack.c.l.b16 %v856_v47 }
 0x31e   :  { %v2599_v45 = vpop.eup %2598 }
 0x31f   :  { %v841_v15 = vmul.f32 %v2599_v45, %v3062_v4  ;;  %v710_v10 = vpop.xlane.xlu2 %709  ;;  %v3147_v4 = vpop.f32.mrf.mxu0 }
 0x320   :  { %v732_v62 = vsub.f32 %v3068_v25, %v710_v10 }
 0x321   :  { %v857_v7 = vpack.c.bf16 %v841_v15, %v841_v15 }
 0x322   :  { %v760_v22 = vmul.f32 1.442695, %v732_v62 }
 0x323   :  { %v979_v8 = vunpack.c.l.b16 %v857_v7 }
 0x324   :  { %2600 = vpow2.f32 %v760_v22 }
 0x325   :  { %v980_v55 = vpack.c.b16 %v979_v8, %v978_v54 }
 0x327   :  { %2356 = vmatmul.msk.bf16.vlgmr.msra.gmra.mxu3 %vm671_vm2, %v980_v55  ;;  %2421 = vmatmul.msk.bf16.gmra.mxu0 %vm128_vm0, %v2746_v20  ;;  %v3153_v25 = vpop.f32.mrf.mxu0 }
 0x32a   :  { %v3143_v1 = vpop.eup %2600  ;;  %v3165_v28 = vpop.f32.mrf.mxu2 }
 0x32b   :  { %v804_v18 = vsel %vm671_vm2, %v3143_v1, 0.0 }
 0x32c   :  { %805 = vadd.xlane.f32.xlu0 %v804_v18 }
 0x332   :  { %v3167_v48 = vpop.f32.mrf.mxu2 }
 0x337   :  { %2387 = vmatmul.msk.bf16.vlgmr.msrb.gmra.mxu3 %vm128_vm0, %v2827_v3  ;;  %2422 = vmatmul.msk.bf16.gmra.mxu0 %vm128_vm0, %v2769_v35 }
 0x344   :  { %v3155_v56 = vpop.f32.mrf.mxu0 }
 0x347   :  { %2388 = vmatmul.msk.bf16.gmra.mxu3 %vm128_vm0, %v2730_v11  ;;  %2423 = vmatmul.msk.bf16.gmra.mxu0 %vm128_vm0, %v2798_v52 }
 0x34c   :  { %v3161_v57 = vpop.f32.mrf.mxu0 }
 0x354   :  { %v1240_v58 = vpop.f32.mrf.mxu0 }
 0x355   :  { %v1378_v59 = vpack.c.bf16 %v1240_v58, %v1240_v58 }
 0x357   :  { %2389 = vmatmul.msk.bf16.gmra.mxu3 %vm128_vm0, %v2746_v20  ;;  %v1420_v63 = vunpack.c.l.b16 %v1378_v59 }
 0x35c   :  { %v1242_v34 = vpop.f32.mrf.mxu0 }
 0x35d   :  { %v1379_v0 = vpack.c.bf16 %v1242_v34, %v1242_v34 }
 0x35f   :  { %v1421_v12 = vunpack.c.l.b16 %v1379_v0  ;;  %v782_v41 = vpop.xlane.xlu1 %781 }
 0x360   :  { %2602 = vrcp.f32 %v782_v41 }
 0x361   :  { %v1422_v14 = vpack.c.b16 %v1421_v12, %v1420_v63 }
 0x363   :  { %v1427_v19 = vsel %vm440_vm1, %v1422_v14, 0 }
 0x364   :  { %1436 = vmatpush.bf16.xpose.msrb.mxu2 %v1427_v19  ;;  %v1245_v53 = vpop.f32.mrf.mxu0 }
 0x365   :  { %v1380_v21 = vpack.c.bf16 %v1245_v53, %v1245_v53 }
 0x366   :  { %v2603_v50 = vpop.eup %2602 }
 0x367   :  { %2390 = vmatmul.msk.bf16.gmra.mxu3 %vm128_vm0, %v2769_v35  ;;  %v1450_v24 = vunpack.c.l.b16 %v1380_v21  ;;  %v836_v10 = vmul.f32 %v2603_v50, %v3112_v37 }
 0x369   :  { %v852_v8 = vpack.c.bf16 %v836_v10, %v836_v10 }
 0x36b   :  { %v3172_v23 = vpop.f32.mrf.mxu2  ;;  %v922_v34 = vunpack.c.l.b16 %v852_v8 }
 0x36c   :  { %v1247_v9 = vpop.f32.mrf.mxu0 }
 0x36d   :  { %v1381_v27 = vpack.c.bf16 %v1247_v9, %v1247_v9 }
 0x36f   :  { %v1451_v30 = vunpack.c.l.b16 %v1381_v27  ;;  %v3184_v27 = vpop.f32.mrf.mxu3 }
 0x371   :  { %v1452_v26 = vpack.c.b16 %v1451_v30, %v1450_v24  ;;  %v809_v24 = vpop.xlane.xlu1 %808 }
 0x373   :  { %v3174_v5 = vpop.f32.mrf.mxu2  ;;  %v1457_v38 = vsel %vm440_vm1, %v1452_v26, 0 }
 0x374   :  { %v1250_v2 = vpop.f32.mrf.mxu0  ;;  %1466 = vmatpush.bf16.xpose.msra.mxu2 %v1457_v38 }
 0x375   :  { %v1382_v39 = vpack.c.bf16 %v1250_v2, %v1250_v2 }
 0x377   :  { %2391 = vmatmul.msk.bf16.gmra.mxu3 %vm128_vm0, %v2798_v52  ;;  %v1480_v16 = vunpack.c.l.b16 %v1382_v39 }
 0x37b   :  { %v1142_v29 = vpop.f32.mrf.mxu2 }
 0x37c   :  { %v1252_v43 = vpop.f32.mrf.mxu0  ;;  %v1182_v36 = vmul.f32 0.17677669, %v1142_v29 }
 0x37d   :  { %v1383_v46 = vpack.c.bf16 %v1252_v43, %v1252_v43 }
 0x37e   :  { %v1362_v31 = vpack.c.bf16 %v1182_v36, %v1182_v36 }
 0x37f   :  { %v1481_v51 = vunpack.c.l.b16 %v1383_v46  ;;  %v3188_v46 = vpop.f32.mrf.mxu3 }
 0x380   :  { %v1415_v42 = vunpack.c.l.b16 %v1362_v31 }
 0x381   :  { %v1482_v6 = vpack.c.b16 %v1481_v51, %v1480_v16 }
 0x383   :  { %v1144_v61 = vpop.f32.mrf.mxu2  ;;  %v1487_v15 = vsel %vm440_vm1, %v1482_v6, 0 }
 0x384   :  { %v1183_v17 = vmul.f32 0.17677669, %v1144_v61  ;;  %v1255_v7 = vpop.f32.mrf.mxu0 }
 0x385   :  { %v1384_v59 = vpack.c.bf16 %v1255_v7, %v1255_v7 }
 0x386   :  { %v1363_v13 = vpack.c.bf16 %v1183_v17, %v1183_v17 }
 0x387   :  { %v785_v33 = vpop.xlane.xlu2 %784  ;;  %v1510_v21 = vunpack.c.l.b16 %v1384_v59 }
 0x388   :  { %v1416_v45 = vunpack.c.l.b16 %v1363_v13  ;;  %2604 = vrcp.f32 %v785_v33 }
 0x389   :  { %2606 = vrcp.f32 %v809_v24 }
 0x38a   :  { %v1417_v47 = vpack.c.b16 %v1416_v45, %v1415_v42 }
 0x38b   :  { %v1147_v62 = vpop.f32.mrf.mxu2 }
 0x38c   :  { %2458 = vmatmul.msk.bf16.vlgmr.msrb.gmra.mxu2 %vm440_vm1, %v1417_v47  ;;  %v1184_v54 = vmul.f32 0.17677669, %v1147_v62  ;;  %v1257_v19 = vpop.f32.mrf.mxu0 }
 0x38d   :  { %1496 = vmatpush.bf16.xpose.msrb.mxu2 %v1487_v15  ;;  %v1385_v9 = vpack.c.bf16 %v1257_v19, %v1257_v19 }
 0x38e   :  { %v2605_v22 = vpop.eup %2604  ;;  %v1364_v58 = vpack.c.bf16 %v1184_v54, %v1184_v54 }
 0x38f   :  { %v837_v55 = vmul.f32 %v2605_v22, %v3129_v44  ;;  %v1511_v44 = vunpack.c.l.b16 %v1385_v9  ;;  %v2607_v39 = vpop.eup %2606 }
 0x390   :  { %v1445_v37 = vunpack.c.l.b16 %v1364_v58  ;;  %v845_v31 = vmul.f32 %v2607_v39, %v3116_v40 }
 0x391   :  { %v853_v18 = vpack.c.bf16 %v837_v55, %v837_v55  ;;  %v1512_v38 = vpack.c.b16 %v1511_v44, %v1510_v21 }
 0x392   :  { %v861_v6 = vpack.c.bf16 %v845_v31, %v845_v31 }
 0x393   :  { %v923_v63 = vunpack.c.l.b16 %v853_v18  ;;  %v1149_v0 = vpop.f32.mrf.mxu2  ;;  %v1517_v29 = vsel %vm440_vm1, %v1512_v38, 0 }
 0x394   :  { %v1185_v12 = vmul.f32 0.17677669, %v1149_v0  ;;  %v1260_v61 = vpop.f32.mrf.mxu0  ;;  %v1035_v62 = vunpack.c.l.b16 %v861_v6 }
 0x395   :  { %v924_v14 = vpack.c.b16 %v923_v63, %v922_v34  ;;  %v1386_v10 = vpack.c.bf16 %v1260_v61, %v1260_v61 }
 0x396   :  { %v1365_v53 = vpack.c.bf16 %v1185_v12, %v1185_v12 }
 0x397   :  { %2354 = vmatmul.msk.bf16.vlgmr.msra.gmra.mxu1 %vm671_vm2, %v924_v14  ;;  %v1540_v54 = vunpack.c.l.b16 %v1386_v10 }
 0x398   :  { %v1446_v30 = vunpack.c.l.b16 %v1365_v53 }
 0x39a   :  { %v1447_v26 = vpack.c.b16 %v1446_v30, %v1445_v37 }
 0x39b   :  { %v1152_v2 = vpop.f32.mrf.mxu2 }
 0x39c   :  { %2459 = vmatmul.msk.bf16.vlgmr.msra.gmra.mxu2 %vm440_vm1, %v1447_v26  ;;  %v1186_v43 = vmul.f32 0.17677669, %v1152_v2  ;;  %v1262_v22 = vpop.f32.mrf.mxu0 }
 0x39d   :  { %1526 = vmatpush.bf16.xpose.msra.mxu2 %v1517_v29  ;;  %v1387_v8 = vpack.c.bf16 %v1262_v22, %v1262_v22 }
 0x39e   :  { %v1366_v41 = vpack.c.bf16 %v1186_v43, %v1186_v43 }
 0x39f   :  { %v806_v36 = vpop.xlane.xlu0 %805  ;;  %v1541_v55 = vunpack.c.l.b16 %v1387_v8 }
 0x3a0   :  { %2608 = vrcp.f32 %v806_v36  ;;  %v1475_v42 = vunpack.c.l.b16 %v1366_v41 }
 0x3a3   :  { %v1154_v16 = vpop.f32.mrf.mxu2 }
 0x3a4   :  { %v1187_v51 = vmul.f32 0.17677669, %v1154_v16  ;;  %v1265_v43 = vpop.f32.mrf.mxu0 }
 0x3a5   :  { %v1388_v41 = vpack.c.bf16 %v1265_v43, %v1265_v43 }
 0x3a6   :  { %v2609_v17 = vpop.eup %2608  ;;  %v1367_v13 = vpack.c.bf16 %v1187_v51, %v1187_v51 }
 0x3a7   :  { %v844_v33 = vmul.f32 %v2609_v17, %v3143_v1  ;;  %v1542_v1 = vpack.c.b16 %v1541_v55, %v1540_v54  ;;  %v1570_v16 = vunpack.c.l.b16 %v1388_v41 }
 0x3a8   :  { %v1476_v50 = vunpack.c.l.b16 %v1367_v13 }
 0x3a9   :  { %v860_v45 = vpack.c.bf16 %v844_v33, %v844_v33  ;;  %v1547_v58 = vsel %vm440_vm1, %v1542_v1, 0 }
 0x3aa   :  { %v1477_v47 = vpack.c.b16 %v1476_v50, %v1475_v42  ;;  %v3192_v15 = vpop.f32.mrf.mxu3 }
 0x3ab   :  { %v1034_v7 = vunpack.c.l.b16 %v860_v45 }
 0x3ac   :  { %2460 = vmatmul.msk.bf16.vlgmr.msrb.gmra.mxu2 %vm440_vm1, %v1477_v47  ;;  %v1267_v36 = vpop.f32.mrf.mxu0 }
 0x3ad   :  { %v1036_v40 = vpack.c.b16 %v1035_v62, %v1034_v7  ;;  %1556 = vmatpush.bf16.xpose.msrb.mxu2 %v1547_v58  ;;  %v1389_v31 = vpack.c.bf16 %v1267_v36, %v1267_v36 }
 0x3af   :  { %2358 = vmatmul.msk.bf16.vlgmr.msrb.gmra.mxu1 %vm671_vm2, %v1036_v40  ;;  %v1571_v61 = vunpack.c.l.b16 %v1389_v31 }
 0x3b1   :  { %v1572_v42 = vpack.c.b16 %v1571_v61, %v1570_v16 }
 0x3b2   :  { %v3196_v18 = vpop.f32.mrf.mxu3 }
 0x3b3   :  { %v1577_v47 = vsel %vm440_vm1, %v1572_v42, 0 }
 0x3b4   :  { %v1270_v45 = vpop.f32.mrf.mxu0 }
 0x3b5   :  { %v1390_v7 = vpack.c.bf16 %v1270_v45, %v1270_v45 }
 0x3b7   :  { %v1600_v54 = vunpack.c.l.b16 %v1390_v7 }
 0x3ba   :  { %v1157_v59 = vpop.f32.mrf.mxu3 }
 0x3bb   :  { %v1188_v34 = vmul.f32 0.17677669, %v1157_v59 }
 0x3bc   :  { %v1272_v22 = vpop.f32.mrf.mxu0 }
 0x3bd   :  { %v1368_v0 = vpack.c.bf16 %v1188_v34, %v1188_v34  ;;  %v1391_v55 = vpack.c.bf16 %v1272_v22, %v1272_v22 }
 0x3bf   :  { %v1505_v19 = vunpack.c.l.b16 %v1368_v0  ;;  %v1601_v1 = vunpack.c.l.b16 %v1391_v55 }
 0x3c1   :  { %v1602_v59 = vpack.c.b16 %v1601_v1, %v1600_v54 }
 0x3c2   :  { %v1159_v63 = vpop.f32.mrf.mxu3 }
 0x3c3   :  { %v1189_v12 = vmul.f32 0.17677669, %v1159_v63  ;;  %v1607_v0 = vsel %vm440_vm1, %v1602_v59, 0 }
 0x3c5   :  { %v1369_v14 = vpack.c.bf16 %v1189_v12, %v1189_v12  ;;  %v1275_v12 = vpop.f32.mrf.mxu0 }
 0x3c7   :  { %v1506_v37 = vunpack.c.l.b16 %v1369_v14 }
 0x3c9   :  { %v1507_v53 = vpack.c.b16 %v1506_v37, %v1505_v19 }
 0x3ca   :  { %v1162_v21 = vpop.f32.mrf.mxu3 }
 0x3cb   :  { %2461 = vmatmul.msk.bf16.vlgmr.msra.gmra.mxu2 %vm440_vm1, %v1507_v53  ;;  %v1190_v9 = vmul.f32 0.17677669, %v1162_v21  ;;  %v1392_v21 = vpack.c.bf16 %v1275_v12, %v1275_v12  ;;  %v2535_v12 = vld [vmem:[%s3543_s3 + $0x38] sm:$0xff] }
 0x3cc   :  { %1586 = vmatpush.bf16.xpose.msra.mxu2 %v1577_v47  ;;  %1317 = vmatpush.bf16.msra.mxu1 %v2535_v12 }
 0x3cd   :  { %v1370_v24 = vpack.c.bf16 %v1190_v9, %v1190_v9 }
 0x3cf   :  { %v1535_v26 = vunpack.c.l.b16 %v1370_v24  ;;  %v3208_v24 = vld [vmem:[%s3544_s4 + $0x10] sm:$0xff] }
 0x3d2   :  { %v1164_v30 = vpop.f32.mrf.mxu3 }
 0x3d3   :  { %v1191_v44 = vmul.f32 0.17677669, %v1164_v30  ;;  %v1277_v30 = vpop.f32.mrf.mxu0 }
 0x3d5   :  { %v1371_v38 = vpack.c.bf16 %v1191_v44, %v1191_v44  ;;  %v1630_v44 = vunpack.c.l.b16 %v1392_v21 }
 0x3d7   :  { %v1536_v2 = vunpack.c.l.b16 %v1371_v38  ;;  %v1393_v38 = vpack.c.bf16 %v1277_v30, %v1277_v30 }
 0x3d9   :  { %v1537_v29 = vpack.c.b16 %v1536_v2, %v1535_v26  ;;  %v1631_v43 = vunpack.c.l.b16 %v1393_v38 }
 0x3da   :  { %v1167_v39 = vpop.f32.mrf.mxu3 }
 0x3db   :  { %2462 = vmatmul.msk.bf16.vlgmr.msrb.gmra.mxu2 %vm440_vm1, %v1537_v29  ;;  %v1192_v51 = vmul.f32 0.17677669, %v1167_v39  ;;  %v1632_v41 = vpack.c.b16 %v1631_v43, %v1630_v44 }
 0x3dc   :  { %1616 = vmatpush.bf16.xpose.msrb.mxu2 %v1607_v0 }
 0x3dd   :  { %v1372_v17 = vpack.c.bf16 %v1192_v51, %v1192_v51  ;;  %v1637_v61 = vsel %vm440_vm1, %v1632_v41, 0 }
 0x3df   :  { %v1565_v50 = vunpack.c.l.b16 %v1372_v17  ;;  %v3221_v17 = vld [vmem:[%s3544_s4 + $0x18] sm:$0xff] }
 0x3e2   :  { %v1169_v13 = vpop.f32.mrf.mxu3 }
 0x3e3   :  { %v1193_v6 = vmul.f32 0.17677669, %v1169_v13 }
 0x3e5   :  { %v1373_v33 = vpack.c.bf16 %v1193_v6, %v1193_v6 }
 0x3e7   :  { %v1566_v10 = vunpack.c.l.b16 %v1373_v33 }
 0x3e9   :  { %v1567_v62 = vpack.c.b16 %v1566_v10, %v1565_v50 }
 0x3ea   :  { %v1172_v40 = vpop.f32.mrf.mxu3 }
 0x3eb   :  { %2463 = vmatmul.msk.bf16.vlgmr.msra.gmra.mxu2 %vm440_vm1, %v1567_v62  ;;  %v1194_v8 = vmul.f32 0.17677669, %v1172_v40 }
 0x3ec   :  { %1646 = vmatpush.bf16.xpose.msra.mxu2 %v1637_v61 }
 0x3ed   :  { %v1374_v58 = vpack.c.bf16 %v1194_v8, %v1194_v8 }
 0x3ef   :  { %v1595_v14 = vunpack.c.l.b16 %v1374_v58 }
 0x3f2   :  { %v1174_v34 = vpop.f32.mrf.mxu3 }
 0x3f3   :  { %v1195_v63 = vmul.f32 0.17677669, %v1174_v34 }
 0x3f5   :  { %v1375_v19 = vpack.c.bf16 %v1195_v63, %v1195_v63 }
 0x3f7   :  { %v1596_v37 = vunpack.c.l.b16 %v1375_v19  ;;  %v2533_v19 = vld [vmem:[%s3543_s3 + $0x28] sm:$0xff] }
 0x3f9   :  { %v1597_v53 = vpack.c.b16 %v1596_v37, %v1595_v14  ;;  %v2534_v14 = vld [vmem:[%s3543_s3 + $0x30] sm:$0xff]  ;;  %v2532_v37 = vld [vmem:[%s3543_s3 + $0x20] sm:$0xff] }
 0x3fa   :  { %v1177_v9 = vpop.f32.mrf.mxu3  ;;  %1318 = vmatpush.bf16.msra.mxu1 %v2534_v14 }
 0x3fb   :  { %2464 = vmatmul.msk.bf16.vlgmr.msrb.gmra.mxu2 %vm440_vm1, %v1597_v53  ;;  %v1196_v26 = vmul.f32 0.17677669, %v1177_v9 }
 0x3fd   :  { %v1376_v39 = vpack.c.bf16 %v1196_v26, %v1196_v26 }
 0x3fe   :  { %1319 = vmatpush.bf16.msra.mxu1 %v2533_v19 }
 0x3ff   :  { %v1625_v42 = vunpack.c.l.b16 %v1376_v39 }
 0x402   :  { %v1179_v31 = vpop.f32.mrf.mxu3  ;;  %1320 = vmatpush.bf16.msra.mxu1 %v2532_v37 }
 0x403   :  { %v1197_v51 = vmul.f32 0.17677669, %v1179_v31 }
 0x405   :  { %v1377_v13 = vpack.c.bf16 %v1197_v51, %v1197_v51  ;;  %2448 = vmatmul.msk.bf16.vlgmr.msra.gmra.mxu1 %vm128_vm0, %v2765_v32 }
 0x407   :  { %v1626_v50 = vunpack.c.l.b16 %v1377_v13 }
 0x409   :  { %v1627_v47 = vpack.c.b16 %v1626_v50, %v1625_v42 }
 0x40b   :  { %2465 = vmatmul.msk.bf16.vlgmr.msra.gmra.mxu2 %vm440_vm1, %v1627_v47 }
 0x40f   :  { %v1438_v2 = vpop.f32.mrf.mxu2 }
 0x410   :  { %v3211_v29 = vadd.f32 %v3208_v24, %v1438_v2 }
 0x412   :  { %v1653_v36 = vsel %vm671_vm2, %v3211_v29, -inf }
 0x413   :  { %1654 = vmax.xlane.f32.xlu2 %v1653_v36 }
 0x414   :  { %v3215_v16 = vpop.f32.mrf.mxu1 }
 0x415   :  { %2449 = vmatmul.msk.bf16.gmra.mxu1 %vm128_vm0, %v2794_v49 }
 0x417   :  { %v1440_v6 = vpop.f32.mrf.mxu2 }
 0x418   :  { %v1441_v33 = vadd.f32 %v3221_v17, %v1440_v6 }
 0x41a   :  { %v1656_v45 = vsel %vm671_vm2, %v1441_v33, -inf }
 0x41b   :  { %1657 = vmax.xlane.f32.xlu0 %v1656_v45 }
 0x41c   :  { %v3225_v10 = vpop.f32.mrf.mxu1 }
 0x41d   :  { %v1090_v62 = vpack.c.bf16 %v3225_v10, %v3215_v16  ;;  %v1092_v16 = vpack.c.bf16 %v3196_v18, %v3192_v15  ;;  %v1093_v10 = vpack.c.bf16 %v3161_v57, %v3155_v56 }
 0x41f   :  { %v1468_v7 = vpop.f32.mrf.mxu2 }
 0x420   :  { %v1469_v40 = vadd.f32 %v3208_v24, %v1468_v7 }
 0x422   :  { %v1659_v22 = vsel %vm671_vm2, %v1469_v40, -inf }
 0x423   :  { %1660 = vmax.xlane.f32.xlu1 %v1659_v22 }
 0x425   :  { %2450 = vmatmul.msk.bf16.gmra.mxu1 %vm128_vm0, %v2813_v60 }
 0x427   :  { %v1470_v54 = vpop.f32.mrf.mxu2 }
 0x428   :  { %v3233_v8 = vadd.f32 %v3221_v17, %v1470_v54 }
 0x42a   :  { %v1662_v55 = vsel %vm671_vm2, %v3233_v8, -inf }
 0x42b   :  { %1663 = vmax.xlane.f32.xlu2 %v1662_v55 }
 0x42f   :  { %v1498_v1 = vpop.f32.mrf.mxu2 }
 0x430   :  { %v3238_v58 = vadd.f32 %v3208_v24, %v1498_v1 }
 0x432   :  { %v1665_v59 = vsel %vm671_vm2, %v3238_v58, -inf }
 0x433   :  { %1666 = vmax.xlane.f32.xlu0 %v1665_v59 }
 0x435   :  { %2451 = vmatmul.msk.bf16.gmra.mxu1 %vm128_vm0, %v2827_v3 }
 0x437   :  { %v1500_v34 = vpop.f32.mrf.mxu2 }
 0x438   :  { %v3243_v63 = vadd.f32 %v3221_v17, %v1500_v34 }
 0x43a   :  { %v1668_v0 = vsel %vm671_vm2, %v3243_v63, -inf }
 0x43b   :  { %1669 = vmax.xlane.f32.xlu1 %v1668_v0 }
 0x445   :  { %2452 = vmatmul.msk.bf16.gmra.mxu1 %vm128_vm0, %v2730_v11 }
 0x44e   :  { %v1528_v53 = vpop.f32.mrf.mxu2 }
 0x44f   :  { %v3260_v21 = vadd.f32 %v3208_v24, %v1528_v53 }
 0x451   :  { %v1671_v9 = vsel %vm671_vm2, %v3260_v21, -inf }
 0x452   :  { %1672 = vmax.xlane.f32.xlu2 %v1671_v9 }
 0x455   :  { %2453 = vmatmul.msk.bf16.gmra.mxu1 %vm128_vm0, %v2746_v20 }
 0x456   :  { %v1530_v30 = vpop.f32.mrf.mxu2 }
 0x457   :  { %v3267_v44 = vadd.f32 %v3221_v17, %v1530_v30 }
 0x459   :  { %v1674_v26 = vsel %vm671_vm2, %v3267_v44, -inf }
 0x45a   :  { %1675 = vmax.xlane.f32.xlu0 %v1674_v26 }
 0x45e   :  { %v1558_v38 = vpop.f32.mrf.mxu2 }
 0x45f   :  { %v3272_v2 = vadd.f32 %v3208_v24, %v1558_v38 }
 0x461   :  { %v1677_v43 = vsel %vm671_vm2, %v3272_v2, -inf }
 0x462   :  { %1678 = vmax.xlane.f32.xlu0 %v1677_v43 }
 0x465   :  { %2454 = vmatmul.msk.bf16.gmra.mxu1 %vm128_vm0, %v2769_v35 }
 0x466   :  { %v1560_v32 = vpop.f32.mrf.mxu2 }
 0x467   :  { %v3290_v60 = vadd.f32 %v3221_v17, %v1560_v32 }
 0x469   :  { %v1680_v6 = vsel %vm671_vm2, %v3290_v60, -inf }
 0x46e   :  { %v1588_v61 = vpop.f32.mrf.mxu2 }
 0x46f   :  { %v3299_v11 = vadd.f32 %v3208_v24, %v1588_v61 }
 0x475   :  { %2455 = vmatmul.msk.bf16.gmra.mxu1 %vm128_vm0, %v2798_v52 }
 0x476   :  { %v1590_v45 = vpop.f32.mrf.mxu2 }
 0x477   :  { %v3309_v34 = vadd.f32 %v3221_v17, %v1590_v45 }
 0x479   :  { %v1686_v12 = vsel %vm671_vm2, %v3309_v34, -inf }
 0x47e   :  { %v1618_v59 = vpop.f32.mrf.mxu2 }
 0x486   :  { %v1655_v36 = vpop.xlane.xlu2 %1654  ;;  %v1620_v53 = vpop.f32.mrf.mxu2 }
 0x487   :  { %v1701_v39 = vsub.f32 %v3211_v29, %v1655_v36  ;;  %v3334_v36 = vpop.f32.mrf.mxu1 }
 0x489   :  { %v1717_v41 = vmul.f32 1.442695, %v1701_v39 }
 0x48b   :  { %2610 = vpow2.f32 %v1717_v41 }
 0x48e   :  { %v1658_v31 = vpop.xlane.xlu0 %1657  ;;  %v1648_v38 = vpop.f32.mrf.mxu2 }
 0x48f   :  { %v1702_v51 = vsub.f32 %v1441_v33, %v1658_v31  ;;  %v3344_v61 = vpop.f32.mrf.mxu1 }
 0x491   :  { %v3283_v42 = vpop.eup %2610  ;;  %v1719_v13 = vmul.f32 1.442695, %v1702_v51 }
 0x492   :  { %v1749_v49 = vsel %vm671_vm2, %v3283_v42, 0.0 }
 0x493   :  { %2612 = vpow2.f32 %v1719_v13  ;;  %1750 = vadd.xlane.f32.xlu1 %v1749_v49 }
 0x496   :  { %v1661_v3 = vpop.xlane.xlu1 %1660  ;;  %v1650_v41 = vpop.f32.mrf.mxu2 }
 0x497   :  { %v1703_v29 = vsub.f32 %v1469_v40, %v1661_v3  ;;  %v1683_v40 = vsel %vm671_vm2, %v3299_v11, -inf  ;;  %v3339_v31 = vadd.f32 %v3221_v17, %v1650_v41  ;;  %v1322_v45 = vpop.f32.mrf.mxu1 }
 0x499   :  { %v3294_v33 = vpop.eup %2612  ;;  %v1721_v50 = vmul.f32 1.442695, %v1703_v29  ;;  %v1698_v49 = vsel %vm671_vm2, %v3339_v31, -inf }
 0x49a   :  { %v1752_v47 = vsel %vm671_vm2, %v3294_v33, 0.0 }
 0x49b   :  { %2614 = vpow2.f32 %v1721_v50  ;;  %1753 = vadd.xlane.f32.xlu2 %v1752_v47  ;;  %1681 = vmax.xlane.f32.xlu1 %v1680_v6 }
 0x49e   :  { %v1664_v7 = vpop.xlane.xlu2 %1663 }
 0x49f   :  { %v1704_v22 = vsub.f32 %v3233_v8, %v1664_v7  ;;  %v1394_v7 = vpack.c.bf16 %v1322_v45, %v1322_v45 }
 0x4a1   :  { %v3304_v54 = vpop.eup %2614  ;;  %v1723_v55 = vmul.f32 1.442695, %v1704_v22 }
 0x4a2   :  { %v1755_v1 = vsel %vm671_vm2, %v3304_v54, 0.0 }
 0x4a3   :  { %2616 = vpow2.f32 %v1723_v55  ;;  %1684 = vmax.xlane.f32.xlu1 %v1683_v40  ;;  %1756 = vadd.xlane.f32.xlu2 %v1755_v1 }
 0x4a6   :  { %v1667_v8 = vpop.xlane.xlu0 %1666 }
 0x4a7   :  { %v1705_v0 = vsub.f32 %v3238_v58, %v1667_v8  ;;  %v1852_v8 = vunpack.c.l.b16 %v1394_v7 }
 0x4a9   :  { %v3316_v14 = vpop.eup %2616  ;;  %v1725_v19 = vmul.f32 1.442695, %v1705_v0 }
 0x4aa   :  { %v1758_v37 = vsel %vm671_vm2, %v3316_v14, 0.0 }
 0x4ab   :  { %2618 = vpow2.f32 %v1725_v19  ;;  %1759 = vadd.xlane.f32.xlu0 %v1758_v37  ;;  %1687 = vmax.xlane.f32.xlu2 %v1686_v12  ;;  %v3364_v12 = vadd.f32 %v3208_v24, %v1648_v38 }
 0x4ad   :  { %v1695_v37 = vsel %vm671_vm2, %v3364_v12, -inf }
 0x4ae   :  { %v1670_v9 = vpop.xlane.xlu1 %1669 }
 0x4af   :  { %v1706_v30 = vsub.f32 %v3243_v63, %v1670_v9  ;;  %v3332_v63 = vadd.f32 %v3208_v24, %v1618_v59 }
 0x4b1   :  { %v3321_v20 = vpop.eup %2618  ;;  %v1727_v26 = vmul.f32 1.442695, %v1706_v30  ;;  %v1689_v39 = vsel %vm671_vm2, %v3332_v63, -inf }
 0x4b2   :  { %v1761_v58 = vsel %vm671_vm2, %v3321_v20, 0.0 }
 0x4b3   :  { %2620 = vpow2.f32 %v1727_v26  ;;  %1762 = vadd.xlane.f32.xlu0 %v1761_v58 }
 0x4b9   :  { %v3327_v43 = vpop.eup %2620 }
 0x4ba   :  { %v1764_v32 = vsel %vm671_vm2, %v3327_v43, 0.0 }
 0x4bb   :  { %1765 = vadd.xlane.f32.xlu1 %v1764_v32 }
 0x4c3   :  { %1690 = vmax.xlane.f32.xlu1 %v1689_v39 }
 0x4c5   :  { %v1673_v35 = vpop.xlane.xlu2 %1672 }
 0x4c6   :  { %v1707_v51 = vsub.f32 %v3260_v21, %v1673_v35  ;;  %v3354_v21 = vadd.f32 %v3221_v17, %v1620_v53 }
 0x4c8   :  { %v1729_v13 = vmul.f32 1.442695, %v1707_v51  ;;  %v1692_v59 = vsel %vm671_vm2, %v3354_v21, -inf }
 0x4ca   :  { %2622 = vpow2.f32 %v1729_v13 }
 0x4cb   :  { %1699 = vmax.xlane.f32.xlu1 %v1698_v49 }
 0x4cd   :  { %v1676_v3 = vpop.xlane.xlu0 %1675 }
 0x4ce   :  { %v1708_v29 = vsub.f32 %v3267_v44, %v1676_v3  ;;  %v1324_v44 = vpop.f32.mrf.mxu1 }
 0x4cf   :  { %v1395_v0 = vpack.c.bf16 %v1324_v44, %v1324_v44 }
 0x4d0   :  { %v3349_v6 = vpop.eup %2622  ;;  %v1731_v50 = vmul.f32 1.442695, %v1708_v29 }
 0x4d1   :  { %v1767_v52 = vsel %vm671_vm2, %v3349_v6, 0.0  ;;  %v1853_v17 = vunpack.c.l.b16 %v1395_v0 }
 0x4d2   :  { %2624 = vpow2.f32 %v1731_v50  ;;  %1768 = vadd.xlane.f32.xlu2 %v1767_v52 }
 0x4d5   :  { %v1679_v47 = vpop.xlane.xlu0 %1678 }
 0x4d6   :  { %v1709_v22 = vsub.f32 %v3272_v2, %v1679_v47  ;;  %v1854_v2 = vpack.c.b16 %v1853_v17, %v1852_v8  ;;  %v1327_v9 = vpop.f32.mrf.mxu1 }
 0x4d7   :  { %v1396_v30 = vpack.c.bf16 %v1327_v9, %v1327_v9 }
 0x4d8   :  { %v3357_v40 = vpop.eup %2624  ;;  %v1733_v55 = vmul.f32 1.442695, %v1709_v22  ;;  %1866 = vmatpush.bf16.msra.mxu3 %v1854_v2 }
 0x4d9   :  { %v1770_v1 = vsel %vm671_vm2, %v3357_v40, 0.0  ;;  %v1880_v58 = vunpack.c.l.b16 %v1396_v30 }
 0x4da   :  { %2626 = vpow2.f32 %v1733_v55  ;;  %1771 = vadd.xlane.f32.xlu0 %v1770_v1  ;;  %1693 = vmax.xlane.f32.xlu2 %v1692_v59 }
 0x4de   :  { %v1329_v26 = vpop.f32.mrf.mxu1 }
 0x4df   :  { %v1397_v32 = vpack.c.bf16 %v1329_v26, %v1329_v26 }
 0x4e0   :  { %v3366_v19 = vpop.eup %2626 }
 0x4e1   :  { %v1773_v53 = vsel %vm671_vm2, %v3366_v19, 0.0  ;;  %v1881_v39 = vunpack.c.l.b16 %v1397_v32 }
 0x4e2   :  { %1696 = vmax.xlane.f32.xlu0 %v1695_v37  ;;  %1774 = vadd.xlane.f32.xlu2 %v1773_v53 }
 0x4e3   :  { %v1882_v24 = vpack.c.b16 %v1881_v39, %v1880_v58 }
 0x4e5   :  { %1894 = vmatpush.bf16.msra.mxu0 %v1882_v24 }
 0x4e6   :  { %v1332_v38 = vpop.f32.mrf.mxu1 }
 0x4e7   :  { %v1398_v41 = vpack.c.bf16 %v1332_v38, %v1332_v38 }
 0x4e9   :  { %v1908_v51 = vunpack.c.l.b16 %v1398_v41 }
 0x4ee   :  { %v1334_v35 = vpop.f32.mrf.mxu1 }
 0x4ef   :  { %v1399_v13 = vpack.c.bf16 %v1334_v35, %v1334_v35 }
 0x4f1   :  { %v1909_v3 = vunpack.c.l.b16 %v1399_v13 }
 0x4f3   :  { %v1910_v29 = vpack.c.b16 %v1909_v3, %v1908_v51 }
 0x4f5   :  { %1922 = vmatpush.bf16.msrb.mxu1 %v1910_v29 }
 0x506   :  { %v1751_v49 = vpop.xlane.xlu1 %1750 }
 0x507   :  { %2628 = vrcp.f32 %v1751_v49 }
 0x50d   :  { %v2629_v52 = vpop.eup %2628 }
 0x50e   :  { %v1754_v50 = vpop.xlane.xlu2 %1753  ;;  %v1682_v45 = vpop.xlane.xlu1 %1681  ;;  %v1813_v22 = vmul.f32 %v2629_v52, %v3283_v42 }
 0x50f   :  { %2630 = vrcp.f32 %v1754_v50  ;;  %v1710_v47 = vsub.f32 %v3290_v60, %v1682_v45  ;;  %v1337_v50 = vpop.f32.mrf.mxu1 }
 0x510   :  { %v1829_v44 = vpack.c.bf16 %v1813_v22, %v1813_v22 }
 0x511   :  { %v1735_v7 = vmul.f32 1.442695, %v1710_v47  ;;  %v1400_v47 = vpack.c.bf16 %v1337_v50, %v1337_v50 }
 0x512   :  { %v1847_v53 = vunpack.c.l.b16 %v1829_v44 }
 0x513   :  { %2632 = vpow2.f32 %v1735_v7 }
 0x515   :  { %v2631_v55 = vpop.eup %2630 }
 0x516   :  { %v1814_v1 = vmul.f32 %v2631_v55, %v3294_v33  ;;  %v1757_v59 = vpop.xlane.xlu2 %1756  ;;  %v1685_v8 = vpop.xlane.xlu1 %1684  ;;  %v1936_v55 = vunpack.c.l.b16 %v1400_v47 }
 0x517   :  { %v1711_v0 = vsub.f32 %v3299_v11, %v1685_v8  ;;  %2634 = vrcp.f32 %v1757_v59  ;;  %v1339_v7 = vpop.f32.mrf.mxu1 }
 0x518   :  { %v1830_v17 = vpack.c.bf16 %v1814_v1, %v1814_v1  ;;  %v1401_v44 = vpack.c.bf16 %v1339_v7, %v1339_v7 }
 0x519   :  { %v3376_v2 = vpop.eup %2632  ;;  %v1737_v37 = vmul.f32 1.442695, %v1711_v0 }
 0x51a   :  { %v1848_v9 = vunpack.c.l.b16 %v1830_v17  ;;  %v1776_v60 = vsel %vm671_vm2, %v3376_v2, 0.0  ;;  %v1937_v17 = vunpack.c.l.b16 %v1401_v44 }
 0x51b   :  { %2636 = vpow2.f32 %v1737_v37  ;;  %1777 = vadd.xlane.f32.xlu0 %v1776_v60 }
 0x51c   :  { %v1849_v42 = vpack.c.b16 %v1848_v9, %v1847_v53  ;;  %v1938_v9 = vpack.c.b16 %v1937_v17, %v1936_v55 }
 0x51d   :  { %v2635_v33 = vpop.eup %2634 }
 0x51e   :  { %v1760_v30 = vpop.xlane.xlu0 %1759  ;;  %v1688_v26 = vpop.xlane.xlu2 %1687  ;;  %2466 = vmatmul.msk.bf16.vlgmr.msra.gmra.mxu3 %vm671_vm2, %v1849_v42  ;;  %v1815_v39 = vmul.f32 %v2635_v33, %v3304_v54  ;;  %1950 = vmatpush.bf16.msrb.mxu2 %v1938_v9 }
 0x51f   :  { %2638 = vrcp.f32 %v1760_v30  ;;  %v1712_v11 = vsub.f32 %v3309_v34, %v1688_v26 }
 0x520   :  { %v1831_v41 = vpack.c.bf16 %v1815_v39, %v1815_v39 }
 0x521   :  { %v3382_v58 = vpop.eup %2636  ;;  %v1739_v32 = vmul.f32 1.442695, %v1712_v11  ;;  %v1342_v11 = vpop.f32.mrf.mxu1 }
 0x522   :  { %v1779_v24 = vsel %vm671_vm2, %v3382_v58, 0.0  ;;  %v1875_v34 = vunpack.c.l.b16 %v1831_v41  ;;  %v1402_v39 = vpack.c.bf16 %v1342_v11, %v1342_v11  ;;  %v2536_v11 = vld [vmem:[%s3545_s5 + $0x10] sm:$0xff] }
 0x523   :  { %2640 = vpow2.f32 %v1739_v32  ;;  %1780 = vadd.xlane.f32.xlu1 %v1779_v24 }
 0x525   :  { %v2639_v38 = vpop.eup %2638 }
 0x526   :  { %v1816_v35 = vmul.f32 %v2639_v38, %v3316_v14  ;;  %v1763_v51 = vpop.xlane.xlu0 %1762 }
 0x527   :  { %2642 = vrcp.f32 %v1763_v51 }
 0x528   :  { %v1832_v13 = vpack.c.bf16 %v1816_v35, %v1816_v35 }
 0x529   :  { %v3388_v49 = vpop.eup %2640  ;;  %v1344_v41 = vpop.f32.mrf.mxu1 }
 0x52a   :  { %v1876_v3 = vunpack.c.l.b16 %v1832_v13  ;;  %v1782_v29 = vsel %vm671_vm2, %v3388_v49, 0.0  ;;  %v1403_v35 = vpack.c.bf16 %v1344_v41, %v1344_v41 }
 0x52b   :  { %1783 = vadd.xlane.f32.xlu2 %v1782_v29 }
 0x52c   :  { %v1877_v54 = vpack.c.b16 %v1876_v3, %v1875_v34  ;;  %v1965_v34 = vunpack.c.l.b16 %v1403_v35 }
 0x52d   :  { %v2643_v52 = vpop.eup %2642 }
 0x52e   :  { %2467 = vmatmul.msk.bf16.vlgmr.msra.gmra.mxu0 %vm671_vm2, %v1877_v54  ;;  %v1766_v45 = vpop.xlane.xlu1 %1765  ;;  %v1817_v14 = vmul.f32 %v2643_v52, %v3321_v20 }
 0x52f   :  { %2644 = vrcp.f32 %v1766_v45 }
 0x530   :  { %v1833_v1 = vpack.c.bf16 %v1817_v14, %v1817_v14 }
 0x532   :  { %v1903_v60 = vunpack.c.l.b16 %v1833_v1 }
 0x535   :  { %v2645_v22 = vpop.eup %2644 }
 0x536   :  { %v1818_v59 = vmul.f32 %v2645_v22, %v3327_v43  ;;  %v1691_v8 = vpop.xlane.xlu1 %1690 }
 0x537   :  { %v1713_v0 = vsub.f32 %v3332_v63, %v1691_v8 }
 0x538   :  { %v1834_v37 = vpack.c.bf16 %v1818_v59, %v1818_v59 }
 0x539   :  { %v1741_v53 = vmul.f32 1.442695, %v1713_v0 }
 0x53a   :  { %v1904_v42 = vunpack.c.l.b16 %v1834_v37 }
 0x53b   :  { %2646 = vpow2.f32 %v1741_v53 }
 0x53c   :  { %v1905_v30 = vpack.c.b16 %v1904_v42, %v1903_v60 }
 0x53e   :  { %2468 = vmatmul.msk.bf16.vlgmr.msrb.gmra.mxu1 %vm671_vm2, %v1905_v30  ;;  %v1700_v20 = vpop.xlane.xlu1 %1699 }
 0x53f   :  { %v1716_v26 = vsub.f32 %v3339_v31, %v1700_v20  ;;  %v1964_v31 = vunpack.c.l.b16 %v1402_v39 }
 0x541   :  { %v3398_v33 = vpop.eup %2646  ;;  %v1747_v43 = vmul.f32 1.442695, %v1716_v26  ;;  %v1966_v54 = vpack.c.b16 %v1965_v34, %v1964_v31  ;;  %v2537_v26 = vld [vmem:[%s3545_s5 + $0x18] sm:$0xff] }
 0x542   :  { %v1785_v63 = vsel %vm671_vm2, %v3398_v33, 0.0 }
 0x543   :  { %2648 = vpow2.f32 %v1747_v43  ;;  %1786 = vadd.xlane.f32.xlu0 %v1785_v63  ;;  %1978 = vmatpush.bf16.msrb.mxu3 %v1966_v54 }
 0x545   :  { %v1769_v32 = vpop.xlane.xlu2 %1768 }
 0x546   :  { %2650 = vrcp.f32 %v1769_v32 }
 0x547   :  { %2124 = vmatpush.bf16.msra.mxu3 %v2537_v26 }
 0x549   :  { %v3402_v24 = vpop.eup %2648 }
 0x54a   :  { %v1794_v38 = vsel %vm671_vm2, %v3402_v24, 0.0 }
 0x54b   :  { %1795 = vadd.xlane.f32.xlu0 %v1794_v38  ;;  %2125 = vmatpush.bf16.msra.mxu3 %v2536_v11 }
 0x54c   :  { %v2651_v3 = vpop.eup %2650 }
 0x54d   :  { %v1772_v51 = vpop.xlane.xlu0 %1771  ;;  %v1694_v13 = vpop.xlane.xlu2 %1693  ;;  %v1819_v45 = vmul.f32 %v2651_v3, %v3349_v6 }
 0x54e   :  { %2652 = vrcp.f32 %v1772_v51  ;;  %v1714_v29 = vsub.f32 %v3354_v21, %v1694_v13 }
 0x54f   :  { %v1835_v47 = vpack.c.bf16 %v1819_v45, %v1819_v45  ;;  %v2523_v45 = vld [vmem:[%s3545_s5 + $0x8] sm:$0xff] }
 0x550   :  { %v1743_v50 = vmul.f32 1.442695, %v1714_v29 }
 0x551   :  { %v1931_v59 = vunpack.c.l.b16 %v1835_v47 }
 0x552   :  { %2654 = vpow2.f32 %v1743_v50 }
 0x554   :  { %v2653_v52 = vpop.eup %2652 }
 0x555   :  { %v1820_v14 = vmul.f32 %v2653_v52, %v3357_v40  ;;  %v1697_v7 = vpop.xlane.xlu0 %1696  ;;  %v1775_v43 = vpop.xlane.xlu2 %1774 }
 0x556   :  { %v1715_v22 = vsub.f32 %v3364_v12, %v1697_v7  ;;  %v1347_v12 = vpop.f32.mrf.mxu1 }
 0x557   :  { %v1836_v55 = vpack.c.bf16 %v1820_v14, %v1820_v14  ;;  %v1404_v37 = vpack.c.bf16 %v1347_v12, %v1347_v12 }
 0x558   :  { %v3410_v44 = vpop.eup %2654  ;;  %v1745_v1 = vmul.f32 1.442695, %v1715_v22 }
 0x559   :  { %v1932_v8 = vunpack.c.l.b16 %v1836_v55  ;;  %v1788_v21 = vsel %vm671_vm2, %v3410_v44, 0.0  ;;  %v1992_v9 = vunpack.c.l.b16 %v1404_v37 }
 0x55a   :  { %2656 = vpow2.f32 %v1745_v1  ;;  %1789 = vadd.xlane.f32.xlu1 %v1788_v21 }
 0x55b   :  { %v1933_v6 = vpack.c.b16 %v1932_v8, %v1931_v59  ;;  %2658 = vrcp.f32 %v1775_v43 }
 0x55d   :  { %2469 = vmatmul.msk.bf16.vlgmr.msrb.gmra.mxu2 %vm671_vm2, %v1933_v6 }
 0x55e   :  { %v1349_v17 = vpop.f32.mrf.mxu1 }
 0x55f   :  { %v1405_v60 = vpack.c.bf16 %v1349_v17, %v1349_v17 }
 0x560   :  { %v3415_v0 = vpop.eup %2656 }
 0x561   :  { %v1791_v40 = vsel %vm671_vm2, %v3415_v0, 0.0  ;;  %v1993_v42 = vunpack.c.l.b16 %v1405_v60  ;;  %v2659_v35 = vpop.eup %2658 }
 0x562   :  { %1792 = vadd.xlane.f32.xlu2 %v1791_v40  ;;  %v1821_v34 = vmul.f32 %v2659_v35, %v3366_v19  ;;  %v2522_v19 = vld [vmem:[%s3545_s5] sm:$0xff] }
 0x563   :  { %v1994_v30 = vpack.c.b16 %v1993_v42, %v1992_v9 }
 0x564   :  { %v1837_v52 = vpack.c.bf16 %v1821_v34, %v1821_v34 }
 0x565   :  { %2006 = vmatpush.bf16.msrb.mxu0 %v1994_v30 }
 0x566   :  { %v1352_v53 = vpop.f32.mrf.mxu1  ;;  %v1959_v1 = vunpack.c.l.b16 %v1837_v52 }
 0x567   :  { %v1406_v63 = vpack.c.bf16 %v1352_v53, %v1352_v53 }
 0x569   :  { %v2020_v39 = vunpack.c.l.b16 %v1406_v63  ;;  %2209 = vmatpush.bf16.msra.mxu0 %v2523_v45  ;;  %v1088_v63 = vpack.c.bf16 %v3188_v46, %v3184_v27 }
 0x56d   :  { %2210 = vmatpush.bf16.msra.mxu0 %v2522_v19 }
 0x56e   :  { %v1354_v20 = vpop.f32.mrf.mxu1 }
 0x56f   :  { %v1407_v38 = vpack.c.bf16 %v1354_v20, %v1354_v20 }
 0x571   :  { %v2021_v31 = vunpack.c.l.b16 %v1407_v38 }
 0x573   :  { %v2022_v51 = vpack.c.b16 %v2021_v31, %v2020_v39  ;;  %v1089_v39 = vpack.c.bf16 %v3153_v25, %v3147_v4 }
 0x575   :  { %2034 = vmatpush.bf16.msra.mxu1 %v2022_v51 }
 0x576   :  { %v1357_v32 = vpop.f32.mrf.mxu1 }
 0x577   :  { %v1408_v13 = vpack.c.bf16 %v1357_v32, %v1357_v32 }
 0x579   :  { %v2048_v29 = vunpack.c.l.b16 %v1408_v13 }
 0x57e   :  { %v1359_v3 = vpop.f32.mrf.mxu1 }
 0x57f   :  { %v1409_v54 = vpack.c.bf16 %v1359_v3, %v1359_v3 }
 0x581   :  { %v2049_v7 = vunpack.c.l.b16 %v1409_v54 }
 0x583   :  { %v2050_v55 = vpack.c.b16 %v2049_v7, %v2048_v29 }
 0x585   :  { %2062 = vmatpush.bf16.msra.mxu2 %v2050_v55 }
 0x58e   :  { %v1778_v41 = vpop.xlane.xlu0 %1777 }
 0x58f   :  { %2660 = vrcp.f32 %v1778_v41 }
 0x595   :  { %v2661_v50 = vpop.eup %2660 }
 0x596   :  { %v1822_v47 = vmul.f32 %v2661_v50, %v3376_v2  ;;  %v1781_v14 = vpop.xlane.xlu1 %1780 }
 0x597   :  { %2662 = vrcp.f32 %v1781_v14 }
 0x598   :  { %v1838_v22 = vpack.c.bf16 %v1822_v47, %v1822_v47 }
 0x59a   :  { %v1960_v59 = vunpack.c.l.b16 %v1838_v22 }
 0x59c   :  { %v1961_v8 = vpack.c.b16 %v1960_v59, %v1959_v1  ;;  %v1095_v59 = vpack.c.bf16 %v3174_v5, %v3172_v23 }
 0x59d   :  { %v2663_v6 = vpop.eup %2662 }
 0x59e   :  { %v1784_v21 = vpop.xlane.xlu2 %1783  ;;  %2470 = vmatmul.msk.bf16.vlgmr.msrb.gmra.mxu3 %vm671_vm2, %v1961_v8  ;;  %v1823_v40 = vmul.f32 %v2663_v6, %v3382_v58 }
 0x59f   :  { %2664 = vrcp.f32 %v1784_v21 }
 0x5a0   :  { %v1839_v17 = vpack.c.bf16 %v1823_v40, %v1823_v40 }
 0x5a1   :  { %v1868_v2 = vpop.f32.mrf.mxu3 }
 0x5a2   :  { %v1987_v60 = vunpack.c.l.b16 %v1839_v17 }
 0x5a5   :  { %v2665_v12 = vpop.eup %2664 }
 0x5a6   :  { %v1824_v37 = vmul.f32 %v2665_v12, %v3388_v49 }
 0x5a8   :  { %v1840_v53 = vpack.c.bf16 %v1824_v37, %v1824_v37 }
 0x5a9   :  { %v1870_v9 = vpop.f32.mrf.mxu3 }
 0x5aa   :  { %v1988_v42 = vunpack.c.l.b16 %v1840_v53  ;;  %v2069_v20 = vpack.c.bf16 %v1870_v9, %v1868_v2 }
 0x5ab   :  { %v1896_v26 = vpop.f32.mrf.mxu0 }
 0x5ac   :  { %v1989_v30 = vpack.c.b16 %v1988_v42, %v1987_v60 }
 0x5ae   :  { %2471 = vmatmul.msk.bf16.vlgmr.msrb.gmra.mxu0 %vm671_vm2, %v1989_v30  ;;  %2486 = vmatmul.msk.bf16.vlgmr.msra.gmra.mxu3 %vm440_vm1, %v2069_v20 }
 0x5b3   :  { %v1898_v43 = vpop.f32.mrf.mxu0 }
 0x5b4   :  { %v2070_v58 = vpack.c.bf16 %v1898_v43, %v1896_v26 }
 0x5b6   :  { %v1787_v11 = vpop.xlane.xlu0 %1786 }
 0x5b7   :  { %2666 = vrcp.f32 %v1787_v11 }
 0x5bb   :  { %v1924_v49 = vpop.f32.mrf.mxu1 }
 0x5bd   :  { %v2667_v35 = vpop.eup %2666 }
 0x5be   :  { %2487 = vmatmul.msk.bf16.gmra.mxu3 %vm440_vm1, %v2070_v58  ;;  %2502 = vmatmul.msk.bf16.vlgmr.msra.gmra.mxu0 %vm440_vm1, %v1088_v63  ;;  %v1796_v41 = vpop.xlane.xlu0 %1795  ;;  %v1825_v27 = vmul.f32 %v2667_v35, %v3398_v33 }
 0x5c0   :  { %v1841_v51 = vpack.c.bf16 %v1825_v27, %v1825_v27 }
 0x5c2   :  { %v2015_v25 = vunpack.c.l.b16 %v1841_v51 }
 0x5c3   :  { %v1926_v32 = vpop.f32.mrf.mxu1 }
 0x5c4   :  { %v2071_v38 = vpack.c.bf16 %v1926_v32, %v1924_v49 }
 0x5cd   :  { %v1790_v31 = vpop.xlane.xlu1 %1789 }
 0x5ce   :  { %2488 = vmatmul.msk.bf16.gmra.mxu3 %vm440_vm1, %v2071_v38  ;;  %2503 = vmatmul.msk.bf16.gmra.mxu0 %vm440_vm1, %v1089_v39  ;;  %2668 = vrcp.f32 %v1790_v31 }
 0x5cf   :  { %2670 = vrcp.f32 %v1796_v41 }
 0x5d4   :  { %v2669_v46 = vpop.eup %2668 }
 0x5d5   :  { %v1826_v13 = vmul.f32 %v2669_v46, %v3410_v44  ;;  %v1793_v34 = vpop.xlane.xlu2 %1792  ;;  %v2671_v3 = vpop.eup %2670 }
 0x5d6   :  { %2672 = vrcp.f32 %v1793_v34  ;;  %v1828_v29 = vmul.f32 %v2671_v3, %v3402_v24 }
 0x5d7   :  { %v1842_v4 = vpack.c.bf16 %v1826_v13, %v1826_v13 }
 0x5d8   :  { %v1844_v52 = vpack.c.bf16 %v1828_v29, %v1828_v29 }
 0x5d9   :  { %v2016_v54 = vunpack.c.l.b16 %v1842_v4 }
 0x5da   :  { %v2044_v14 = vunpack.c.l.b16 %v1844_v52 }
 0x5db   :  { %v2017_v50 = vpack.c.b16 %v2016_v54, %v2015_v25 }
 0x5dc   :  { %v2673_v45 = vpop.eup %2672 }
 0x5dd   :  { %v1827_v47 = vmul.f32 %v2673_v45, %v3415_v0  ;;  %2472 = vmatmul.msk.bf16.vlgmr.msra.gmra.mxu1 %vm671_vm2, %v2017_v50  ;;  %v1091_v0 = vpack.c.bf16 %v3167_v48, %v3165_v28 }
 0x5de   :  { %2504 = vmatmul.msk.bf16.gmra.mxu0 %vm440_vm1, %v1090_v62  ;;  %v1094_v62 = vpack.c.bf16 %v3344_v61, %v3334_v36 }
 0x5df   :  { %v1843_v33 = vpack.c.bf16 %v1827_v47, %v1827_v47 }
 0x5e0   :  { %v1952_v44 = vpop.f32.mrf.mxu2 }
 0x5e1   :  { %v2043_v7 = vunpack.c.l.b16 %v1843_v33 }
 0x5e3   :  { %v2045_v22 = vpack.c.b16 %v2044_v14, %v2043_v7 }
 0x5e5   :  { %2473 = vmatmul.msk.bf16.vlgmr.msra.gmra.mxu2 %vm671_vm2, %v2045_v22 }
 0x5e8   :  { %v1954_v24 = vpop.f32.mrf.mxu2 }
 0x5e9   :  { %v2072_v55 = vpack.c.bf16 %v1954_v24, %v1952_v44 }
 0x5eb   :  { %2489 = vmatmul.msk.bf16.gmra.mxu3 %vm440_vm1, %v2072_v55 }
 0x5ee   :  { %2505 = vmatmul.msk.bf16.gmra.mxu0 %vm440_vm1, %v1091_v0 }
 0x5fe   :  { %2506 = vmatmul.msk.bf16.gmra.mxu0 %vm440_vm1, %v1092_v16 }
 0x60e   :  { %2507 = vmatmul.msk.bf16.gmra.mxu0 %vm440_vm1, %v1093_v10 }
 0x61e   :  { %2508 = vmatmul.msk.bf16.gmra.mxu0 %vm440_vm1, %v1094_v62 }
 0x621   :  { %v1980_v19 = vpop.f32.mrf.mxu3 }
 0x629   :  { %v1982_v1 = vpop.f32.mrf.mxu3 }
 0x62a   :  { %v2073_v28 = vpack.c.bf16 %v1982_v1, %v1980_v19 }
 0x62b   :  { %v2008_v48 = vpop.f32.mrf.mxu0 }
 0x62c   :  { %2490 = vmatmul.msk.bf16.gmra.mxu3 %vm440_vm1, %v2073_v28 }
 0x62e   :  { %2509 = vmatmul.msk.bf16.gmra.mxu0 %vm440_vm1, %v1095_v59 }
 0x631   :  { %v2127_v15 = vpop.f32.mrf.mxu3 }
 0x633   :  { %v2010_v56 = vpop.f32.mrf.mxu0 }
 0x634   :  { %v2074_v57 = vpack.c.bf16 %v2010_v56, %v2008_v48 }
 0x639   :  { %v2129_v18 = vpop.f32.mrf.mxu3 }
 0x63b   :  { %v2212_v8 = vpop.f32.mrf.mxu0 }
 0x63c   :  { %v2213_v21 = vadd.f32 %v2212_v8, %v2127_v15  ;;  %2491 = vmatmul.msk.bf16.gmra.mxu3 %vm440_vm1, %v2074_v57 }
 0x63e   :  { %2252 = vst.msk [vmem:[%s3546_s6] sm:$0xff] %vm128_vm0, %v2213_v21 }
 0x641   :  { %v2132_v23 = vpop.f32.mrf.mxu3 }
 0x643   :  { %v2214_v36 = vpop.f32.mrf.mxu0 }
 0x644   :  { %v2215_v61 = vadd.f32 %v2214_v36, %v2129_v18 }
 0x646   :  { %2253 = vst.msk [vmem:[%s3546_s6 + $0x8] sm:$0xff] %vm128_vm0, %v2215_v61 }
 0x649   :  { %v2134_v2 = vpop.f32.mrf.mxu3 }
 0x64b   :  { %v2217_v5 = vpop.f32.mrf.mxu0 }
 0x64c   :  { %v2218_v6 = vadd.f32 %v2217_v5, %v2132_v23 }
 0x64e   :  { %2254 = vst.msk [vmem:[%s3546_s6 + $0x10] sm:$0xff] %vm128_vm0, %v2218_v6 }
 0x651   :  { %v2137_v17 = vpop.f32.mrf.mxu3 }
 0x653   :  { %v2219_v40 = vpop.f32.mrf.mxu0 }
 0x654   :  { %v2220_v12 = vadd.f32 %v2219_v40, %v2134_v2 }
 0x656   :  { %2255 = vst.msk [vmem:[%s3546_s6 + $0x18] sm:$0xff] %vm128_vm0, %v2220_v12 }
 0x659   :  { %v2139_v42 = vpop.f32.mrf.mxu3 }
 0x65a   :  { %v2036_v37 = vpop.f32.mrf.mxu1 }
 0x65b   :  { %v2222_v53 = vpop.f32.mrf.mxu0 }
 0x65c   :  { %v2223_v9 = vadd.f32 %v2222_v53, %v2137_v17 }
 0x65e   :  { %2256 = vst.msk [vmem:[%s3546_s6 + $0x20] sm:$0xff] %vm128_vm0, %v2223_v9 }
 0x662   :  { %v2038_v60 = vpop.f32.mrf.mxu1 }
 0x663   :  { %v2075_v30 = vpack.c.bf16 %v2038_v60, %v2036_v37  ;;  %v2224_v20 = vpop.f32.mrf.mxu0 }
 0x664   :  { %v2225_v26 = vadd.f32 %v2224_v20, %v2139_v42 }
 0x665   :  { %2492 = vmatmul.msk.bf16.gmra.mxu3 %vm440_vm1, %v2075_v30 }
 0x666   :  { %2257 = vst.msk [vmem:[%s3546_s6 + $0x28] sm:$0xff] %vm128_vm0, %v2225_v26 }
 0x668   :  { %v2064_v43 = vpop.f32.mrf.mxu2 }
 0x66b   :  { %v2227_v63 = vpop.f32.mrf.mxu0 }
 0x66e   :  { %v2142_v58 = vpop.f32.mrf.mxu3 }
 0x66f   :  { %v2228_v49 = vadd.f32 %v2227_v63, %v2142_v58 }
 0x670   :  { %v2066_v11 = vpop.f32.mrf.mxu2 }
 0x671   :  { %2258 = vst.msk [vmem:[%s3546_s6 + $0x30] sm:$0xff] %vm128_vm0, %v2228_v49  ;;  %v2076_v32 = vpack.c.bf16 %v2066_v11, %v2064_v43 }
 0x673   :  { %v2229_v39 = vpop.f32.mrf.mxu0 }
 0x675   :  { %2493 = vmatmul.msk.bf16.gmra.mxu3 %vm440_vm1, %v2076_v32 }
 0x676   :  { %v2144_v38 = vpop.f32.mrf.mxu3 }
 0x677   :  { %v2230_v41 = vadd.f32 %v2229_v39, %v2144_v38 }
 0x679   :  { %2259 = vst.msk [vmem:[%s3546_s6 + $0x38] sm:$0xff] %vm128_vm0, %v2230_v41 }
 0x67b   :  { %v2232_v31 = vpop.f32.mrf.mxu0 }
 0x683   :  { %v2234_v46 = vpop.f32.mrf.mxu0 }
 0x68b   :  { %v2237_v34 = vpop.f32.mrf.mxu0 }
 0x693   :  { %v2239_v25 = vpop.f32.mrf.mxu0 }
 0x69b   :  { %v2242_v50 = vpop.f32.mrf.mxu0 }
 0x6a3   :  { %v2244_v47 = vpop.f32.mrf.mxu0 }
 0x6ab   :  { %v2247_v14 = vpop.f32.mrf.mxu0 }
 0x6af   :  { %v2147_v35 = vpop.f32.mrf.mxu3 }
 0x6b0   :  { %v2233_v27 = vadd.f32 %v2232_v31, %v2147_v35 }
 0x6b2   :  { %2260 = vst.msk [vmem:[%s3546_s6 + $0x40] sm:$0xff] %vm128_vm0, %v2233_v27 }
 0x6b3   :  { %v2249_v24 = vpop.f32.mrf.mxu0 }
 0x6b7   :  { %v2149_v51 = vpop.f32.mrf.mxu3 }
 0x6b8   :  { %v2235_v13 = vadd.f32 %v2234_v46, %v2149_v51 }
 0x6ba   :  { %2261 = vst.msk [vmem:[%s3546_s6 + $0x48] sm:$0xff] %vm128_vm0, %v2235_v13 }
 0x6bf   :  { %v2152_v3 = vpop.f32.mrf.mxu3 }
 0x6c0   :  { %v2238_v4 = vadd.f32 %v2237_v34, %v2152_v3 }
 0x6c2   :  { %2262 = vst.msk [vmem:[%s3546_s6 + $0x50] sm:$0xff] %vm128_vm0, %v2238_v4 }
 0x6c7   :  { %v2154_v29 = vpop.f32.mrf.mxu3 }
 0x6c8   :  { %v2240_v54 = vadd.f32 %v2239_v25, %v2154_v29 }
 0x6ca   :  { %2263 = vst.msk [vmem:[%s3546_s6 + $0x58] sm:$0xff] %vm128_vm0, %v2240_v54 }
 0x6e8   :  { %v2157_v45 = vpop.f32.mrf.mxu3 }
 0x6e9   :  { %v2243_v52 = vadd.f32 %v2242_v50, %v2157_v45 }
 0x6eb   :  { %2264 = vst.msk [vmem:[%s3546_s6 + $0x60] sm:$0xff] %vm128_vm0, %v2243_v52 }
 0x6f0   :  { %v2159_v33 = vpop.f32.mrf.mxu3 }
 0x6f1   :  { %v2245_v44 = vadd.f32 %v2244_v47, %v2159_v33 }
 0x6f3   :  { %2265 = vst.msk [vmem:[%s3546_s6 + $0x68] sm:$0xff] %vm128_vm0, %v2245_v44 }
 0x6f8   :  { %v2162_v7 = vpop.f32.mrf.mxu3 }
 0x6f9   :  { %v2248_v22 = vadd.f32 %v2247_v14, %v2162_v7 }
 0x6fb   :  { %2266 = vst.msk [vmem:[%s3546_s6 + $0x70] sm:$0xff] %vm128_vm0, %v2248_v22 }
 0x700   :  { %v2164_v55 = vpop.f32.mrf.mxu3 }
 0x701   :  { %v2250_v0 = vadd.f32 %v2249_v24, %v2164_v55 }
 0x703   :  { %2267 = vst.msk [vmem:[%s3546_s6 + $0x78] sm:$0xff] %vm128_vm0, %v2250_v0 }

// kernel: my_layer_forward.15
= control target key start
LH: loop header
LB: loop body
LE: loop exit
PB: predicated region body
PF: predicated region fallthrough
CT: control target
= control target key end

     0   :  { %9 = vsyncpa [#allocation3], 0  ;;  %s1175_s0 = inlined_call_operand.vmem [shape: bf16[2,64,256], index: 0, kind: input, shape index: {}]   ;;  %s1176_s1 = inlined_call_operand.vmem [shape: bf16[256,64], index: 1, kind: input, shape index: {}]   ;;  %s1177_s2 = inlined_call_operand.vmem [shape: f32[1,64], index: 2, kind: input, shape index: {}]   ;;  %s1178_s3 = inlined_call_operand.vmem [shape: f32[2,64,64], index: 3, kind: input, shape index: {}]   ;;  %s1179_s4 = inlined_call_operand.hbm [shape: f32[2,64,64], index: 4, kind: output, shape index: {}]  }
   0x1   :  { %11 = vsyncpa [#allocation3 + $0x1], 0  ;;  %s966_s15 = smov 0   ;;  %s968_s16 = smov 0  }
   0x2   :  { %s970_s17 = smov 0   ;;  %s972_s18 = smov 0  }
   0x3   :  { %s974_s19 = smov 0   ;;  %s976_s20 = smov 0  }
   0x4 LB: > { %s647_s21 = sadd.s32 4294967295, %s937_s20   ;;  %s648_s22 = sadd.s32 4294967294, %s937_s20   ;;  %s937_s20 = sphi %s976_s20, %s17_s20   ;;  %s933_s19 = sphi %s974_s19, %s1186_s19   ;;  %s929_s18 = sphi %s972_s18, %s1185_s18   ;;  %s925_s17 = sphi %s970_s17, %s1184_s17   ;;  %s921_s16 = sphi %s968_s16, %s1183_s16   ;;  %s917_s15 = sphi %s966_s15, %s1182_s15  }
   0x5   : > { %s29_s23 = sadd.s32 1, %s933_s19  ;;  %s136_s24 = sadd.s32 1, %s925_s17 }
   0x6   : > { %p31_p0 = scmp.ge.s32.totalorder %s29_s23, 2  ;;  %p146_p1 = scmp.ne.s32.totalorder %s925_s17, %s921_s16 }
   0x7   : > { %p147_p2 = scmp.eq.s32.totalorder %s647_s21, 1  ;;  %p152_p3 = scmp.ne.s32.totalorder %s921_s16, %s917_s15 }
   0x8   : > { %s1188_s23 = smov (%p31_p0, %s29_s23), 0  ;;  %p153_p5 = scmp.eq.s32.totalorder %s648_s22, 1 }
   0x9   : > { %p1006_p4 = por %p147_p2, %p146_p1  ;;  %s131_s26 = ssub.s32 %s933_s19, %s1188_s23 }
   0xa   : > { %p651_p6 = scmp.ge.s32.totalorder %s937_s20, 1  ;;  %p134_p7 = scmp.eq.s32.totalorder %s131_s26, 0 }
   0xb   : > { %p1013_p8 = por %p153_p5, %p152_p3  ;;  %p204_p9 = scmp.lt.s32.totalorder %s937_s20, 3 }
   0xc   : > { %s1019_s28 = scalar_select %p134_p7, %s925_s17, %s136_s24  }
   0xd   : > { %p205_p10 = pnand %p651_p6, %p204_p9 }
   0xe   : > { %p245_p11 = scmp.lt.s32.totalorder (!%p205_p10), %s929_s18, 1  ;;  %s241_s11 = sand.u32 (!%p205_p10), 1, %s921_s16  }
   0xf   : > { %208 = sbr.rel (%p205_p10) target bundleno = 218 (0xda), region = 36  ;;  %s652_s22 = sshll.u32 (!%p205_p10), %s241_s11, 6 }
  0x10   : > { %s530_s5 = scalar_lea.sflag (!%p205_p10), [#allocation3], %s241_s11  ;;  %s879_s13 = scalar_lea.hbm (!%p205_p10), %s1179_s4, 128 }
  0x14   : > { %v775_v0 = vld [vmem:[%s1176_s1 + $0x38] sm:$0xff]  ;;  %v774_v2 = vld [vmem:[%s1176_s1 + $0x30] sm:$0xff]  ;;  %v773_v4 = vld [vmem:[%s1176_s1 + $0x28] sm:$0xff]  ;;  %s1053_s7 = scalar_select %p245_p11, %s929_s18, 1  ;;  %vm520_vm0 = vcmask 523264  }
  0x15   : > { %v783_v1 = vld [vmem:[%s1176_s1 + $0x78] sm:$0xff]  ;;  %446 = vmatpush.bf16.msra.mxu0 %v775_v0  ;;  %785 = vmatpush.bf16.msra.mxu2 %v775_v0  ;;  %v782_v3 = vld [vmem:[%s1176_s1 + $0x70] sm:$0xff]  ;;  %v781_v5 = vld [vmem:[%s1176_s1 + $0x68] sm:$0xff] }
  0x16   : > { %475 = vmatpush.bf16.msra.mxu1 %v783_v1  ;;  %793 = vmatpush.bf16.msra.mxu3 %v783_v1  ;;  %v772_v6 = vld [vmem:[%s1176_s1 + $0x20] sm:$0xff]  ;;  %v771_v8 = vld [vmem:[%s1176_s1 + $0x18] sm:$0xff]  ;;  %v770_v10 = vld [vmem:[%s1176_s1 + $0x10] sm:$0xff]  ;;  %s758_s12 = sshll.u32 %s1053_s7, 6  ;;  %s784_s7 = sshll.u32 %s929_s18, 6 }
  0x17   : > { %v780_v7 = vld [vmem:[%s1176_s1 + $0x60] sm:$0xff]  ;;  %v779_v9 = vld [vmem:[%s1176_s1 + $0x58] sm:$0xff]  ;;  %v778_v11 = vld [vmem:[%s1176_s1 + $0x50] sm:$0xff]  ;;  %s1070_s24 = scalar_lea.vmem %s1175_s0, %s758_s12  ;;  %s1106_s21 = scalar_lea.vmem %s1178_s3, %s758_s12 }
  0x18   : > { %v769_v12 = vld [vmem:[%s1176_s1 + $0x8] sm:$0xff]  ;;  %v768_v14 = vld [vmem:[%s1176_s1] sm:$0xff]  ;;  %v667_v28 = vld [vmem:[%s1070_s24 + $0x10] sm:$0xf]  ;;  %s543_s29 = scalar_lea.hbm %s1179_s4, %s784_s7 }
  0x19   : > { %447 = vmatpush.bf16.msra.mxu0 %v774_v2  ;;  %786 = vmatpush.bf16.msra.mxu2 %v774_v2  ;;  %v777_v13 = vld [vmem:[%s1176_s1 + $0x48] sm:$0xff]  ;;  %v776_v15 = vld [vmem:[%s1176_s1 + $0x40] sm:$0xff]  ;;  %v763_v29 = vld [vmem:[%s1070_s24 + $0x14] sm:$0xf0]  ;;  %s546_s18 = sshll.u32 %s543_s29, 4  ;;  %s547_s18 = int_to_ptr.hbm [resolvable:$true] %s546_s18 }
  0x1a   : > { %476 = vmatpush.bf16.msra.mxu1 %v782_v3  ;;  %794 = vmatpush.bf16.msra.mxu3 %v782_v3  ;;  %v659_v16 = vld [vmem:[%s1070_s24] sm:$0xf]  ;;  %v761_v17 = vld [vmem:[%s1070_s24 + $0x4] sm:$0xf0]  ;;  %v760_v20 = vld [vmem:[%s1070_s24 + $0x4] sm:$0xf]  ;;  %v668_v36 = vor.u32 %v763_v29, %v667_v28 }
  0x1b   : > { %v675_v18 = vld [vmem:[%s1070_s24 + $0x20] sm:$0xf]  ;;  %v765_v19 = vld [vmem:[%s1070_s24 + $0x24] sm:$0xf0]  ;;  %v661_v21 = vld [vmem:[%s1070_s24 + $0x8] sm:$0xf0]  ;;  %v660_v24 = vor.u32 %v761_v17, %v659_v16 }
  0x1c   : > { %v764_v22 = vld [vmem:[%s1070_s24 + $0x24] sm:$0xf]  ;;  %v677_v23 = vld [vmem:[%s1070_s24 + $0x28] sm:$0xf0]  ;;  %v676_v25 = vor.u32 %v765_v19, %v675_v18  ;;  %v664_v26 = vor.u32 %v760_v20, %v661_v21  ;;  %v683_v30 = vld [vmem:[%s1070_s24 + $0x30] sm:$0xf] }
  0x1d   : > { %448 = vmatpush.bf16.msra.mxu0 %v773_v4  ;;  %787 = vmatpush.bf16.msra.mxu2 %v773_v4  ;;  %v680_v27 = vor.u32 %v764_v22, %v677_v23  ;;  %v767_v31 = vld [vmem:[%s1070_s24 + $0x34] sm:$0xf0]  ;;  %v762_v32 = vld [vmem:[%s1070_s24 + $0x14] sm:$0xf]  ;;  %v669_v33 = vld [vmem:[%s1070_s24 + $0x18] sm:$0xf0] }
  0x1e   : > { %477 = vmatpush.bf16.msra.mxu1 %v781_v5  ;;  %795 = vmatpush.bf16.msra.mxu3 %v781_v5  ;;  %v766_v34 = vld [vmem:[%s1070_s24 + $0x34] sm:$0xf]  ;;  %v685_v35 = vld [vmem:[%s1070_s24 + $0x38] sm:$0xf0]  ;;  %v684_v37 = vor.u32 %v767_v31, %v683_v30  ;;  %v672_v38 = vor.u32 %v762_v32, %v669_v33  ;;  %v858_v40 = vld [vmem:[%s1177_s2] ss:$0 sm:$0xff] }
  0x1f   : > { %v688_v39 = vor.u32 %v766_v34, %v685_v35  ;;  %v504_v44 = vld [vmem:[%s1106_s21] sm:$0xff]  ;;  %s1111_s24 = scalar_lea.vmem [#allocation2], %s652_s22  ;;  %v505_v55 = vld [vmem:[%s1106_s21 + $0x8] sm:$0xff]  ;;  %v506_v3 = vld [vmem:[%s1106_s21 + $0x10] sm:$0xff]  ;;  %s873_s6 = sshra.s32 %s547_s18, 4  ;;  %s874_s6 = int_to_ptr.hbm [resolvable:$true] %s873_s6 }
  0x20   : > { %v508_v50 = vld [vmem:[%s1106_s21 + $0x20] sm:$0xff]  ;;  %v509_v62 = vld [vmem:[%s1106_s21 + $0x28] sm:$0xff]  ;;  %s544_s30 = sshll.u32 %s1111_s24, 4  ;;  %v511_v22 = vld [vmem:[%s1106_s21 + $0x38] sm:$0xff]  ;;  %s875_s8 = scalar_lea.hbm %s874_s6, 64  ;;  %s545_s30 = int_to_ptr.vmem [resolvable:$true] %s544_s30 }
  0x21   : > { %449 = vmatpush.bf16.msra.mxu0 %v772_v6  ;;  %788 = vmatpush.bf16.msra.mxu2 %v772_v6  ;;  %p876_p12 = scmp.ne.s32.totalorder %s874_s6, %s875_s8  ;;  %p880_p1 = scmp.lt.s32.totalorder %s874_s6, %s1179_s4 }
  0x22   : > { %478 = vmatpush.bf16.msra.mxu1 %v780_v7  ;;  %796 = vmatpush.bf16.msra.mxu3 %v780_v7  ;;  %p881_p2 = scmp.lt.s32.totalorder %s879_s13, %s875_s8 }
  0x23   : > { %p877_p13 = pnand %p876_p12, %p1006_p4 }
  0x24   : > { %p882_p3 = por %p881_p2, %p880_p1 }
  0x25   : > { %450 = vmatpush.bf16.msra.mxu0 %v771_v8  ;;  %789 = vmatpush.bf16.msra.mxu2 %v771_v8  ;;  %p878_p0 = pneg %p877_p13 }
  0x26   : > { %479 = vmatpush.bf16.msra.mxu1 %v779_v9  ;;  %797 = vmatpush.bf16.msra.mxu3 %v779_v9 }
  0x27   : > { %p883_p5 = pnand %p882_p3, %p878_p0 }
  0x29   : > { %451 = vmatpush.bf16.msra.mxu0 %v770_v10  ;;  %790 = vmatpush.bf16.msra.mxu2 %v770_v10  ;;  %v510_v10 = vld [vmem:[%s1106_s21 + $0x30] sm:$0xff] }
  0x2a   : > { %480 = vmatpush.bf16.msra.mxu1 %v778_v11  ;;  %798 = vmatpush.bf16.msra.mxu3 %v778_v11 }
  0x2d   : > { %452 = vmatpush.bf16.msra.mxu0 %v769_v12  ;;  %791 = vmatpush.bf16.msra.mxu2 %v769_v12 }
  0x2e   : > { %481 = vmatpush.bf16.msra.mxu1 %v777_v13  ;;  %799 = vmatpush.bf16.msra.mxu3 %v777_v13 }
  0x31   : > { %453 = vmatpush.bf16.msra.mxu0 %v768_v14  ;;  %792 = vmatpush.bf16.msra.mxu2 %v768_v14 }
  0x32   : > { %482 = vmatpush.bf16.msra.mxu1 %v776_v15  ;;  %800 = vmatpush.bf16.msra.mxu3 %v776_v15  ;;  %v507_v15 = vld [vmem:[%s1106_s21 + $0x18] sm:$0xff] }
  0x34   : > { %454 = vmatmul.bf16.vlgmr.msra.gmra.mxu0 %v660_v24  ;;  %464 = vmatmul.bf16.vlgmr.msra.gmra.mxu2 %v676_v25 }
  0x35   : > { %483 = vmatmul.bf16.vlgmr.msra.gmra.mxu1 %v664_v26  ;;  %493 = vmatmul.bf16.vlgmr.msra.gmra.mxu3 %v680_v27 }
  0x44   : > { %459 = vmatmul.bf16.gmra.mxu0 %v668_v36  ;;  %469 = vmatmul.bf16.gmra.mxu2 %v684_v37 }
  0x45   : > { %488 = vmatmul.bf16.gmra.mxu1 %v672_v38  ;;  %498 = vmatmul.bf16.gmra.mxu3 %v688_v39 }
  0xb1   : > { %v455_v41 = vpop.f32.mrf.mxu0 }
  0xb2   : > { %v456_v42 = vadd.f32 %v858_v40, %v455_v41  ;;  %v484_v43 = vpop.f32.mrf.mxu1 }
  0xb4   : > { %v485_v45 = vadd.f32 %v484_v43, %v456_v42 }
  0xb6   : > { %v512_v46 = vadd.f32 %v504_v44, %v485_v45 }
  0xb7   : > { %v465_v47 = vpop.f32.mrf.mxu2 }
  0xb8   : > { %521 = vst.msk [vmem:[%s1111_s24] sm:$0xff] %vm520_vm0, %v512_v46  ;;  %v466_v48 = vadd.f32 %v858_v40, %v465_v47  ;;  %v494_v49 = vpop.f32.mrf.mxu3 }
  0xb9   : > { %v457_v51 = vpop.f32.mrf.mxu0 }
  0xba   : > { %v495_v52 = vadd.f32 %v494_v49, %v466_v48  ;;  %v458_v53 = vadd.f32 %v858_v40, %v457_v51  ;;  %v486_v54 = vpop.f32.mrf.mxu1 }
  0xbc   : > { %v516_v56 = vadd.f32 %v508_v50, %v495_v52  ;;  %v487_v57 = vadd.f32 %v486_v54, %v458_v53 }
  0xbe   : > { %525 = vst.msk [vmem:[%s1111_s24 + $0x20] sm:$0xff] %vm520_vm0, %v516_v56  ;;  %v513_v58 = vadd.f32 %v505_v55, %v487_v57 }
  0xbf   : > { %v467_v59 = vpop.f32.mrf.mxu2 }
  0xc0   : > { %522 = vst.msk [vmem:[%s1111_s24 + $0x8] sm:$0xff] %vm520_vm0, %v513_v58  ;;  %v468_v60 = vadd.f32 %v858_v40, %v467_v59  ;;  %v496_v61 = vpop.f32.mrf.mxu3 }
  0xc1   : > { %v460_v63 = vpop.f32.mrf.mxu0 }
  0xc2   : > { %v497_v0 = vadd.f32 %v496_v61, %v468_v60  ;;  %v461_v1 = vadd.f32 %v858_v40, %v460_v63  ;;  %v489_v2 = vpop.f32.mrf.mxu1 }
  0xc4   : > { %v517_v4 = vadd.f32 %v509_v62, %v497_v0  ;;  %v490_v5 = vadd.f32 %v489_v2, %v461_v1 }
  0xc6   : > { %526 = vst.msk [vmem:[%s1111_s24 + $0x28] sm:$0xff] %vm520_vm0, %v517_v4  ;;  %v514_v6 = vadd.f32 %v506_v3, %v490_v5 }
  0xc7   : > { %v470_v7 = vpop.f32.mrf.mxu2 }
  0xc8   : > { %523 = vst.msk [vmem:[%s1111_s24 + $0x10] sm:$0xff] %vm520_vm0, %v514_v6  ;;  %v471_v8 = vadd.f32 %v858_v40, %v470_v7  ;;  %v499_v9 = vpop.f32.mrf.mxu3 }
  0xc9   : > { %v462_v11 = vpop.f32.mrf.mxu0 }
  0xca   : > { %v500_v12 = vadd.f32 %v499_v9, %v471_v8  ;;  %v463_v13 = vadd.f32 %v858_v40, %v462_v11  ;;  %v491_v14 = vpop.f32.mrf.mxu1 }
  0xcc   : > { %v518_v16 = vadd.f32 %v510_v10, %v500_v12  ;;  %v492_v17 = vadd.f32 %v491_v14, %v463_v13 }
  0xce   : > { %527 = vst.msk [vmem:[%s1111_s24 + $0x30] sm:$0xff] %vm520_vm0, %v518_v16  ;;  %v515_v18 = vadd.f32 %v507_v15, %v492_v17 }
  0xcf   : > { %v472_v19 = vpop.f32.mrf.mxu2 }
  0xd0   : > { %524 = vst.msk [vmem:[%s1111_s24 + $0x18] sm:$0xff] %vm520_vm0, %v515_v18  ;;  %v473_v20 = vadd.f32 %v858_v40, %v472_v19  ;;  %v501_v21 = vpop.f32.mrf.mxu3 }
  0xd2   : > { %v502_v23 = vadd.f32 %v501_v21, %v473_v20 }
  0xd4   : > { %v519_v24 = vadd.f32 %v511_v22, %v502_v23 }
  0xd6   : > { %528 = vst.msk [vmem:[%s1111_s24 + $0x38] sm:$0xff] %vm520_vm0, %v519_v24 }
  0xd7   : > { %886 = shalt.err (!%p883_p5)
}
  0xd8   : > { %s939_s11 = smov 128   ;;  %s940_s22 = smov 8  }
  0xd9   : > { %801 = dma.vmem_to_hbm [thread:$0]  (%p1006_p4), %s545_s30, 1024, %s547_s18, %s530_s5, %s939_s11, %s939_s11, %s940_s22  }
  0xda PF: > { %p807_p6 = scmp.ge.s32.totalorder %s937_s20, 2  ;;  %s561_s24 = sand.u32 1, %s917_s15  }
  0xdb   : > { %s562_s7 = scalar_lea.sflag [#allocation3], %s561_s24 }
  0xdc   : > { %p804_p7 = pnand %p807_p6, %p1013_p8 }
  0xde   : > { %p805_p9 = pneg %p804_p7 }
  0xe0   : > { %912 = dma.done.wait (%p805_p9), %s562_s7, 1024  }
  0xe1   : > { %914 = vsyncadd (%p805_p9), %s562_s7, 4294966272  ;;  %s17_s20 = sadd.s32 1, %s937_s20   ;;  %s1182_s15 = smov %s921_s16 }
  0xe2   : > { %p14_p10 = scmp.ge.s32.totalorder %s17_s20, 4   ;;  %s1183_s16 = smov %s925_s17 }
  0xe3   : > { %s1184_s17 = smov %s1019_s28  ;;  %s1185_s18 = smov %s933_s19 }
  0xe4   : > { %s1186_s19 = smov %s1188_s23  ;;  %16 = sbr.rel (!%p14_p10) target bundleno = 4 (0x4), region = 74 }
  0xe9   :  { %568 = vsyncpa [#allocation3], 1 }
  0xea   :  { %570 = vsyncpa [#allocation3 + $0x1], 1 }

// kernel: my_layer_forward.13
= control target key start
LH: loop header
LB: loop body
LE: loop exit
PB: predicated region body
PF: predicated region fallthrough
CT: control target
= control target key end

     0   :  { %s1277_s27 = smov 0   ;;  %s1279_s28 = smov 0   ;;  %s1490_s0 = inlined_call_operand.vmem [shape: f32[2,64,64], index: 0, kind: input, shape index: {}]   ;;  %s1491_s1 = inlined_call_operand.vmem [shape: f32[2,64,64], index: 1, kind: input, shape index: {}]   ;;  %s1492_s2 = inlined_call_operand.vmem [shape: f32[2,64,64], index: 2, kind: input, shape index: {}]   ;;  %s1493_s3 = inlined_call_operand.vmem [shape: bf16[64,64], index: 3, kind: input, shape index: {}]   ;;  %s1494_s4 = inlined_call_operand.vmem [shape: bf16[64,64], index: 4, kind: input, shape index: {}]   ;;  %s1495_s5 = inlined_call_operand.vmem [shape: f32[1,64], index: 5, kind: input, shape index: {}]   ;;  %s1496_s6 = inlined_call_operand.vmem [shape: bf16[64,256], index: 6, kind: input, shape index: {}]   ;;  %s1497_s7 = inlined_call_operand.vmem [shape: f32[1,256], index: 7, kind: input, shape index: {}]   ;;  %s1498_s8 = inlined_call_operand.vmem [shape: bf16[2,64,256], index: 8, kind: output, shape index: {}]  }
   0x1   :  { %s1281_s29 = smov 0  }
   0x2 LB: > { %s30_s30 = sadd.s32 1, %s1226_s28  ;;  %p1040_p0 = scmp.ge.s32.totalorder %s1230_s29, 1  ;;  %s1230_s29 = sphi %s1281_s29, %s18_s29   ;;  %s1226_s28 = sphi %s1279_s28, %s1500_s28   ;;  %s1222_s27 = sphi %s1277_s27, %s1499_s27  }
   0x3   : > { %p32_p1 = scmp.ge.s32.totalorder %s30_s30, 2  ;;  %p317_p2 = scmp.lt.s32.totalorder %s1230_s29, 3 }
   0x5   : > { %s1502_s30 = smov (%p32_p1, %s30_s30), 0  ;;  %p318_p3 = pnand %p1040_p0, %p317_p2 }
   0x6   : > { %p379_p4 = scmp.lt.s32.totalorder (!%p318_p3), %s1222_s27, 1 }
   0x7   : > { %321 = sbr.rel (%p318_p3) target bundleno = 387 (0x183), region = 52 }
   0xc   : > { %v1142_v0 = vld [vmem:[%s1494_s4 + $0x18] sm:$0xff]  ;;  %v1141_v2 = vld [vmem:[%s1494_s4 + $0x10] sm:$0xff]  ;;  %s1504_s27 = smov (!%p379_p4, %s1222_s27), 1  ;;  %v1140_v4 = vld [vmem:[%s1494_s4 + $0x8] sm:$0xff]  ;;  %vm484_vm0 = vcmask 523264  }
   0xd   : > { %v1138_v1 = vld [vmem:[%s1493_s3 + $0x18] sm:$0xff]  ;;  %501 = vmatpush.bf16.msra.mxu0 %v1142_v0  ;;  %v1137_v3 = vld [vmem:[%s1493_s3 + $0x10] sm:$0xff]  ;;  %s1307_s17 = sshll.u32 %s1504_s27, 6  ;;  %v1136_v5 = vld [vmem:[%s1493_s3 + $0x8] sm:$0xff] }
   0xe   : > { %566 = vmatpush.bf16.msra.mxu1 %v1138_v1  ;;  %s1319_s24 = scalar_lea.vmem %s1491_s1, %s1307_s17  ;;  %s1325_s27 = scalar_lea.vmem %s1490_s0, %s1307_s17  ;;  %v1139_v6 = vld [vmem:[%s1494_s4] sm:$0xff]  ;;  %v1115_v32 = vld [vmem:[%s1496_s6 + $0x30] sm:$0xf]  ;;  %v1150_v33 = vld [vmem:[%s1496_s6 + $0x34] sm:$0xf0] }
   0xf   : > { %v1135_v7 = vld [vmem:[%s1493_s3] sm:$0xff]  ;;  %v441_v9 = vld [vmem:[%s1319_s24 + $0x8] sm:$0xff]  ;;  %v442_v14 = vld [vmem:[%s1319_s24 + $0x10] sm:$0xff]  ;;  %v1116_v35 = vor.u32 %v1150_v33, %v1115_v32  ;;  %s1412_s13 = scalar_lea.vmem %s1492_s2, %s1307_s17  ;;  %s1452_s19 = scalar_lea.vmem %s1498_s8, %s1307_s17 }
  0x10   : > { %v440_v8 = vld [vmem:[%s1319_s24] sm:$0xff]  ;;  %v421_v11 = vld [vmem:[%s1325_s27 + $0x8] sm:$0xff]  ;;  %v443_v15 = vld [vmem:[%s1319_s24 + $0x18] sm:$0xff] }
  0x11   : > { %502 = vmatpush.bf16.msra.mxu0 %v1141_v2  ;;  %v420_v10 = vld [vmem:[%s1325_s27] sm:$0xff]  ;;  %v448_v12 = vpack.c.bf16 %v441_v9, %v440_v8  ;;  %v422_v16 = vld [vmem:[%s1325_s27 + $0x10] sm:$0xff]  ;;  %v423_v17 = vld [vmem:[%s1325_s27 + $0x18] sm:$0xff]  ;;  %v449_v18 = vpack.c.bf16 %v443_v15, %v442_v14  ;;  %693 = vmatpush.bf16.msra.mxu2 %v1116_v35 }
  0x12   : > { %567 = vmatpush.bf16.msra.mxu1 %v1137_v3  ;;  %v428_v13 = vpack.c.bf16 %v421_v11, %v420_v10  ;;  %v429_v19 = vpack.c.bf16 %v423_v17, %v422_v16  ;;  %v444_v20 = vld [vmem:[%s1319_s24 + $0x20] sm:$0xff]  ;;  %v445_v21 = vld [vmem:[%s1319_s24 + $0x28] sm:$0xff]  ;;  %v446_v26 = vld [vmem:[%s1319_s24 + $0x30] sm:$0xff] }
  0x13   : > { %v424_v22 = vld [vmem:[%s1325_s27 + $0x20] sm:$0xff]  ;;  %v425_v23 = vld [vmem:[%s1325_s27 + $0x28] sm:$0xff]  ;;  %v450_v24 = vpack.c.bf16 %v445_v21, %v444_v20  ;;  %v447_v27 = vld [vmem:[%s1319_s24 + $0x38] sm:$0xff] }
  0x14   : > { %v430_v25 = vpack.c.bf16 %v425_v23, %v424_v22  ;;  %v426_v28 = vld [vmem:[%s1325_s27 + $0x30] sm:$0xff]  ;;  %v427_v29 = vld [vmem:[%s1325_s27 + $0x38] sm:$0xff]  ;;  %v451_v30 = vpack.c.bf16 %v447_v27, %v446_v26  ;;  %v1107_v38 = vld [vmem:[%s1496_s6 + $0x20] sm:$0xf] }
  0x15   : > { %503 = vmatpush.bf16.msra.mxu0 %v1140_v4  ;;  %v431_v31 = vpack.c.bf16 %v427_v29, %v426_v28  ;;  %v1149_v34 = vld [vmem:[%s1496_s6 + $0x34] sm:$0xf]  ;;  %v1117_v36 = vld [vmem:[%s1496_s6 + $0x38] sm:$0xf0]  ;;  %v1148_v39 = vld [vmem:[%s1496_s6 + $0x24] sm:$0xf0] }
  0x16   : > { %568 = vmatpush.bf16.msra.mxu1 %v1136_v5  ;;  %v1120_v37 = vor.u32 %v1149_v34, %v1117_v36  ;;  %v1108_v40 = vor.u32 %v1148_v39, %v1107_v38  ;;  %v1147_v41 = vld [vmem:[%s1496_s6 + $0x24] sm:$0xf]  ;;  %v1109_v42 = vld [vmem:[%s1496_s6 + $0x28] sm:$0xf0]  ;;  %v1099_v44 = vld [vmem:[%s1496_s6 + $0x10] sm:$0xf] }
  0x17   : > { %v1112_v43 = vor.u32 %v1147_v41, %v1109_v42  ;;  %v1146_v45 = vld [vmem:[%s1496_s6 + $0x14] sm:$0xf0]  ;;  %v1145_v46 = vld [vmem:[%s1496_s6 + $0x14] sm:$0xf]  ;;  %v1101_v48 = vld [vmem:[%s1496_s6 + $0x18] sm:$0xf0] }
  0x18   : > { %722 = vmatpush.bf16.msra.mxu3 %v1120_v37  ;;  %694 = vmatpush.bf16.msra.mxu2 %v1108_v40  ;;  %v1100_v47 = vor.u32 %v1146_v45, %v1099_v44  ;;  %v1104_v49 = vor.u32 %v1145_v46, %v1101_v48  ;;  %v1091_v50 = vld [vmem:[%s1496_s6] sm:$0xf]  ;;  %v1144_v51 = vld [vmem:[%s1496_s6 + $0x4] sm:$0xf0]  ;;  %v1143_v53 = vld [vmem:[%s1496_s6 + $0x4] sm:$0xf] }
  0x19   : > { %504 = vmatpush.bf16.msra.mxu0 %v1139_v6  ;;  %v1092_v52 = vor.u32 %v1144_v51, %v1091_v50  ;;  %v1093_v54 = vld [vmem:[%s1496_s6 + $0x8] sm:$0xf0]  ;;  %v1175_v59 = vld [vmem:[%s1495_s5] ss:$0 sm:$0xff]  ;;  %v606_v14 = vld [vmem:[%s1412_s13 + $0x18] sm:$0xff] }
  0x1a   : > { %569 = vmatpush.bf16.msra.mxu1 %v1135_v7  ;;  %v1096_v55 = vor.u32 %v1143_v53, %v1093_v54  ;;  %v603_v0 = vld [vmem:[%s1412_s13] sm:$0xff]  ;;  %v604_v1 = vld [vmem:[%s1412_s13 + $0x8] sm:$0xff]  ;;  %v609_v39 = vld [vmem:[%s1412_s13 + $0x30] sm:$0xff] }
  0x1b   : > { %v607_v26 = vld [vmem:[%s1412_s13 + $0x20] sm:$0xff]  ;;  %v608_v27 = vld [vmem:[%s1412_s13 + $0x28] sm:$0xff]  ;;  %v610_v40 = vld [vmem:[%s1412_s13 + $0x38] sm:$0xff] }
  0x1c   : > { %1065 = vmatmul.msk.bf16.vlgmr.msra.gmra.mxu0 %vm484_vm0, %v448_v12  ;;  %723 = vmatpush.bf16.msra.mxu3 %v1112_v43  ;;  %v631_v45 = vld [vmem:[%s1497_s7] sm:$0x3] }
  0x1d   : > { %1085 = vmatmul.msk.bf16.vlgmr.msra.gmra.mxu1 %vm484_vm0, %v428_v13  ;;  %695 = vmatpush.bf16.msra.mxu2 %v1100_v47  ;;  %v605_v13 = vld [vmem:[%s1412_s13 + $0x10] sm:$0xff]  ;;  %v1433_v46 = vperm.slane %v631_v45, 0  ;;  %v1435_v47 = vperm.slane %v631_v45, 1 }
  0x20   : > { %724 = vmatpush.bf16.msra.mxu3 %v1104_v49 }
  0x21   : > { %696 = vmatpush.bf16.msra.mxu2 %v1092_v52 }
  0x24   : > { %725 = vmatpush.bf16.msra.mxu3 %v1096_v55 }
  0x2c   : > { %1066 = vmatmul.msk.bf16.gmra.mxu0 %vm484_vm0, %v449_v18 }
  0x2d   : > { %1086 = vmatmul.msk.bf16.gmra.mxu1 %vm484_vm0, %v429_v19 }
  0x3c   : > { %1067 = vmatmul.msk.bf16.gmra.mxu0 %vm484_vm0, %v450_v24 }
  0x3d   : > { %1087 = vmatmul.msk.bf16.gmra.mxu1 %vm484_vm0, %v430_v25 }
  0x4c   : > { %1068 = vmatmul.msk.bf16.gmra.mxu0 %vm484_vm0, %v451_v30 }
  0x4d   : > { %1088 = vmatmul.msk.bf16.gmra.mxu1 %vm484_vm0, %v431_v31 }
  0x99   : > { %v506_v56 = vpop.f32.mrf.mxu0 }
  0x9a   : > { %v571_v57 = vpop.f32.mrf.mxu1 }
  0x9b   : > { %v572_v58 = vadd.f32 %v571_v57, %v506_v56 }
  0x9d   : > { %v595_v62 = vadd.f32 %v1175_v59, %v572_v58 }
  0x9f   : > { %v611_v3 = vadd.f32 %v603_v0, %v595_v62 }
  0xa1   : > { %v508_v60 = vpop.f32.mrf.mxu0 }
  0xa2   : > { %v573_v61 = vpop.f32.mrf.mxu1 }
  0xa3   : > { %v574_v63 = vadd.f32 %v573_v61, %v508_v60 }
  0xa5   : > { %v596_v2 = vadd.f32 %v1175_v59, %v574_v63 }
  0xa7   : > { %v612_v4 = vadd.f32 %v604_v1, %v596_v2 }
  0xa9   : > { %v619_v5 = vpack.c.bf16 %v612_v4, %v611_v3  ;;  %v511_v6 = vpop.f32.mrf.mxu0 }
  0xaa   : > { %v576_v7 = vpop.f32.mrf.mxu1 }
  0xab   : > { %1121 = vmatmul.msk.bf16.vlgmr.msra.gmra.mxu2 %vm484_vm0, %v619_v5  ;;  %1125 = vmatmul.msk.bf16.vlgmr.msra.gmra.mxu3 %vm484_vm0, %v619_v5  ;;  %v577_v8 = vadd.f32 %v576_v7, %v511_v6 }
  0xad   : > { %v597_v11 = vadd.f32 %v1175_v59, %v577_v8 }
  0xaf   : > { %v613_v16 = vadd.f32 %v605_v13, %v597_v11 }
  0xb1   : > { %v513_v9 = vpop.f32.mrf.mxu0 }
  0xb2   : > { %v578_v10 = vpop.f32.mrf.mxu1 }
  0xb3   : > { %v579_v12 = vadd.f32 %v578_v10, %v513_v9 }
  0xb5   : > { %v598_v15 = vadd.f32 %v1175_v59, %v579_v12 }
  0xb7   : > { %v614_v17 = vadd.f32 %v606_v14, %v598_v15 }
  0xb9   : > { %v620_v18 = vpack.c.bf16 %v614_v17, %v613_v16  ;;  %v516_v19 = vpop.f32.mrf.mxu0 }
  0xba   : > { %v581_v20 = vpop.f32.mrf.mxu1 }
  0xbb   : > { %1122 = vmatmul.msk.bf16.gmra.mxu2 %vm484_vm0, %v620_v18  ;;  %1126 = vmatmul.msk.bf16.gmra.mxu3 %vm484_vm0, %v620_v18  ;;  %v582_v21 = vadd.f32 %v581_v20, %v516_v19 }
  0xbd   : > { %v599_v24 = vadd.f32 %v1175_v59, %v582_v21 }
  0xbf   : > { %v615_v29 = vadd.f32 %v607_v26, %v599_v24 }
  0xc1   : > { %v518_v22 = vpop.f32.mrf.mxu0 }
  0xc2   : > { %v583_v23 = vpop.f32.mrf.mxu1 }
  0xc3   : > { %v584_v25 = vadd.f32 %v583_v23, %v518_v22 }
  0xc5   : > { %v600_v28 = vadd.f32 %v1175_v59, %v584_v25 }
  0xc7   : > { %v616_v30 = vadd.f32 %v608_v27, %v600_v28 }
  0xc9   : > { %v621_v31 = vpack.c.bf16 %v616_v30, %v615_v29  ;;  %v521_v32 = vpop.f32.mrf.mxu0 }
  0xca   : > { %v586_v33 = vpop.f32.mrf.mxu1 }
  0xcb   : > { %1123 = vmatmul.msk.bf16.gmra.mxu2 %vm484_vm0, %v621_v31  ;;  %1127 = vmatmul.msk.bf16.gmra.mxu3 %vm484_vm0, %v621_v31  ;;  %v587_v34 = vadd.f32 %v586_v33, %v521_v32 }
  0xcd   : > { %v601_v37 = vadd.f32 %v1175_v59, %v587_v34 }
  0xcf   : > { %v617_v42 = vadd.f32 %v609_v39, %v601_v37 }
  0xd1   : > { %v523_v35 = vpop.f32.mrf.mxu0 }
  0xd2   : > { %v588_v36 = vpop.f32.mrf.mxu1 }
  0xd3   : > { %v589_v38 = vadd.f32 %v588_v36, %v523_v35 }
  0xd5   : > { %v602_v41 = vadd.f32 %v1175_v59, %v589_v38 }
  0xd7   : > { %v618_v43 = vadd.f32 %v610_v40, %v602_v41 }
  0xd9   : > { %v622_v44 = vpack.c.bf16 %v618_v43, %v617_v42 }
  0xdb   : > { %1124 = vmatmul.msk.bf16.gmra.mxu2 %vm484_vm0, %v622_v44  ;;  %1128 = vmatmul.msk.bf16.gmra.mxu3 %vm484_vm0, %v622_v44 }
 0x12e   : > { %v698_v48 = vpop.f32.mrf.mxu2  ;;  %v727_v49 = vpop.f32.mrf.mxu3 }
 0x12f   : > { %v699_v50 = vadd.f32 %v698_v48, %v1433_v46  ;;  %v728_v51 = vadd.f32 %v727_v49, %v1435_v47 }
 0x131   : > { %v763_v52 = vmul.f32 0.044715, %v699_v50  ;;  %v764_v53 = vmul.f32 0.044715, %v728_v51  ;;  %v747_v18 = vmul.f32 0.5, %v699_v50  ;;  %v748_v22 = vmul.f32 0.5, %v728_v51 }
 0x133   : > { %v779_v54 = vmul.f32 %v763_v52, %v699_v50  ;;  %v780_v55 = vmul.f32 %v764_v53, %v728_v51 }
 0x135   : > { %v795_v56 = vmul.f32 %v779_v54, %v699_v50  ;;  %v796_v57 = vmul.f32 %v780_v55, %v728_v51 }
 0x136   : > { %v700_v58 = vpop.f32.mrf.mxu2  ;;  %v729_v59 = vpop.f32.mrf.mxu3 }
 0x137   : > { %v811_v60 = vadd.f32 %v795_v56, %v699_v50  ;;  %v812_v61 = vadd.f32 %v796_v57, %v728_v51  ;;  %v701_v62 = vadd.f32 %v700_v58, %v1433_v46  ;;  %v730_v63 = vadd.f32 %v729_v59, %v1435_v47 }
 0x139   : > { %v827_v0 = vmul.f32 0.7978846, %v811_v60  ;;  %v828_v1 = vmul.f32 0.7978846, %v812_v61  ;;  %v765_v2 = vmul.f32 0.044715, %v701_v62 }
 0x13a   : > { %v766_v3 = vmul.f32 0.044715, %v730_v63  ;;  %v749_v43 = vmul.f32 0.5, %v701_v62  ;;  %v750_v45 = vmul.f32 0.5, %v730_v63 }
 0x13b   : > { %1176 = vtanh.f32 %v827_v0  ;;  %v781_v4 = vmul.f32 %v765_v2, %v701_v62 }
 0x13c   : > { %1178 = vtanh.f32 %v828_v1  ;;  %v782_v5 = vmul.f32 %v766_v3, %v730_v63 }
 0x13d   : > { %v797_v6 = vmul.f32 %v781_v4, %v701_v62 }
 0x13e   : > { %v798_v7 = vmul.f32 %v782_v5, %v730_v63  ;;  %v703_v8 = vpop.f32.mrf.mxu2  ;;  %v732_v9 = vpop.f32.mrf.mxu3 }
 0x13f   : > { %v704_v10 = vadd.f32 %v703_v8, %v1433_v46  ;;  %v1443_v11 = vadd.f32 %v732_v9, %v1435_v47  ;;  %v813_v12 = vadd.f32 %v797_v6, %v701_v62 }
 0x140   : > { %v814_v13 = vadd.f32 %v798_v7, %v730_v63 }
 0x141   : > { %v1177_v14 = vpop.eup %1176  ;;  %v767_v15 = vmul.f32 0.044715, %v704_v10  ;;  %v768_v16 = vmul.f32 0.044715, %v1443_v11  ;;  %v829_v20 = vmul.f32 0.7978846, %v813_v12 }
 0x142   : > { %v1179_v17 = vpop.eup %1178  ;;  %v859_v19 = vadd.f32 1.0, %v1177_v14  ;;  %v830_v21 = vmul.f32 0.7978846, %v814_v13  ;;  %v751_v63 = vmul.f32 0.5, %v704_v10  ;;  %v752_v6 = vmul.f32 0.5, %v1443_v11 }
 0x143   : > { %v860_v23 = vadd.f32 1.0, %v1179_v17  ;;  %v783_v24 = vmul.f32 %v767_v15, %v704_v10  ;;  %v784_v25 = vmul.f32 %v768_v16, %v1443_v11  ;;  %1180 = vtanh.f32 %v829_v20 }
 0x144   : > { %v875_v26 = vmul.f32 %v859_v19, %v747_v18  ;;  %1182 = vtanh.f32 %v830_v21 }
 0x145   : > { %v876_v27 = vmul.f32 %v860_v23, %v748_v22  ;;  %v799_v28 = vmul.f32 %v783_v24, %v704_v10  ;;  %v800_v29 = vmul.f32 %v784_v25, %v1443_v11 }
 0x146   : > { %v705_v30 = vpop.f32.mrf.mxu2  ;;  %v734_v31 = vpop.f32.mrf.mxu3 }
 0x147   : > { %v891_v32 = vpack.c.bf16 %v876_v27, %v875_v26  ;;  %v815_v33 = vadd.f32 %v799_v28, %v704_v10  ;;  %v816_v34 = vadd.f32 %v800_v29, %v1443_v11  ;;  %v706_v35 = vadd.f32 %v705_v30, %v1433_v46 }
 0x148   : > { %v735_v36 = vadd.f32 %v734_v31, %v1435_v47 }
 0x149   : > { %899 = vst [vmem:[%s1452_s19] sm:$0xff] %v891_v32  ;;  %v831_v37 = vmul.f32 0.7978846, %v815_v33  ;;  %v832_v38 = vmul.f32 0.7978846, %v816_v34  ;;  %v1181_v39 = vpop.eup %1180  ;;  %v769_v40 = vmul.f32 0.044715, %v706_v35 }
 0x14a   : > { %v770_v41 = vmul.f32 0.044715, %v735_v36  ;;  %v1183_v42 = vpop.eup %1182  ;;  %v861_v44 = vadd.f32 1.0, %v1181_v39  ;;  %v753_v27 = vmul.f32 0.5, %v706_v35  ;;  %v754_v29 = vmul.f32 0.5, %v735_v36 }
 0x14b   : > { %1184 = vtanh.f32 %v831_v37  ;;  %v862_v48 = vadd.f32 1.0, %v1183_v42  ;;  %v785_v49 = vmul.f32 %v769_v40, %v706_v35 }
 0x14c   : > { %1186 = vtanh.f32 %v832_v38  ;;  %v786_v50 = vmul.f32 %v770_v41, %v735_v36  ;;  %v877_v51 = vmul.f32 %v861_v44, %v749_v43 }
 0x14d   : > { %v878_v52 = vmul.f32 %v862_v48, %v750_v45  ;;  %v801_v53 = vmul.f32 %v785_v49, %v706_v35 }
 0x14e   : > { %v802_v54 = vmul.f32 %v786_v50, %v735_v36  ;;  %v708_v55 = vpop.f32.mrf.mxu2  ;;  %v737_v56 = vpop.f32.mrf.mxu3 }
 0x14f   : > { %v709_v57 = vadd.f32 %v708_v55, %v1433_v46  ;;  %v1460_v58 = vadd.f32 %v737_v56, %v1435_v47  ;;  %v892_v59 = vpack.c.bf16 %v878_v52, %v877_v51  ;;  %v817_v60 = vadd.f32 %v801_v53, %v706_v35 }
 0x150   : > { %v818_v61 = vadd.f32 %v802_v54, %v735_v36 }
 0x151   : > { %v1185_v62 = vpop.eup %1184  ;;  %v771_v0 = vmul.f32 0.044715, %v709_v57  ;;  %v772_v1 = vmul.f32 0.044715, %v1460_v58  ;;  %900 = vst [vmem:[%s1452_s19 + $0x8] sm:$0xff] %v892_v59  ;;  %v755_v45 = vmul.f32 0.5, %v709_v57 }
 0x152   : > { %v1187_v2 = vpop.eup %1186  ;;  %v863_v3 = vadd.f32 1.0, %v1185_v62  ;;  %v833_v4 = vmul.f32 0.7978846, %v817_v60  ;;  %v834_v5 = vmul.f32 0.7978846, %v818_v61  ;;  %v756_v54 = vmul.f32 0.5, %v1460_v58 }
 0x153   : > { %v864_v7 = vadd.f32 1.0, %v1187_v2  ;;  %v787_v8 = vmul.f32 %v771_v0, %v709_v57  ;;  %v788_v9 = vmul.f32 %v772_v1, %v1460_v58 }
 0x154   : > { %v879_v12 = vmul.f32 %v863_v3, %v751_v63  ;;  %1188 = vtanh.f32 %v833_v4 }
 0x155   : > { %v880_v13 = vmul.f32 %v864_v7, %v752_v6  ;;  %1190 = vtanh.f32 %v834_v5  ;;  %v803_v10 = vmul.f32 %v787_v8, %v709_v57  ;;  %v804_v14 = vmul.f32 %v788_v9, %v1460_v58 }
 0x156   : > { %v710_v15 = vpop.f32.mrf.mxu2  ;;  %v739_v16 = vpop.f32.mrf.mxu3 }
 0x157   : > { %v893_v17 = vpack.c.bf16 %v880_v13, %v879_v12  ;;  %v819_v18 = vadd.f32 %v803_v10, %v709_v57  ;;  %v820_v19 = vadd.f32 %v804_v14, %v1460_v58  ;;  %v711_v11 = vadd.f32 %v710_v15, %v1433_v46 }
 0x158   : > { %v740_v20 = vadd.f32 %v739_v16, %v1435_v47 }
 0x159   : > { %901 = vst [vmem:[%s1452_s19 + $0x10] sm:$0xff] %v893_v17  ;;  %v835_v21 = vmul.f32 0.7978846, %v819_v18  ;;  %v836_v22 = vmul.f32 0.7978846, %v820_v19  ;;  %v757_v13 = vmul.f32 0.5, %v711_v11 }
 0x15a   : > { %v1189_v23 = vpop.eup %1188  ;;  %v773_v24 = vmul.f32 0.044715, %v711_v11  ;;  %v774_v25 = vmul.f32 0.044715, %v740_v20  ;;  %v758_v14 = vmul.f32 0.5, %v740_v20 }
 0x15b   : > { %v1191_v26 = vpop.eup %1190  ;;  %v865_v28 = vadd.f32 1.0, %v1189_v23  ;;  %1192 = vtanh.f32 %v835_v21 }
 0x15c   : > { %v866_v30 = vadd.f32 1.0, %v1191_v26  ;;  %1194 = vtanh.f32 %v836_v22  ;;  %v789_v31 = vmul.f32 %v773_v24, %v711_v11  ;;  %v790_v32 = vmul.f32 %v774_v25, %v740_v20 }
 0x15d   : > { %v881_v33 = vmul.f32 %v865_v28, %v753_v27 }
 0x15e   : > { %v882_v34 = vmul.f32 %v866_v30, %v754_v29  ;;  %v805_v37 = vmul.f32 %v789_v31, %v711_v11  ;;  %v806_v38 = vmul.f32 %v790_v32, %v740_v20  ;;  %v713_v39 = vpop.f32.mrf.mxu2  ;;  %v742_v40 = vpop.f32.mrf.mxu3 }
 0x15f   : > { %v714_v41 = vadd.f32 %v713_v39, %v1433_v46  ;;  %v743_v42 = vadd.f32 %v742_v40, %v1435_v47 }
 0x160   : > { %v894_v43 = vpack.c.bf16 %v882_v34, %v881_v33  ;;  %v821_v35 = vadd.f32 %v805_v37, %v711_v11  ;;  %v822_v44 = vadd.f32 %v806_v38, %v740_v20 }
 0x161   : > { %v1193_v36 = vpop.eup %1192  ;;  %v775_v48 = vmul.f32 0.044715, %v714_v41  ;;  %v776_v49 = vmul.f32 0.044715, %v743_v42  ;;  %v759_v25 = vmul.f32 0.5, %v714_v41  ;;  %v760_v28 = vmul.f32 0.5, %v743_v42 }
 0x162   : > { %v1195_v50 = vpop.eup %1194  ;;  %902 = vst [vmem:[%s1452_s19 + $0x18] sm:$0xff] %v894_v43  ;;  %v867_v51 = vadd.f32 1.0, %v1193_v36  ;;  %v837_v52 = vmul.f32 0.7978846, %v821_v35  ;;  %v838_v53 = vmul.f32 0.7978846, %v822_v44 }
 0x163   : > { %v868_v55 = vadd.f32 1.0, %v1195_v50  ;;  %v791_v56 = vmul.f32 %v775_v48, %v714_v41  ;;  %v792_v59 = vmul.f32 %v776_v49, %v743_v42 }
 0x164   : > { %v883_v60 = vmul.f32 %v867_v51, %v755_v45  ;;  %1196 = vtanh.f32 %v837_v52 }
 0x165   : > { %v884_v61 = vmul.f32 %v868_v55, %v756_v54  ;;  %1198 = vtanh.f32 %v838_v53  ;;  %v807_v62 = vmul.f32 %v791_v56, %v714_v41  ;;  %v808_v63 = vmul.f32 %v792_v59, %v743_v42 }
 0x166   : > { %v715_v57 = vpop.f32.mrf.mxu2  ;;  %v744_v0 = vpop.f32.mrf.mxu3 }
 0x167   : > { %v895_v1 = vpack.c.bf16 %v884_v61, %v883_v60  ;;  %v823_v2 = vadd.f32 %v807_v62, %v714_v41  ;;  %v824_v3 = vadd.f32 %v808_v63, %v743_v42  ;;  %v716_v4 = vadd.f32 %v715_v57, %v1433_v46 }
 0x168   : > { %v745_v5 = vadd.f32 %v744_v0, %v1435_v47 }
 0x169   : > { %903 = vst [vmem:[%s1452_s19 + $0x20] sm:$0xff] %v895_v1  ;;  %v839_v58 = vmul.f32 0.7978846, %v823_v2  ;;  %v840_v6 = vmul.f32 0.7978846, %v824_v3  ;;  %v761_v37 = vmul.f32 0.5, %v716_v4 }
 0x16a   : > { %v1197_v7 = vpop.eup %1196  ;;  %v777_v8 = vmul.f32 0.044715, %v716_v4  ;;  %v778_v9 = vmul.f32 0.044715, %v745_v5  ;;  %v762_v39 = vmul.f32 0.5, %v745_v5 }
 0x16b   : > { %v1199_v12 = vpop.eup %1198  ;;  %v869_v10 = vadd.f32 1.0, %v1197_v7  ;;  %1200 = vtanh.f32 %v839_v58 }
 0x16c   : > { %v870_v15 = vadd.f32 1.0, %v1199_v12  ;;  %1202 = vtanh.f32 %v840_v6  ;;  %v793_v16 = vmul.f32 %v777_v8, %v716_v4  ;;  %v794_v17 = vmul.f32 %v778_v9, %v745_v5 }
 0x16d   : > { %v885_v18 = vmul.f32 %v869_v10, %v757_v13 }
 0x16e   : > { %v886_v46 = vmul.f32 %v870_v15, %v758_v14  ;;  %v809_v19 = vmul.f32 %v793_v16, %v716_v4  ;;  %v810_v47 = vmul.f32 %v794_v17, %v745_v5 }
 0x170   : > { %v896_v21 = vpack.c.bf16 %v886_v46, %v885_v18  ;;  %v825_v22 = vadd.f32 %v809_v19, %v716_v4  ;;  %v826_v23 = vadd.f32 %v810_v47, %v745_v5 }
 0x171   : > { %v1201_v24 = vpop.eup %1200 }
 0x172   : > { %v1203_v26 = vpop.eup %1202  ;;  %904 = vst [vmem:[%s1452_s19 + $0x28] sm:$0xff] %v896_v21  ;;  %v871_v11 = vadd.f32 1.0, %v1201_v24  ;;  %v841_v20 = vmul.f32 0.7978846, %v825_v22  ;;  %v842_v27 = vmul.f32 0.7978846, %v826_v23 }
 0x173   : > { %v872_v29 = vadd.f32 1.0, %v1203_v26 }
 0x174   : > { %v887_v30 = vmul.f32 %v871_v11, %v759_v25  ;;  %1204 = vtanh.f32 %v841_v20 }
 0x175   : > { %v888_v31 = vmul.f32 %v872_v29, %v760_v28  ;;  %1206 = vtanh.f32 %v842_v27 }
 0x177   : > { %v897_v32 = vpack.c.bf16 %v888_v31, %v887_v30 }
 0x179   : > { %905 = vst [vmem:[%s1452_s19 + $0x30] sm:$0xff] %v897_v32 }
 0x17a   : > { %v1205_v33 = vpop.eup %1204 }
 0x17b   : > { %v1207_v34 = vpop.eup %1206  ;;  %v873_v38 = vadd.f32 1.0, %v1205_v33 }
 0x17c   : > { %v874_v40 = vadd.f32 1.0, %v1207_v34 }
 0x17d   : > { %v889_v41 = vmul.f32 %v873_v38, %v761_v37 }
 0x17e   : > { %v890_v43 = vmul.f32 %v874_v40, %v762_v39 }
 0x180   : > { %v898_v35 = vpack.c.bf16 %v890_v43, %v889_v41 }
 0x182   : > { %906 = vst [vmem:[%s1452_s19 + $0x38] sm:$0xff] %v898_v35 }
 0x183 PF: > { %s18_s29 = sadd.s32 1, %s1230_s29   ;;  %s1499_s27 = smov %s1226_s28 }
 0x184   : > { %p15_p5 = scmp.ge.s32.totalorder %s18_s29, 4   ;;  %s1500_s28 = smov %s1502_s30 }
 0x186   :  { %17 = sbr.rel (!%p15_p5) target bundleno = 2 (0x2), region = 88 }

// kernel: my_layer_forward.14
= control target key start
LH: loop header
LB: loop body
LE: loop exit
PB: predicated region body
PF: predicated region fallthrough
CT: control target
= control target key end

     0   :  { %s3488_s12 = smov 0   ;;  %s6214_s0 = inlined_call_operand.vmem [shape: bf16[2,12,12,256], index: 0, kind: input, shape index: {}]   ;;  %s6215_s1 = inlined_call_operand.vmem [shape: f32[5,5,256], index: 1, kind: input, shape index: {}]   ;;  %s6216_s2 = inlined_call_operand.vmem [shape: f32[1,1,256], index: 2, kind: input, shape index: {}]   ;;  %s6217_s3 = inlined_call_operand.vmem [shape: bf16[2,8,8,256], index: 3, kind: output, shape index: {}]  }
   0x1 LB: > { %s3440_s13 = sadd.s32 4294967295, %s3466_s12   ;;  %p3444_p0 = scmp.ge.s32.totalorder %s3466_s12, 1  ;;  %s3466_s12 = sphi %s3488_s12, %s13_s12  }
   0x2   : > { %p137_p1 = scmp.lt.s32.totalorder %s3466_s12, 3 }
   0x4   : > { %p138_p2 = pnand %p3444_p0, %p137_p1 }
   0x6   : > { %141 = sbr.rel (%p138_p2) target bundleno = 595 (0x253), region = 32 }
   0xb   : > { %p161_p3 = scmp.lt.s32.totalorder %s3440_s13, 1  ;;  %v3508_v1 = vld [vmem:[%s6215_s1] sm:$0x1f]  ;;  %v3513_v2 = vld [vmem:[%s6215_s1 + $0x8] sm:$0x1f]  ;;  %vm353_vm0 = vcmask 1046528  }
   0xc   : > { %6417 = vst [vmem:[#allocation2_spill] sm:$0xff] %v3508_v1  ;;  %v3520_v7 = vperm.slane %v3508_v1, 0  ;;  %v3523_v8 = vperm.slane %v3513_v2, 0  ;;  %v3532_v13 = vperm.slane %v3508_v1, 1  ;;  %v3535_v14 = vperm.slane %v3513_v2, 1 }
   0xd   : > { %s7239_s13 = smov (!%p161_p3, %s3440_s13), 1  ;;  %6418 = vst [vmem:[#allocation3_spill] sm:$0xff] %v3513_v2  ;;  %vm500_vm1 = vcmask 1045504   ;;  %vm647_vm2 = vcmask 1044480   ;;  %vm794_vm3 = vcmask 1043456  }
   0xe   : > { %s3451_s14 = smul.u32 192, %s7239_s13  ;;  %s3450_s15 = sshll.u32 %s7239_s13, 6 }
  0x10   : > { %s3502_s17 = scalar_lea.vmem %s6214_s0, %s3451_s14 }
  0x11   : > { %v171_v0 = vld [vmem:[%s3502_s17] sm:$0xff]  ;;  %v172_v3 = vld [vmem:[%s3502_s17 + $0x8] sm:$0x33]  ;;  %v173_v4 = vld [vmem:[%s3502_s17 + $0x10] sm:$0xff] }
  0x12   : > { %v174_v5 = vld [vmem:[%s3502_s17 + $0x18] sm:$0x33]  ;;  %v175_v6 = vld [vmem:[%s3502_s17 + $0x20] sm:$0xff]  ;;  %v176_v9 = vld [vmem:[%s3502_s17 + $0x28] sm:$0x33]  ;;  %v3527_v11 = vunpack.c.l.bf16 %v171_v0  ;;  %v3529_v12 = vunpack.c.h.bf16 %v171_v0  ;;  %v3539_v17 = vunpack.c.l.bf16 %v172_v3  ;;  %v3541_v18 = vunpack.c.h.bf16 %v172_v3 }
  0x13   : > { %v177_v10 = vld [vmem:[%s3502_s17 + $0x30] sm:$0xff]  ;;  %v178_v15 = vld [vmem:[%s3502_s17 + $0x38] sm:$0x33]  ;;  %v179_v16 = vld [vmem:[%s3502_s17 + $0x40] sm:$0xff]  ;;  %v3543_v19 = vunpack.c.l.bf16 %v173_v4  ;;  %v3545_v20 = vunpack.c.h.bf16 %v173_v4  ;;  %v3549_v23 = vunpack.c.l.bf16 %v174_v5  ;;  %v3551_v24 = vunpack.c.h.bf16 %v174_v5 }
  0x14   : > { %6419 = vst [vmem:[#allocation4_spill] sm:$0xff] %v3527_v11  ;;  %v180_v21 = vld [vmem:[%s3502_s17 + $0x48] sm:$0x33]  ;;  %v181_v22 = vld [vmem:[%s3502_s17 + $0x50] sm:$0xff]  ;;  %v3553_v25 = vunpack.c.l.bf16 %v175_v6  ;;  %v3555_v26 = vunpack.c.h.bf16 %v175_v6  ;;  %v182_v27 = vld [vmem:[%s3502_s17 + $0x58] sm:$0x33]  ;;  %v3559_v29 = vunpack.c.l.bf16 %v176_v9  ;;  %v3561_v30 = vunpack.c.h.bf16 %v176_v9 }
  0x15   : > { %6420 = vst [vmem:[#allocation5_spill] sm:$0xff] %v3529_v12  ;;  %v183_v28 = vld [vmem:[%s3502_s17 + $0x60] sm:$0xff]  ;;  %v3563_v31 = vunpack.c.l.bf16 %v177_v10  ;;  %v3565_v32 = vunpack.c.h.bf16 %v177_v10  ;;  %v184_v33 = vld [vmem:[%s3502_s17 + $0x68] sm:$0x33]  ;;  %v185_v34 = vld [vmem:[%s3502_s17 + $0x70] sm:$0xff]  ;;  %v3569_v35 = vunpack.c.l.bf16 %v178_v15  ;;  %v3571_v36 = vunpack.c.h.bf16 %v178_v15 }
  0x16   : > { %6421 = vst [vmem:[#allocation6_spill] sm:$0xff] %v3539_v17  ;;  %v3573_v37 = vunpack.c.l.bf16 %v179_v16  ;;  %v3575_v38 = vunpack.c.h.bf16 %v179_v16  ;;  %v186_v39 = vld [vmem:[%s3502_s17 + $0x78] sm:$0x33]  ;;  %v187_v40 = vld [vmem:[%s3502_s17 + $0x80] sm:$0xff]  ;;  %v3579_v41 = vunpack.c.l.bf16 %v180_v21  ;;  %v3581_v42 = vunpack.c.h.bf16 %v180_v21  ;;  %v188_v45 = vld [vmem:[%s3502_s17 + $0x88] sm:$0x33] }
  0x17   : > { %6422 = vst [vmem:[#allocation7_spill] sm:$0xff] %v3541_v18  ;;  %v3583_v43 = vunpack.c.l.bf16 %v181_v22  ;;  %v3585_v44 = vunpack.c.h.bf16 %v181_v22  ;;  %v189_v46 = vld [vmem:[%s3502_s17 + $0x90] sm:$0xff]  ;;  %v3589_v47 = vunpack.c.l.bf16 %v182_v27  ;;  %v3591_v48 = vunpack.c.h.bf16 %v182_v27  ;;  %v190_v51 = vld [vmem:[%s3502_s17 + $0x98] sm:$0x33]  ;;  %v191_v52 = vld [vmem:[%s3502_s17 + $0xa0] sm:$0xff] }
  0x18   : > { %6423 = vst [vmem:[#allocation8_spill] sm:$0xff] %v3543_v19  ;;  %v3593_v49 = vunpack.c.l.bf16 %v183_v28  ;;  %v3595_v50 = vunpack.c.h.bf16 %v183_v28  ;;  %v3599_v53 = vunpack.c.l.bf16 %v184_v33  ;;  %v3601_v54 = vunpack.c.h.bf16 %v184_v33  ;;  %v192_v57 = vld [vmem:[%s3502_s17 + $0xa8] sm:$0x33]  ;;  %v193_v58 = vld [vmem:[%s3502_s17 + $0xb0] sm:$0xff]  ;;  %v194_v63 = vld [vmem:[%s3502_s17 + $0xb8] sm:$0x33]  ;;  %s170_s17 = scalar_lea.vmem %s6217_s3, %s3450_s15 }
  0x19   : > { %6424 = vst [vmem:[#allocation9_spill] sm:$0xff] %v3545_v20  ;;  %v3603_v55 = vunpack.c.l.bf16 %v185_v34  ;;  %v3605_v56 = vunpack.c.h.bf16 %v185_v34  ;;  %v3609_v59 = vunpack.c.l.bf16 %v186_v39  ;;  %v3611_v60 = vunpack.c.h.bf16 %v186_v39 }
  0x1a   : > { %6425 = vst [vmem:[#allocation10_spill] sm:$0xff] %v3549_v23  ;;  %v3613_v61 = vunpack.c.l.bf16 %v187_v40  ;;  %v3615_v62 = vunpack.c.h.bf16 %v187_v40  ;;  %v3618_v0 = vunpack.c.l.bf16 %v188_v45  ;;  %v3620_v3 = vunpack.c.h.bf16 %v188_v45 }
  0x1b   : > { %6426 = vst [vmem:[#allocation11_spill] sm:$0xff] %v3551_v24  ;;  %v3622_v4 = vunpack.c.l.bf16 %v189_v46  ;;  %v3624_v5 = vunpack.c.h.bf16 %v189_v46  ;;  %v3626_v6 = vunpack.c.l.bf16 %v190_v51  ;;  %v3628_v9 = vunpack.c.h.bf16 %v190_v51 }
  0x1c   : > { %6427 = vst [vmem:[#allocation12_spill] sm:$0xff] %v3553_v25  ;;  %v3630_v10 = vunpack.c.l.bf16 %v191_v52  ;;  %v3632_v15 = vunpack.c.h.bf16 %v191_v52  ;;  %v3634_v16 = vunpack.c.l.bf16 %v192_v57  ;;  %v3636_v21 = vunpack.c.h.bf16 %v192_v57 }
  0x1d   : > { %6428 = vst [vmem:[#allocation13_spill] sm:$0xff] %v3555_v26  ;;  %v3638_v22 = vunpack.c.l.bf16 %v193_v58  ;;  %v3640_v27 = vunpack.c.h.bf16 %v193_v58  ;;  %v3642_v28 = vunpack.c.l.bf16 %v194_v63  ;;  %v3644_v33 = vunpack.c.h.bf16 %v194_v63 }
  0x1e   : > { %6429 = vst [vmem:[#allocation14_spill] sm:$0xff] %v3559_v29  ;;  %v3648_v34 = vmul.f32 %v3520_v7, %v3527_v11  ;;  %v3652_v39 = vmul.f32 %v3523_v8, %v3529_v12  ;;  %v3656_v40 = vmul.f32 %v3520_v7, %v3543_v19  ;;  %v3660_v45 = vmul.f32 %v3523_v8, %v3545_v20 }
  0x1f   : > { %6430 = vst [vmem:[#allocation15_spill] sm:$0xff] %v3561_v30  ;;  %v3664_v46 = vmul.f32 %v3520_v7, %v3553_v25  ;;  %v3668_v51 = vmul.f32 %v3523_v8, %v3555_v26  ;;  %v3672_v52 = vmul.f32 %v3520_v7, %v3563_v31  ;;  %v3676_v57 = vmul.f32 %v3523_v8, %v3565_v32 }
  0x20   : > { %6431 = vst [vmem:[#allocation16_spill] sm:$0xff] %v3563_v31  ;;  %v3680_v58 = vmul.f32 %v3520_v7, %v3573_v37  ;;  %v3684_v63 = vmul.f32 %v3523_v8, %v3575_v38 }
  0x21   : > { %6432 = vst [vmem:[#allocation17_spill] sm:$0xff] %v3565_v32 }
  0x22   : > { %6433 = vst [vmem:[#allocation18_spill] sm:$0xff] %v3569_v35 }
  0x23   : > { %6434 = vst [vmem:[#allocation19_spill] sm:$0xff] %v3571_v36 }
  0x24   : > { %6435 = vst [vmem:[#allocation20_spill] sm:$0xff] %v3573_v37 }
  0x25   : > { %6436 = vst [vmem:[#allocation21_spill] sm:$0xff] %v3575_v38 }
  0x26   : > { %6437 = vst [vmem:[#allocation22_spill] sm:$0xff] %v3579_v41 }
  0x27   : > { %6438 = vst [vmem:[#allocation23_spill] sm:$0xff] %v3581_v42 }
  0x28   : > { %6439 = vst [vmem:[#allocation24_spill] sm:$0xff] %v3583_v43 }
  0x29   : > { %6440 = vst [vmem:[#allocation25_spill] sm:$0xff] %v3585_v44 }
  0x2a   : > { %6441 = vst [vmem:[#allocation26_spill] sm:$0xff] %v3589_v47 }
  0x2b   : > { %6442 = vst [vmem:[#allocation27_spill] sm:$0xff] %v3591_v48 }
  0x2c   : > { %6443 = vst [vmem:[#allocation28_spill] sm:$0xff] %v3593_v49 }
  0x2d   : > { %6444 = vst [vmem:[#allocation29_spill] sm:$0xff] %v3595_v50 }
  0x2e   : > { %6445 = vst [vmem:[#allocation30_spill] sm:$0xff] %v3599_v53 }
  0x2f   : > { %6446 = vst [vmem:[#allocation31_spill] sm:$0xff] %v3601_v54 }
  0x30   : > { %6447 = vst [vmem:[#allocation32_spill] sm:$0xff] %v3603_v55 }
  0x31   : > { %6448 = vst [vmem:[#allocation33_spill] sm:$0xff] %v3605_v56 }
  0x32   : > { %6449 = vst [vmem:[#allocation34_spill] sm:$0xff] %v3609_v59 }
  0x33   : > { %6450 = vst [vmem:[#allocation35_spill] sm:$0xff] %v3611_v60 }
  0x34   : > { %6451 = vst [vmem:[#allocation36_spill] sm:$0xff] %v3613_v61  ;;  %v300_v61 = vmul.f32 %v3535_v14, %v3561_v30  ;;  %v307_v30 = vmul.f32 %v3532_v13, %v3579_v41  ;;  %v313_v41 = vmul.f32 %v3532_v13, %v3593_v49 }
  0x35   : > { %6452 = vst [vmem:[#allocation37_spill] sm:$0xff] %v3615_v62  ;;  %v299_v62 = vmul.f32 %v3532_v13, %v3559_v29  ;;  %v306_v29 = vmul.f32 %v3535_v14, %v3575_v38  ;;  %v312_v38 = vmul.f32 %v3535_v14, %v3591_v48 }
  0x36   : > { %6453 = vst [vmem:[#allocation38_spill] sm:$0xff] %v3618_v0  ;;  %v298_v0 = vmul.f32 %v3535_v14, %v3555_v26  ;;  %v305_v26 = vmul.f32 %v3532_v13, %v3573_v37  ;;  %v311_v37 = vmul.f32 %v3532_v13, %v3589_v47 }
  0x37   : > { %6454 = vst [vmem:[#allocation39_spill] sm:$0xff] %v3620_v3  ;;  %v297_v3 = vmul.f32 %v3532_v13, %v3553_v25  ;;  %v304_v25 = vmul.f32 %v3535_v14, %v3571_v36 }
  0x38   : > { %6455 = vst [vmem:[#allocation40_spill] sm:$0xff] %v3622_v4  ;;  %v296_v4 = vmul.f32 %v3535_v14, %v3551_v24  ;;  %v303_v24 = vmul.f32 %v3532_v13, %v3569_v35  ;;  %v310_v35 = vmul.f32 %v3535_v14, %v3585_v44 }
  0x39   : > { %6456 = vst [vmem:[#allocation41_spill] sm:$0xff] %v3624_v5  ;;  %v294_v5 = vmul.f32 %v3535_v14, %v3545_v20  ;;  %v301_v20 = vmul.f32 %v3532_v13, %v3563_v31  ;;  %v308_v31 = vmul.f32 %v3535_v14, %v3581_v42  ;;  %v314_v42 = vmul.f32 %v3535_v14, %v3595_v50 }
  0x3a   : > { %6457 = vst [vmem:[#allocation42_spill] sm:$0xff] %v3626_v6  ;;  %v292_v6 = vmul.f32 %v3535_v14, %v3541_v18 }
  0x3b   : > { %6458 = vst [vmem:[#allocation43_spill] sm:$0xff] %v3628_v9  ;;  %v291_v9 = vmul.f32 %v3532_v13, %v3539_v17 }
  0x3c   : > { %6459 = vst [vmem:[#allocation44_spill] sm:$0xff] %v3630_v10  ;;  %v290_v10 = vmul.f32 %v3535_v14, %v3529_v12  ;;  %v358_v17 = vrot.slane %v292_v6, 1  ;;  %v317_v6 = vmul.f32 %v3532_v13, %v3603_v55  ;;  %v366_v12 = vrot.slane %v297_v3, 1 }
  0x3d   : > { %6460 = vst [vmem:[#allocation45_spill] sm:$0xff] %v3632_v15  ;;  %v289_v15 = vmul.f32 %v3532_v13, %v3527_v11  ;;  %v355_v36 = vrot.slane %v291_v9, 1  ;;  %v316_v9 = vmul.f32 %v3535_v14, %v3601_v54  ;;  %v364_v54 = vrot.slane %v296_v4, 1 }
  0x3e   : > { %6461 = vst [vmem:[#allocation46_spill] sm:$0xff] %v3634_v16  ;;  %v3708_v16 = vmul.f32 %v3523_v8, %v3605_v56  ;;  %v357_v18 = vrot.slane %v290_v10, 1  ;;  %v318_v10 = vmul.f32 %v3535_v14, %v3605_v56  ;;  %v367_v11 = vrot.slane %v299_v62, 1 }
  0x3f   : > { %6462 = vst [vmem:[#allocation47_spill] sm:$0xff] %v3636_v21  ;;  %v3704_v21 = vmul.f32 %v3520_v7, %v3603_v55  ;;  %v369_v55 = vrot.slane %v298_v0, 1  ;;  %v373_v56 = vrot.slane %v303_v24, 1  ;;  %v394_v4 = vrot.slane %v316_v9, 1  ;;  %v6484_v9 = vld [vmem:[#allocation7_spill] sm:$0xff] }
  0x40   : > { %6463 = vst [vmem:[#allocation48_spill] sm:$0xff] %v3638_v22  ;;  %v3700_v22 = vmul.f32 %v3523_v8, %v3595_v50 }
  0x41   : > { %6464 = vst [vmem:[#allocation49_spill] sm:$0xff] %v3640_v27  ;;  %v3696_v27 = vmul.f32 %v3520_v7, %v3593_v49  ;;  %v320_v49 = vmul.f32 %v3535_v14, %v3611_v60  ;;  %v387_v60 = vrot.slane %v310_v35, 1 }
  0x42   : > { %6465 = vst [vmem:[#allocation50_spill] sm:$0xff] %v3642_v28  ;;  %v3692_v28 = vmul.f32 %v3523_v8, %v3585_v44  ;;  %v295_v8 = vmul.f32 %v3532_v13, %v3549_v23  ;;  %v302_v23 = vmul.f32 %v3535_v14, %v3565_v32  ;;  %v309_v32 = vmul.f32 %v3532_v13, %v3583_v43 }
  0x43   : > { %6466 = vst [vmem:[#allocation51_spill] sm:$0xff] %v3644_v33  ;;  %v3688_v33 = vmul.f32 %v3520_v7, %v3583_v43  ;;  %v293_v7 = vmul.f32 %v3532_v13, %v3543_v19  ;;  %v354_v19 = vrot.slane %v289_v15, 1  ;;  %v315_v43 = vmul.f32 %v3532_v13, %v3599_v53 }
  0x44   : > { %6467 = vst [vmem:[#allocation52_spill] sm:$0xff] %v3692_v28  ;;  %v319_v15 = vmul.f32 %v3532_v13, %v3609_v59  ;;  %v361_v50 = vrot.slane %v295_v8, 1  ;;  %v359_v53 = vsel %vm353_vm0, %v357_v18, %v358_v17  ;;  %v363_v44 = vrot.slane %v294_v5, 1 }
  0x45   : > { %6468 = vst [vmem:[#allocation53_spill] sm:$0xff] %v3696_v27  ;;  %v360_v48 = vrot.slane %v293_v7, 1  ;;  %v356_v47 = vsel %vm353_vm0, %v354_v19, %v355_v36  ;;  %v376_v27 = vrot.slane %v304_v25, 1  ;;  %v378_v13 = vrot.slane %v305_v26, 1 }
  0x46   : > { %6469 = vst [vmem:[#allocation54_spill] sm:$0xff] %v3700_v22  ;;  %v375_v22 = vrot.slane %v302_v23, 1  ;;  %v379_v59 = vrot.slane %v307_v30, 1  ;;  %v381_v28 = vrot.slane %v306_v29, 1  ;;  %v382_v14 = vrot.slane %v308_v31, 1 }
  0x47   : > { %6470 = vst [vmem:[#allocation55_spill] sm:$0xff] %v3704_v21  ;;  %v372_v21 = vrot.slane %v301_v20, 1  ;;  %v384_v7 = vrot.slane %v309_v32, 1  ;;  %v385_v8 = vrot.slane %v311_v37, 1  ;;  %v388_v19 = vrot.slane %v312_v38, 1 }
  0x48   : > { %6471 = vst [vmem:[#allocation56_spill] sm:$0xff] %v3708_v16  ;;  %v370_v16 = vrot.slane %v300_v61, 1  ;;  %v390_v36 = vrot.slane %v313_v41, 1  ;;  %v391_v17 = vrot.slane %v315_v43, 1  ;;  %v393_v18 = vrot.slane %v314_v42, 1 }
  0x49   : > { %v362_v62 = vsel %vm353_vm0, %v360_v48, %v361_v50  ;;  %v365_v61 = vsel %vm353_vm0, %v363_v44, %v364_v54  ;;  %v396_v20 = vrot.slane %v317_v6, 1  ;;  %v397_v24 = vrot.slane %v319_v15, 1 }
  0x4a   : > { %v368_v23 = vsel %vm353_vm0, %v366_v12, %v367_v11  ;;  %v371_v25 = vsel %vm353_vm0, %v369_v55, %v370_v16  ;;  %v399_v26 = vrot.slane %v318_v10, 1  ;;  %v400_v29 = vrot.slane %v320_v49, 1  ;;  %v6485_v10 = vld [vmem:[#allocation8_spill] sm:$0xff] }
  0x4b   : > { %v374_v30 = vsel %vm353_vm0, %v372_v21, %v373_v56  ;;  %v377_v31 = vsel %vm353_vm0, %v375_v22, %v376_v27  ;;  %v380_v32 = vsel %vm353_vm0, %v378_v13, %v379_v59  ;;  %v383_v35 = vsel %vm353_vm0, %v381_v28, %v382_v14  ;;  %v6472_v3 = vld [vmem:[#allocation52_spill] sm:$0xff]  ;;  %v6486_v13 = vld [vmem:[#allocation9_spill] sm:$0xff] }
  0x4c   : > { %v386_v37 = vsel %vm353_vm0, %v384_v7, %v385_v8  ;;  %v389_v38 = vsel %vm353_vm0, %v387_v60, %v388_v19  ;;  %v392_v41 = vsel %vm353_vm0, %v390_v36, %v391_v17  ;;  %v395_v11 = vsel %vm353_vm0, %v393_v18, %v394_v4  ;;  %v6473_v16 = vld [vmem:[#allocation53_spill] sm:$0xff]  ;;  %v6487_v7 = vld [vmem:[#allocation10_spill] sm:$0xff]  ;;  %v6488_v19 = vld [vmem:[#allocation11_spill] sm:$0xff] }
  0x4d   : > { %v398_v12 = vsel %vm353_vm0, %v396_v20, %v397_v24  ;;  %v3790_v42 = vadd.f32 %v356_v47, %v3648_v34  ;;  %v3793_v43 = vadd.f32 %v359_v53, %v3652_v39  ;;  %v3796_v44 = vadd.f32 %v362_v62, %v3656_v40  ;;  %v6474_v22 = vld [vmem:[#allocation54_spill] sm:$0xff]  ;;  %v6489_v17 = vld [vmem:[#allocation12_spill] sm:$0xff]  ;;  %v6490_v4 = vld [vmem:[#allocation13_spill] sm:$0xff] }
  0x4e   : > { %v401_v48 = vsel %vm353_vm0, %v399_v26, %v400_v29  ;;  %v3800_v49 = vadd.f32 %v365_v61, %v3660_v45  ;;  %v3803_v50 = vadd.f32 %v368_v23, %v3664_v46  ;;  %v434_v54 = vperm.slane %v3508_v1, 2  ;;  %v6475_v28 = vld [vmem:[#allocation55_spill] sm:$0xff]  ;;  %v6479_v45 = vld [vmem:[#allocation4_spill] sm:$0xff]  ;;  %v6491_v61 = vld [vmem:[#allocation14_spill] sm:$0xff] }
  0x4f   : > { %v3807_v55 = vadd.f32 %v371_v25, %v3668_v51  ;;  %v3810_v47 = vadd.f32 %v374_v30, %v3672_v52  ;;  %v3813_v53 = vadd.f32 %v377_v31, %v3676_v57  ;;  %v435_v56 = vperm.slane %v3513_v2, 2  ;;  %v6477_v39 = vld [vmem:[#allocation56_spill] sm:$0xff]  ;;  %v6482_v52 = vld [vmem:[#allocation5_spill] sm:$0xff]  ;;  %v6492_v24 = vld [vmem:[#allocation15_spill] sm:$0xff] }
  0x50   : > { %v3817_v59 = vadd.f32 %v380_v32, %v3680_v58  ;;  %v3820_v60 = vadd.f32 %v383_v35, %v3684_v63  ;;  %v3823_v0 = vadd.f32 %v386_v37, %v3688_v33  ;;  %v3826_v5 = vadd.f32 %v389_v38, %v6472_v3  ;;  %v6483_v58 = vld [vmem:[#allocation6_spill] sm:$0xff]  ;;  %v6493_v25 = vld [vmem:[#allocation16_spill] sm:$0xff]  ;;  %v6494_v29 = vld [vmem:[#allocation17_spill] sm:$0xff] }
  0x51   : > { %v3829_v21 = vadd.f32 %v392_v41, %v6473_v16  ;;  %v3832_v27 = vadd.f32 %v395_v11, %v6474_v22  ;;  %v3835_v34 = vadd.f32 %v398_v12, %v6475_v28  ;;  %v3838_v40 = vadd.f32 %v401_v48, %v6477_v39  ;;  %v6495_v31 = vld [vmem:[#allocation18_spill] sm:$0xff]  ;;  %v6496_v35 = vld [vmem:[#allocation19_spill] sm:$0xff]  ;;  %v6497_v38 = vld [vmem:[#allocation20_spill] sm:$0xff] }
  0x52   : > { %v436_v46 = vmul.f32 %v434_v54, %v6479_v45  ;;  %v3842_v33 = vperm.slane %v3508_v1, 3  ;;  %v3845_v51 = vperm.slane %v3513_v2, 3  ;;  %v437_v57 = vmul.f32 %v435_v56, %v6482_v52  ;;  %v6498_v11 = vld [vmem:[#allocation21_spill] sm:$0xff]  ;;  %v6499_v48 = vld [vmem:[#allocation22_spill] sm:$0xff]  ;;  %v6500_v16 = vld [vmem:[#allocation23_spill] sm:$0xff] }
  0x53   : > { %6476 = vst [vmem:[#allocation52_spill] sm:$0xff] %v3835_v34  ;;  %v438_v63 = vmul.f32 %v434_v54, %v6483_v58  ;;  %v439_v6 = vmul.f32 %v435_v56, %v6484_v9  ;;  %v440_v15 = vmul.f32 %v434_v54, %v6485_v10  ;;  %v441_v14 = vmul.f32 %v435_v56, %v6486_v13  ;;  %v6501_v28 = vld [vmem:[#allocation24_spill] sm:$0xff]  ;;  %v6502_v2 = vld [vmem:[#allocation25_spill] sm:$0xff]  ;;  %v6507_v10 = vld [vmem:[#allocation30_spill] sm:$0xff] }
  0x54   : > { %6478 = vst [vmem:[#allocation53_spill] sm:$0xff] %v3838_v40  ;;  %v442_v8 = vmul.f32 %v434_v54, %v6487_v7  ;;  %v443_v36 = vmul.f32 %v435_v56, %v6488_v19  ;;  %v444_v18 = vmul.f32 %v434_v54, %v6489_v17  ;;  %v445_v62 = vmul.f32 %v435_v56, %v6490_v4  ;;  %v6504_v19 = vld [vmem:[#allocation27_spill] sm:$0xff]  ;;  %v6505_v7 = vld [vmem:[#allocation28_spill] sm:$0xff]  ;;  %v6506_v13 = vld [vmem:[#allocation29_spill] sm:$0xff] }
  0x55   : > { %6480 = vst [vmem:[#allocation54_spill] sm:$0xff] %v3842_v33  ;;  %v446_v20 = vmul.f32 %v434_v54, %v6491_v61  ;;  %v447_v23 = vmul.f32 %v435_v56, %v6492_v24  ;;  %v448_v26 = vmul.f32 %v434_v54, %v6493_v25  ;;  %v449_v30 = vmul.f32 %v435_v56, %v6494_v29  ;;  %v6503_v24 = vld [vmem:[#allocation26_spill] sm:$0xff]  ;;  %v6508_v9 = vld [vmem:[#allocation31_spill] sm:$0xff]  ;;  %v6509_v58 = vld [vmem:[#allocation32_spill] sm:$0xff] }
  0x56   : > { %6481 = vst [vmem:[#allocation55_spill] sm:$0xff] %v3845_v51  ;;  %v450_v32 = vmul.f32 %v434_v54, %v6495_v31  ;;  %v451_v37 = vmul.f32 %v435_v56, %v6496_v35  ;;  %v452_v41 = vmul.f32 %v434_v54, %v6497_v38  ;;  %v453_v12 = vmul.f32 %v435_v56, %v6498_v11  ;;  %v6510_v51 = vld [vmem:[#allocation33_spill] sm:$0xff] }
  0x57   : > { %v454_v3 = vmul.f32 %v434_v54, %v6499_v48  ;;  %v455_v22 = vmul.f32 %v435_v56, %v6500_v16  ;;  %v456_v39 = vmul.f32 %v434_v54, %v6501_v28  ;;  %v457_v1 = vmul.f32 %v435_v56, %v6502_v2 }
  0x58   : > { %v458_v25 = vmul.f32 %v434_v54, %v6503_v24  ;;  %v501_v61 = vrot.slane %v436_v46, 2  ;;  %v502_v29 = vrot.slane %v438_v63, 2  ;;  %v504_v4 = vrot.slane %v437_v57, 2  ;;  %v6511_v46 = vld [vmem:[#allocation34_spill] sm:$0xff]  ;;  %v6512_v57 = vld [vmem:[#allocation35_spill] sm:$0xff] }
  0x59   : > { %v505_v31 = vrot.slane %v439_v6, 2  ;;  %v507_v17 = vrot.slane %v440_v15, 2  ;;  %v508_v35 = vrot.slane %v442_v8, 2  ;;  %v459_v38 = vmul.f32 %v435_v56, %v6504_v19 }
  0x5a   : > { %v460_v11 = vmul.f32 %v434_v54, %v6505_v7  ;;  %v461_v48 = vmul.f32 %v435_v56, %v6506_v13  ;;  %v462_v16 = vmul.f32 %v434_v54, %v6507_v10  ;;  %v463_v28 = vmul.f32 %v435_v56, %v6508_v9 }
  0x5b   : > { %v464_v2 = vmul.f32 %v434_v54, %v6509_v58  ;;  %v465_v24 = vmul.f32 %v435_v56, %v6510_v51  ;;  %v466_v63 = vmul.f32 %v434_v54, %v6511_v46  ;;  %v467_v6 = vmul.f32 %v435_v56, %v6512_v57 }
  0x5c   : > { %v503_v15 = vsel %vm500_vm1, %v501_v61, %v502_v29  ;;  %v510_v8 = vrot.slane %v441_v14, 2  ;;  %v511_v19 = vrot.slane %v443_v36, 2  ;;  %v506_v7 = vsel %vm500_vm1, %v504_v4, %v505_v31 }
  0x5d   : > { %v509_v13 = vsel %vm500_vm1, %v507_v17, %v508_v35  ;;  %v513_v52 = vrot.slane %v444_v18, 2  ;;  %v514_v10 = vrot.slane %v446_v20, 2  ;;  %v516_v33 = vrot.slane %v445_v62, 2 }
  0x5e   : > { %v517_v9 = vrot.slane %v447_v23, 2  ;;  %v519_v45 = vrot.slane %v448_v26, 2  ;;  %v520_v58 = vrot.slane %v450_v32, 2  ;;  %v522_v40 = vrot.slane %v449_v30, 2 }
  0x5f   : > { %v523_v51 = vrot.slane %v451_v37, 2  ;;  %v525_v34 = vrot.slane %v452_v41, 2  ;;  %v526_v54 = vrot.slane %v454_v3, 2  ;;  %v528_v46 = vrot.slane %v453_v12, 2  ;;  %v6518_v41 = vld [vmem:[#allocation54_spill] sm:$0xff]  ;;  %v6520_v12 = vld [vmem:[#allocation55_spill] sm:$0xff] }
  0x60   : > { %v529_v56 = vrot.slane %v455_v22, 2  ;;  %v531_v57 = vrot.slane %v456_v39, 2  ;;  %v532_v61 = vrot.slane %v458_v25, 2  ;;  %v534_v14 = vrot.slane %v457_v1, 2  ;;  %v6522_v3 = vld [vmem:[#allocation7_spill] sm:$0xff] }
  0x61   : > { %v535_v36 = vrot.slane %v459_v38, 2  ;;  %v537_v29 = vrot.slane %v460_v11, 2  ;;  %v538_v4 = vrot.slane %v462_v16, 2  ;;  %v540_v31 = vrot.slane %v461_v48, 2  ;;  %v6519_v11 = vld [vmem:[#allocation5_spill] sm:$0xff]  ;;  %v6521_v48 = vld [vmem:[#allocation6_spill] sm:$0xff] }
  0x62   : > { %v541_v17 = vrot.slane %v463_v28, 2  ;;  %v543_v18 = vrot.slane %v464_v2, 2  ;;  %v544_v20 = vrot.slane %v466_v63, 2  ;;  %v512_v62 = vsel %vm500_vm1, %v510_v8, %v511_v19  ;;  %v6524_v28 = vld [vmem:[#allocation9_spill] sm:$0xff] }
  0x63   : > { %v515_v23 = vsel %vm500_vm1, %v513_v52, %v514_v10  ;;  %v546_v26 = vrot.slane %v465_v24, 2  ;;  %v547_v30 = vrot.slane %v467_v6, 2  ;;  %v518_v32 = vsel %vm500_vm1, %v516_v33, %v517_v9 }
  0x64   : > { %v521_v35 = vsel %vm500_vm1, %v519_v45, %v520_v58  ;;  %v524_v25 = vsel %vm500_vm1, %v522_v40, %v523_v51  ;;  %v527_v1 = vsel %vm500_vm1, %v525_v34, %v526_v54  ;;  %v530_v37 = vsel %vm500_vm1, %v528_v46, %v529_v56  ;;  %v6525_v46 = vld [vmem:[#allocation10_spill] sm:$0xff]  ;;  %v6528_v54 = vld [vmem:[#allocation13_spill] sm:$0xff] }
  0x65   : > { %v533_v38 = vsel %vm500_vm1, %v531_v57, %v532_v61  ;;  %v536_v2 = vsel %vm500_vm1, %v534_v14, %v535_v36  ;;  %v539_v19 = vsel %vm500_vm1, %v537_v29, %v538_v4  ;;  %v542_v52 = vsel %vm500_vm1, %v540_v31, %v541_v17  ;;  %v6526_v57 = vld [vmem:[#allocation11_spill] sm:$0xff]  ;;  %v6529_v61 = vld [vmem:[#allocation14_spill] sm:$0xff]  ;;  %v6531_v4 = vld [vmem:[#allocation16_spill] sm:$0xff] }
  0x66   : > { %v545_v10 = vsel %vm500_vm1, %v543_v18, %v544_v20  ;;  %v3894_v33 = vadd.f32 %v503_v15, %v3790_v42  ;;  %v3897_v45 = vadd.f32 %v506_v7, %v3793_v43  ;;  %v548_v34 = vsel %vm500_vm1, %v546_v26, %v547_v30  ;;  %v6527_v15 = vld [vmem:[#allocation12_spill] sm:$0xff]  ;;  %v6530_v36 = vld [vmem:[#allocation15_spill] sm:$0xff]  ;;  %v6532_v17 = vld [vmem:[#allocation17_spill] sm:$0xff] }
  0x67   : > { %v3901_v40 = vadd.f32 %v509_v13, %v3796_v44  ;;  %v3904_v51 = vadd.f32 %v512_v62, %v3800_v49  ;;  %v3907_v58 = vadd.f32 %v515_v23, %v3803_v50  ;;  %v3910_v9 = vadd.f32 %v518_v32, %v3807_v55  ;;  %v6533_v20 = vld [vmem:[#allocation18_spill] sm:$0xff]  ;;  %v6534_v23 = vld [vmem:[#allocation19_spill] sm:$0xff]  ;;  %v6535_v30 = vld [vmem:[#allocation20_spill] sm:$0xff] }
  0x68   : > { %v3913_v42 = vadd.f32 %v521_v35, %v3810_v47  ;;  %v3916_v43 = vadd.f32 %v524_v25, %v3813_v53  ;;  %v3919_v7 = vadd.f32 %v527_v1, %v3817_v59  ;;  %v3922_v44 = vadd.f32 %v530_v37, %v3820_v60  ;;  %v6513_v53 = vld [vmem:[#allocation52_spill] sm:$0xff]  ;;  %v6515_v59 = vld [vmem:[#allocation53_spill] sm:$0xff]  ;;  %v6537_v1 = vld [vmem:[#allocation22_spill] sm:$0xff] }
  0x69   : > { %v3925_v49 = vadd.f32 %v533_v38, %v3823_v0  ;;  %v3928_v50 = vadd.f32 %v536_v2, %v3826_v5  ;;  %v3931_v55 = vadd.f32 %v539_v19, %v3829_v21  ;;  %v3934_v47 = vadd.f32 %v542_v52, %v3832_v27  ;;  %v6517_v60 = vld [vmem:[#allocation4_spill] sm:$0xff]  ;;  %v6536_v35 = vld [vmem:[#allocation21_spill] sm:$0xff]  ;;  %v6538_v38 = vld [vmem:[#allocation23_spill] sm:$0xff] }
  0x6a   : > { %v3937_v13 = vadd.f32 %v545_v10, %v6513_v53  ;;  %v3940_v24 = vadd.f32 %v548_v34, %v6515_v59  ;;  %v583_v0 = vmul.f32 %v6518_v41, %v6517_v60  ;;  %v584_v5 = vmul.f32 %v6520_v12, %v6519_v11  ;;  %v6523_v27 = vld [vmem:[#allocation8_spill] sm:$0xff]  ;;  %v6540_v10 = vld [vmem:[#allocation25_spill] sm:$0xff]  ;;  %v6541_v53 = vld [vmem:[#allocation26_spill] sm:$0xff] }
  0x6b   : > { %v585_v21 = vmul.f32 %v6518_v41, %v6521_v48  ;;  %v586_v16 = vmul.f32 %v6520_v12, %v6522_v3  ;;  %v587_v22 = vmul.f32 %v6518_v41, %v6523_v27  ;;  %v588_v39 = vmul.f32 %v6520_v12, %v6524_v28  ;;  %v6539_v19 = vld [vmem:[#allocation24_spill] sm:$0xff] }
  0x6c   : > { %6514 = vst [vmem:[#allocation56_spill] sm:$0xff] %v3937_v13  ;;  %v589_v63 = vmul.f32 %v6518_v41, %v6525_v46  ;;  %v590_v6 = vmul.f32 %v6520_v12, %v6526_v57  ;;  %v591_v8 = vmul.f32 %v6518_v41, %v6527_v15  ;;  %v592_v56 = vmul.f32 %v6520_v12, %v6528_v54  ;;  %v6544_v54 = vld [vmem:[#allocation29_spill] sm:$0xff]  ;;  %v6545_v15 = vld [vmem:[#allocation30_spill] sm:$0xff]  ;;  %v6546_v57 = vld [vmem:[#allocation31_spill] sm:$0xff] }
  0x6d   : > { %6516 = vst [vmem:[#allocation52_spill] sm:$0xff] %v3940_v24  ;;  %v593_v14 = vmul.f32 %v6518_v41, %v6529_v61  ;;  %v594_v29 = vmul.f32 %v6520_v12, %v6530_v36  ;;  %v595_v31 = vmul.f32 %v6518_v41, %v6531_v4  ;;  %v596_v18 = vmul.f32 %v6520_v12, %v6532_v17  ;;  %v6542_v36 = vld [vmem:[#allocation27_spill] sm:$0xff]  ;;  %v6543_v61 = vld [vmem:[#allocation28_spill] sm:$0xff] }
  0x6e   : > { %v597_v62 = vmul.f32 %v6518_v41, %v6533_v20  ;;  %v598_v26 = vmul.f32 %v6520_v12, %v6534_v23  ;;  %v599_v32 = vmul.f32 %v6518_v41, %v6535_v30  ;;  %v600_v25 = vmul.f32 %v6520_v12, %v6536_v35 }
  0x6f   : > { %v601_v37 = vmul.f32 %v6518_v41, %v6537_v1  ;;  %v602_v2 = vmul.f32 %v6520_v12, %v6538_v38  ;;  %v603_v52 = vmul.f32 %v6518_v41, %v6539_v19  ;;  %v604_v34 = vmul.f32 %v6520_v12, %v6540_v10 }
  0x70   : > { %v605_v59 = vmul.f32 %v6518_v41, %v6541_v53  ;;  %v648_v23 = vrot.slane %v583_v0, 3  ;;  %v649_v30 = vrot.slane %v585_v21, 3  ;;  %v651_v20 = vrot.slane %v584_v5, 3  ;;  %v6547_v21 = vld [vmem:[#allocation32_spill] sm:$0xff]  ;;  %v6550_v53 = vld [vmem:[#allocation35_spill] sm:$0xff] }
  0x71   : > { %v652_v17 = vrot.slane %v586_v16, 3  ;;  %v654_v35 = vrot.slane %v587_v22, 3  ;;  %v655_v4 = vrot.slane %v589_v63, 3  ;;  %v606_v1 = vmul.f32 %v6520_v12, %v6542_v36  ;;  %v6548_v16 = vld [vmem:[#allocation33_spill] sm:$0xff]  ;;  %v6549_v63 = vld [vmem:[#allocation34_spill] sm:$0xff] }
  0x72   : > { %v607_v38 = vmul.f32 %v6518_v41, %v6543_v61  ;;  %v608_v19 = vmul.f32 %v6520_v12, %v6544_v54  ;;  %v609_v10 = vmul.f32 %v6518_v41, %v6545_v15  ;;  %v610_v0 = vmul.f32 %v6520_v12, %v6546_v57 }
  0x73   : > { %v611_v5 = vmul.f32 %v6518_v41, %v6547_v21  ;;  %v612_v22 = vmul.f32 %v6520_v12, %v6548_v16  ;;  %v613_v36 = vmul.f32 %v6518_v41, %v6549_v63  ;;  %v614_v61 = vmul.f32 %v6520_v12, %v6550_v53 }
  0x74   : > { %v650_v54 = vsel %vm647_vm2, %v648_v23, %v649_v30  ;;  %v657_v46 = vrot.slane %v588_v39, 3  ;;  %v658_v28 = vrot.slane %v590_v6, 3  ;;  %v653_v15 = vsel %vm647_vm2, %v651_v20, %v652_v17 }
  0x75   : > { %v656_v57 = vsel %vm647_vm2, %v654_v35, %v655_v4  ;;  %v660_v27 = vrot.slane %v591_v8, 3  ;;  %v661_v3 = vrot.slane %v593_v14, 3  ;;  %v663_v21 = vrot.slane %v592_v56, 3 }
  0x76   : > { %v664_v48 = vrot.slane %v594_v29, 3  ;;  %v666_v11 = vrot.slane %v595_v31, 3  ;;  %v667_v16 = vrot.slane %v597_v62, 3  ;;  %v669_v60 = vrot.slane %v596_v18, 3 }
  0x77   : > { %v670_v24 = vrot.slane %v598_v26, 3  ;;  %v672_v41 = vrot.slane %v599_v32, 3  ;;  %v673_v63 = vrot.slane %v601_v37, 3  ;;  %v675_v13 = vrot.slane %v600_v25, 3 }
  0x78   : > { %v676_v12 = vrot.slane %v602_v2, 3  ;;  %v678_v53 = vrot.slane %v603_v52, 3  ;;  %v679_v23 = vrot.slane %v605_v59, 3  ;;  %v681_v39 = vrot.slane %v604_v34, 3 }
  0x79   : > { %v682_v6 = vrot.slane %v606_v1, 3  ;;  %v684_v30 = vrot.slane %v607_v38, 3  ;;  %v685_v17 = vrot.slane %v609_v10, 3  ;;  %v687_v20 = vrot.slane %v608_v19, 3 }
  0x7a   : > { %v688_v4 = vrot.slane %v610_v0, 3  ;;  %v690_v8 = vrot.slane %v611_v5, 3  ;;  %v691_v14 = vrot.slane %v613_v36, 3  ;;  %v659_v56 = vsel %vm647_vm2, %v657_v46, %v658_v28  ;;  %v6566_v0 = vld [vmem:[#allocation6_spill] sm:$0xff]  ;;  %v6567_v5 = vld [vmem:[#allocation7_spill] sm:$0xff] }
  0x7b   : > { %v662_v29 = vsel %vm647_vm2, %v660_v27, %v661_v3  ;;  %v693_v31 = vrot.slane %v612_v22, 3  ;;  %v694_v18 = vrot.slane %v614_v61, 3  ;;  %v665_v62 = vsel %vm647_vm2, %v663_v21, %v664_v48  ;;  %v4040_v61 = vld [vmem:[%s6215_s1 + $0x10] sm:$0x1f] }
  0x7c   : > { %v668_v26 = vsel %vm647_vm2, %v666_v11, %v667_v16  ;;  %v671_v32 = vsel %vm647_vm2, %v669_v60, %v670_v24  ;;  %v674_v35 = vsel %vm647_vm2, %v672_v41, %v673_v63  ;;  %v677_v25 = vsel %vm647_vm2, %v675_v13, %v676_v12  ;;  %6551 = vst [vmem:[#allocation53_spill] sm:$0xff] %v4040_v61  ;;  %v6568_v22 = vld [vmem:[#allocation8_spill] sm:$0xff]  ;;  %v6569_v41 = vld [vmem:[#allocation9_spill] sm:$0xff] }
  0x7d   : > { %v680_v1 = vsel %vm647_vm2, %v678_v53, %v679_v23  ;;  %v683_v36 = vsel %vm647_vm2, %v681_v39, %v682_v6  ;;  %v686_v28 = vsel %vm647_vm2, %v684_v30, %v685_v17  ;;  %v689_v3 = vsel %vm647_vm2, %v687_v20, %v688_v4  ;;  %v6570_v23 = vld [vmem:[#allocation10_spill] sm:$0xff]  ;;  %v6571_v6 = vld [vmem:[#allocation11_spill] sm:$0xff]  ;;  %v6572_v17 = vld [vmem:[#allocation12_spill] sm:$0xff] }
  0x7e   : > { %v692_v27 = vsel %vm647_vm2, %v690_v8, %v691_v14  ;;  %v4022_v48 = vadd.f32 %v650_v54, %v3894_v33  ;;  %v4025_v11 = vadd.f32 %v653_v15, %v3897_v45  ;;  %v695_v24 = vsel %vm647_vm2, %v693_v31, %v694_v18  ;;  %v4045_v33 = vld [vmem:[%s6215_s1 + $0x18] sm:$0x1f]  ;;  %v6574_v14 = vld [vmem:[#allocation14_spill] sm:$0xff]  ;;  %v6576_v18 = vld [vmem:[#allocation16_spill] sm:$0xff] }
  0x7f   : > { %v4029_v13 = vadd.f32 %v656_v57, %v3901_v40  ;;  %v4032_v60 = vadd.f32 %v659_v56, %v3904_v51  ;;  %v4035_v46 = vadd.f32 %v662_v29, %v3907_v58  ;;  %6552 = vst [vmem:[#allocation54_spill] sm:$0xff] %v4045_v33  ;;  %v4048_v45 = vadd.f32 %v665_v62, %v3910_v9  ;;  %v6553_v51 = vld [vmem:[#allocation2_spill] sm:$0xff]  ;;  %v6554_v58 = vld [vmem:[#allocation3_spill] sm:$0xff]  ;;  %v6573_v4 = vld [vmem:[#allocation13_spill] sm:$0xff] }
  0x80   : > { %v4051_v40 = vadd.f32 %v668_v26, %v3913_v42  ;;  %v728_v57 = vperm.slane %v6553_v51, 4  ;;  %v729_v15 = vperm.slane %v6554_v58, 4  ;;  %v4056_v54 = vadd.f32 %v671_v32, %v3916_v43  ;;  %v6556_v43 = vld [vmem:[#allocation56_spill] sm:$0xff]  ;;  %v6575_v29 = vld [vmem:[#allocation15_spill] sm:$0xff]  ;;  %v6577_v26 = vld [vmem:[#allocation17_spill] sm:$0xff] }
  0x81   : > { %v4059_v37 = vadd.f32 %v674_v35, %v3919_v7  ;;  %v4062_v38 = vadd.f32 %v677_v25, %v3922_v44  ;;  %v4065_v2 = vadd.f32 %v680_v1, %v3925_v49  ;;  %v4068_v9 = vadd.f32 %v683_v36, %v3928_v50  ;;  %v6558_v7 = vld [vmem:[#allocation52_spill] sm:$0xff]  ;;  %v6578_v35 = vld [vmem:[#allocation18_spill] sm:$0xff]  ;;  %v6579_v1 = vld [vmem:[#allocation19_spill] sm:$0xff] }
  0x82   : > { %v4071_v42 = vadd.f32 %v686_v28, %v3931_v55  ;;  %v4074_v19 = vadd.f32 %v689_v3, %v3934_v47  ;;  %v4077_v52 = vadd.f32 %v692_v27, %v6556_v43  ;;  %v4080_v10 = vadd.f32 %v695_v24, %v6558_v7  ;;  %v6562_v50 = vld [vmem:[#allocation4_spill] sm:$0xff]  ;;  %v6563_v55 = vld [vmem:[#allocation5_spill] sm:$0xff]  ;;  %v6582_v51 = vld [vmem:[#allocation22_spill] sm:$0xff] }
  0x83   : > { %v4083_v44 = vperm.slane %v4040_v61, 0  ;;  %v4086_v49 = vperm.slane %v4045_v33, 0  ;;  %v730_v34 = vmul.f32 %v728_v57, %v6562_v50  ;;  %v731_v53 = vmul.f32 %v729_v15, %v6563_v55  ;;  %v6580_v28 = vld [vmem:[#allocation20_spill] sm:$0xff]  ;;  %v6581_v27 = vld [vmem:[#allocation21_spill] sm:$0xff]  ;;  %v6583_v43 = vld [vmem:[#allocation23_spill] sm:$0xff] }
  0x84   : > { %6555 = vst [vmem:[#allocation55_spill] sm:$0xff] %v4074_v19  ;;  %v4091_v47 = vperm.slane %v4040_v61, 1  ;;  %v4094_v59 = vperm.slane %v4045_v33, 1  ;;  %v732_v21 = vmul.f32 %v728_v57, %v6566_v0  ;;  %v733_v16 = vmul.f32 %v729_v15, %v6567_v5  ;;  %v6584_v50 = vld [vmem:[#allocation24_spill] sm:$0xff]  ;;  %v6585_v0 = vld [vmem:[#allocation25_spill] sm:$0xff] }
  0x85   : > { %6557 = vst [vmem:[#allocation2_spill] sm:$0xff] %v4077_v52  ;;  %v734_v63 = vmul.f32 %v728_v57, %v6568_v22  ;;  %v735_v12 = vmul.f32 %v729_v15, %v6569_v41  ;;  %v736_v39 = vmul.f32 %v728_v57, %v6570_v23  ;;  %v737_v30 = vmul.f32 %v729_v15, %v6571_v6  ;;  %v6586_v6 = vld [vmem:[#allocation26_spill] sm:$0xff]  ;;  %v6587_v23 = vld [vmem:[#allocation27_spill] sm:$0xff] }
  0x86   : > { %6559 = vst [vmem:[#allocation3_spill] sm:$0xff] %v4080_v10  ;;  %v738_v20 = vmul.f32 %v728_v57, %v6572_v17  ;;  %v739_v8 = vmul.f32 %v729_v15, %v6573_v4  ;;  %v740_v56 = vmul.f32 %v728_v57, %v6574_v14  ;;  %v741_v31 = vmul.f32 %v729_v15, %v6575_v29  ;;  %v6592_v4 = vld [vmem:[#allocation32_spill] sm:$0xff]  ;;  %v6593_v17 = vld [vmem:[#allocation33_spill] sm:$0xff] }
  0x87   : > { %6560 = vst [vmem:[#allocation56_spill] sm:$0xff] %v4083_v44  ;;  %v742_v62 = vmul.f32 %v728_v57, %v6576_v18  ;;  %v743_v32 = vmul.f32 %v729_v15, %v6577_v26  ;;  %v744_v25 = vmul.f32 %v728_v57, %v6578_v35  ;;  %v745_v36 = vmul.f32 %v729_v15, %v6579_v1  ;;  %v6590_v26 = vld [vmem:[#allocation30_spill] sm:$0xff]  ;;  %v6591_v18 = vld [vmem:[#allocation31_spill] sm:$0xff] }
  0x88   : > { %6561 = vst [vmem:[#allocation52_spill] sm:$0xff] %v4086_v49  ;;  %v746_v3 = vmul.f32 %v728_v57, %v6580_v28  ;;  %v747_v24 = vmul.f32 %v729_v15, %v6581_v27  ;;  %v748_v58 = vmul.f32 %v728_v57, %v6582_v51  ;;  %v749_v7 = vmul.f32 %v729_v15, %v6583_v43  ;;  %v6589_v28 = vld [vmem:[#allocation29_spill] sm:$0xff] }
  0x89   : > { %6564 = vst [vmem:[#allocation4_spill] sm:$0xff] %v4091_v47  ;;  %v750_v55 = vmul.f32 %v728_v57, %v6584_v50  ;;  %v751_v5 = vmul.f32 %v729_v15, %v6585_v0  ;;  %v795_v33 = vrot.slane %v730_v34, 4  ;;  %v796_v61 = vrot.slane %v732_v21, 4  ;;  %v6594_v34 = vld [vmem:[#allocation34_spill] sm:$0xff] }
  0x8a   : > { %6565 = vst [vmem:[#allocation5_spill] sm:$0xff] %v4094_v59  ;;  %v798_v29 = vrot.slane %v731_v53, 4  ;;  %v799_v14 = vrot.slane %v733_v16, 4  ;;  %v752_v35 = vmul.f32 %v728_v57, %v6586_v6  ;;  %v753_v1 = vmul.f32 %v729_v15, %v6587_v23  ;;  %v6588_v59 = vld [vmem:[#allocation28_spill] sm:$0xff]  ;;  %v6595_v53 = vld [vmem:[#allocation35_spill] sm:$0xff] }
  0x8b   : > { %v754_v47 = vmul.f32 %v728_v57, %v6588_v59  ;;  %v755_v27 = vmul.f32 %v729_v15, %v6589_v28  ;;  %v756_v51 = vmul.f32 %v728_v57, %v6590_v26  ;;  %v757_v43 = vmul.f32 %v729_v15, %v6591_v18 }
  0x8c   : > { %v758_v50 = vmul.f32 %v728_v57, %v6592_v4  ;;  %v759_v0 = vmul.f32 %v729_v15, %v6593_v17  ;;  %v760_v21 = vmul.f32 %v728_v57, %v6594_v34  ;;  %v761_v16 = vmul.f32 %v729_v15, %v6595_v53 }
  0x8d   : > { %v801_v49 = vrot.slane %v734_v63, 4  ;;  %v802_v6 = vrot.slane %v736_v39, 4  ;;  %v797_v23 = vsel %vm794_vm3, %v795_v33, %v796_v61  ;;  %v800_v59 = vsel %vm794_vm3, %v798_v29, %v799_v14 }
  0x8e   : > { %v804_v41 = vrot.slane %v735_v12, 4  ;;  %v805_v28 = vrot.slane %v737_v30, 4  ;;  %v807_v44 = vrot.slane %v738_v20, 4  ;;  %v808_v26 = vrot.slane %v740_v56, 4 }
  0x8f   : > { %v810_v22 = vrot.slane %v739_v8, 4  ;;  %v811_v18 = vrot.slane %v741_v31, 4  ;;  %v813_v10 = vrot.slane %v742_v62, 4  ;;  %v814_v4 = vrot.slane %v744_v25, 4 }
  0x90   : > { %v816_v52 = vrot.slane %v743_v32, 4  ;;  %v817_v17 = vrot.slane %v745_v36, 4  ;;  %v819_v19 = vrot.slane %v746_v3, 4  ;;  %v820_v57 = vrot.slane %v748_v58, 4  ;;  %v6599_v58 = vld [vmem:[#allocation8_spill] sm:$0xff] }
  0x91   : > { %v822_v34 = vrot.slane %v747_v24, 4  ;;  %v823_v15 = vrot.slane %v749_v7, 4  ;;  %v825_v63 = vrot.slane %v750_v55, 4  ;;  %v826_v39 = vrot.slane %v752_v35, 4  ;;  %v6597_v24 = vld [vmem:[#allocation2_spill] sm:$0xff]  ;;  %v6602_v7 = vld [vmem:[#allocation52_spill] sm:$0xff] }
  0x92   : > { %v828_v53 = vrot.slane %v751_v5, 4  ;;  %v829_v61 = vrot.slane %v753_v1, 4  ;;  %v831_v33 = vrot.slane %v754_v47, 4  ;;  %v832_v14 = vrot.slane %v756_v51, 4  ;;  %v6598_v51 = vld [vmem:[#allocation3_spill] sm:$0xff]  ;;  %v6605_v55 = vld [vmem:[#allocation16_spill] sm:$0xff] }
  0x93   : > { %v834_v12 = vrot.slane %v755_v27, 4  ;;  %v835_v30 = vrot.slane %v757_v43, 4  ;;  %v803_v20 = vsel %vm794_vm3, %v801_v49, %v802_v6  ;;  %v806_v8 = vsel %vm794_vm3, %v804_v41, %v805_v28 }
  0x94   : > { %v837_v56 = vrot.slane %v758_v50, 4  ;;  %v838_v29 = vrot.slane %v760_v21, 4  ;;  %v809_v31 = vsel %vm794_vm3, %v807_v44, %v808_v26  ;;  %v812_v62 = vsel %vm794_vm3, %v810_v22, %v811_v18  ;;  %v6603_v50 = vld [vmem:[#allocation12_spill] sm:$0xff] }
  0x95   : > { %v840_v32 = vrot.slane %v759_v0, 4  ;;  %v841_v25 = vrot.slane %v761_v16, 4  ;;  %v815_v35 = vsel %vm794_vm3, %v813_v10, %v814_v4  ;;  %v818_v1 = vsel %vm794_vm3, %v816_v52, %v817_v17  ;;  %v6606_v0 = vld [vmem:[#allocation17_spill] sm:$0xff] }
  0x96   : > { %v821_v47 = vsel %vm794_vm3, %v819_v19, %v820_v57  ;;  %v824_v36 = vsel %vm794_vm3, %v822_v34, %v823_v15  ;;  %v827_v49 = vsel %vm794_vm3, %v825_v63, %v826_v39  ;;  %v830_v41 = vsel %vm794_vm3, %v828_v53, %v829_v61  ;;  %v6607_v34 = vld [vmem:[#allocation20_spill] sm:$0xff]  ;;  %v6608_v53 = vld [vmem:[#allocation21_spill] sm:$0xff] }
  0x97   : > { %v833_v6 = vsel %vm794_vm3, %v831_v33, %v832_v14  ;;  %v836_v44 = vsel %vm794_vm3, %v834_v12, %v835_v30  ;;  %v839_v22 = vsel %vm794_vm3, %v837_v56, %v838_v29  ;;  %v859_v18 = vadd.f32 %v797_v23, %v4022_v48  ;;  %v6596_v23 = vld [vmem:[#allocation55_spill] sm:$0xff]  ;;  %v6609_v57 = vld [vmem:[#allocation24_spill] sm:$0xff]  ;;  %v6610_v63 = vld [vmem:[#allocation25_spill] sm:$0xff] }
  0x98   : > { %v860_v10 = vadd.f32 %v800_v59, %v4025_v11  ;;  %v861_v52 = vadd.f32 %v803_v20, %v4029_v13  ;;  %v842_v19 = vsel %vm794_vm3, %v840_v32, %v841_v25  ;;  %v862_v17 = vadd.f32 %v806_v8, %v4032_v60  ;;  %v6611_v61 = vld [vmem:[#allocation28_spill] sm:$0xff]  ;;  %v6612_v14 = vld [vmem:[#allocation29_spill] sm:$0xff] }
  0x99   : > { %v863_v4 = vadd.f32 %v809_v31, %v4035_v46  ;;  %v864_v26 = vadd.f32 %v812_v62, %v4048_v45  ;;  %v865_v28 = vadd.f32 %v815_v35, %v4051_v40  ;;  %v866_v3 = vadd.f32 %v818_v1, %v4056_v54  ;;  %v6600_v40 = vld [vmem:[#allocation56_spill] sm:$0xff]  ;;  %v6601_v54 = vld [vmem:[#allocation9_spill] sm:$0xff] }
  0x9a   : > { %v867_v27 = vadd.f32 %v821_v47, %v4059_v37  ;;  %v868_v48 = vadd.f32 %v824_v36, %v4062_v38  ;;  %v869_v11 = vadd.f32 %v827_v49, %v4065_v2  ;;  %v870_v13 = vadd.f32 %v830_v41, %v4068_v9  ;;  %v6604_v2 = vld [vmem:[#allocation13_spill] sm:$0xff]  ;;  %v6613_v30 = vld [vmem:[#allocation32_spill] sm:$0xff] }
  0x9b   : > { %v871_v59 = vadd.f32 %v833_v6, %v4071_v42  ;;  %v872_v60 = vadd.f32 %v836_v44, %v6596_v23  ;;  %v873_v46 = vadd.f32 %v839_v22, %v6597_v24  ;;  %v874_v45 = vadd.f32 %v842_v19, %v6598_v51  ;;  %v6614_v8 = vld [vmem:[#allocation33_spill] sm:$0xff]  ;;  %v6615_v29 = vld [vmem:[#allocation36_spill] sm:$0xff]  ;;  %v6623_v23 = vld [vmem:[#allocation11_spill] sm:$0xff] }
  0x9c   : > { %v877_v43 = vmul.f32 %v6600_v40, %v6599_v58  ;;  %v878_v37 = vmul.f32 %v6602_v7, %v6601_v54  ;;  %v879_v38 = vmul.f32 %v6600_v40, %v6603_v50  ;;  %v880_v9 = vmul.f32 %v6602_v7, %v6604_v2  ;;  %v6616_v62 = vld [vmem:[#allocation37_spill] sm:$0xff]  ;;  %v6624_v24 = vld [vmem:[#allocation14_spill] sm:$0xff]  ;;  %v6625_v51 = vld [vmem:[#allocation15_spill] sm:$0xff] }
  0x9d   : > { %v881_v42 = vmul.f32 %v6600_v40, %v6605_v55  ;;  %v882_v5 = vmul.f32 %v6602_v7, %v6606_v0  ;;  %v883_v21 = vmul.f32 %v6600_v40, %v6607_v34  ;;  %v884_v16 = vmul.f32 %v6602_v7, %v6608_v53 }
  0x9e   : > { %v885_v15 = vmul.f32 %v6600_v40, %v6609_v57  ;;  %v886_v39 = vmul.f32 %v6602_v7, %v6610_v63  ;;  %v887_v33 = vmul.f32 %v6600_v40, %v6611_v61  ;;  %v888_v12 = vmul.f32 %v6602_v7, %v6612_v14 }
  0x9f   : > { %v889_v20 = vmul.f32 %v6600_v40, %v6613_v30  ;;  %v890_v56 = vmul.f32 %v6602_v7, %v6614_v8  ;;  %v891_v31 = vmul.f32 %v6600_v40, %v6615_v29  ;;  %v892_v32 = vmul.f32 %v6602_v7, %v6616_v62  ;;  %v6626_v7 = vld [vmem:[#allocation18_spill] sm:$0xff] }
  0xa0   : > { %v4190_v25 = vadd.f32 %v877_v43, %v859_v18  ;;  %v4192_v35 = vadd.f32 %v878_v37, %v860_v10  ;;  %v4194_v1 = vadd.f32 %v879_v38, %v861_v52  ;;  %v4196_v47 = vadd.f32 %v880_v9, %v862_v17  ;;  %v6627_v38 = vld [vmem:[#allocation19_spill] sm:$0xff] }
  0xa1   : > { %v4198_v36 = vadd.f32 %v881_v42, %v863_v4  ;;  %v4200_v49 = vadd.f32 %v882_v5, %v864_v26  ;;  %v4202_v41 = vadd.f32 %v883_v21, %v865_v28  ;;  %v4204_v6 = vadd.f32 %v884_v16, %v866_v3  ;;  %v6620_v26 = vld [vmem:[#allocation4_spill] sm:$0xff]  ;;  %v6621_v3 = vld [vmem:[#allocation5_spill] sm:$0xff]  ;;  %v6628_v21 = vld [vmem:[#allocation22_spill] sm:$0xff] }
  0xa2   : > { %v4206_v44 = vadd.f32 %v885_v15, %v867_v27  ;;  %v4208_v22 = vadd.f32 %v886_v39, %v868_v48  ;;  %v4210_v18 = vadd.f32 %v887_v33, %v869_v11  ;;  %v4212_v10 = vadd.f32 %v888_v12, %v870_v13  ;;  %v6622_v48 = vld [vmem:[#allocation10_spill] sm:$0xff]  ;;  %v6629_v15 = vld [vmem:[#allocation23_spill] sm:$0xff] }
  0xa3   : > { %v4214_v52 = vadd.f32 %v889_v20, %v871_v59  ;;  %v4216_v19 = vadd.f32 %v890_v56, %v872_v60  ;;  %v4218_v17 = vadd.f32 %v891_v31, %v873_v46  ;;  %v4220_v4 = vadd.f32 %v892_v32, %v874_v45  ;;  %v6630_v20 = vld [vmem:[#allocation26_spill] sm:$0xff]  ;;  %v6631_v31 = vld [vmem:[#allocation27_spill] sm:$0xff] }
  0xa4   : > { %v911_v28 = vmul.f32 %v6620_v26, %v6599_v58  ;;  %v912_v27 = vmul.f32 %v6621_v3, %v6601_v54  ;;  %v913_v11 = vmul.f32 %v6620_v26, %v6622_v48  ;;  %v914_v13 = vmul.f32 %v6621_v3, %v6623_v23 }
  0xa5   : > { %6617 = vst [vmem:[#allocation6_spill] sm:$0xff] %v4216_v19  ;;  %v915_v59 = vmul.f32 %v6620_v26, %v6603_v50  ;;  %v916_v60 = vmul.f32 %v6621_v3, %v6604_v2  ;;  %v917_v46 = vmul.f32 %v6620_v26, %v6624_v24  ;;  %v918_v45 = vmul.f32 %v6621_v3, %v6625_v51 }
  0xa6   : > { %6618 = vst [vmem:[#allocation7_spill] sm:$0xff] %v4218_v17  ;;  %v919_v40 = vmul.f32 %v6620_v26, %v6605_v55  ;;  %v920_v43 = vmul.f32 %v6621_v3, %v6606_v0  ;;  %v921_v37 = vmul.f32 %v6620_v26, %v6626_v7  ;;  %v922_v9 = vmul.f32 %v6621_v3, %v6627_v38 }
  0xa7   : > { %6619 = vst [vmem:[#allocation55_spill] sm:$0xff] %v4220_v4  ;;  %v923_v42 = vmul.f32 %v6620_v26, %v6607_v34  ;;  %v924_v5 = vmul.f32 %v6621_v3, %v6608_v53  ;;  %v925_v16 = vmul.f32 %v6620_v26, %v6628_v21  ;;  %v926_v39 = vmul.f32 %v6621_v3, %v6629_v15 }
  0xa8   : > { %v927_v33 = vmul.f32 %v6620_v26, %v6609_v57  ;;  %v928_v12 = vmul.f32 %v6621_v3, %v6610_v63  ;;  %v929_v56 = vmul.f32 %v6620_v26, %v6630_v20  ;;  %v930_v32 = vmul.f32 %v6621_v3, %v6631_v31  ;;  %v6632_v57 = vld [vmem:[#allocation30_spill] sm:$0xff]  ;;  %v6633_v63 = vld [vmem:[#allocation31_spill] sm:$0xff] }
  0xa9   : > { %v931_v53 = vmul.f32 %v6620_v26, %v6611_v61  ;;  %v932_v21 = vmul.f32 %v6621_v3, %v6612_v14  ;;  %v975_v34 = vrot.slane %v911_v28, 1  ;;  %v976_v15 = vrot.slane %v913_v11, 1  ;;  %v6634_v61 = vld [vmem:[#allocation34_spill] sm:$0xff]  ;;  %v6635_v14 = vld [vmem:[#allocation35_spill] sm:$0xff] }
  0xaa   : > { %v978_v38 = vrot.slane %v912_v27, 1  ;;  %v979_v7 = vrot.slane %v914_v13, 1  ;;  %v933_v0 = vmul.f32 %v6620_v26, %v6632_v57  ;;  %v934_v55 = vmul.f32 %v6621_v3, %v6633_v63  ;;  %v6636_v13 = vld [vmem:[#allocation38_spill] sm:$0xff]  ;;  %v6637_v57 = vld [vmem:[#allocation39_spill] sm:$0xff] }
  0xab   : > { %v935_v20 = vmul.f32 %v6620_v26, %v6613_v30  ;;  %v936_v31 = vmul.f32 %v6621_v3, %v6614_v8  ;;  %v937_v51 = vmul.f32 %v6620_v26, %v6634_v61  ;;  %v938_v28 = vmul.f32 %v6621_v3, %v6635_v14 }
  0xac   : > { %v939_v27 = vmul.f32 %v6620_v26, %v6615_v29  ;;  %v940_v11 = vmul.f32 %v6621_v3, %v6616_v62  ;;  %v941_v63 = vmul.f32 %v6620_v26, %v6636_v13  ;;  %v942_v30 = vmul.f32 %v6621_v3, %v6637_v57 }
  0xad   : > { %v981_v24 = vrot.slane %v915_v59, 1  ;;  %v982_v8 = vrot.slane %v917_v46, 1  ;;  %v977_v2 = vsel %vm353_vm0, %v975_v34, %v976_v15  ;;  %v980_v61 = vsel %vm353_vm0, %v978_v38, %v979_v7 }
  0xae   : > { %v984_v50 = vrot.slane %v916_v60, 1  ;;  %v985_v14 = vrot.slane %v918_v45, 1  ;;  %v987_v23 = vrot.slane %v919_v40, 1  ;;  %v988_v48 = vrot.slane %v921_v37, 1 }
  0xaf   : > { %v990_v29 = vrot.slane %v920_v43, 1  ;;  %v991_v54 = vrot.slane %v922_v9, 1  ;;  %v993_v58 = vrot.slane %v923_v42, 1  ;;  %v994_v62 = vrot.slane %v925_v16, 1 }
  0xb0   : > { %v996_v4 = vrot.slane %v924_v5, 1  ;;  %v997_v17 = vrot.slane %v926_v39, 1  ;;  %v999_v26 = vrot.slane %v927_v33, 1  ;;  %v1000_v13 = vrot.slane %v929_v56, 1 }
  0xb1   : > { %v1002_v19 = vrot.slane %v928_v12, 1  ;;  %v1003_v3 = vrot.slane %v930_v32, 1  ;;  %v1005_v59 = vrot.slane %v931_v53, 1  ;;  %v1006_v46 = vrot.slane %v933_v0, 1  ;;  %v6647_v12 = vld [vmem:[#allocation9_spill] sm:$0xff] }
  0xb2   : > { %v1008_v57 = vrot.slane %v932_v21, 1  ;;  %v1009_v34 = vrot.slane %v934_v55, 1  ;;  %v1011_v15 = vrot.slane %v935_v20, 1  ;;  %v1012_v7 = vrot.slane %v937_v51, 1 }
  0xb3   : > { %v1014_v60 = vrot.slane %v936_v31, 1  ;;  %v1015_v45 = vrot.slane %v938_v28, 1  ;;  %v983_v40 = vsel %vm353_vm0, %v981_v24, %v982_v8  ;;  %v986_v43 = vsel %vm353_vm0, %v984_v50, %v985_v14  ;;  %v6651_v31 = vld [vmem:[#allocation11_spill] sm:$0xff]  ;;  %v6652_v28 = vld [vmem:[#allocation12_spill] sm:$0xff] }
  0xb4   : > { %v1017_v37 = vrot.slane %v939_v27, 1  ;;  %v1018_v38 = vrot.slane %v941_v63, 1  ;;  %v989_v9 = vsel %vm353_vm0, %v987_v23, %v988_v48  ;;  %v992_v42 = vsel %vm353_vm0, %v990_v29, %v991_v54 }
  0xb5   : > { %v1020_v5 = vrot.slane %v940_v11, 1  ;;  %v1021_v16 = vrot.slane %v942_v30, 1  ;;  %v995_v0 = vsel %vm353_vm0, %v993_v58, %v994_v62  ;;  %v998_v55 = vsel %vm353_vm0, %v996_v4, %v997_v17  ;;  %v6639_v4 = vld [vmem:[#allocation54_spill] sm:$0xff]  ;;  %v6653_v11 = vld [vmem:[#allocation13_spill] sm:$0xff] }
  0xb6   : > { %v1001_v53 = vsel %vm353_vm0, %v999_v26, %v1000_v13  ;;  %v1004_v51 = vsel %vm353_vm0, %v1002_v19, %v1003_v3  ;;  %v1007_v8 = vsel %vm353_vm0, %v1005_v59, %v1006_v46  ;;  %v1010_v50 = vsel %vm353_vm0, %v1008_v57, %v1009_v34  ;;  %v6638_v57 = vld [vmem:[#allocation53_spill] sm:$0xff]  ;;  %v6654_v26 = vld [vmem:[#allocation14_spill] sm:$0xff]  ;;  %v6655_v59 = vld [vmem:[#allocation15_spill] sm:$0xff] }
  0xb7   : > { %v1013_v63 = vsel %vm353_vm0, %v1011_v15, %v1012_v7  ;;  %v1016_v14 = vsel %vm353_vm0, %v1014_v60, %v1015_v45  ;;  %v1019_v54 = vsel %vm353_vm0, %v1017_v37, %v1018_v38  ;;  %v4302_v30 = vadd.f32 %v977_v2, %v4190_v25  ;;  %v6656_v34 = vld [vmem:[#allocation16_spill] sm:$0xff]  ;;  %v6657_v7 = vld [vmem:[#allocation17_spill] sm:$0xff]  ;;  %v6658_v45 = vld [vmem:[#allocation18_spill] sm:$0xff] }
  0xb8   : > { %v4305_v58 = vadd.f32 %v980_v61, %v4192_v35  ;;  %v4308_v29 = vadd.f32 %v983_v40, %v4194_v1  ;;  %v1022_v62 = vsel %vm353_vm0, %v1020_v5, %v1021_v16  ;;  %v4312_v19 = vadd.f32 %v986_v43, %v4196_v47  ;;  %v6659_v43 = vld [vmem:[#allocation19_spill] sm:$0xff]  ;;  %v6660_v38 = vld [vmem:[#allocation20_spill] sm:$0xff]  ;;  %v6662_v16 = vld [vmem:[#allocation22_spill] sm:$0xff] }
  0xb9   : > { %v1055_v17 = vperm.slane %v6638_v57, 2  ;;  %v1056_v48 = vperm.slane %v6639_v4, 2  ;;  %v4317_v23 = vadd.f32 %v989_v9, %v4198_v36  ;;  %v4320_v2 = vadd.f32 %v992_v42, %v4200_v49  ;;  %v6661_v42 = vld [vmem:[#allocation21_spill] sm:$0xff] }
  0xba   : > { %v4323_v61 = vadd.f32 %v995_v0, %v4202_v41  ;;  %v4326_v25 = vadd.f32 %v998_v55, %v4204_v6  ;;  %v4329_v35 = vadd.f32 %v1001_v53, %v4206_v44  ;;  %v4332_v1 = vadd.f32 %v1004_v51, %v4208_v22  ;;  %v6640_v41 = vld [vmem:[#allocation6_spill] sm:$0xff]  ;;  %v6642_v6 = vld [vmem:[#allocation7_spill] sm:$0xff]  ;;  %v6646_v22 = vld [vmem:[#allocation8_spill] sm:$0xff] }
  0xbb   : > { %v4335_v47 = vadd.f32 %v1007_v8, %v4210_v18  ;;  %v4338_v36 = vadd.f32 %v1010_v50, %v4212_v10  ;;  %v4341_v49 = vadd.f32 %v1013_v63, %v4214_v52  ;;  %v4344_v24 = vadd.f32 %v1016_v14, %v6640_v41  ;;  %v6644_v44 = vld [vmem:[#allocation55_spill] sm:$0xff]  ;;  %v6650_v52 = vld [vmem:[#allocation10_spill] sm:$0xff]  ;;  %v6664_v51 = vld [vmem:[#allocation24_spill] sm:$0xff] }
  0xbc   : > { %v4347_v21 = vadd.f32 %v1019_v54, %v6642_v6  ;;  %v4350_v39 = vadd.f32 %v1022_v62, %v6644_v44  ;;  %v1057_v33 = vmul.f32 %v1055_v17, %v6646_v22  ;;  %v1058_v18 = vmul.f32 %v1056_v48, %v6647_v12  ;;  %v6663_v55 = vld [vmem:[#allocation23_spill] sm:$0xff]  ;;  %v6665_v50 = vld [vmem:[#allocation25_spill] sm:$0xff]  ;;  %v6666_v14 = vld [vmem:[#allocation26_spill] sm:$0xff] }
  0xbd   : > { %6641 = vst [vmem:[#allocation2_spill] sm:$0xff] %v4344_v24  ;;  %v4355_v20 = vperm.slane %v6638_v57, 3  ;;  %v4358_v10 = vperm.slane %v6639_v4, 3  ;;  %v1059_v56 = vmul.f32 %v1055_v17, %v6650_v52  ;;  %v1060_v32 = vmul.f32 %v1056_v48, %v6651_v31  ;;  %v6667_v62 = vld [vmem:[#allocation27_spill] sm:$0xff]  ;;  %v6668_v6 = vld [vmem:[#allocation28_spill] sm:$0xff]  ;;  %v6669_v4 = vld [vmem:[#allocation29_spill] sm:$0xff] }
  0xbe   : > { %6643 = vst [vmem:[#allocation3_spill] sm:$0xff] %v4347_v21  ;;  %v1061_v27 = vmul.f32 %v1055_v17, %v6652_v28  ;;  %v1062_v13 = vmul.f32 %v1056_v48, %v6653_v11  ;;  %v1063_v3 = vmul.f32 %v1055_v17, %v6654_v26  ;;  %v1064_v46 = vmul.f32 %v1056_v48, %v6655_v59  ;;  %v6672_v59 = vld [vmem:[#allocation32_spill] sm:$0xff]  ;;  %v6673_v26 = vld [vmem:[#allocation33_spill] sm:$0xff]  ;;  %v6674_v11 = vld [vmem:[#allocation34_spill] sm:$0xff] }
  0xbf   : > { %6645 = vst [vmem:[#allocation56_spill] sm:$0xff] %v4350_v39  ;;  %v1065_v15 = vmul.f32 %v1055_v17, %v6656_v34  ;;  %v1066_v60 = vmul.f32 %v1056_v48, %v6657_v7  ;;  %v1067_v40 = vmul.f32 %v1055_v17, %v6658_v45  ;;  %v1068_v37 = vmul.f32 %v1056_v48, %v6659_v43  ;;  %v6670_v7 = vld [vmem:[#allocation30_spill] sm:$0xff]  ;;  %v6671_v34 = vld [vmem:[#allocation31_spill] sm:$0xff]  ;;  %v6676_v31 = vld [vmem:[#allocation36_spill] sm:$0xff] }
  0xc0   : > { %6648 = vst [vmem:[#allocation52_spill] sm:$0xff] %v4355_v20  ;;  %v1069_v9 = vmul.f32 %v1055_v17, %v6660_v38  ;;  %v1070_v5 = vmul.f32 %v1056_v48, %v6661_v42  ;;  %v1071_v0 = vmul.f32 %v1055_v17, %v6662_v16  ;;  %v1072_v53 = vmul.f32 %v1056_v48, %v6663_v55  ;;  %v6675_v28 = vld [vmem:[#allocation35_spill] sm:$0xff]  ;;  %v6677_v52 = vld [vmem:[#allocation37_spill] sm:$0xff] }
  0xc1   : > { %6649 = vst [vmem:[#allocation4_spill] sm:$0xff] %v4358_v10  ;;  %v1073_v8 = vmul.f32 %v1055_v17, %v6664_v51  ;;  %v1074_v63 = vmul.f32 %v1056_v48, %v6665_v50  ;;  %v1075_v54 = vmul.f32 %v1055_v17, %v6666_v14  ;;  %v1076_v41 = vmul.f32 %v1056_v48, %v6667_v62 }
  0xc2   : > { %v1077_v44 = vmul.f32 %v1055_v17, %v6668_v6  ;;  %v1078_v57 = vmul.f32 %v1056_v48, %v6669_v4  ;;  %v1121_v43 = vrot.slane %v1057_v33, 2  ;;  %v1122_v38 = vrot.slane %v1059_v56, 2  ;;  %v6678_v33 = vld [vmem:[#allocation38_spill] sm:$0xff] }
  0xc3   : > { %v1124_v45 = vrot.slane %v1058_v18, 2  ;;  %v1125_v42 = vrot.slane %v1060_v32, 2  ;;  %v1079_v16 = vmul.f32 %v1055_v17, %v6670_v7  ;;  %v1080_v55 = vmul.f32 %v1056_v48, %v6671_v34  ;;  %v6679_v18 = vld [vmem:[#allocation39_spill] sm:$0xff] }
  0xc4   : > { %v1081_v51 = vmul.f32 %v1055_v17, %v6672_v59  ;;  %v1082_v50 = vmul.f32 %v1056_v48, %v6673_v26  ;;  %v1083_v14 = vmul.f32 %v1055_v17, %v6674_v11  ;;  %v1084_v62 = vmul.f32 %v1056_v48, %v6675_v28 }
  0xc5   : > { %v1085_v6 = vmul.f32 %v1055_v17, %v6676_v31  ;;  %v1086_v4 = vmul.f32 %v1056_v48, %v6677_v52  ;;  %v1087_v56 = vmul.f32 %v1055_v17, %v6678_v33  ;;  %v1088_v32 = vmul.f32 %v1056_v48, %v6679_v18 }
  0xc6   : > { %v1127_v10 = vrot.slane %v1061_v27, 2  ;;  %v1128_v7 = vrot.slane %v1063_v3, 2  ;;  %v1123_v34 = vsel %vm500_vm1, %v1121_v43, %v1122_v38  ;;  %v1126_v59 = vsel %vm500_vm1, %v1124_v45, %v1125_v42 }
  0xc7   : > { %v1130_v12 = vrot.slane %v1062_v13, 2  ;;  %v1131_v26 = vrot.slane %v1064_v46, 2  ;;  %v1133_v20 = vrot.slane %v1065_v15, 2  ;;  %v1134_v11 = vrot.slane %v1067_v40, 2 }
  0xc8   : > { %v1136_v22 = vrot.slane %v1066_v60, 2  ;;  %v1137_v28 = vrot.slane %v1068_v37, 2  ;;  %v1139_v39 = vrot.slane %v1069_v9, 2  ;;  %v1140_v31 = vrot.slane %v1071_v0, 2 }
  0xc9   : > { %v1142_v21 = vrot.slane %v1070_v5, 2  ;;  %v1143_v52 = vrot.slane %v1072_v53, 2  ;;  %v1145_v24 = vrot.slane %v1073_v8, 2  ;;  %v1146_v17 = vrot.slane %v1075_v54, 2 }
  0xca   : > { %v1148_v33 = vrot.slane %v1074_v63, 2  ;;  %v1149_v48 = vrot.slane %v1076_v41, 2  ;;  %v1151_v27 = vrot.slane %v1077_v44, 2  ;;  %v1152_v3 = vrot.slane %v1079_v16, 2 }
  0xcb   : > { %v1154_v18 = vrot.slane %v1078_v57, 2  ;;  %v1155_v43 = vrot.slane %v1080_v55, 2  ;;  %v1157_v38 = vrot.slane %v1081_v51, 2  ;;  %v1158_v45 = vrot.slane %v1083_v14, 2  ;;  %v6687_v51 = vld [vmem:[#allocation52_spill] sm:$0xff] }
  0xcc   : > { %v1160_v13 = vrot.slane %v1082_v50, 2  ;;  %v1161_v46 = vrot.slane %v1084_v62, 2  ;;  %v1129_v15 = vsel %vm500_vm1, %v1127_v10, %v1128_v7  ;;  %v1132_v60 = vsel %vm500_vm1, %v1130_v12, %v1131_v26  ;;  %v6689_v50 = vld [vmem:[#allocation4_spill] sm:$0xff] }
  0xcd   : > { %v1163_v40 = vrot.slane %v1085_v6, 2  ;;  %v1164_v37 = vrot.slane %v1087_v56, 2  ;;  %v1135_v9 = vsel %vm500_vm1, %v1133_v20, %v1134_v11  ;;  %v1138_v42 = vsel %vm500_vm1, %v1136_v22, %v1137_v28  ;;  %v6692_v62 = vld [vmem:[#allocation12_spill] sm:$0xff]  ;;  %v6693_v6 = vld [vmem:[#allocation13_spill] sm:$0xff] }
  0xce   : > { %v1166_v5 = vrot.slane %v1086_v4, 2  ;;  %v1167_v0 = vrot.slane %v1088_v32, 2  ;;  %v1141_v16 = vsel %vm500_vm1, %v1139_v39, %v1140_v31  ;;  %v1144_v57 = vsel %vm500_vm1, %v1142_v21, %v1143_v52 }
  0xcf   : > { %v1147_v55 = vsel %vm500_vm1, %v1145_v24, %v1146_v17  ;;  %v1150_v53 = vsel %vm500_vm1, %v1148_v33, %v1149_v48  ;;  %v1153_v10 = vsel %vm500_vm1, %v1151_v27, %v1152_v3  ;;  %v1156_v12 = vsel %vm500_vm1, %v1154_v18, %v1155_v43  ;;  %v6694_v33 = vld [vmem:[#allocation14_spill] sm:$0xff]  ;;  %v6695_v18 = vld [vmem:[#allocation15_spill] sm:$0xff]  ;;  %v6696_v17 = vld [vmem:[#allocation16_spill] sm:$0xff] }
  0xd0   : > { %v1159_v26 = vsel %vm500_vm1, %v1157_v38, %v1158_v45  ;;  %v1162_v20 = vsel %vm500_vm1, %v1160_v13, %v1161_v46  ;;  %v1165_v22 = vsel %vm500_vm1, %v1163_v40, %v1164_v37  ;;  %v4406_v4 = vadd.f32 %v1123_v34, %v4302_v30  ;;  %v6697_v27 = vld [vmem:[#allocation17_spill] sm:$0xff]  ;;  %v6698_v43 = vld [vmem:[#allocation18_spill] sm:$0xff]  ;;  %v6699_v45 = vld [vmem:[#allocation19_spill] sm:$0xff] }
  0xd1   : > { %v4409_v39 = vadd.f32 %v1126_v59, %v4305_v58  ;;  %v4412_v24 = vadd.f32 %v1129_v15, %v4308_v29  ;;  %v1168_v21 = vsel %vm500_vm1, %v1166_v5, %v1167_v0  ;;  %v4416_v52 = vadd.f32 %v1132_v60, %v4312_v19  ;;  %v6700_v46 = vld [vmem:[#allocation20_spill] sm:$0xff]  ;;  %v6701_v60 = vld [vmem:[#allocation21_spill] sm:$0xff]  ;;  %v6702_v37 = vld [vmem:[#allocation22_spill] sm:$0xff] }
  0xd2   : > { %v4419_v31 = vadd.f32 %v1135_v9, %v4317_v23  ;;  %v4422_v28 = vadd.f32 %v1138_v42, %v4320_v2  ;;  %v4425_v30 = vadd.f32 %v1141_v16, %v4323_v61  ;;  %v4428_v58 = vadd.f32 %v1144_v57, %v4326_v25  ;;  %v6680_v61 = vld [vmem:[#allocation2_spill] sm:$0xff]  ;;  %v6682_v25 = vld [vmem:[#allocation3_spill] sm:$0xff]  ;;  %v6704_v0 = vld [vmem:[#allocation24_spill] sm:$0xff] }
  0xd3   : > { %v4431_v29 = vadd.f32 %v1147_v55, %v4329_v35  ;;  %v4434_v11 = vadd.f32 %v1150_v53, %v4332_v1  ;;  %v4437_v19 = vadd.f32 %v1153_v10, %v4335_v47  ;;  %v4440_v23 = vadd.f32 %v1156_v12, %v4338_v36  ;;  %v6684_v35 = vld [vmem:[#allocation56_spill] sm:$0xff]  ;;  %v6688_v47 = vld [vmem:[#allocation9_spill] sm:$0xff]  ;;  %v6690_v36 = vld [vmem:[#allocation10_spill] sm:$0xff] }
  0xd4   : > { %v4443_v2 = vadd.f32 %v1159_v26, %v4341_v49  ;;  %v4446_v59 = vadd.f32 %v1162_v20, %v6680_v61  ;;  %v4449_v34 = vadd.f32 %v1165_v22, %v6682_v25  ;;  %v4452_v7 = vadd.f32 %v1168_v21, %v6684_v35  ;;  %v6686_v1 = vld [vmem:[#allocation8_spill] sm:$0xff]  ;;  %v6691_v49 = vld [vmem:[#allocation11_spill] sm:$0xff]  ;;  %v6705_v57 = vld [vmem:[#allocation25_spill] sm:$0xff] }
  0xd5   : > { %v1203_v8 = vmul.f32 %v6687_v51, %v6686_v1  ;;  %v1204_v63 = vmul.f32 %v6689_v50, %v6688_v47  ;;  %v1205_v14 = vmul.f32 %v6687_v51, %v6690_v36  ;;  %v1206_v54 = vmul.f32 %v6689_v50, %v6691_v49  ;;  %v6703_v42 = vld [vmem:[#allocation23_spill] sm:$0xff]  ;;  %v6706_v53 = vld [vmem:[#allocation26_spill] sm:$0xff]  ;;  %v6708_v20 = vld [vmem:[#allocation28_spill] sm:$0xff] }
  0xd6   : > { %6681 = vst [vmem:[#allocation5_spill] sm:$0xff] %v4446_v59  ;;  %v1207_v41 = vmul.f32 %v6687_v51, %v6692_v62  ;;  %v1208_v44 = vmul.f32 %v6689_v50, %v6693_v6  ;;  %v1209_v56 = vmul.f32 %v6687_v51, %v6694_v33  ;;  %v1210_v32 = vmul.f32 %v6689_v50, %v6695_v18  ;;  %v6707_v12 = vld [vmem:[#allocation27_spill] sm:$0xff]  ;;  %v6709_v21 = vld [vmem:[#allocation29_spill] sm:$0xff] }
  0xd7   : > { %6683 = vst [vmem:[#allocation6_spill] sm:$0xff] %v4449_v34  ;;  %v1211_v48 = vmul.f32 %v6687_v51, %v6696_v17  ;;  %v1212_v3 = vmul.f32 %v6689_v50, %v6697_v27  ;;  %v1213_v38 = vmul.f32 %v6687_v51, %v6698_v43  ;;  %v1214_v13 = vmul.f32 %v6689_v50, %v6699_v45  ;;  %v6718_v17 = vld [vmem:[#allocation38_spill] sm:$0xff]  ;;  %v6719_v18 = vld [vmem:[#allocation39_spill] sm:$0xff] }
  0xd8   : > { %6685 = vst [vmem:[#allocation7_spill] sm:$0xff] %v4452_v7  ;;  %v1215_v15 = vmul.f32 %v6687_v51, %v6700_v46  ;;  %v1216_v40 = vmul.f32 %v6689_v50, %v6701_v60  ;;  %v1217_v9 = vmul.f32 %v6687_v51, %v6702_v37  ;;  %v1218_v5 = vmul.f32 %v6689_v50, %v6703_v42 }
  0xd9   : > { %v1219_v16 = vmul.f32 %v6687_v51, %v6704_v0  ;;  %v1220_v55 = vmul.f32 %v6689_v50, %v6705_v57  ;;  %v1221_v10 = vmul.f32 %v6687_v51, %v6706_v53  ;;  %v1222_v26 = vmul.f32 %v6689_v50, %v6707_v12  ;;  %v6710_v0 = vld [vmem:[#allocation30_spill] sm:$0xff]  ;;  %v6711_v57 = vld [vmem:[#allocation31_spill] sm:$0xff]  ;;  %v6712_v53 = vld [vmem:[#allocation32_spill] sm:$0xff] }
  0xda   : > { %v1223_v22 = vmul.f32 %v6687_v51, %v6708_v20  ;;  %v1224_v61 = vmul.f32 %v6689_v50, %v6709_v21  ;;  %v1267_v25 = vrot.slane %v1203_v8, 3  ;;  %v1268_v35 = vrot.slane %v1205_v14, 3  ;;  %v6713_v12 = vld [vmem:[#allocation33_spill] sm:$0xff]  ;;  %v6714_v20 = vld [vmem:[#allocation34_spill] sm:$0xff]  ;;  %v6715_v21 = vld [vmem:[#allocation35_spill] sm:$0xff] }
  0xdb   : > { %v1270_v42 = vrot.slane %v1204_v63, 3  ;;  %v1271_v37 = vrot.slane %v1206_v54, 3  ;;  %v1225_v60 = vmul.f32 %v6687_v51, %v6710_v0  ;;  %v1226_v46 = vmul.f32 %v6689_v50, %v6711_v57  ;;  %v6716_v63 = vld [vmem:[#allocation36_spill] sm:$0xff]  ;;  %v6717_v54 = vld [vmem:[#allocation37_spill] sm:$0xff] }
  0xdc   : > { %v1227_v45 = vmul.f32 %v6687_v51, %v6712_v53  ;;  %v1228_v43 = vmul.f32 %v6689_v50, %v6713_v12  ;;  %v1229_v27 = vmul.f32 %v6687_v51, %v6714_v20  ;;  %v1230_v8 = vmul.f32 %v6689_v50, %v6715_v21 }
  0xdd   : > { %v1231_v14 = vmul.f32 %v6687_v51, %v6716_v63  ;;  %v1232_v0 = vmul.f32 %v6689_v50, %v6717_v54  ;;  %v1233_v57 = vmul.f32 %v6687_v51, %v6718_v17  ;;  %v1234_v53 = vmul.f32 %v6689_v50, %v6719_v18 }
  0xde   : > { %v1273_v33 = vrot.slane %v1207_v41, 3  ;;  %v1274_v12 = vrot.slane %v1209_v56, 3  ;;  %v1269_v6 = vsel %vm647_vm2, %v1267_v25, %v1268_v35  ;;  %v1272_v20 = vsel %vm647_vm2, %v1270_v42, %v1271_v37 }
  0xdf   : > { %v1276_v62 = vrot.slane %v1208_v44, 3  ;;  %v1277_v21 = vrot.slane %v1210_v32, 3  ;;  %v1279_v49 = vrot.slane %v1211_v48, 3  ;;  %v1280_v36 = vrot.slane %v1213_v38, 3 }
  0xe0   : > { %v1282_v63 = vrot.slane %v1212_v3, 3  ;;  %v1283_v47 = vrot.slane %v1214_v13, 3  ;;  %v1285_v1 = vrot.slane %v1215_v15, 3  ;;  %v1286_v54 = vrot.slane %v1217_v9, 3 }
  0xe1   : > { %v1288_v7 = vrot.slane %v1216_v40, 3  ;;  %v1289_v34 = vrot.slane %v1218_v5, 3  ;;  %v1291_v51 = vrot.slane %v1219_v16, 3  ;;  %v1292_v17 = vrot.slane %v1221_v10, 3  ;;  %v6725_v10 = vld [vmem:[#allocation6_spill] sm:$0xff] }
  0xe2   : > { %v1294_v59 = vrot.slane %v1220_v55, 3  ;;  %v1295_v50 = vrot.slane %v1222_v26, 3  ;;  %v1297_v41 = vrot.slane %v1223_v22, 3  ;;  %v1298_v56 = vrot.slane %v1225_v60, 3 }
  0xe3   : > { %v1300_v18 = vrot.slane %v1224_v61, 3  ;;  %v1301_v25 = vrot.slane %v1226_v46, 3  ;;  %v1303_v35 = vrot.slane %v1227_v45, 3  ;;  %v1304_v37 = vrot.slane %v1229_v27, 3 }
  0xe4   : > { %v1306_v44 = vrot.slane %v1228_v43, 3  ;;  %v1307_v32 = vrot.slane %v1230_v8, 3  ;;  %v1275_v48 = vsel %vm647_vm2, %v1273_v33, %v1274_v12  ;;  %v1278_v3 = vsel %vm647_vm2, %v1276_v62, %v1277_v21  ;;  %v6733_v21 = vld [vmem:[#allocation9_spill] sm:$0xff]  ;;  %v6734_v8 = vld [vmem:[#allocation10_spill] sm:$0xff] }
  0xe5   : > { %v1309_v38 = vrot.slane %v1231_v14, 3  ;;  %v1310_v13 = vrot.slane %v1233_v57, 3  ;;  %v1281_v15 = vsel %vm647_vm2, %v1279_v49, %v1280_v36  ;;  %v1284_v40 = vsel %vm647_vm2, %v1282_v63, %v1283_v47  ;;  %v6735_v14 = vld [vmem:[#allocation11_spill] sm:$0xff] }
  0xe6   : > { %v1312_v9 = vrot.slane %v1232_v0, 3  ;;  %v1313_v42 = vrot.slane %v1234_v53, 3  ;;  %v1287_v60 = vsel %vm647_vm2, %v1285_v1, %v1286_v54  ;;  %v1290_v46 = vsel %vm647_vm2, %v1288_v7, %v1289_v34 }
  0xe7   : > { %v1293_v27 = vsel %vm647_vm2, %v1291_v51, %v1292_v17  ;;  %v1296_v43 = vsel %vm647_vm2, %v1294_v59, %v1295_v50  ;;  %v1299_v33 = vsel %vm647_vm2, %v1297_v41, %v1298_v56  ;;  %v1302_v62 = vsel %vm647_vm2, %v1300_v18, %v1301_v25  ;;  %v6736_v51 = vld [vmem:[#allocation12_spill] sm:$0xff]  ;;  %v6737_v41 = vld [vmem:[#allocation13_spill] sm:$0xff]  ;;  %v6738_v25 = vld [vmem:[#allocation14_spill] sm:$0xff] }
  0xe8   : > { %v1305_v45 = vsel %vm647_vm2, %v1303_v35, %v1304_v37  ;;  %v1308_v36 = vsel %vm647_vm2, %v1306_v44, %v1307_v32  ;;  %v1311_v47 = vsel %vm647_vm2, %v1309_v38, %v1310_v13  ;;  %v4534_v49 = vadd.f32 %v1269_v6, %v4406_v4  ;;  %v4555_v4 = vld [vmem:[%s6215_s1 + $0x20] sm:$0x1f]  ;;  %v6739_v37 = vld [vmem:[#allocation15_spill] sm:$0xff]  ;;  %v6740_v32 = vld [vmem:[#allocation16_spill] sm:$0xff] }
  0xe9   : > { %v4537_v1 = vadd.f32 %v1272_v20, %v4409_v39  ;;  %v4540_v34 = vadd.f32 %v1275_v48, %v4412_v24  ;;  %v1314_v59 = vsel %vm647_vm2, %v1312_v9, %v1313_v42  ;;  %v4544_v7 = vadd.f32 %v1278_v3, %v4416_v52  ;;  %6720 = vst [vmem:[#allocation55_spill] sm:$0xff] %v4555_v4  ;;  %v4560_v39 = vld [vmem:[%s6215_s1 + $0x28] sm:$0x1f]  ;;  %v6732_v20 = vld [vmem:[#allocation8_spill] sm:$0xff]  ;;  %v6741_v3 = vld [vmem:[#allocation17_spill] sm:$0xff] }
  0xea   : > { %v4547_v18 = vadd.f32 %v1281_v15, %v4419_v31  ;;  %v4550_v17 = vadd.f32 %v1284_v40, %v4422_v28  ;;  %6721 = vst [vmem:[#allocation2_spill] sm:$0xff] %v4560_v39  ;;  %v4563_v24 = vadd.f32 %v1287_v60, %v4425_v30  ;;  %v4566_v52 = vadd.f32 %v1290_v46, %v4428_v58  ;;  %v6722_v31 = vld [vmem:[#allocation53_spill] sm:$0xff]  ;;  %v6723_v28 = vld [vmem:[#allocation54_spill] sm:$0xff]  ;;  %v6743_v40 = vld [vmem:[#allocation19_spill] sm:$0xff] }
  0xeb   : > { %v1347_v6 = vperm.slane %v6722_v31, 4  ;;  %v1348_v5 = vperm.slane %v6723_v28, 4  ;;  %v4571_v0 = vadd.f32 %v1293_v27, %v4431_v29  ;;  %v4574_v16 = vadd.f32 %v1296_v43, %v4434_v11  ;;  %v6724_v58 = vld [vmem:[#allocation5_spill] sm:$0xff]  ;;  %v6726_v29 = vld [vmem:[#allocation7_spill] sm:$0xff]  ;;  %v6742_v13 = vld [vmem:[#allocation18_spill] sm:$0xff] }
  0xec   : > { %v4577_v57 = vadd.f32 %v1299_v33, %v4437_v19  ;;  %v4580_v55 = vadd.f32 %v1302_v62, %v4440_v23  ;;  %v4583_v30 = vadd.f32 %v1305_v45, %v4443_v2  ;;  %v4586_v53 = vadd.f32 %v1308_v36, %v6724_v58  ;;  %v6744_v42 = vld [vmem:[#allocation20_spill] sm:$0xff]  ;;  %v6745_v46 = vld [vmem:[#allocation21_spill] sm:$0xff]  ;;  %v6746_v43 = vld [vmem:[#allocation22_spill] sm:$0xff] }
  0xed   : > { %v4589_v12 = vadd.f32 %v1311_v47, %v6725_v10  ;;  %v4592_v26 = vadd.f32 %v1314_v59, %v6726_v29  ;;  %v4595_v11 = vperm.slane %v4555_v4, 0  ;;  %v4598_v19 = vperm.slane %v4560_v39, 0  ;;  %v6747_v62 = vld [vmem:[#allocation23_spill] sm:$0xff]  ;;  %v6748_v36 = vld [vmem:[#allocation24_spill] sm:$0xff]  ;;  %v6749_v59 = vld [vmem:[#allocation25_spill] sm:$0xff] }
  0xee   : > { %v4601_v23 = vperm.slane %v4555_v4, 1  ;;  %v4604_v2 = vperm.slane %v4560_v39, 1  ;;  %v1349_v22 = vmul.f32 %v1347_v6, %v6732_v20  ;;  %v1350_v61 = vmul.f32 %v1348_v5, %v6733_v21  ;;  %v6750_v28 = vld [vmem:[#allocation26_spill] sm:$0xff]  ;;  %v6751_v10 = vld [vmem:[#allocation27_spill] sm:$0xff]  ;;  %v6752_v20 = vld [vmem:[#allocation28_spill] sm:$0xff] }
  0xef   : > { %6727 = vst [vmem:[#allocation3_spill] sm:$0xff] %v4592_v26  ;;  %v1351_v63 = vmul.f32 %v1347_v6, %v6734_v8  ;;  %v1352_v54 = vmul.f32 %v1348_v5, %v6735_v14  ;;  %v1353_v50 = vmul.f32 %v1347_v6, %v6736_v51  ;;  %v1354_v56 = vmul.f32 %v1348_v5, %v6737_v41  ;;  %v6753_v8 = vld [vmem:[#allocation29_spill] sm:$0xff]  ;;  %v6754_v39 = vld [vmem:[#allocation30_spill] sm:$0xff] }
  0xf0   : > { %6728 = vst [vmem:[#allocation56_spill] sm:$0xff] %v4595_v11  ;;  %v1355_v35 = vmul.f32 %v1347_v6, %v6738_v25  ;;  %v1356_v44 = vmul.f32 %v1348_v5, %v6739_v37  ;;  %v1357_v48 = vmul.f32 %v1347_v6, %v6740_v32  ;;  %v1358_v38 = vmul.f32 %v1348_v5, %v6741_v3  ;;  %v6758_v3 = vld [vmem:[#allocation34_spill] sm:$0xff]  ;;  %v6759_v32 = vld [vmem:[#allocation35_spill] sm:$0xff]  ;;  %v6761_v41 = vld [vmem:[#allocation37_spill] sm:$0xff] }
  0xf1   : > { %6729 = vst [vmem:[#allocation52_spill] sm:$0xff] %v4598_v19  ;;  %v1359_v15 = vmul.f32 %v1347_v6, %v6742_v13  ;;  %v1360_v9 = vmul.f32 %v1348_v5, %v6743_v40  ;;  %v1361_v60 = vmul.f32 %v1347_v6, %v6744_v42  ;;  %v1362_v27 = vmul.f32 %v1348_v5, %v6745_v46  ;;  %v6755_v40 = vld [vmem:[#allocation31_spill] sm:$0xff]  ;;  %v6756_v46 = vld [vmem:[#allocation32_spill] sm:$0xff]  ;;  %v6757_v42 = vld [vmem:[#allocation33_spill] sm:$0xff] }
  0xf2   : > { %6730 = vst [vmem:[#allocation4_spill] sm:$0xff] %v4601_v23  ;;  %v1363_v33 = vmul.f32 %v1347_v6, %v6746_v43  ;;  %v1364_v45 = vmul.f32 %v1348_v5, %v6747_v62  ;;  %v1365_v47 = vmul.f32 %v1347_v6, %v6748_v36  ;;  %v1366_v31 = vmul.f32 %v1348_v5, %v6749_v59  ;;  %v6760_v19 = vld [vmem:[#allocation36_spill] sm:$0xff] }
  0xf3   : > { %6731 = vst [vmem:[#allocation53_spill] sm:$0xff] %v4604_v2  ;;  %v1367_v58 = vmul.f32 %v1347_v6, %v6750_v28  ;;  %v1368_v29 = vmul.f32 %v1348_v5, %v6751_v10  ;;  %v1369_v21 = vmul.f32 %v1347_v6, %v6752_v20  ;;  %v1370_v14 = vmul.f32 %v1348_v5, %v6753_v8 }
  0xf4   : > { %v1371_v4 = vmul.f32 %v1347_v6, %v6754_v39  ;;  %v1372_v13 = vmul.f32 %v1348_v5, %v6755_v40  ;;  %v1413_v37 = vrot.slane %v1349_v22, 4  ;;  %v1414_v43 = vrot.slane %v1351_v63, 4  ;;  %v6762_v22 = vld [vmem:[#allocation38_spill] sm:$0xff] }
  0xf5   : > { %v1416_v25 = vrot.slane %v1350_v61, 4  ;;  %v1417_v62 = vrot.slane %v1352_v54, 4  ;;  %v1419_v2 = vrot.slane %v1353_v50, 4  ;;  %v1420_v23 = vrot.slane %v1355_v35, 4  ;;  %v6763_v61 = vld [vmem:[#allocation39_spill] sm:$0xff] }
  0xf6   : > { %v1422_v36 = vrot.slane %v1354_v56, 4  ;;  %v1423_v59 = vrot.slane %v1356_v44, 4  ;;  %v1373_v28 = vmul.f32 %v1347_v6, %v6756_v46  ;;  %v1374_v10 = vmul.f32 %v1348_v5, %v6757_v42 }
  0xf7   : > { %v1375_v20 = vmul.f32 %v1347_v6, %v6758_v3  ;;  %v1376_v8 = vmul.f32 %v1348_v5, %v6759_v32  ;;  %v1377_v39 = vmul.f32 %v1347_v6, %v6760_v19  ;;  %v1378_v40 = vmul.f32 %v1348_v5, %v6761_v41 }
  0xf8   : > { %v1379_v63 = vmul.f32 %v1347_v6, %v6762_v22  ;;  %v1380_v54 = vmul.f32 %v1348_v5, %v6763_v61  ;;  %v1415_v50 = vsel %vm794_vm3, %v1413_v37, %v1414_v43  ;;  %v1418_v56 = vsel %vm794_vm3, %v1416_v25, %v1417_v62 }
  0xf9   : > { %v1425_v35 = vrot.slane %v1357_v48, 4  ;;  %v1426_v44 = vrot.slane %v1359_v15, 4  ;;  %v1421_v42 = vsel %vm794_vm3, %v1419_v2, %v1420_v23  ;;  %v1424_v3 = vsel %vm794_vm3, %v1422_v36, %v1423_v59 }
  0xfa   : > { %v1428_v46 = vrot.slane %v1358_v38, 4  ;;  %v1429_v32 = vrot.slane %v1360_v9, 4  ;;  %v1431_v11 = vrot.slane %v1361_v60, 4  ;;  %v1432_v19 = vrot.slane %v1363_v33, 4 }
  0xfb   : > { %v1434_v51 = vrot.slane %v1362_v27, 4  ;;  %v1435_v41 = vrot.slane %v1364_v45, 4  ;;  %v1437_v26 = vrot.slane %v1365_v47, 4  ;;  %v1438_v6 = vrot.slane %v1367_v58, 4 }
  0xfc   : > { %v1440_v22 = vrot.slane %v1366_v31, 4  ;;  %v1441_v5 = vrot.slane %v1368_v29, 4  ;;  %v1443_v61 = vrot.slane %v1369_v21, 4  ;;  %v1444_v37 = vrot.slane %v1371_v4, 4  ;;  %v6768_v21 = vld [vmem:[#allocation52_spill] sm:$0xff] }
  0xfd   : > { %v1446_v43 = vrot.slane %v1370_v14, 4  ;;  %v1447_v25 = vrot.slane %v1372_v13, 4  ;;  %v1449_v48 = vrot.slane %v1373_v28, 4  ;;  %v1450_v15 = vrot.slane %v1375_v20, 4  ;;  %v6771_v14 = vld [vmem:[#allocation20_spill] sm:$0xff] }
  0xfe   : > { %v1452_v62 = vrot.slane %v1374_v10, 4  ;;  %v1453_v23 = vrot.slane %v1376_v8, 4  ;;  %v1455_v2 = vrot.slane %v1377_v39, 4  ;;  %v1456_v36 = vrot.slane %v1379_v63, 4  ;;  %v6769_v8 = vld [vmem:[#allocation16_spill] sm:$0xff] }
  0xff   : > { %v1458_v38 = vrot.slane %v1378_v40, 4  ;;  %v1459_v9 = vrot.slane %v1380_v54, 4  ;;  %v1427_v60 = vsel %vm794_vm3, %v1425_v35, %v1426_v44  ;;  %v1430_v27 = vsel %vm794_vm3, %v1428_v46, %v1429_v32  ;;  %v6776_v35 = vld [vmem:[#allocation29_spill] sm:$0xff] }
 0x100   : > { %v1433_v33 = vsel %vm794_vm3, %v1431_v11, %v1432_v19  ;;  %v1436_v45 = vsel %vm794_vm3, %v1434_v51, %v1435_v41  ;;  %v1439_v4 = vsel %vm794_vm3, %v1437_v26, %v1438_v6  ;;  %v1442_v13 = vsel %vm794_vm3, %v1440_v22, %v1441_v5  ;;  %v6773_v22 = vld [vmem:[#allocation24_spill] sm:$0xff] }
 0x101   : > { %v1445_v47 = vsel %vm794_vm3, %v1443_v61, %v1444_v37  ;;  %v1448_v59 = vsel %vm794_vm3, %v1446_v43, %v1447_v25  ;;  %v1451_v39 = vsel %vm794_vm3, %v1449_v48, %v1450_v15  ;;  %v1454_v40 = vsel %vm794_vm3, %v1452_v62, %v1453_v23  ;;  %v6774_v61 = vld [vmem:[#allocation25_spill] sm:$0xff]  ;;  %v6777_v6 = vld [vmem:[#allocation32_spill] sm:$0xff] }
 0x102   : > { %v1477_v31 = vadd.f32 %v1415_v50, %v4534_v49  ;;  %v1478_v32 = vadd.f32 %v1418_v56, %v4537_v1  ;;  %v1457_v11 = vsel %vm794_vm3, %v1455_v2, %v1456_v36  ;;  %v1460_v19 = vsel %vm794_vm3, %v1458_v38, %v1459_v9  ;;  %v6775_v50 = vld [vmem:[#allocation28_spill] sm:$0xff]  ;;  %v6778_v37 = vld [vmem:[#allocation33_spill] sm:$0xff] }
 0x103   : > { %v1479_v26 = vadd.f32 %v1421_v42, %v4540_v34  ;;  %v1480_v51 = vadd.f32 %v1424_v3, %v4544_v7  ;;  %v1481_v41 = vadd.f32 %v1427_v60, %v4547_v18  ;;  %v1482_v46 = vadd.f32 %v1430_v27, %v4550_v17  ;;  %v6764_v3 = vld [vmem:[#allocation3_spill] sm:$0xff]  ;;  %v6765_v42 = vld [vmem:[#allocation12_spill] sm:$0xff]  ;;  %v6780_v15 = vld [vmem:[#allocation37_spill] sm:$0xff] }
 0x104   : > { %v1483_v28 = vadd.f32 %v1433_v33, %v4563_v24  ;;  %v1484_v58 = vadd.f32 %v1436_v45, %v4566_v52  ;;  %v1485_v49 = vadd.f32 %v1439_v4, %v4571_v0  ;;  %v1486_v1 = vadd.f32 %v1442_v13, %v4574_v16  ;;  %v6766_v24 = vld [vmem:[#allocation56_spill] sm:$0xff]  ;;  %v6767_v52 = vld [vmem:[#allocation13_spill] sm:$0xff] }
 0x105   : > { %v1487_v10 = vadd.f32 %v1445_v47, %v4577_v57  ;;  %v1488_v29 = vadd.f32 %v1448_v59, %v4580_v55  ;;  %v1489_v34 = vadd.f32 %v1451_v39, %v4583_v30  ;;  %v1490_v7 = vadd.f32 %v1454_v40, %v4586_v53  ;;  %v6770_v57 = vld [vmem:[#allocation17_spill] sm:$0xff]  ;;  %v6779_v25 = vld [vmem:[#allocation36_spill] sm:$0xff] }
 0x106   : > { %v1491_v18 = vadd.f32 %v1457_v11, %v4589_v12  ;;  %v1492_v17 = vadd.f32 %v1460_v19, %v6764_v3  ;;  %v1495_v20 = vmul.f32 %v6766_v24, %v6765_v42  ;;  %v1496_v0 = vmul.f32 %v6768_v21, %v6767_v52  ;;  %v6772_v53 = vld [vmem:[#allocation21_spill] sm:$0xff]  ;;  %v6781_v23 = vld [vmem:[#allocation40_spill] sm:$0xff]  ;;  %v6789_v3 = vld [vmem:[#allocation19_spill] sm:$0xff] }
 0x107   : > { %v1497_v16 = vmul.f32 %v6766_v24, %v6769_v8  ;;  %v1498_v55 = vmul.f32 %v6768_v21, %v6770_v57  ;;  %v1499_v30 = vmul.f32 %v6766_v24, %v6771_v14  ;;  %v1500_v12 = vmul.f32 %v6768_v21, %v6772_v53  ;;  %v6782_v36 = vld [vmem:[#allocation41_spill] sm:$0xff] }
 0x108   : > { %v1501_v63 = vmul.f32 %v6766_v24, %v6773_v22  ;;  %v1502_v54 = vmul.f32 %v6768_v21, %v6774_v61  ;;  %v1503_v56 = vmul.f32 %v6766_v24, %v6775_v50  ;;  %v1504_v44 = vmul.f32 %v6768_v21, %v6776_v35 }
 0x109   : > { %v1505_v5 = vmul.f32 %v6766_v24, %v6777_v6  ;;  %v1506_v43 = vmul.f32 %v6768_v21, %v6778_v37  ;;  %v1507_v48 = vmul.f32 %v6766_v24, %v6779_v25  ;;  %v1508_v62 = vmul.f32 %v6768_v21, %v6780_v15 }
 0x10a   : > { %v1509_v2 = vmul.f32 %v6766_v24, %v6781_v23  ;;  %v1510_v38 = vmul.f32 %v6768_v21, %v6782_v36  ;;  %v4702_v9 = vadd.f32 %v1495_v20, %v1477_v31  ;;  %v4704_v60 = vadd.f32 %v1496_v0, %v1478_v32  ;;  %v6790_v21 = vld [vmem:[#allocation22_spill] sm:$0xff] }
 0x10b   : > { %v4706_v27 = vadd.f32 %v1497_v16, %v1479_v26  ;;  %v4708_v33 = vadd.f32 %v1498_v55, %v1480_v51  ;;  %v4710_v45 = vadd.f32 %v1499_v30, %v1481_v41  ;;  %v4712_v4 = vadd.f32 %v1500_v12, %v1482_v46  ;;  %v6784_v51 = vld [vmem:[#allocation4_spill] sm:$0xff]  ;;  %v6785_v46 = vld [vmem:[#allocation53_spill] sm:$0xff]  ;;  %v6791_v16 = vld [vmem:[#allocation23_spill] sm:$0xff] }
 0x10c   : > { %v4714_v13 = vadd.f32 %v1501_v63, %v1483_v28  ;;  %v4716_v47 = vadd.f32 %v1502_v54, %v1484_v58  ;;  %v4718_v59 = vadd.f32 %v1503_v56, %v1485_v49  ;;  %v4720_v39 = vadd.f32 %v1504_v44, %v1486_v1  ;;  %v6786_v58 = vld [vmem:[#allocation14_spill] sm:$0xff]  ;;  %v6787_v1 = vld [vmem:[#allocation15_spill] sm:$0xff] }
 0x10d   : > { %v4722_v40 = vadd.f32 %v1505_v5, %v1487_v10  ;;  %v4724_v31 = vadd.f32 %v1506_v43, %v1488_v29  ;;  %v4726_v32 = vadd.f32 %v1507_v48, %v1489_v34  ;;  %v4728_v11 = vadd.f32 %v1508_v62, %v1490_v7  ;;  %v6788_v7 = vld [vmem:[#allocation18_spill] sm:$0xff]  ;;  %v6793_v56 = vld [vmem:[#allocation27_spill] sm:$0xff] }
 0x10e   : > { %v4730_v19 = vadd.f32 %v1509_v2, %v1491_v18  ;;  %v4732_v26 = vadd.f32 %v1510_v38, %v1492_v17  ;;  %v1529_v41 = vmul.f32 %v6784_v51, %v6765_v42  ;;  %v1530_v28 = vmul.f32 %v6785_v46, %v6767_v52  ;;  %v6792_v63 = vld [vmem:[#allocation26_spill] sm:$0xff]  ;;  %v6795_v2 = vld [vmem:[#allocation31_spill] sm:$0xff] }
 0x10f   : > { %v1531_v49 = vmul.f32 %v6784_v51, %v6786_v58  ;;  %v1532_v10 = vmul.f32 %v6785_v46, %v6787_v1  ;;  %v1533_v29 = vmul.f32 %v6784_v51, %v6769_v8  ;;  %v1534_v34 = vmul.f32 %v6785_v46, %v6770_v57  ;;  %v6794_v48 = vld [vmem:[#allocation30_spill] sm:$0xff]  ;;  %v6799_v8 = vld [vmem:[#allocation39_spill] sm:$0xff] }
 0x110   : > { %6783 = vst [vmem:[#allocation54_spill] sm:$0xff] %v4732_v26  ;;  %v1535_v18 = vmul.f32 %v6784_v51, %v6788_v7  ;;  %v1536_v17 = vmul.f32 %v6785_v46, %v6789_v3  ;;  %v1537_v24 = vmul.f32 %v6784_v51, %v6771_v14  ;;  %v1538_v20 = vmul.f32 %v6785_v46, %v6772_v53  ;;  %v6798_v57 = vld [vmem:[#allocation38_spill] sm:$0xff] }
 0x111   : > { %v1539_v0 = vmul.f32 %v6784_v51, %v6790_v21  ;;  %v1540_v55 = vmul.f32 %v6785_v46, %v6791_v16  ;;  %v1541_v30 = vmul.f32 %v6784_v51, %v6773_v22  ;;  %v1542_v12 = vmul.f32 %v6785_v46, %v6774_v61  ;;  %v6796_v22 = vld [vmem:[#allocation34_spill] sm:$0xff]  ;;  %v6797_v16 = vld [vmem:[#allocation35_spill] sm:$0xff] }
 0x112   : > { %v1543_v54 = vmul.f32 %v6784_v51, %v6792_v63  ;;  %v1544_v44 = vmul.f32 %v6785_v46, %v6793_v56  ;;  %v1545_v5 = vmul.f32 %v6784_v51, %v6775_v50  ;;  %v1546_v43 = vmul.f32 %v6785_v46, %v6776_v35 }
 0x113   : > { %v1547_v62 = vmul.f32 %v6784_v51, %v6794_v48  ;;  %v1548_v38 = vmul.f32 %v6785_v46, %v6795_v2  ;;  %v1549_v61 = vmul.f32 %v6784_v51, %v6777_v6  ;;  %v1550_v63 = vmul.f32 %v6785_v46, %v6778_v37 }
 0x114   : > { %v1551_v56 = vmul.f32 %v6784_v51, %v6796_v22  ;;  %v1552_v50 = vmul.f32 %v6785_v46, %v6797_v16  ;;  %v1593_v21 = vrot.slane %v1529_v41, 1  ;;  %v1594_v35 = vrot.slane %v1531_v49, 1  ;;  %v6800_v49 = vld [vmem:[#allocation42_spill] sm:$0xff] }
 0x115   : > { %v1596_v53 = vrot.slane %v1530_v28, 1  ;;  %v1597_v14 = vrot.slane %v1532_v10, 1  ;;  %v1599_v48 = vrot.slane %v1533_v29, 1  ;;  %v1600_v3 = vrot.slane %v1535_v18, 1  ;;  %v6801_v29 = vld [vmem:[#allocation43_spill] sm:$0xff] }
 0x116   : > { %v1602_v7 = vrot.slane %v1534_v34, 1  ;;  %v1603_v2 = vrot.slane %v1536_v17, 1  ;;  %v1553_v6 = vmul.f32 %v6784_v51, %v6779_v25  ;;  %v1554_v37 = vmul.f32 %v6785_v46, %v6780_v15 }
 0x117   : > { %v1555_v22 = vmul.f32 %v6784_v51, %v6798_v57  ;;  %v1556_v16 = vmul.f32 %v6785_v46, %v6799_v8  ;;  %v1557_v41 = vmul.f32 %v6784_v51, %v6781_v23  ;;  %v1558_v28 = vmul.f32 %v6785_v46, %v6782_v36 }
 0x118   : > { %v1559_v10 = vmul.f32 %v6784_v51, %v6800_v49  ;;  %v1560_v34 = vmul.f32 %v6785_v46, %v6801_v29  ;;  %v1595_v18 = vsel %vm353_vm0, %v1593_v21, %v1594_v35  ;;  %v1598_v17 = vsel %vm353_vm0, %v1596_v53, %v1597_v14 }
 0x119   : > { %v1605_v57 = vrot.slane %v1537_v24, 1  ;;  %v1606_v15 = vrot.slane %v1539_v0, 1  ;;  %v1601_v8 = vsel %vm353_vm0, %v1599_v48, %v1600_v3  ;;  %v1604_v25 = vsel %vm353_vm0, %v1602_v7, %v1603_v2  ;;  %v6810_v2 = vld [vmem:[#allocation14_spill] sm:$0xff] }
 0x11a   : > { %v1608_v23 = vrot.slane %v1538_v20, 1  ;;  %v1609_v1 = vrot.slane %v1540_v55, 1  ;;  %v1611_v58 = vrot.slane %v1541_v30, 1  ;;  %v1612_v36 = vrot.slane %v1543_v54, 1 }
 0x11b   : > { %v1614_v52 = vrot.slane %v1542_v12, 1  ;;  %v1615_v42 = vrot.slane %v1544_v44, 1  ;;  %v1617_v51 = vrot.slane %v1545_v5, 1  ;;  %v1618_v49 = vrot.slane %v1547_v62, 1  ;;  %v6809_v62 = vld [vmem:[#allocation13_spill] sm:$0xff] }
 0x11c   : > { %v1620_v26 = vrot.slane %v1546_v43, 1  ;;  %v1621_v46 = vrot.slane %v1548_v38, 1  ;;  %v1623_v29 = vrot.slane %v1549_v61, 1  ;;  %v1624_v35 = vrot.slane %v1551_v56, 1 }
 0x11d   : > { %v1626_v21 = vrot.slane %v1550_v63, 1  ;;  %v1627_v14 = vrot.slane %v1552_v50, 1  ;;  %v1629_v53 = vrot.slane %v1553_v6, 1  ;;  %v1630_v24 = vrot.slane %v1555_v22, 1 }
 0x11e   : > { %v1632_v0 = vrot.slane %v1554_v37, 1  ;;  %v1633_v3 = vrot.slane %v1556_v16, 1  ;;  %v1607_v7 = vsel %vm353_vm0, %v1605_v57, %v1606_v15  ;;  %v1610_v20 = vsel %vm353_vm0, %v1608_v23, %v1609_v1 }
 0x11f   : > { %v1635_v55 = vrot.slane %v1557_v41, 1  ;;  %v1636_v30 = vrot.slane %v1559_v10, 1  ;;  %v1613_v12 = vsel %vm353_vm0, %v1611_v58, %v1612_v36  ;;  %v1616_v54 = vsel %vm353_vm0, %v1614_v52, %v1615_v42 }
 0x120   : > { %v1638_v44 = vrot.slane %v1558_v28, 1  ;;  %v1639_v5 = vrot.slane %v1560_v34, 1  ;;  %v1619_v61 = vsel %vm353_vm0, %v1617_v51, %v1618_v49  ;;  %v1622_v50 = vsel %vm353_vm0, %v1620_v26, %v1621_v46  ;;  %v6812_v28 = vld [vmem:[#allocation16_spill] sm:$0xff]  ;;  %v6813_v49 = vld [vmem:[#allocation17_spill] sm:$0xff] }
 0x121   : > { %v1625_v22 = vsel %vm353_vm0, %v1623_v29, %v1624_v35  ;;  %v1628_v6 = vsel %vm353_vm0, %v1626_v21, %v1627_v14  ;;  %v1631_v57 = vsel %vm353_vm0, %v1629_v53, %v1630_v24  ;;  %v1634_v37 = vsel %vm353_vm0, %v1632_v0, %v1633_v3  ;;  %v6814_v29 = vld [vmem:[#allocation18_spill] sm:$0xff]  ;;  %v6816_v51 = vld [vmem:[#allocation20_spill] sm:$0xff]  ;;  %v6817_v35 = vld [vmem:[#allocation21_spill] sm:$0xff] }
 0x122   : > { %v4813_v15 = vadd.f32 %v1595_v18, %v4702_v9  ;;  %v4816_v23 = vadd.f32 %v1598_v17, %v4704_v60  ;;  %v1637_v42 = vsel %vm353_vm0, %v1635_v55, %v1636_v30  ;;  %v4820_v52 = vadd.f32 %v1601_v8, %v4706_v27  ;;  %v6802_v9 = vld [vmem:[#allocation55_spill] sm:$0xff]  ;;  %v6803_v60 = vld [vmem:[#allocation2_spill] sm:$0xff]  ;;  %v6820_v3 = vld [vmem:[#allocation24_spill] sm:$0xff] }
 0x123   : > { %v4823_v36 = vadd.f32 %v1604_v25, %v4708_v33  ;;  %v4826_v26 = vadd.f32 %v1607_v7, %v4710_v45  ;;  %v1640_v58 = vsel %vm353_vm0, %v1638_v44, %v1639_v5  ;;  %v4830_v1 = vadd.f32 %v1610_v20, %v4712_v4  ;;  %v6815_v18 = vld [vmem:[#allocation19_spill] sm:$0xff]  ;;  %v6818_v14 = vld [vmem:[#allocation22_spill] sm:$0xff]  ;;  %v6821_v20 = vld [vmem:[#allocation25_spill] sm:$0xff] }
 0x124   : > { %v1673_v16 = vperm.slane %v6802_v9, 2  ;;  %v1674_v63 = vperm.slane %v6803_v60, 2  ;;  %v4835_v56 = vadd.f32 %v1613_v12, %v4714_v13  ;;  %v4838_v8 = vadd.f32 %v1616_v54, %v4716_v47  ;;  %v6819_v24 = vld [vmem:[#allocation23_spill] sm:$0xff]  ;;  %v6822_v30 = vld [vmem:[#allocation26_spill] sm:$0xff]  ;;  %v6824_v5 = vld [vmem:[#allocation28_spill] sm:$0xff] }
 0x125   : > { %v4841_v25 = vadd.f32 %v1619_v61, %v4718_v59  ;;  %v4844_v27 = vadd.f32 %v1622_v50, %v4720_v39  ;;  %v4847_v33 = vadd.f32 %v1625_v22, %v4722_v40  ;;  %v4850_v45 = vadd.f32 %v1628_v6, %v4724_v31  ;;  %v6804_v59 = vld [vmem:[#allocation54_spill] sm:$0xff]  ;;  %v6808_v31 = vld [vmem:[#allocation12_spill] sm:$0xff]  ;;  %v6823_v54 = vld [vmem:[#allocation27_spill] sm:$0xff] }
 0x126   : > { %v4853_v4 = vadd.f32 %v1631_v57, %v4726_v32  ;;  %v4856_v13 = vadd.f32 %v1634_v37, %v4728_v11  ;;  %v4859_v47 = vadd.f32 %v1637_v42, %v4730_v19  ;;  %v4862_v43 = vadd.f32 %v1640_v58, %v6804_v59  ;;  %v6811_v11 = vld [vmem:[#allocation15_spill] sm:$0xff]  ;;  %v6825_v50 = vld [vmem:[#allocation29_spill] sm:$0xff]  ;;  %v6826_v6 = vld [vmem:[#allocation30_spill] sm:$0xff] }
 0x127   : > { %v4865_v39 = vperm.slane %v6802_v9, 3  ;;  %v4868_v40 = vperm.slane %v6803_v60, 3  ;;  %v1675_v48 = vmul.f32 %v1673_v16, %v6808_v31  ;;  %v1676_v32 = vmul.f32 %v1674_v63, %v6809_v62  ;;  %v6827_v37 = vld [vmem:[#allocation31_spill] sm:$0xff]  ;;  %v6828_v58 = vld [vmem:[#allocation32_spill] sm:$0xff]  ;;  %v6829_v60 = vld [vmem:[#allocation33_spill] sm:$0xff] }
 0x128   : > { %6805 = vst [vmem:[#allocation5_spill] sm:$0xff] %v4862_v43  ;;  %v1677_v38 = vmul.f32 %v1673_v16, %v6810_v2  ;;  %v1678_v41 = vmul.f32 %v1674_v63, %v6811_v11  ;;  %v1679_v19 = vmul.f32 %v1673_v16, %v6812_v28  ;;  %v1680_v10 = vmul.f32 %v1674_v63, %v6813_v49  ;;  %v6832_v49 = vld [vmem:[#allocation36_spill] sm:$0xff]  ;;  %v6833_v28 = vld [vmem:[#allocation37_spill] sm:$0xff]  ;;  %v6834_v11 = vld [vmem:[#allocation38_spill] sm:$0xff] }
 0x129   : > { %6806 = vst [vmem:[#allocation6_spill] sm:$0xff] %v4865_v39  ;;  %v1681_v34 = vmul.f32 %v1673_v16, %v6814_v29  ;;  %v1682_v17 = vmul.f32 %v1674_v63, %v6815_v18  ;;  %v1683_v46 = vmul.f32 %v1673_v16, %v6816_v51  ;;  %v1684_v21 = vmul.f32 %v1674_v63, %v6817_v35  ;;  %v6835_v2 = vld [vmem:[#allocation39_spill] sm:$0xff]  ;;  %v6837_v62 = vld [vmem:[#allocation41_spill] sm:$0xff] }
 0x12a   : > { %6807 = vst [vmem:[#allocation7_spill] sm:$0xff] %v4868_v40  ;;  %v1685_v53 = vmul.f32 %v1673_v16, %v6818_v14  ;;  %v1686_v0 = vmul.f32 %v1674_v63, %v6819_v24  ;;  %v1687_v7 = vmul.f32 %v1673_v16, %v6820_v3  ;;  %v1688_v55 = vmul.f32 %v1674_v63, %v6821_v20  ;;  %v6830_v24 = vld [vmem:[#allocation34_spill] sm:$0xff]  ;;  %v6831_v14 = vld [vmem:[#allocation35_spill] sm:$0xff]  ;;  %v6836_v40 = vld [vmem:[#allocation40_spill] sm:$0xff] }
 0x12b   : > { %v1689_v12 = vmul.f32 %v1673_v16, %v6822_v30  ;;  %v1690_v44 = vmul.f32 %v1674_v63, %v6823_v54  ;;  %v1691_v61 = vmul.f32 %v1673_v16, %v6824_v5  ;;  %v1692_v22 = vmul.f32 %v1674_v63, %v6825_v50 }
 0x12c   : > { %v1693_v57 = vmul.f32 %v1673_v16, %v6826_v6  ;;  %v1694_v42 = vmul.f32 %v1674_v63, %v6827_v37  ;;  %v1695_v59 = vmul.f32 %v1673_v16, %v6828_v58  ;;  %v1696_v9 = vmul.f32 %v1674_v63, %v6829_v60 }
 0x12d   : > { %v1697_v3 = vmul.f32 %v1673_v16, %v6830_v24  ;;  %v1698_v20 = vmul.f32 %v1674_v63, %v6831_v14  ;;  %v1739_v35 = vrot.slane %v1675_v48, 2  ;;  %v1740_v30 = vrot.slane %v1677_v38, 2  ;;  %v6838_v48 = vld [vmem:[#allocation42_spill] sm:$0xff] }
 0x12e   : > { %v1742_v51 = vrot.slane %v1676_v32, 2  ;;  %v1743_v54 = vrot.slane %v1678_v41, 2  ;;  %v1745_v18 = vrot.slane %v1679_v19, 2  ;;  %v1746_v5 = vrot.slane %v1681_v34, 2  ;;  %v6839_v32 = vld [vmem:[#allocation43_spill] sm:$0xff] }
 0x12f   : > { %v1748_v29 = vrot.slane %v1680_v10, 2  ;;  %v1749_v50 = vrot.slane %v1682_v17, 2  ;;  %v1699_v6 = vmul.f32 %v1673_v16, %v6832_v49  ;;  %v1700_v37 = vmul.f32 %v1674_v63, %v6833_v28 }
 0x130   : > { %v1701_v58 = vmul.f32 %v1673_v16, %v6834_v11  ;;  %v1702_v60 = vmul.f32 %v1674_v63, %v6835_v2  ;;  %v1703_v24 = vmul.f32 %v1673_v16, %v6836_v40  ;;  %v1704_v14 = vmul.f32 %v1674_v63, %v6837_v62 }
 0x131   : > { %v1705_v38 = vmul.f32 %v1673_v16, %v6838_v48  ;;  %v1706_v41 = vmul.f32 %v1674_v63, %v6839_v32  ;;  %v1741_v19 = vsel %vm500_vm1, %v1739_v35, %v1740_v30  ;;  %v1744_v10 = vsel %vm500_vm1, %v1742_v51, %v1743_v54 }
 0x132   : > { %v1751_v34 = vrot.slane %v1683_v46, 2  ;;  %v1752_v17 = vrot.slane %v1685_v53, 2  ;;  %v1747_v28 = vsel %vm500_vm1, %v1745_v18, %v1746_v5  ;;  %v1750_v11 = vsel %vm500_vm1, %v1748_v29, %v1749_v50 }
 0x133   : > { %v1754_v49 = vrot.slane %v1684_v21, 2  ;;  %v1755_v2 = vrot.slane %v1686_v0, 2  ;;  %v1757_v39 = vrot.slane %v1687_v7, 2  ;;  %v1758_v40 = vrot.slane %v1689_v12, 2 }
 0x134   : > { %v1760_v31 = vrot.slane %v1688_v55, 2  ;;  %v1761_v62 = vrot.slane %v1690_v44, 2  ;;  %v1763_v43 = vrot.slane %v1691_v61, 2  ;;  %v1764_v16 = vrot.slane %v1693_v57, 2 }
 0x135   : > { %v1766_v48 = vrot.slane %v1692_v22, 2  ;;  %v1767_v63 = vrot.slane %v1694_v42, 2  ;;  %v1769_v32 = vrot.slane %v1695_v59, 2  ;;  %v1770_v35 = vrot.slane %v1697_v3, 2 }
 0x136   : > { %v1772_v30 = vrot.slane %v1696_v9, 2  ;;  %v1773_v51 = vrot.slane %v1698_v20, 2  ;;  %v1775_v46 = vrot.slane %v1699_v6, 2  ;;  %v1776_v53 = vrot.slane %v1701_v58, 2  ;;  %v6845_v6 = vld [vmem:[#allocation7_spill] sm:$0xff] }
 0x137   : > { %v1778_v54 = vrot.slane %v1700_v37, 2  ;;  %v1779_v18 = vrot.slane %v1702_v60, 2  ;;  %v1781_v5 = vrot.slane %v1703_v24, 2  ;;  %v1782_v29 = vrot.slane %v1705_v38, 2 }
 0x138   : > { %v1784_v21 = vrot.slane %v1704_v14, 2  ;;  %v1785_v0 = vrot.slane %v1706_v41, 2  ;;  %v1753_v7 = vsel %vm500_vm1, %v1751_v34, %v1752_v17  ;;  %v1756_v55 = vsel %vm500_vm1, %v1754_v49, %v1755_v2  ;;  %v6853_v34 = vld [vmem:[#allocation21_spill] sm:$0xff] }
 0x139   : > { %v1759_v12 = vsel %vm500_vm1, %v1757_v39, %v1758_v40  ;;  %v1762_v44 = vsel %vm500_vm1, %v1760_v31, %v1761_v62  ;;  %v1765_v3 = vsel %vm500_vm1, %v1763_v43, %v1764_v16  ;;  %v1768_v9 = vsel %vm500_vm1, %v1766_v48, %v1767_v63  ;;  %v6850_v48 = vld [vmem:[#allocation18_spill] sm:$0xff] }
 0x13a   : > { %v1771_v20 = vsel %vm500_vm1, %v1769_v32, %v1770_v35  ;;  %v1774_v60 = vsel %vm500_vm1, %v1772_v30, %v1773_v51  ;;  %v1777_v24 = vsel %vm500_vm1, %v1775_v46, %v1776_v53  ;;  %v1780_v14 = vsel %vm500_vm1, %v1778_v54, %v1779_v18  ;;  %v6851_v32 = vld [vmem:[#allocation19_spill] sm:$0xff]  ;;  %v6854_v16 = vld [vmem:[#allocation22_spill] sm:$0xff]  ;;  %v6856_v51 = vld [vmem:[#allocation24_spill] sm:$0xff] }
 0x13b   : > { %v4917_v61 = vadd.f32 %v1741_v19, %v4813_v15  ;;  %v4920_v2 = vadd.f32 %v1744_v10, %v4816_v23  ;;  %v1783_v39 = vsel %vm500_vm1, %v1781_v5, %v1782_v29  ;;  %v1786_v43 = vsel %vm500_vm1, %v1784_v21, %v1785_v0  ;;  %v6852_v19 = vld [vmem:[#allocation20_spill] sm:$0xff]  ;;  %v6855_v35 = vld [vmem:[#allocation23_spill] sm:$0xff]  ;;  %v6857_v53 = vld [vmem:[#allocation25_spill] sm:$0xff] }
 0x13c   : > { %v4925_v40 = vadd.f32 %v1747_v28, %v4820_v52  ;;  %v4928_v31 = vadd.f32 %v1750_v11, %v4823_v36  ;;  %v4931_v62 = vadd.f32 %v1753_v7, %v4826_v26  ;;  %v4934_v49 = vadd.f32 %v1756_v55, %v4830_v1  ;;  %v6843_v28 = vld [vmem:[#allocation6_spill] sm:$0xff]  ;;  %v6859_v29 = vld [vmem:[#allocation27_spill] sm:$0xff]  ;;  %v6860_v0 = vld [vmem:[#allocation28_spill] sm:$0xff] }
 0x13d   : > { %v4937_v15 = vadd.f32 %v1759_v12, %v4835_v56  ;;  %v4940_v23 = vadd.f32 %v1762_v44, %v4838_v8  ;;  %v4943_v50 = vadd.f32 %v1765_v3, %v4841_v25  ;;  %v4946_v52 = vadd.f32 %v1768_v9, %v4844_v27  ;;  %v6840_v25 = vld [vmem:[#allocation5_spill] sm:$0xff]  ;;  %v6842_v27 = vld [vmem:[#allocation12_spill] sm:$0xff]  ;;  %v6858_v18 = vld [vmem:[#allocation26_spill] sm:$0xff] }
 0x13e   : > { %v4949_v36 = vadd.f32 %v1771_v20, %v4847_v33  ;;  %v4952_v26 = vadd.f32 %v1774_v60, %v4850_v45  ;;  %v4955_v1 = vadd.f32 %v1777_v24, %v4853_v4  ;;  %v4958_v56 = vadd.f32 %v1780_v14, %v4856_v13  ;;  %v6844_v33 = vld [vmem:[#allocation13_spill] sm:$0xff]  ;;  %v6846_v45 = vld [vmem:[#allocation14_spill] sm:$0xff]  ;;  %v6847_v4 = vld [vmem:[#allocation15_spill] sm:$0xff] }
 0x13f   : > { %v4961_v8 = vadd.f32 %v1783_v39, %v4859_v47  ;;  %v4964_v11 = vadd.f32 %v1786_v43, %v6840_v25  ;;  %v1821_v22 = vmul.f32 %v6843_v28, %v6842_v27  ;;  %v1822_v57 = vmul.f32 %v6845_v6, %v6844_v33  ;;  %v6848_v13 = vld [vmem:[#allocation16_spill] sm:$0xff]  ;;  %v6849_v47 = vld [vmem:[#allocation17_spill] sm:$0xff]  ;;  %v6862_v44 = vld [vmem:[#allocation30_spill] sm:$0xff] }
 0x140   : > { %v1823_v37 = vmul.f32 %v6843_v28, %v6846_v45  ;;  %v1824_v42 = vmul.f32 %v6845_v6, %v6847_v4  ;;  %v1825_v58 = vmul.f32 %v6843_v28, %v6848_v13  ;;  %v1826_v59 = vmul.f32 %v6845_v6, %v6849_v47  ;;  %v6861_v55 = vld [vmem:[#allocation29_spill] sm:$0xff]  ;;  %v6863_v9 = vld [vmem:[#allocation31_spill] sm:$0xff]  ;;  %v6864_v60 = vld [vmem:[#allocation32_spill] sm:$0xff] }
 0x141   : > { %6841 = vst [vmem:[#allocation8_spill] sm:$0xff] %v4964_v11  ;;  %v1827_v38 = vmul.f32 %v6843_v28, %v6850_v48  ;;  %v1828_v41 = vmul.f32 %v6845_v6, %v6851_v32  ;;  %v1829_v10 = vmul.f32 %v6843_v28, %v6852_v19  ;;  %v1830_v17 = vmul.f32 %v6845_v6, %v6853_v34  ;;  %v6865_v14 = vld [vmem:[#allocation33_spill] sm:$0xff]  ;;  %v6866_v43 = vld [vmem:[#allocation34_spill] sm:$0xff]  ;;  %v6868_v34 = vld [vmem:[#allocation36_spill] sm:$0xff] }
 0x142   : > { %v1831_v63 = vmul.f32 %v6843_v28, %v6854_v16  ;;  %v1832_v30 = vmul.f32 %v6845_v6, %v6855_v35  ;;  %v1833_v46 = vmul.f32 %v6843_v28, %v6856_v51  ;;  %v1834_v54 = vmul.f32 %v6845_v6, %v6857_v53  ;;  %v6869_v19 = vld [vmem:[#allocation37_spill] sm:$0xff]  ;;  %v6870_v32 = vld [vmem:[#allocation38_spill] sm:$0xff]  ;;  %v6871_v48 = vld [vmem:[#allocation39_spill] sm:$0xff] }
 0x143   : > { %v1835_v5 = vmul.f32 %v6843_v28, %v6858_v18  ;;  %v1836_v21 = vmul.f32 %v6845_v6, %v6859_v29  ;;  %v1837_v7 = vmul.f32 %v6843_v28, %v6860_v0  ;;  %v1838_v12 = vmul.f32 %v6845_v6, %v6861_v55  ;;  %v6867_v29 = vld [vmem:[#allocation35_spill] sm:$0xff] }
 0x144   : > { %v1839_v3 = vmul.f32 %v6843_v28, %v6862_v44  ;;  %v1840_v20 = vmul.f32 %v6845_v6, %v6863_v9  ;;  %v1841_v24 = vmul.f32 %v6843_v28, %v6864_v60  ;;  %v1842_v39 = vmul.f32 %v6845_v6, %v6865_v14 }
 0x145   : > { %v1843_v25 = vmul.f32 %v6843_v28, %v6866_v43  ;;  %v1844_v0 = vmul.f32 %v6845_v6, %v6867_v29  ;;  %v1885_v18 = vrot.slane %v1821_v22, 3  ;;  %v1886_v55 = vrot.slane %v1823_v37, 3  ;;  %v6872_v22 = vld [vmem:[#allocation40_spill] sm:$0xff]  ;;  %v6873_v37 = vld [vmem:[#allocation41_spill] sm:$0xff] }
 0x146   : > { %v1888_v53 = vrot.slane %v1822_v57, 3  ;;  %v1889_v51 = vrot.slane %v1824_v42, 3  ;;  %v1891_v44 = vrot.slane %v1825_v58, 3  ;;  %v1892_v35 = vrot.slane %v1827_v38, 3  ;;  %v6874_v58 = vld [vmem:[#allocation42_spill] sm:$0xff]  ;;  %v6875_v38 = vld [vmem:[#allocation43_spill] sm:$0xff] }
 0x147   : > { %v1894_v16 = vrot.slane %v1826_v59, 3  ;;  %v1895_v9 = vrot.slane %v1828_v41, 3  ;;  %v1845_v60 = vmul.f32 %v6843_v28, %v6868_v34  ;;  %v1846_v14 = vmul.f32 %v6845_v6, %v6869_v19 }
 0x148   : > { %v1847_v43 = vmul.f32 %v6843_v28, %v6870_v32  ;;  %v1848_v29 = vmul.f32 %v6845_v6, %v6871_v48  ;;  %v1849_v57 = vmul.f32 %v6843_v28, %v6872_v22  ;;  %v1850_v42 = vmul.f32 %v6845_v6, %v6873_v37 }
 0x149   : > { %v1851_v59 = vmul.f32 %v6843_v28, %v6874_v58  ;;  %v1852_v41 = vmul.f32 %v6845_v6, %v6875_v38  ;;  %v1887_v19 = vsel %vm647_vm2, %v1885_v18, %v1886_v55  ;;  %v1890_v34 = vsel %vm647_vm2, %v1888_v53, %v1889_v51 }
 0x14a   : > { %v1897_v32 = vrot.slane %v1829_v10, 3  ;;  %v1898_v47 = vrot.slane %v1831_v63, 3  ;;  %v1893_v48 = vsel %vm647_vm2, %v1891_v44, %v1892_v35  ;;  %v1896_v13 = vsel %vm647_vm2, %v1894_v16, %v1895_v9  ;;  %v5063_v9 = vld [vmem:[%s6215_s1 + $0x30] sm:$0x1f] }
 0x14b   : > { %v1900_v22 = vrot.slane %v1830_v17, 3  ;;  %v1901_v4 = vrot.slane %v1832_v30, 3  ;;  %v1903_v45 = vrot.slane %v1833_v46, 3  ;;  %v1904_v37 = vrot.slane %v1835_v5, 3  ;;  %6876 = vst [vmem:[#allocation9_spill] sm:$0xff] %v5063_v9 }
 0x14c   : > { %v1906_v33 = vrot.slane %v1834_v54, 3  ;;  %v1907_v27 = vrot.slane %v1836_v21, 3  ;;  %v1909_v28 = vrot.slane %v1837_v7, 3  ;;  %v1910_v58 = vrot.slane %v1839_v3, 3 }
 0x14d   : > { %v1912_v11 = vrot.slane %v1838_v12, 3  ;;  %v1913_v6 = vrot.slane %v1840_v20, 3  ;;  %v1915_v38 = vrot.slane %v1841_v24, 3  ;;  %v1916_v18 = vrot.slane %v1843_v25, 3  ;;  %v6887_v25 = vld [vmem:[#allocation13_spill] sm:$0xff] }
 0x14e   : > { %v1918_v55 = vrot.slane %v1842_v39, 3  ;;  %v1919_v51 = vrot.slane %v1844_v0, 3  ;;  %v1921_v10 = vrot.slane %v1845_v60, 3  ;;  %v1922_v63 = vrot.slane %v1847_v43, 3 }
 0x14f   : > { %v1924_v53 = vrot.slane %v1846_v14, 3  ;;  %v1925_v35 = vrot.slane %v1848_v29, 3  ;;  %v1899_v16 = vsel %vm647_vm2, %v1897_v32, %v1898_v47  ;;  %v1902_v17 = vsel %vm647_vm2, %v1900_v22, %v1901_v4 }
 0x150   : > { %v1927_v30 = vrot.slane %v1849_v57, 3  ;;  %v1928_v46 = vrot.slane %v1851_v59, 3  ;;  %v1905_v54 = vsel %vm647_vm2, %v1903_v45, %v1904_v37  ;;  %v1908_v5 = vsel %vm647_vm2, %v1906_v33, %v1907_v27  ;;  %v6891_v37 = vld [vmem:[#allocation15_spill] sm:$0xff] }
 0x151   : > { %v1930_v21 = vrot.slane %v1850_v42, 3  ;;  %v1931_v7 = vrot.slane %v1852_v41, 3  ;;  %v1911_v12 = vsel %vm647_vm2, %v1909_v28, %v1910_v58  ;;  %v1914_v0 = vsel %vm647_vm2, %v1912_v11, %v1913_v6  ;;  %v6892_v58 = vld [vmem:[#allocation16_spill] sm:$0xff]  ;;  %v6894_v28 = vld [vmem:[#allocation18_spill] sm:$0xff] }
 0x152   : > { %v1917_v44 = vsel %vm647_vm2, %v1915_v38, %v1916_v18  ;;  %v1920_v29 = vsel %vm647_vm2, %v1918_v55, %v1919_v51  ;;  %v1923_v47 = vsel %vm647_vm2, %v1921_v10, %v1922_v63  ;;  %v1926_v4 = vsel %vm647_vm2, %v1924_v53, %v1925_v35  ;;  %v6893_v38 = vld [vmem:[#allocation17_spill] sm:$0xff]  ;;  %v6895_v18 = vld [vmem:[#allocation19_spill] sm:$0xff]  ;;  %v6896_v51 = vld [vmem:[#allocation20_spill] sm:$0xff] }
 0x153   : > { %v5045_v32 = vadd.f32 %v1887_v19, %v4917_v61  ;;  %v5048_v45 = vadd.f32 %v1890_v34, %v4920_v2  ;;  %v1929_v27 = vsel %vm647_vm2, %v1927_v30, %v1928_v46  ;;  %v5052_v33 = vadd.f32 %v1893_v48, %v4925_v40  ;;  %v5068_v61 = vld [vmem:[%s6215_s1 + $0x38] sm:$0x1f]  ;;  %v6879_v48 = vld [vmem:[#allocation2_spill] sm:$0xff]  ;;  %v6900_v46 = vld [vmem:[#allocation24_spill] sm:$0xff] }
 0x154   : > { %v5055_v11 = vadd.f32 %v1896_v13, %v4928_v31  ;;  %v5058_v3 = vadd.f32 %v1899_v16, %v4931_v62  ;;  %6877 = vst [vmem:[#allocation10_spill] sm:$0xff] %v5068_v61  ;;  %v1932_v2 = vsel %vm647_vm2, %v1930_v21, %v1931_v7  ;;  %v5072_v40 = vadd.f32 %v1902_v17, %v4934_v49  ;;  %v6878_v31 = vld [vmem:[#allocation55_spill] sm:$0xff]  ;;  %v6897_v63 = vld [vmem:[#allocation21_spill] sm:$0xff]  ;;  %v6898_v35 = vld [vmem:[#allocation22_spill] sm:$0xff] }
 0x155   : > { %v1965_v13 = vperm.slane %v6878_v31, 4  ;;  %v1966_v62 = vperm.slane %v6879_v48, 4  ;;  %v5077_v19 = vadd.f32 %v1905_v54, %v4937_v15  ;;  %v5080_v34 = vadd.f32 %v1908_v5, %v4940_v23  ;;  %v6899_v17 = vld [vmem:[#allocation23_spill] sm:$0xff]  ;;  %v6901_v5 = vld [vmem:[#allocation25_spill] sm:$0xff]  ;;  %v6902_v7 = vld [vmem:[#allocation26_spill] sm:$0xff] }
 0x156   : > { %v5083_v20 = vadd.f32 %v1911_v12, %v4943_v50  ;;  %v5086_v60 = vadd.f32 %v1914_v0, %v4946_v52  ;;  %v5089_v24 = vadd.f32 %v1917_v44, %v4949_v36  ;;  %v5092_v49 = vadd.f32 %v1920_v29, %v4952_v26  ;;  %v6882_v50 = vld [vmem:[#allocation8_spill] sm:$0xff]  ;;  %v6903_v0 = vld [vmem:[#allocation27_spill] sm:$0xff] }
 0x157   : > { %v5095_v14 = vadd.f32 %v1923_v47, %v4955_v1  ;;  %v5098_v15 = vadd.f32 %v1926_v4, %v4958_v56  ;;  %v5101_v23 = vadd.f32 %v1929_v27, %v4961_v8  ;;  %v5104_v39 = vadd.f32 %v1932_v2, %v6882_v50  ;;  %v6886_v26 = vld [vmem:[#allocation12_spill] sm:$0xff]  ;;  %v6890_v8 = vld [vmem:[#allocation14_spill] sm:$0xff]  ;;  %v6905_v4 = vld [vmem:[#allocation29_spill] sm:$0xff] }
 0x158   : > { %v5107_v52 = vperm.slane %v5063_v9, 0  ;;  %v5110_v36 = vperm.slane %v5068_v61, 0  ;;  %v1967_v43 = vmul.f32 %v1965_v13, %v6886_v26  ;;  %v1968_v1 = vmul.f32 %v1966_v62, %v6887_v25  ;;  %v6904_v29 = vld [vmem:[#allocation28_spill] sm:$0xff]  ;;  %v6906_v2 = vld [vmem:[#allocation30_spill] sm:$0xff]  ;;  %v6907_v48 = vld [vmem:[#allocation31_spill] sm:$0xff] }
 0x159   : > { %6880 = vst [vmem:[#allocation11_spill] sm:$0xff] %v5098_v15  ;;  %v5115_v22 = vperm.slane %v5063_v9, 1  ;;  %v5118_v56 = vperm.slane %v5068_v61, 1  ;;  %v1969_v57 = vmul.f32 %v1965_v13, %v6890_v8  ;;  %v1970_v42 = vmul.f32 %v1966_v62, %v6891_v37  ;;  %v6908_v26 = vld [vmem:[#allocation32_spill] sm:$0xff]  ;;  %v6909_v8 = vld [vmem:[#allocation33_spill] sm:$0xff] }
 0x15a   : > { %6881 = vst [vmem:[#allocation3_spill] sm:$0xff] %v5101_v23  ;;  %v1971_v59 = vmul.f32 %v1965_v13, %v6892_v58  ;;  %v1972_v41 = vmul.f32 %v1966_v62, %v6893_v38  ;;  %v1973_v6 = vmul.f32 %v1965_v13, %v6894_v28  ;;  %v1974_v55 = vmul.f32 %v1966_v62, %v6895_v18  ;;  %v6910_v18 = vld [vmem:[#allocation34_spill] sm:$0xff]  ;;  %v6911_v28 = vld [vmem:[#allocation35_spill] sm:$0xff] }
 0x15b   : > { %6883 = vst [vmem:[#allocation56_spill] sm:$0xff] %v5104_v39  ;;  %v1975_v10 = vmul.f32 %v1965_v13, %v6896_v51  ;;  %v1976_v53 = vmul.f32 %v1966_v62, %v6897_v63  ;;  %v1977_v16 = vmul.f32 %v1965_v13, %v6898_v35  ;;  %v1978_v30 = vmul.f32 %v1966_v62, %v6899_v17  ;;  %v6916_v63 = vld [vmem:[#allocation40_spill] sm:$0xff]  ;;  %v6917_v51 = vld [vmem:[#allocation41_spill] sm:$0xff] }
 0x15c   : > { %6884 = vst [vmem:[#allocation52_spill] sm:$0xff] %v5107_v52  ;;  %v1979_v54 = vmul.f32 %v1965_v13, %v6900_v46  ;;  %v1980_v21 = vmul.f32 %v1966_v62, %v6901_v5  ;;  %v1981_v12 = vmul.f32 %v1965_v13, %v6902_v7  ;;  %v1982_v44 = vmul.f32 %v1966_v62, %v6903_v0  ;;  %v6914_v5 = vld [vmem:[#allocation38_spill] sm:$0xff]  ;;  %v6915_v46 = vld [vmem:[#allocation39_spill] sm:$0xff] }
 0x15d   : > { %6885 = vst [vmem:[#allocation4_spill] sm:$0xff] %v5110_v36  ;;  %v1983_v47 = vmul.f32 %v1965_v13, %v6904_v29  ;;  %v1984_v27 = vmul.f32 %v1966_v62, %v6905_v4  ;;  %v1985_v31 = vmul.f32 %v1965_v13, %v6906_v2  ;;  %v1986_v50 = vmul.f32 %v1966_v62, %v6907_v48  ;;  %v6913_v29 = vld [vmem:[#allocation37_spill] sm:$0xff] }
 0x15e   : > { %6888 = vst [vmem:[#allocation53_spill] sm:$0xff] %v5115_v22  ;;  %v1987_v25 = vmul.f32 %v1965_v13, %v6908_v26  ;;  %v1988_v37 = vmul.f32 %v1966_v62, %v6909_v8  ;;  %v2031_v61 = vrot.slane %v1967_v43, 4  ;;  %v2032_v9 = vrot.slane %v1969_v57, 4  ;;  %v6918_v43 = vld [vmem:[#allocation42_spill] sm:$0xff] }
 0x15f   : > { %6889 = vst [vmem:[#allocation54_spill] sm:$0xff] %v5118_v56  ;;  %v2034_v17 = vrot.slane %v1968_v1, 4  ;;  %v2035_v35 = vrot.slane %v1970_v42, 4  ;;  %v1989_v7 = vmul.f32 %v1965_v13, %v6910_v18  ;;  %v1990_v0 = vmul.f32 %v1966_v62, %v6911_v28  ;;  %v6912_v56 = vld [vmem:[#allocation36_spill] sm:$0xff]  ;;  %v6919_v1 = vld [vmem:[#allocation43_spill] sm:$0xff] }
 0x160   : > { %v1991_v22 = vmul.f32 %v1965_v13, %v6912_v56  ;;  %v1992_v4 = vmul.f32 %v1966_v62, %v6913_v29  ;;  %v1993_v2 = vmul.f32 %v1965_v13, %v6914_v5  ;;  %v1994_v48 = vmul.f32 %v1966_v62, %v6915_v46 }
 0x161   : > { %v1995_v26 = vmul.f32 %v1965_v13, %v6916_v63  ;;  %v1996_v8 = vmul.f32 %v1966_v62, %v6917_v51  ;;  %v1997_v57 = vmul.f32 %v1965_v13, %v6918_v43  ;;  %v1998_v42 = vmul.f32 %v1966_v62, %v6919_v1 }
 0x162   : > { %v2037_v36 = vrot.slane %v1971_v59, 4  ;;  %v2038_v18 = vrot.slane %v1973_v6, 4  ;;  %v2033_v28 = vsel %vm794_vm3, %v2031_v61, %v2032_v9  ;;  %v2036_v56 = vsel %vm794_vm3, %v2034_v17, %v2035_v35 }
 0x163   : > { %v2040_v38 = vrot.slane %v1972_v41, 4  ;;  %v2041_v29 = vrot.slane %v1974_v55, 4  ;;  %v2043_v52 = vrot.slane %v1975_v10, 4  ;;  %v2044_v5 = vrot.slane %v1977_v16, 4 }
 0x164   : > { %v2046_v58 = vrot.slane %v1976_v53, 4  ;;  %v2047_v46 = vrot.slane %v1978_v30, 4  ;;  %v2049_v39 = vrot.slane %v1979_v54, 4  ;;  %v2050_v63 = vrot.slane %v1981_v12, 4 }
 0x165   : > { %v2052_v23 = vrot.slane %v1980_v21, 4  ;;  %v2053_v51 = vrot.slane %v1982_v44, 4  ;;  %v2055_v15 = vrot.slane %v1983_v47, 4  ;;  %v2056_v13 = vrot.slane %v1985_v31, 4  ;;  %v6923_v31 = vld [vmem:[#allocation16_spill] sm:$0xff] }
 0x166   : > { %v2058_v43 = vrot.slane %v1984_v27, 4  ;;  %v2059_v62 = vrot.slane %v1986_v50, 4  ;;  %v2061_v59 = vrot.slane %v1987_v25, 4  ;;  %v2062_v6 = vrot.slane %v1989_v7, 4  ;;  %v6921_v27 = vld [vmem:[#allocation3_spill] sm:$0xff]  ;;  %v6926_v50 = vld [vmem:[#allocation4_spill] sm:$0xff] }
 0x167   : > { %v2064_v1 = vrot.slane %v1988_v37, 4  ;;  %v2065_v9 = vrot.slane %v1990_v0, 4  ;;  %v2067_v61 = vrot.slane %v1991_v22, 4  ;;  %v2068_v35 = vrot.slane %v1993_v2, 4  ;;  %v6922_v2 = vld [vmem:[#allocation56_spill] sm:$0xff] }
 0x168   : > { %v2070_v41 = vrot.slane %v1992_v4, 4  ;;  %v2071_v55 = vrot.slane %v1994_v48, 4  ;;  %v2039_v10 = vsel %vm794_vm3, %v2037_v36, %v2038_v18  ;;  %v2042_v53 = vsel %vm794_vm3, %v2040_v38, %v2041_v29  ;;  %v6929_v25 = vld [vmem:[#allocation24_spill] sm:$0xff] }
 0x169   : > { %v2073_v16 = vrot.slane %v1995_v26, 4  ;;  %v2074_v17 = vrot.slane %v1997_v57, 4  ;;  %v2045_v30 = vsel %vm794_vm3, %v2043_v52, %v2044_v5  ;;  %v2048_v54 = vsel %vm794_vm3, %v2046_v58, %v2047_v46  ;;  %v6927_v26 = vld [vmem:[#allocation20_spill] sm:$0xff] }
 0x16a   : > { %v2076_v21 = vrot.slane %v1996_v8, 4  ;;  %v2077_v12 = vrot.slane %v1998_v42, 4  ;;  %v2051_v7 = vsel %vm794_vm3, %v2049_v39, %v2050_v63  ;;  %v2054_v0 = vsel %vm794_vm3, %v2052_v23, %v2053_v51  ;;  %v6930_v8 = vld [vmem:[#allocation25_spill] sm:$0xff] }
 0x16b   : > { %v2057_v22 = vsel %vm794_vm3, %v2055_v15, %v2056_v13  ;;  %v2060_v44 = vsel %vm794_vm3, %v2058_v43, %v2059_v62  ;;  %v2063_v36 = vsel %vm794_vm3, %v2061_v59, %v2062_v6  ;;  %v2066_v38 = vsel %vm794_vm3, %v2064_v1, %v2065_v9  ;;  %v6931_v43 = vld [vmem:[#allocation28_spill] sm:$0xff]  ;;  %v6932_v1 = vld [vmem:[#allocation29_spill] sm:$0xff] }
 0x16c   : > { %v2069_v18 = vsel %vm794_vm3, %v2067_v61, %v2068_v35  ;;  %v2072_v52 = vsel %vm794_vm3, %v2070_v41, %v2071_v55  ;;  %v2075_v58 = vsel %vm794_vm3, %v2073_v16, %v2074_v17  ;;  %v2095_v46 = vadd.f32 %v2033_v28, %v5045_v32  ;;  %v6920_v28 = vld [vmem:[#allocation11_spill] sm:$0xff]  ;;  %v6933_v13 = vld [vmem:[#allocation32_spill] sm:$0xff]  ;;  %v6934_v59 = vld [vmem:[#allocation33_spill] sm:$0xff] }
 0x16d   : > { %v2096_v39 = vadd.f32 %v2036_v56, %v5048_v45  ;;  %v2097_v23 = vadd.f32 %v2039_v10, %v5052_v33  ;;  %v2078_v15 = vsel %vm794_vm3, %v2076_v21, %v2077_v12  ;;  %v2098_v51 = vadd.f32 %v2042_v53, %v5055_v11  ;;  %v6935_v9 = vld [vmem:[#allocation36_spill] sm:$0xff]  ;;  %v6936_v35 = vld [vmem:[#allocation37_spill] sm:$0xff] }
 0x16e   : > { %v2099_v63 = vadd.f32 %v2045_v30, %v5058_v3  ;;  %v2100_v5 = vadd.f32 %v2048_v54, %v5072_v40  ;;  %v2101_v29 = vadd.f32 %v2051_v7, %v5077_v19  ;;  %v2102_v47 = vadd.f32 %v2054_v0, %v5080_v34  ;;  %v6924_v19 = vld [vmem:[#allocation52_spill] sm:$0xff]  ;;  %v6925_v34 = vld [vmem:[#allocation17_spill] sm:$0xff] }
 0x16f   : > { %v2103_v4 = vadd.f32 %v2057_v22, %v5083_v20  ;;  %v2104_v32 = vadd.f32 %v2060_v44, %v5086_v60  ;;  %v2105_v45 = vadd.f32 %v2063_v36, %v5089_v24  ;;  %v2106_v33 = vadd.f32 %v2066_v38, %v5092_v49  ;;  %v6928_v24 = vld [vmem:[#allocation21_spill] sm:$0xff]  ;;  %v6937_v55 = vld [vmem:[#allocation40_spill] sm:$0xff] }
 0x170   : > { %v2107_v56 = vadd.f32 %v2069_v18, %v5095_v14  ;;  %v2108_v11 = vadd.f32 %v2072_v52, %v6920_v28  ;;  %v2109_v3 = vadd.f32 %v2075_v58, %v6921_v27  ;;  %v2110_v40 = vadd.f32 %v2078_v15, %v6922_v2  ;;  %v6938_v53 = vld [vmem:[#allocation41_spill] sm:$0xff]  ;;  %v6939_v17 = vld [vmem:[#allocation44_spill] sm:$0xff]  ;;  %v6947_v28 = vld [vmem:[#allocation19_spill] sm:$0xff] }
 0x171   : > { %v2113_v48 = vmul.f32 %v6924_v19, %v6923_v31  ;;  %v2114_v20 = vmul.f32 %v6926_v50, %v6925_v34  ;;  %v2115_v60 = vmul.f32 %v6924_v19, %v6927_v26  ;;  %v2116_v49 = vmul.f32 %v6926_v50, %v6928_v24  ;;  %v6940_v54 = vld [vmem:[#allocation45_spill] sm:$0xff]  ;;  %v6948_v27 = vld [vmem:[#allocation22_spill] sm:$0xff]  ;;  %v6949_v2 = vld [vmem:[#allocation23_spill] sm:$0xff] }
 0x172   : > { %v2117_v14 = vmul.f32 %v6924_v19, %v6929_v25  ;;  %v2118_v37 = vmul.f32 %v6926_v50, %v6930_v8  ;;  %v2119_v57 = vmul.f32 %v6924_v19, %v6931_v43  ;;  %v2120_v42 = vmul.f32 %v6926_v50, %v6932_v1 }
 0x173   : > { %v2121_v62 = vmul.f32 %v6924_v19, %v6933_v13  ;;  %v2122_v6 = vmul.f32 %v6926_v50, %v6934_v59  ;;  %v2123_v61 = vmul.f32 %v6924_v19, %v6935_v9  ;;  %v2124_v41 = vmul.f32 %v6926_v50, %v6936_v35 }
 0x174   : > { %v2125_v10 = vmul.f32 %v6924_v19, %v6937_v55  ;;  %v2126_v16 = vmul.f32 %v6926_v50, %v6938_v53  ;;  %v2127_v30 = vmul.f32 %v6924_v19, %v6939_v17  ;;  %v2128_v21 = vmul.f32 %v6926_v50, %v6940_v54  ;;  %v6950_v50 = vld [vmem:[#allocation26_spill] sm:$0xff] }
 0x175   : > { %v5214_v12 = vadd.f32 %v2113_v48, %v2095_v46  ;;  %v5216_v7 = vadd.f32 %v2114_v20, %v2096_v39  ;;  %v5218_v0 = vadd.f32 %v2115_v60, %v2097_v23  ;;  %v5220_v22 = vadd.f32 %v2116_v49, %v2098_v51  ;;  %v6951_v60 = vld [vmem:[#allocation27_spill] sm:$0xff] }
 0x176   : > { %v5222_v44 = vadd.f32 %v2117_v14, %v2099_v63  ;;  %v5224_v36 = vadd.f32 %v2118_v37, %v2100_v5  ;;  %v5226_v38 = vadd.f32 %v2119_v57, %v2101_v29  ;;  %v5228_v18 = vadd.f32 %v2120_v42, %v2102_v47  ;;  %v6944_v5 = vld [vmem:[#allocation53_spill] sm:$0xff]  ;;  %v6945_v47 = vld [vmem:[#allocation54_spill] sm:$0xff] }
 0x177   : > { %v5230_v52 = vadd.f32 %v2121_v62, %v2103_v4  ;;  %v5232_v58 = vadd.f32 %v2122_v6, %v2104_v32  ;;  %v5234_v46 = vadd.f32 %v2123_v61, %v2105_v45  ;;  %v5236_v39 = vadd.f32 %v2124_v41, %v2106_v33  ;;  %v6946_v32 = vld [vmem:[#allocation18_spill] sm:$0xff]  ;;  %v6953_v62 = vld [vmem:[#allocation31_spill] sm:$0xff] }
 0x178   : > { %v5238_v23 = vadd.f32 %v2125_v10, %v2107_v56  ;;  %v5240_v15 = vadd.f32 %v2126_v16, %v2108_v11  ;;  %v5242_v51 = vadd.f32 %v2127_v30, %v2109_v3  ;;  %v5244_v63 = vadd.f32 %v2128_v21, %v2110_v40  ;;  %v6952_v57 = vld [vmem:[#allocation30_spill] sm:$0xff]  ;;  %v6955_v30 = vld [vmem:[#allocation35_spill] sm:$0xff] }
 0x179   : > { %v2147_v29 = vmul.f32 %v6944_v5, %v6923_v31  ;;  %v2148_v4 = vmul.f32 %v6945_v47, %v6925_v34  ;;  %v2149_v45 = vmul.f32 %v6944_v5, %v6946_v32  ;;  %v2150_v33 = vmul.f32 %v6945_v47, %v6947_v28  ;;  %v6954_v10 = vld [vmem:[#allocation34_spill] sm:$0xff] }
 0x17a   : > { %6941 = vst [vmem:[#allocation5_spill] sm:$0xff] %v5240_v15  ;;  %v2151_v56 = vmul.f32 %v6944_v5, %v6927_v26  ;;  %v2152_v11 = vmul.f32 %v6945_v47, %v6928_v24  ;;  %v2153_v3 = vmul.f32 %v6944_v5, %v6948_v27  ;;  %v2154_v40 = vmul.f32 %v6945_v47, %v6949_v2 }
 0x17b   : > { %6942 = vst [vmem:[#allocation6_spill] sm:$0xff] %v5242_v51  ;;  %v2155_v19 = vmul.f32 %v6944_v5, %v6929_v25  ;;  %v2156_v48 = vmul.f32 %v6945_v47, %v6930_v8  ;;  %v2157_v20 = vmul.f32 %v6944_v5, %v6950_v50  ;;  %v2158_v49 = vmul.f32 %v6945_v47, %v6951_v60 }
 0x17c   : > { %6943 = vst [vmem:[#allocation7_spill] sm:$0xff] %v5244_v63  ;;  %v2159_v14 = vmul.f32 %v6944_v5, %v6931_v43  ;;  %v2160_v37 = vmul.f32 %v6945_v47, %v6932_v1  ;;  %v2161_v42 = vmul.f32 %v6944_v5, %v6952_v57  ;;  %v2162_v6 = vmul.f32 %v6945_v47, %v6953_v62 }
 0x17d   : > { %v2163_v61 = vmul.f32 %v6944_v5, %v6933_v13  ;;  %v2164_v41 = vmul.f32 %v6945_v47, %v6934_v59  ;;  %v2165_v16 = vmul.f32 %v6944_v5, %v6954_v10  ;;  %v2166_v21 = vmul.f32 %v6945_v47, %v6955_v30  ;;  %v6956_v13 = vld [vmem:[#allocation38_spill] sm:$0xff]  ;;  %v6957_v59 = vld [vmem:[#allocation39_spill] sm:$0xff] }
 0x17e   : > { %v2167_v1 = vmul.f32 %v6944_v5, %v6935_v9  ;;  %v2168_v57 = vmul.f32 %v6945_v47, %v6936_v35  ;;  %v2211_v43 = vrot.slane %v2147_v29, 1  ;;  %v2212_v62 = vrot.slane %v2149_v45, 1  ;;  %v6958_v9 = vld [vmem:[#allocation42_spill] sm:$0xff]  ;;  %v6959_v35 = vld [vmem:[#allocation43_spill] sm:$0xff] }
 0x17f   : > { %v2214_v60 = vrot.slane %v2148_v4, 1  ;;  %v2215_v50 = vrot.slane %v2150_v33, 1  ;;  %v2169_v8 = vmul.f32 %v6944_v5, %v6956_v13  ;;  %v2170_v25 = vmul.f32 %v6945_v47, %v6957_v59  ;;  %v6960_v33 = vld [vmem:[#allocation46_spill] sm:$0xff]  ;;  %v6961_v13 = vld [vmem:[#allocation47_spill] sm:$0xff] }
 0x180   : > { %v2171_v10 = vmul.f32 %v6944_v5, %v6937_v55  ;;  %v2172_v30 = vmul.f32 %v6945_v47, %v6938_v53  ;;  %v2173_v2 = vmul.f32 %v6944_v5, %v6958_v9  ;;  %v2174_v29 = vmul.f32 %v6945_v47, %v6959_v35 }
 0x181   : > { %v2175_v4 = vmul.f32 %v6944_v5, %v6939_v17  ;;  %v2176_v45 = vmul.f32 %v6945_v47, %v6940_v54  ;;  %v2177_v59 = vmul.f32 %v6944_v5, %v6960_v33  ;;  %v2178_v55 = vmul.f32 %v6945_v47, %v6961_v13 }
 0x182   : > { %v2217_v27 = vrot.slane %v2151_v56, 1  ;;  %v2218_v53 = vrot.slane %v2153_v3, 1  ;;  %v2213_v24 = vsel %vm353_vm0, %v2211_v43, %v2212_v62  ;;  %v2216_v9 = vsel %vm353_vm0, %v2214_v60, %v2215_v50 }
 0x183   : > { %v2220_v26 = vrot.slane %v2152_v11, 1  ;;  %v2221_v35 = vrot.slane %v2154_v40, 1  ;;  %v2223_v28 = vrot.slane %v2155_v19, 1  ;;  %v2224_v32 = vrot.slane %v2157_v20, 1 }
 0x184   : > { %v2226_v17 = vrot.slane %v2156_v48, 1  ;;  %v2227_v34 = vrot.slane %v2158_v49, 1  ;;  %v2229_v31 = vrot.slane %v2159_v14, 1  ;;  %v2230_v54 = vrot.slane %v2161_v42, 1 }
 0x185   : > { %v2232_v63 = vrot.slane %v2160_v37, 1  ;;  %v2233_v51 = vrot.slane %v2162_v6, 1  ;;  %v2235_v5 = vrot.slane %v2163_v61, 1  ;;  %v2236_v33 = vrot.slane %v2165_v16, 1 }
 0x186   : > { %v2238_v15 = vrot.slane %v2164_v41, 1  ;;  %v2239_v47 = vrot.slane %v2166_v21, 1  ;;  %v2241_v56 = vrot.slane %v2167_v1, 1  ;;  %v2242_v3 = vrot.slane %v2169_v8, 1  ;;  %v6971_v41 = vld [vmem:[#allocation17_spill] sm:$0xff] }
 0x187   : > { %v2244_v13 = vrot.slane %v2168_v57, 1  ;;  %v2245_v43 = vrot.slane %v2170_v25, 1  ;;  %v2247_v62 = vrot.slane %v2171_v10, 1  ;;  %v2248_v50 = vrot.slane %v2173_v2, 1 }
 0x188   : > { %v2250_v11 = vrot.slane %v2172_v30, 1  ;;  %v2251_v40 = vrot.slane %v2174_v29, 1  ;;  %v2219_v19 = vsel %vm353_vm0, %v2217_v27, %v2218_v53  ;;  %v2222_v48 = vsel %vm353_vm0, %v2220_v26, %v2221_v35  ;;  %v6975_v30 = vld [vmem:[#allocation19_spill] sm:$0xff]  ;;  %v6976_v29 = vld [vmem:[#allocation20_spill] sm:$0xff] }
 0x189   : > { %v2253_v20 = vrot.slane %v2175_v4, 1  ;;  %v2254_v60 = vrot.slane %v2177_v59, 1  ;;  %v2225_v49 = vsel %vm353_vm0, %v2223_v28, %v2224_v32  ;;  %v2228_v14 = vsel %vm353_vm0, %v2226_v17, %v2227_v34 }
 0x18a   : > { %v2256_v37 = vrot.slane %v2176_v45, 1  ;;  %v2257_v42 = vrot.slane %v2178_v55, 1  ;;  %v2231_v8 = vsel %vm353_vm0, %v2229_v31, %v2230_v54  ;;  %v2234_v25 = vsel %vm353_vm0, %v2232_v63, %v2233_v51  ;;  %v6963_v63 = vld [vmem:[#allocation10_spill] sm:$0xff]  ;;  %v6977_v45 = vld [vmem:[#allocation21_spill] sm:$0xff] }
 0x18b   : > { %v2237_v1 = vsel %vm353_vm0, %v2235_v5, %v2236_v33  ;;  %v2240_v2 = vsel %vm353_vm0, %v2238_v15, %v2239_v47  ;;  %v2243_v53 = vsel %vm353_vm0, %v2241_v56, %v2242_v3  ;;  %v2246_v26 = vsel %vm353_vm0, %v2244_v13, %v2245_v43  ;;  %v6962_v13 = vld [vmem:[#allocation9_spill] sm:$0xff]  ;;  %v6978_v5 = vld [vmem:[#allocation22_spill] sm:$0xff]  ;;  %v6979_v56 = vld [vmem:[#allocation23_spill] sm:$0xff] }
 0x18c   : > { %v2249_v59 = vsel %vm353_vm0, %v2247_v62, %v2248_v50  ;;  %v2252_v35 = vsel %vm353_vm0, %v2250_v11, %v2251_v40  ;;  %v2255_v34 = vsel %vm353_vm0, %v2253_v20, %v2254_v60  ;;  %v5326_v55 = vadd.f32 %v2213_v24, %v5214_v12  ;;  %v6980_v43 = vld [vmem:[#allocation24_spill] sm:$0xff]  ;;  %v6981_v50 = vld [vmem:[#allocation25_spill] sm:$0xff]  ;;  %v6982_v40 = vld [vmem:[#allocation26_spill] sm:$0xff] }
 0x18d   : > { %v5329_v31 = vadd.f32 %v2216_v9, %v5216_v7  ;;  %v5332_v17 = vadd.f32 %v2219_v19, %v5218_v0  ;;  %v2258_v54 = vsel %vm353_vm0, %v2256_v37, %v2257_v42  ;;  %v5336_v15 = vadd.f32 %v2222_v48, %v5220_v22  ;;  %v6983_v48 = vld [vmem:[#allocation27_spill] sm:$0xff]  ;;  %v6984_v60 = vld [vmem:[#allocation28_spill] sm:$0xff]  ;;  %v6986_v42 = vld [vmem:[#allocation30_spill] sm:$0xff] }
 0x18e   : > { %v2291_v51 = vperm.slane %v6962_v13, 2  ;;  %v2292_v32 = vperm.slane %v6963_v63, 2  ;;  %v5341_v28 = vadd.f32 %v2225_v49, %v5222_v44  ;;  %v5344_v24 = vadd.f32 %v2228_v14, %v5224_v36  ;;  %v6985_v14 = vld [vmem:[#allocation29_spill] sm:$0xff] }
 0x18f   : > { %v5347_v9 = vadd.f32 %v2231_v8, %v5226_v38  ;;  %v5350_v12 = vadd.f32 %v2234_v25, %v5228_v18  ;;  %v5353_v7 = vadd.f32 %v2237_v1, %v5230_v52  ;;  %v5356_v0 = vadd.f32 %v2240_v2, %v5232_v58  ;;  %v6964_v38 = vld [vmem:[#allocation5_spill] sm:$0xff]  ;;  %v6966_v18 = vld [vmem:[#allocation6_spill] sm:$0xff]  ;;  %v6968_v52 = vld [vmem:[#allocation7_spill] sm:$0xff] }
 0x190   : > { %v5359_v22 = vadd.f32 %v2243_v53, %v5234_v46  ;;  %v5362_v44 = vadd.f32 %v2246_v26, %v5236_v39  ;;  %v5365_v36 = vadd.f32 %v2249_v59, %v5238_v23  ;;  %v5368_v27 = vadd.f32 %v2252_v35, %v6964_v38  ;;  %v6970_v58 = vld [vmem:[#allocation16_spill] sm:$0xff]  ;;  %v6974_v23 = vld [vmem:[#allocation18_spill] sm:$0xff]  ;;  %v6987_v25 = vld [vmem:[#allocation31_spill] sm:$0xff] }
 0x191   : > { %v5371_v57 = vadd.f32 %v2255_v34, %v6966_v18  ;;  %v5374_v6 = vadd.f32 %v2258_v54, %v6968_v52  ;;  %v2293_v61 = vmul.f32 %v2291_v51, %v6970_v58  ;;  %v2294_v46 = vmul.f32 %v2292_v32, %v6971_v41  ;;  %v6988_v2 = vld [vmem:[#allocation32_spill] sm:$0xff]  ;;  %v6989_v26 = vld [vmem:[#allocation33_spill] sm:$0xff]  ;;  %v6990_v35 = vld [vmem:[#allocation34_spill] sm:$0xff] }
 0x192   : > { %6965 = vst [vmem:[#allocation55_spill] sm:$0xff] %v5368_v27  ;;  %v5379_v10 = vperm.slane %v6962_v13, 3  ;;  %v5382_v39 = vperm.slane %v6963_v63, 3  ;;  %v2295_v16 = vmul.f32 %v2291_v51, %v6974_v23  ;;  %v2296_v21 = vmul.f32 %v2292_v32, %v6975_v30  ;;  %v6991_v54 = vld [vmem:[#allocation35_spill] sm:$0xff]  ;;  %v6992_v18 = vld [vmem:[#allocation36_spill] sm:$0xff]  ;;  %v6993_v63 = vld [vmem:[#allocation37_spill] sm:$0xff] }
 0x193   : > { %6967 = vst [vmem:[#allocation2_spill] sm:$0xff] %v5371_v57  ;;  %v2297_v4 = vmul.f32 %v2291_v51, %v6976_v29  ;;  %v2298_v33 = vmul.f32 %v2292_v32, %v6977_v45  ;;  %v2299_v47 = vmul.f32 %v2291_v51, %v6978_v5  ;;  %v2300_v3 = vmul.f32 %v2292_v32, %v6979_v56  ;;  %v6996_v56 = vld [vmem:[#allocation40_spill] sm:$0xff]  ;;  %v6997_v5 = vld [vmem:[#allocation41_spill] sm:$0xff]  ;;  %v6998_v45 = vld [vmem:[#allocation42_spill] sm:$0xff] }
 0x194   : > { %6969 = vst [vmem:[#allocation8_spill] sm:$0xff] %v5374_v6  ;;  %v2301_v62 = vmul.f32 %v2291_v51, %v6980_v43  ;;  %v2302_v11 = vmul.f32 %v2292_v32, %v6981_v50  ;;  %v2303_v19 = vmul.f32 %v2291_v51, %v6982_v40  ;;  %v2304_v20 = vmul.f32 %v2292_v32, %v6983_v48  ;;  %v6994_v50 = vld [vmem:[#allocation38_spill] sm:$0xff]  ;;  %v6995_v43 = vld [vmem:[#allocation39_spill] sm:$0xff]  ;;  %v7000_v30 = vld [vmem:[#allocation44_spill] sm:$0xff] }
 0x195   : > { %6972 = vst [vmem:[#allocation12_spill] sm:$0xff] %v5379_v10  ;;  %v2305_v49 = vmul.f32 %v2291_v51, %v6984_v60  ;;  %v2306_v37 = vmul.f32 %v2292_v32, %v6985_v14  ;;  %v2307_v8 = vmul.f32 %v2291_v51, %v6986_v42  ;;  %v2308_v1 = vmul.f32 %v2292_v32, %v6987_v25  ;;  %v6999_v29 = vld [vmem:[#allocation43_spill] sm:$0xff]  ;;  %v7001_v23 = vld [vmem:[#allocation45_spill] sm:$0xff] }
 0x196   : > { %6973 = vst [vmem:[#allocation13_spill] sm:$0xff] %v5382_v39  ;;  %v2309_v53 = vmul.f32 %v2291_v51, %v6988_v2  ;;  %v2310_v59 = vmul.f32 %v2292_v32, %v6989_v26  ;;  %v2311_v34 = vmul.f32 %v2291_v51, %v6990_v35  ;;  %v2312_v38 = vmul.f32 %v2292_v32, %v6991_v54 }
 0x197   : > { %v2313_v52 = vmul.f32 %v2291_v51, %v6992_v18  ;;  %v2314_v13 = vmul.f32 %v2292_v32, %v6993_v63  ;;  %v2357_v48 = vrot.slane %v2293_v61, 2  ;;  %v2358_v60 = vrot.slane %v2295_v16, 2  ;;  %v7002_v61 = vld [vmem:[#allocation46_spill] sm:$0xff] }
 0x198   : > { %v2360_v40 = vrot.slane %v2294_v46, 2  ;;  %v2361_v14 = vrot.slane %v2296_v21, 2  ;;  %v2315_v42 = vmul.f32 %v2291_v51, %v6994_v50  ;;  %v2316_v25 = vmul.f32 %v2292_v32, %v6995_v43  ;;  %v7003_v46 = vld [vmem:[#allocation47_spill] sm:$0xff] }
 0x199   : > { %v2317_v2 = vmul.f32 %v2291_v51, %v6996_v56  ;;  %v2318_v26 = vmul.f32 %v2292_v32, %v6997_v5  ;;  %v2319_v35 = vmul.f32 %v2291_v51, %v6998_v45  ;;  %v2320_v54 = vmul.f32 %v2292_v32, %v6999_v29 }
 0x19a   : > { %v2321_v18 = vmul.f32 %v2291_v51, %v7000_v30  ;;  %v2322_v63 = vmul.f32 %v2292_v32, %v7001_v23  ;;  %v2323_v16 = vmul.f32 %v2291_v51, %v7002_v61  ;;  %v2324_v21 = vmul.f32 %v2292_v32, %v7003_v46 }
 0x19b   : > { %v2363_v39 = vrot.slane %v2297_v4, 2  ;;  %v2364_v50 = vrot.slane %v2299_v47, 2  ;;  %v2359_v43 = vsel %vm500_vm1, %v2357_v48, %v2358_v60  ;;  %v2362_v56 = vsel %vm500_vm1, %v2360_v40, %v2361_v14 }
 0x19c   : > { %v2366_v41 = vrot.slane %v2298_v33, 2  ;;  %v2367_v5 = vrot.slane %v2300_v3, 2  ;;  %v2369_v10 = vrot.slane %v2301_v62, 2  ;;  %v2370_v45 = vrot.slane %v2303_v19, 2 }
 0x19d   : > { %v2372_v58 = vrot.slane %v2302_v11, 2  ;;  %v2373_v29 = vrot.slane %v2304_v20, 2  ;;  %v2375_v6 = vrot.slane %v2305_v49, 2  ;;  %v2376_v30 = vrot.slane %v2307_v8, 2 }
 0x19e   : > { %v2378_v57 = vrot.slane %v2306_v37, 2  ;;  %v2379_v23 = vrot.slane %v2308_v1, 2  ;;  %v2381_v27 = vrot.slane %v2309_v53, 2  ;;  %v2382_v51 = vrot.slane %v2311_v34, 2 }
 0x19f   : > { %v2384_v61 = vrot.slane %v2310_v59, 2  ;;  %v2385_v32 = vrot.slane %v2312_v38, 2  ;;  %v2387_v4 = vrot.slane %v2313_v52, 2  ;;  %v2388_v47 = vrot.slane %v2315_v42, 2 }
 0x1a0   : > { %v2390_v46 = vrot.slane %v2314_v13, 2  ;;  %v2391_v48 = vrot.slane %v2316_v25, 2  ;;  %v2393_v60 = vrot.slane %v2317_v2, 2  ;;  %v2394_v40 = vrot.slane %v2319_v35, 2  ;;  %v7011_v2 = vld [vmem:[#allocation12_spill] sm:$0xff] }
 0x1a1   : > { %v2396_v33 = vrot.slane %v2318_v26, 2  ;;  %v2397_v3 = vrot.slane %v2320_v54, 2  ;;  %v2365_v62 = vsel %vm500_vm1, %v2363_v39, %v2364_v50  ;;  %v2368_v11 = vsel %vm500_vm1, %v2366_v41, %v2367_v5  ;;  %v7013_v26 = vld [vmem:[#allocation13_spill] sm:$0xff]  ;;  %v7016_v54 = vld [vmem:[#allocation20_spill] sm:$0xff] }
 0x1a2   : > { %v2399_v19 = vrot.slane %v2321_v18, 2  ;;  %v2400_v20 = vrot.slane %v2323_v16, 2  ;;  %v2371_v49 = vsel %vm500_vm1, %v2369_v10, %v2370_v45  ;;  %v2374_v14 = vsel %vm500_vm1, %v2372_v58, %v2373_v29  ;;  %v7017_v18 = vld [vmem:[#allocation21_spill] sm:$0xff] }
 0x1a3   : > { %v2402_v37 = vrot.slane %v2322_v63, 2  ;;  %v2403_v8 = vrot.slane %v2324_v21, 2  ;;  %v2377_v42 = vsel %vm500_vm1, %v2375_v6, %v2376_v30  ;;  %v2380_v13 = vsel %vm500_vm1, %v2378_v57, %v2379_v23 }
 0x1a4   : > { %v2383_v25 = vsel %vm500_vm1, %v2381_v27, %v2382_v51  ;;  %v2386_v1 = vsel %vm500_vm1, %v2384_v61, %v2385_v32  ;;  %v2389_v39 = vsel %vm500_vm1, %v2387_v4, %v2388_v47  ;;  %v2392_v41 = vsel %vm500_vm1, %v2390_v46, %v2391_v48  ;;  %v7018_v61 = vld [vmem:[#allocation22_spill] sm:$0xff]  ;;  %v7019_v46 = vld [vmem:[#allocation23_spill] sm:$0xff]  ;;  %v7020_v51 = vld [vmem:[#allocation24_spill] sm:$0xff] }
 0x1a5   : > { %v2395_v5 = vsel %vm500_vm1, %v2393_v60, %v2394_v40  ;;  %v2398_v10 = vsel %vm500_vm1, %v2396_v33, %v2397_v3  ;;  %v2401_v58 = vsel %vm500_vm1, %v2399_v19, %v2400_v20  ;;  %v5430_v63 = vadd.f32 %v2359_v43, %v5326_v55  ;;  %v7021_v4 = vld [vmem:[#allocation25_spill] sm:$0xff]  ;;  %v7022_v48 = vld [vmem:[#allocation26_spill] sm:$0xff]  ;;  %v7023_v40 = vld [vmem:[#allocation27_spill] sm:$0xff] }
 0x1a6   : > { %v5433_v6 = vadd.f32 %v2362_v56, %v5329_v31  ;;  %v5436_v27 = vadd.f32 %v2365_v62, %v5332_v17  ;;  %v2404_v57 = vsel %vm500_vm1, %v2402_v37, %v2403_v8  ;;  %v5440_v23 = vadd.f32 %v2368_v11, %v5336_v15  ;;  %v7024_v3 = vld [vmem:[#allocation28_spill] sm:$0xff]  ;;  %v7025_v11 = vld [vmem:[#allocation29_spill] sm:$0xff]  ;;  %v7026_v20 = vld [vmem:[#allocation30_spill] sm:$0xff] }
 0x1a7   : > { %v5443_v30 = vadd.f32 %v2371_v49, %v5341_v28  ;;  %v5446_v29 = vadd.f32 %v2374_v14, %v5344_v24  ;;  %v5449_v55 = vadd.f32 %v2377_v42, %v5347_v9  ;;  %v5452_v31 = vadd.f32 %v2380_v13, %v5350_v12  ;;  %v7004_v9 = vld [vmem:[#allocation55_spill] sm:$0xff]  ;;  %v7006_v12 = vld [vmem:[#allocation2_spill] sm:$0xff]  ;;  %v7028_v8 = vld [vmem:[#allocation32_spill] sm:$0xff] }
 0x1a8   : > { %v5455_v17 = vadd.f32 %v2383_v25, %v5353_v7  ;;  %v5458_v45 = vadd.f32 %v2386_v1, %v5356_v0  ;;  %v5461_v15 = vadd.f32 %v2389_v39, %v5359_v22  ;;  %v5464_v28 = vadd.f32 %v2392_v41, %v5362_v44  ;;  %v7008_v7 = vld [vmem:[#allocation8_spill] sm:$0xff]  ;;  %v7012_v22 = vld [vmem:[#allocation17_spill] sm:$0xff]  ;;  %v7014_v44 = vld [vmem:[#allocation18_spill] sm:$0xff] }
 0x1a9   : > { %v5467_v24 = vadd.f32 %v2395_v5, %v5365_v36  ;;  %v5470_v56 = vadd.f32 %v2398_v10, %v7004_v9  ;;  %v5473_v43 = vadd.f32 %v2401_v58, %v7006_v12  ;;  %v5476_v50 = vadd.f32 %v2404_v57, %v7008_v7  ;;  %v7010_v0 = vld [vmem:[#allocation16_spill] sm:$0xff]  ;;  %v7015_v36 = vld [vmem:[#allocation19_spill] sm:$0xff]  ;;  %v7029_v13 = vld [vmem:[#allocation33_spill] sm:$0xff] }
 0x1aa   : > { %v2439_v53 = vmul.f32 %v7011_v2, %v7010_v0  ;;  %v2440_v59 = vmul.f32 %v7013_v26, %v7012_v22  ;;  %v2441_v35 = vmul.f32 %v7011_v2, %v7014_v44  ;;  %v2442_v34 = vmul.f32 %v7013_v26, %v7015_v36  ;;  %v7027_v14 = vld [vmem:[#allocation31_spill] sm:$0xff]  ;;  %v7030_v1 = vld [vmem:[#allocation34_spill] sm:$0xff]  ;;  %v7032_v10 = vld [vmem:[#allocation36_spill] sm:$0xff] }
 0x1ab   : > { %7005 = vst [vmem:[#allocation14_spill] sm:$0xff] %v5470_v56  ;;  %v2443_v38 = vmul.f32 %v7011_v2, %v7016_v54  ;;  %v2444_v52 = vmul.f32 %v7013_v26, %v7017_v18  ;;  %v2445_v16 = vmul.f32 %v7011_v2, %v7018_v61  ;;  %v2446_v21 = vmul.f32 %v7013_v26, %v7019_v46  ;;  %v7031_v41 = vld [vmem:[#allocation35_spill] sm:$0xff]  ;;  %v7033_v57 = vld [vmem:[#allocation37_spill] sm:$0xff] }
 0x1ac   : > { %7007 = vst [vmem:[#allocation15_spill] sm:$0xff] %v5473_v43  ;;  %v2447_v32 = vmul.f32 %v7011_v2, %v7020_v51  ;;  %v2448_v47 = vmul.f32 %v7013_v26, %v7021_v4  ;;  %v2449_v60 = vmul.f32 %v7011_v2, %v7022_v48  ;;  %v2450_v33 = vmul.f32 %v7013_v26, %v7023_v40  ;;  %v7042_v51 = vld [vmem:[#allocation46_spill] sm:$0xff]  ;;  %v7043_v46 = vld [vmem:[#allocation47_spill] sm:$0xff] }
 0x1ad   : > { %7009 = vst [vmem:[#allocation11_spill] sm:$0xff] %v5476_v50  ;;  %v2451_v62 = vmul.f32 %v7011_v2, %v7024_v3  ;;  %v2452_v19 = vmul.f32 %v7013_v26, %v7025_v11  ;;  %v2453_v49 = vmul.f32 %v7011_v2, %v7026_v20  ;;  %v2454_v37 = vmul.f32 %v7013_v26, %v7027_v14 }
 0x1ae   : > { %v2455_v42 = vmul.f32 %v7011_v2, %v7028_v8  ;;  %v2456_v25 = vmul.f32 %v7013_v26, %v7029_v13  ;;  %v2457_v39 = vmul.f32 %v7011_v2, %v7030_v1  ;;  %v2458_v5 = vmul.f32 %v7013_v26, %v7031_v41  ;;  %v7034_v8 = vld [vmem:[#allocation38_spill] sm:$0xff]  ;;  %v7035_v13 = vld [vmem:[#allocation39_spill] sm:$0xff]  ;;  %v7036_v1 = vld [vmem:[#allocation40_spill] sm:$0xff] }
 0x1af   : > { %v2459_v58 = vmul.f32 %v7011_v2, %v7032_v10  ;;  %v2460_v9 = vmul.f32 %v7013_v26, %v7033_v57  ;;  %v2503_v12 = vrot.slane %v2439_v53, 3  ;;  %v2504_v7 = vrot.slane %v2441_v35, 3  ;;  %v7037_v41 = vld [vmem:[#allocation41_spill] sm:$0xff]  ;;  %v7038_v10 = vld [vmem:[#allocation42_spill] sm:$0xff]  ;;  %v7039_v57 = vld [vmem:[#allocation43_spill] sm:$0xff] }
 0x1b0   : > { %v2506_v14 = vrot.slane %v2440_v59, 3  ;;  %v2507_v20 = vrot.slane %v2442_v34, 3  ;;  %v2461_v11 = vmul.f32 %v7011_v2, %v7034_v8  ;;  %v2462_v3 = vmul.f32 %v7013_v26, %v7035_v13  ;;  %v7040_v59 = vld [vmem:[#allocation44_spill] sm:$0xff]  ;;  %v7041_v34 = vld [vmem:[#allocation45_spill] sm:$0xff] }
 0x1b1   : > { %v2463_v40 = vmul.f32 %v7011_v2, %v7036_v1  ;;  %v2464_v48 = vmul.f32 %v7013_v26, %v7037_v41  ;;  %v2465_v4 = vmul.f32 %v7011_v2, %v7038_v10  ;;  %v2466_v53 = vmul.f32 %v7013_v26, %v7039_v57 }
 0x1b2   : > { %v2467_v35 = vmul.f32 %v7011_v2, %v7040_v59  ;;  %v2468_v8 = vmul.f32 %v7013_v26, %v7041_v34  ;;  %v2469_v13 = vmul.f32 %v7011_v2, %v7042_v51  ;;  %v2470_v1 = vmul.f32 %v7013_v26, %v7043_v46 }
 0x1b3   : > { %v2509_v61 = vrot.slane %v2443_v38, 3  ;;  %v2510_v41 = vrot.slane %v2445_v16, 3  ;;  %v2505_v18 = vsel %vm647_vm2, %v2503_v12, %v2504_v7  ;;  %v2508_v10 = vsel %vm647_vm2, %v2506_v14, %v2507_v20 }
 0x1b4   : > { %v2512_v54 = vrot.slane %v2444_v52, 3  ;;  %v2513_v57 = vrot.slane %v2446_v21, 3  ;;  %v2515_v36 = vrot.slane %v2447_v32, 3  ;;  %v2516_v44 = vrot.slane %v2449_v60, 3 }
 0x1b5   : > { %v2518_v59 = vrot.slane %v2448_v47, 3  ;;  %v2519_v22 = vrot.slane %v2450_v33, 3  ;;  %v2521_v0 = vrot.slane %v2451_v62, 3  ;;  %v2522_v34 = vrot.slane %v2453_v49, 3 }
 0x1b6   : > { %v2524_v50 = vrot.slane %v2452_v19, 3  ;;  %v2525_v43 = vrot.slane %v2454_v37, 3  ;;  %v2527_v2 = vrot.slane %v2455_v42, 3  ;;  %v2528_v51 = vrot.slane %v2457_v39, 3  ;;  %v7049_v39 = vld [vmem:[#allocation15_spill] sm:$0xff] }
 0x1b7   : > { %v2530_v56 = vrot.slane %v2456_v25, 3  ;;  %v2531_v26 = vrot.slane %v2458_v5, 3  ;;  %v2533_v38 = vrot.slane %v2459_v58, 3  ;;  %v2534_v16 = vrot.slane %v2461_v11, 3 }
 0x1b8   : > { %v2536_v46 = vrot.slane %v2460_v9, 3  ;;  %v2537_v12 = vrot.slane %v2462_v3, 3  ;;  %v2539_v7 = vrot.slane %v2463_v40, 3  ;;  %v2540_v20 = vrot.slane %v2465_v4, 3 }
 0x1b9   : > { %v2542_v52 = vrot.slane %v2464_v48, 3  ;;  %v2543_v21 = vrot.slane %v2466_v53, 3  ;;  %v2511_v32 = vsel %vm647_vm2, %v2509_v61, %v2510_v41  ;;  %v2514_v47 = vsel %vm647_vm2, %v2512_v54, %v2513_v57  ;;  %v7057_v57 = vld [vmem:[#allocation17_spill] sm:$0xff]  ;;  %v7058_v53 = vld [vmem:[#allocation18_spill] sm:$0xff] }
 0x1ba   : > { %v2545_v60 = vrot.slane %v2467_v35, 3  ;;  %v2546_v33 = vrot.slane %v2469_v13, 3  ;;  %v2517_v62 = vsel %vm647_vm2, %v2515_v36, %v2516_v44  ;;  %v2520_v19 = vsel %vm647_vm2, %v2518_v59, %v2519_v22  ;;  %v7059_v35 = vld [vmem:[#allocation19_spill] sm:$0xff] }
 0x1bb   : > { %v2548_v49 = vrot.slane %v2468_v8, 3  ;;  %v2549_v14 = vrot.slane %v2470_v1, 3  ;;  %v2523_v11 = vsel %vm647_vm2, %v2521_v0, %v2522_v34  ;;  %v2526_v3 = vsel %vm647_vm2, %v2524_v50, %v2525_v43 }
 0x1bc   : > { %v2529_v4 = vsel %vm647_vm2, %v2527_v2, %v2528_v51  ;;  %v2532_v48 = vsel %vm647_vm2, %v2530_v56, %v2531_v26  ;;  %v2535_v61 = vsel %vm647_vm2, %v2533_v38, %v2534_v16  ;;  %v2538_v54 = vsel %vm647_vm2, %v2536_v46, %v2537_v12  ;;  %v7060_v2 = vld [vmem:[#allocation20_spill] sm:$0xff]  ;;  %v7061_v38 = vld [vmem:[#allocation21_spill] sm:$0xff]  ;;  %v7062_v12 = vld [vmem:[#allocation22_spill] sm:$0xff] }
 0x1bd   : > { %v2541_v40 = vsel %vm647_vm2, %v2539_v7, %v2540_v20  ;;  %v2544_v44 = vsel %vm647_vm2, %v2542_v52, %v2543_v21  ;;  %v2547_v22 = vsel %vm647_vm2, %v2545_v60, %v2546_v33  ;;  %v5558_v36 = vadd.f32 %v2505_v18, %v5430_v63  ;;  %v5579_v63 = vld [vmem:[%s6215_s1 + $0x40] sm:$0x1f]  ;;  %v7063_v20 = vld [vmem:[#allocation23_spill] sm:$0xff]  ;;  %v7064_v21 = vld [vmem:[#allocation24_spill] sm:$0xff] }
 0x1be   : > { %v5561_v0 = vadd.f32 %v2508_v10, %v5433_v6  ;;  %v5564_v43 = vadd.f32 %v2511_v32, %v5436_v27  ;;  %v2550_v56 = vsel %vm647_vm2, %v2548_v49, %v2549_v14  ;;  %v5568_v50 = vadd.f32 %v2514_v47, %v5440_v23  ;;  %7044 = vst [vmem:[#allocation3_spill] sm:$0xff] %v5579_v63  ;;  %v5584_v6 = vld [vmem:[%s6215_s1 + $0x48] sm:$0x1f]  ;;  %v7056_v10 = vld [vmem:[#allocation16_spill] sm:$0xff]  ;;  %v7065_v47 = vld [vmem:[#allocation25_spill] sm:$0xff] }
 0x1bf   : > { %v5571_v46 = vadd.f32 %v2517_v62, %v5443_v30  ;;  %v5574_v51 = vadd.f32 %v2520_v19, %v5446_v29  ;;  %7045 = vst [vmem:[#allocation56_spill] sm:$0xff] %v5584_v6  ;;  %v5587_v27 = vadd.f32 %v2523_v11, %v5449_v55  ;;  %v5590_v23 = vadd.f32 %v2526_v3, %v5452_v31  ;;  %v7046_v30 = vld [vmem:[#allocation9_spill] sm:$0xff]  ;;  %v7047_v29 = vld [vmem:[#allocation10_spill] sm:$0xff]  ;;  %v7067_v19 = vld [vmem:[#allocation27_spill] sm:$0xff] }
 0x1c0   : > { %v2583_v18 = vperm.slane %v7046_v30, 4  ;;  %v2584_v37 = vperm.slane %v7047_v29, 4  ;;  %v5595_v8 = vadd.f32 %v2529_v4, %v5455_v17  ;;  %v5598_v42 = vadd.f32 %v2532_v48, %v5458_v45  ;;  %v7048_v31 = vld [vmem:[#allocation14_spill] sm:$0xff]  ;;  %v7050_v17 = vld [vmem:[#allocation11_spill] sm:$0xff]  ;;  %v7068_v14 = vld [vmem:[#allocation28_spill] sm:$0xff] }
 0x1c1   : > { %v5601_v13 = vadd.f32 %v2535_v61, %v5461_v15  ;;  %v5604_v25 = vadd.f32 %v2538_v54, %v5464_v28  ;;  %v5607_v55 = vadd.f32 %v2541_v40, %v5467_v24  ;;  %v5610_v1 = vadd.f32 %v2544_v44, %v7048_v31  ;;  %v7066_v33 = vld [vmem:[#allocation26_spill] sm:$0xff]  ;;  %v7069_v3 = vld [vmem:[#allocation29_spill] sm:$0xff]  ;;  %v7071_v54 = vld [vmem:[#allocation31_spill] sm:$0xff] }
 0x1c2   : > { %v5613_v41 = vadd.f32 %v2547_v22, %v7049_v39  ;;  %v5616_v5 = vadd.f32 %v2550_v56, %v7050_v17  ;;  %v5619_v45 = vperm.slane %v5579_v63, 0  ;;  %v5622_v15 = vperm.slane %v5584_v6, 0  ;;  %v7070_v48 = vld [vmem:[#allocation30_spill] sm:$0xff]  ;;  %v7072_v44 = vld [vmem:[#allocation32_spill] sm:$0xff]  ;;  %v7073_v56 = vld [vmem:[#allocation33_spill] sm:$0xff] }
 0x1c3   : > { %v5625_v28 = vperm.slane %v5579_v63, 1  ;;  %v5628_v24 = vperm.slane %v5584_v6, 1  ;;  %v2585_v58 = vmul.f32 %v2583_v18, %v7056_v10  ;;  %v2586_v9 = vmul.f32 %v2584_v37, %v7057_v57  ;;  %v7074_v29 = vld [vmem:[#allocation34_spill] sm:$0xff]  ;;  %v7075_v39 = vld [vmem:[#allocation35_spill] sm:$0xff]  ;;  %v7076_v10 = vld [vmem:[#allocation36_spill] sm:$0xff] }
 0x1c4   : > { %7051 = vst [vmem:[#allocation52_spill] sm:$0xff] %v5616_v5  ;;  %v2587_v59 = vmul.f32 %v2583_v18, %v7058_v53  ;;  %v2588_v34 = vmul.f32 %v2584_v37, %v7059_v35  ;;  %v2589_v26 = vmul.f32 %v2583_v18, %v7060_v2  ;;  %v2590_v16 = vmul.f32 %v2584_v37, %v7061_v38  ;;  %v7077_v53 = vld [vmem:[#allocation37_spill] sm:$0xff]  ;;  %v7078_v6 = vld [vmem:[#allocation38_spill] sm:$0xff] }
 0x1c5   : > { %7052 = vst [vmem:[#allocation4_spill] sm:$0xff] %v5619_v45  ;;  %v2591_v7 = vmul.f32 %v2583_v18, %v7062_v12  ;;  %v2592_v52 = vmul.f32 %v2584_v37, %v7063_v20  ;;  %v2593_v32 = vmul.f32 %v2583_v18, %v7064_v21  ;;  %v2594_v60 = vmul.f32 %v2584_v37, %v7065_v47  ;;  %v7082_v47 = vld [vmem:[#allocation42_spill] sm:$0xff]  ;;  %v7083_v21 = vld [vmem:[#allocation43_spill] sm:$0xff]  ;;  %v7085_v38 = vld [vmem:[#allocation45_spill] sm:$0xff] }
 0x1c6   : > { %7053 = vst [vmem:[#allocation53_spill] sm:$0xff] %v5622_v15  ;;  %v2595_v62 = vmul.f32 %v2583_v18, %v7066_v33  ;;  %v2596_v49 = vmul.f32 %v2584_v37, %v7067_v19  ;;  %v2597_v11 = vmul.f32 %v2583_v18, %v7068_v14  ;;  %v2598_v4 = vmul.f32 %v2584_v37, %v7069_v3  ;;  %v7079_v19 = vld [vmem:[#allocation39_spill] sm:$0xff]  ;;  %v7080_v3 = vld [vmem:[#allocation40_spill] sm:$0xff]  ;;  %v7081_v14 = vld [vmem:[#allocation41_spill] sm:$0xff] }
 0x1c7   : > { %7054 = vst [vmem:[#allocation54_spill] sm:$0xff] %v5625_v28  ;;  %v2599_v61 = vmul.f32 %v2583_v18, %v7070_v48  ;;  %v2600_v40 = vmul.f32 %v2584_v37, %v7071_v54  ;;  %v2601_v22 = vmul.f32 %v2583_v18, %v7072_v44  ;;  %v2602_v30 = vmul.f32 %v2584_v37, %v7073_v56  ;;  %v7084_v15 = vld [vmem:[#allocation44_spill] sm:$0xff] }
 0x1c8   : > { %7055 = vst [vmem:[#allocation5_spill] sm:$0xff] %v5628_v24  ;;  %v2603_v31 = vmul.f32 %v2583_v18, %v7074_v29  ;;  %v2604_v17 = vmul.f32 %v2584_v37, %v7075_v39  ;;  %v2605_v57 = vmul.f32 %v2583_v18, %v7076_v10  ;;  %v2606_v35 = vmul.f32 %v2584_v37, %v7077_v53 }
 0x1c9   : > { %v2607_v63 = vmul.f32 %v2583_v18, %v7078_v6  ;;  %v2608_v33 = vmul.f32 %v2584_v37, %v7079_v19  ;;  %v2649_v20 = vrot.slane %v2585_v58, 4  ;;  %v2650_v48 = vrot.slane %v2587_v59, 4  ;;  %v7086_v58 = vld [vmem:[#allocation46_spill] sm:$0xff] }
 0x1ca   : > { %v2652_v12 = vrot.slane %v2586_v9, 4  ;;  %v2653_v54 = vrot.slane %v2588_v34, 4  ;;  %v2655_v24 = vrot.slane %v2589_v26, 4  ;;  %v2656_v28 = vrot.slane %v2591_v7, 4  ;;  %v7087_v9 = vld [vmem:[#allocation47_spill] sm:$0xff] }
 0x1cb   : > { %v2658_v44 = vrot.slane %v2590_v16, 4  ;;  %v2659_v56 = vrot.slane %v2592_v52, 4  ;;  %v2609_v29 = vmul.f32 %v2583_v18, %v7080_v3  ;;  %v2610_v39 = vmul.f32 %v2584_v37, %v7081_v14 }
 0x1cc   : > { %v2611_v10 = vmul.f32 %v2583_v18, %v7082_v47  ;;  %v2612_v53 = vmul.f32 %v2584_v37, %v7083_v21  ;;  %v2613_v6 = vmul.f32 %v2583_v18, %v7084_v15  ;;  %v2614_v19 = vmul.f32 %v2584_v37, %v7085_v38 }
 0x1cd   : > { %v2615_v59 = vmul.f32 %v2583_v18, %v7086_v58  ;;  %v2616_v34 = vmul.f32 %v2584_v37, %v7087_v9  ;;  %v2651_v26 = vsel %vm794_vm3, %v2649_v20, %v2650_v48  ;;  %v2654_v16 = vsel %vm794_vm3, %v2652_v12, %v2653_v54 }
 0x1ce   : > { %v2661_v7 = vrot.slane %v2593_v32, 4  ;;  %v2662_v52 = vrot.slane %v2595_v62, 4  ;;  %v2657_v14 = vsel %vm794_vm3, %v2655_v24, %v2656_v28  ;;  %v2660_v47 = vsel %vm794_vm3, %v2658_v44, %v2659_v56 }
 0x1cf   : > { %v2664_v3 = vrot.slane %v2594_v60, 4  ;;  %v2665_v21 = vrot.slane %v2596_v49, 4  ;;  %v2667_v45 = vrot.slane %v2597_v11, 4  ;;  %v2668_v15 = vrot.slane %v2599_v61, 4 }
 0x1d0   : > { %v2670_v2 = vrot.slane %v2598_v4, 4  ;;  %v2671_v38 = vrot.slane %v2600_v40, 4  ;;  %v2673_v5 = vrot.slane %v2601_v22, 4  ;;  %v2674_v18 = vrot.slane %v2603_v31, 4 }
 0x1d1   : > { %v2676_v58 = vrot.slane %v2602_v30, 4  ;;  %v2677_v37 = vrot.slane %v2604_v17, 4  ;;  %v2679_v9 = vrot.slane %v2605_v57, 4  ;;  %v2680_v20 = vrot.slane %v2607_v63, 4  ;;  %v7092_v57 = vld [vmem:[#allocation53_spill] sm:$0xff] }
 0x1d2   : > { %v2682_v48 = vrot.slane %v2606_v35, 4  ;;  %v2683_v12 = vrot.slane %v2608_v33, 4  ;;  %v2685_v32 = vrot.slane %v2609_v29, 4  ;;  %v2686_v62 = vrot.slane %v2611_v10, 4  ;;  %v7095_v35 = vld [vmem:[#allocation28_spill] sm:$0xff] }
 0x1d3   : > { %v2688_v54 = vrot.slane %v2610_v39, 4  ;;  %v2689_v28 = vrot.slane %v2612_v53, 4  ;;  %v2663_v24 = vsel %vm794_vm3, %v2661_v7, %v2662_v52  ;;  %v2691_v60 = vrot.slane %v2613_v6, 4  ;;  %v7093_v53 = vld [vmem:[#allocation24_spill] sm:$0xff]  ;;  %v7100_v7 = vld [vmem:[#allocation37_spill] sm:$0xff] }
 0x1d4   : > { %v2692_v49 = vrot.slane %v2615_v59, 4  ;;  %v2694_v11 = vrot.slane %v2614_v19, 4  ;;  %v2666_v4 = vsel %vm794_vm3, %v2664_v3, %v2665_v21  ;;  %v2669_v61 = vsel %vm794_vm3, %v2667_v45, %v2668_v15 }
 0x1d5   : > { %v2672_v40 = vsel %vm794_vm3, %v2670_v2, %v2671_v38  ;;  %v2695_v44 = vrot.slane %v2616_v34, 4  ;;  %v2675_v63 = vsel %vm794_vm3, %v2673_v5, %v2674_v18  ;;  %v2678_v33 = vsel %vm794_vm3, %v2676_v58, %v2677_v37  ;;  %v7097_v58 = vld [vmem:[#allocation32_spill] sm:$0xff] }
 0x1d6   : > { %v2681_v22 = vsel %vm794_vm3, %v2679_v9, %v2680_v20  ;;  %v2684_v56 = vsel %vm794_vm3, %v2682_v48, %v2683_v12  ;;  %v2687_v30 = vsel %vm794_vm3, %v2685_v32, %v2686_v62  ;;  %v2690_v6 = vsel %vm794_vm3, %v2688_v54, %v2689_v28  ;;  %v7098_v9 = vld [vmem:[#allocation33_spill] sm:$0xff]  ;;  %v7101_v18 = vld [vmem:[#allocation40_spill] sm:$0xff] }
 0x1d7   : > { %v2713_v19 = vadd.f32 %v2651_v26, %v5558_v36  ;;  %v2714_v21 = vadd.f32 %v2654_v16, %v5561_v0  ;;  %v2693_v45 = vsel %vm794_vm3, %v2691_v60, %v2692_v49  ;;  %v2696_v15 = vsel %vm794_vm3, %v2694_v11, %v2695_v44  ;;  %v7099_v26 = vld [vmem:[#allocation36_spill] sm:$0xff]  ;;  %v7102_v20 = vld [vmem:[#allocation41_spill] sm:$0xff] }
 0x1d8   : > { %v2715_v5 = vadd.f32 %v2657_v14, %v5564_v43  ;;  %v2716_v2 = vadd.f32 %v2660_v47, %v5568_v50  ;;  %v2717_v38 = vadd.f32 %v2663_v24, %v5571_v46  ;;  %v2718_v3 = vadd.f32 %v2666_v4, %v5574_v51  ;;  %v7088_v47 = vld [vmem:[#allocation52_spill] sm:$0xff]  ;;  %v7104_v62 = vld [vmem:[#allocation45_spill] sm:$0xff] }
 0x1d9   : > { %v2719_v29 = vadd.f32 %v2669_v61, %v5587_v27  ;;  %v2720_v31 = vadd.f32 %v2672_v40, %v5590_v23  ;;  %v2721_v36 = vadd.f32 %v2675_v63, %v5595_v8  ;;  %v2722_v0 = vadd.f32 %v2678_v33, %v5598_v42  ;;  %v7089_v14 = vld [vmem:[#allocation20_spill] sm:$0xff]  ;;  %v7091_v23 = vld [vmem:[#allocation21_spill] sm:$0xff] }
 0x1da   : > { %v2723_v39 = vadd.f32 %v2681_v22, %v5601_v13  ;;  %v2724_v17 = vadd.f32 %v2684_v56, %v5604_v25  ;;  %v2725_v43 = vadd.f32 %v2687_v30, %v5607_v55  ;;  %v2726_v50 = vadd.f32 %v2690_v6, %v5610_v1  ;;  %v7090_v27 = vld [vmem:[#allocation4_spill] sm:$0xff]  ;;  %v7094_v13 = vld [vmem:[#allocation25_spill] sm:$0xff] }
 0x1db   : > { %v2727_v46 = vadd.f32 %v2693_v45, %v5613_v41  ;;  %v2728_v51 = vadd.f32 %v2696_v15, %v7088_v47  ;;  %v2731_v10 = vmul.f32 %v7090_v27, %v7089_v14  ;;  %v2732_v8 = vmul.f32 %v7092_v57, %v7091_v23  ;;  %v7096_v1 = vld [vmem:[#allocation29_spill] sm:$0xff]  ;;  %v7103_v12 = vld [vmem:[#allocation44_spill] sm:$0xff]  ;;  %v7113_v47 = vld [vmem:[#allocation27_spill] sm:$0xff] }
 0x1dc   : > { %v2733_v42 = vmul.f32 %v7090_v27, %v7093_v53  ;;  %v2734_v25 = vmul.f32 %v7092_v57, %v7094_v13  ;;  %v2735_v55 = vmul.f32 %v7090_v27, %v7095_v35  ;;  %v2736_v41 = vmul.f32 %v7092_v57, %v7096_v1  ;;  %v7105_v28 = vld [vmem:[#allocation48_spill] sm:$0xff]  ;;  %v7106_v60 = vld [vmem:[#allocation49_spill] sm:$0xff] }
 0x1dd   : > { %v2737_v59 = vmul.f32 %v7090_v27, %v7097_v58  ;;  %v2738_v34 = vmul.f32 %v7092_v57, %v7098_v9  ;;  %v2739_v16 = vmul.f32 %v7090_v27, %v7099_v26  ;;  %v2740_v52 = vmul.f32 %v7092_v57, %v7100_v7 }
 0x1de   : > { %v2741_v37 = vmul.f32 %v7090_v27, %v7101_v18  ;;  %v2742_v48 = vmul.f32 %v7092_v57, %v7102_v20  ;;  %v2743_v32 = vmul.f32 %v7090_v27, %v7103_v12  ;;  %v2744_v54 = vmul.f32 %v7092_v57, %v7104_v62 }
 0x1df   : > { %v2745_v24 = vmul.f32 %v7090_v27, %v7105_v28  ;;  %v2746_v49 = vmul.f32 %v7092_v57, %v7106_v60  ;;  %v5726_v11 = vadd.f32 %v2731_v10, %v2713_v19  ;;  %v5728_v4 = vadd.f32 %v2732_v8, %v2714_v21  ;;  %v7114_v57 = vld [vmem:[#allocation30_spill] sm:$0xff] }
 0x1e0   : > { %v5730_v61 = vadd.f32 %v2733_v42, %v2715_v5  ;;  %v5732_v40 = vadd.f32 %v2734_v25, %v2716_v2  ;;  %v5734_v44 = vadd.f32 %v2735_v55, %v2717_v38  ;;  %v5736_v63 = vadd.f32 %v2736_v41, %v2718_v3  ;;  %v7108_v2 = vld [vmem:[#allocation54_spill] sm:$0xff]  ;;  %v7109_v3 = vld [vmem:[#allocation5_spill] sm:$0xff]  ;;  %v7115_v42 = vld [vmem:[#allocation31_spill] sm:$0xff] }
 0x1e1   : > { %v5738_v33 = vadd.f32 %v2737_v59, %v2719_v29  ;;  %v5740_v22 = vadd.f32 %v2738_v34, %v2720_v31  ;;  %v5742_v56 = vadd.f32 %v2739_v16, %v2721_v36  ;;  %v5744_v30 = vadd.f32 %v2740_v52, %v2722_v0  ;;  %v7110_v31 = vld [vmem:[#allocation22_spill] sm:$0xff]  ;;  %v7111_v0 = vld [vmem:[#allocation23_spill] sm:$0xff] }
 0x1e2   : > { %v5746_v6 = vadd.f32 %v2741_v37, %v2723_v39  ;;  %v5748_v19 = vadd.f32 %v2742_v48, %v2724_v17  ;;  %v5750_v21 = vadd.f32 %v2743_v32, %v2725_v43  ;;  %v5752_v45 = vadd.f32 %v2744_v54, %v2726_v50  ;;  %v7112_v50 = vld [vmem:[#allocation26_spill] sm:$0xff]  ;;  %v7117_v16 = vld [vmem:[#allocation35_spill] sm:$0xff] }
 0x1e3   : > { %v5754_v15 = vadd.f32 %v2745_v24, %v2727_v46  ;;  %v5756_v5 = vadd.f32 %v2746_v49, %v2728_v51  ;;  %v2765_v38 = vmul.f32 %v7108_v2, %v7089_v14  ;;  %v2766_v29 = vmul.f32 %v7109_v3, %v7091_v23  ;;  %v7116_v59 = vld [vmem:[#allocation34_spill] sm:$0xff]  ;;  %v7119_v24 = vld [vmem:[#allocation39_spill] sm:$0xff] }
 0x1e4   : > { %v2767_v36 = vmul.f32 %v7108_v2, %v7110_v31  ;;  %v2768_v39 = vmul.f32 %v7109_v3, %v7111_v0  ;;  %v2769_v17 = vmul.f32 %v7108_v2, %v7093_v53  ;;  %v2770_v43 = vmul.f32 %v7109_v3, %v7094_v13  ;;  %v7118_v32 = vld [vmem:[#allocation38_spill] sm:$0xff]  ;;  %v7123_v53 = vld [vmem:[#allocation47_spill] sm:$0xff] }
 0x1e5   : > { %7107 = vst [vmem:[#allocation6_spill] sm:$0xff] %v5756_v5  ;;  %v2771_v46 = vmul.f32 %v7108_v2, %v7112_v50  ;;  %v2772_v51 = vmul.f32 %v7109_v3, %v7113_v47  ;;  %v2773_v27 = vmul.f32 %v7108_v2, %v7095_v35  ;;  %v2774_v10 = vmul.f32 %v7109_v3, %v7096_v1  ;;  %v7122_v13 = vld [vmem:[#allocation46_spill] sm:$0xff] }
 0x1e6   : > { %v2775_v8 = vmul.f32 %v7108_v2, %v7114_v57  ;;  %v2776_v25 = vmul.f32 %v7109_v3, %v7115_v42  ;;  %v2777_v55 = vmul.f32 %v7108_v2, %v7097_v58  ;;  %v2778_v41 = vmul.f32 %v7109_v3, %v7098_v9  ;;  %v7120_v58 = vld [vmem:[#allocation42_spill] sm:$0xff]  ;;  %v7121_v42 = vld [vmem:[#allocation43_spill] sm:$0xff] }
 0x1e7   : > { %v2779_v34 = vmul.f32 %v7108_v2, %v7116_v59  ;;  %v2780_v52 = vmul.f32 %v7109_v3, %v7117_v16  ;;  %v2781_v37 = vmul.f32 %v7108_v2, %v7099_v26  ;;  %v2782_v48 = vmul.f32 %v7109_v3, %v7100_v7 }
 0x1e8   : > { %v2783_v54 = vmul.f32 %v7108_v2, %v7118_v32  ;;  %v2784_v49 = vmul.f32 %v7109_v3, %v7119_v24  ;;  %v2785_v9 = vmul.f32 %v7108_v2, %v7101_v18  ;;  %v2786_v59 = vmul.f32 %v7109_v3, %v7102_v20 }
 0x1e9   : > { %v2787_v16 = vmul.f32 %v7108_v2, %v7120_v58  ;;  %v2788_v26 = vmul.f32 %v7109_v3, %v7121_v42  ;;  %v2829_v57 = vrot.slane %v2765_v38, 1  ;;  %v2830_v7 = vrot.slane %v2767_v36, 1  ;;  %v7124_v36 = vld [vmem:[#allocation50_spill] sm:$0xff] }
 0x1ea   : > { %v2832_v1 = vrot.slane %v2766_v29, 1  ;;  %v2833_v35 = vrot.slane %v2768_v39, 1  ;;  %v2835_v32 = vrot.slane %v2769_v17, 1  ;;  %v2836_v47 = vrot.slane %v2771_v46, 1  ;;  %v7125_v17 = vld [vmem:[#allocation51_spill] sm:$0xff] }
 0x1eb   : > { %v2838_v50 = vrot.slane %v2770_v43, 1  ;;  %v2839_v24 = vrot.slane %v2772_v51, 1  ;;  %v2789_v18 = vmul.f32 %v7108_v2, %v7103_v12  ;;  %v2790_v20 = vmul.f32 %v7109_v3, %v7104_v62 }
 0x1ec   : > { %v2791_v58 = vmul.f32 %v7108_v2, %v7122_v13  ;;  %v2792_v42 = vmul.f32 %v7109_v3, %v7123_v53  ;;  %v2793_v38 = vmul.f32 %v7108_v2, %v7105_v28  ;;  %v2794_v29 = vmul.f32 %v7109_v3, %v7106_v60 }
 0x1ed   : > { %v2795_v39 = vmul.f32 %v7108_v2, %v7124_v36  ;;  %v2796_v43 = vmul.f32 %v7109_v3, %v7125_v17  ;;  %v2831_v46 = vsel %vm353_vm0, %v2829_v57, %v2830_v7  ;;  %v2834_v51 = vsel %vm353_vm0, %v2832_v1, %v2833_v35 }
 0x1ee   : > { %v2841_v13 = vrot.slane %v2773_v27, 1  ;;  %v2842_v62 = vrot.slane %v2775_v8, 1  ;;  %v2837_v53 = vsel %vm353_vm0, %v2835_v32, %v2836_v47  ;;  %v2840_v12 = vsel %vm353_vm0, %v2838_v50, %v2839_v24  ;;  %v7134_v24 = vld [vmem:[#allocation22_spill] sm:$0xff] }
 0x1ef   : > { %v2844_v28 = vrot.slane %v2774_v10, 1  ;;  %v2845_v0 = vrot.slane %v2776_v25, 1  ;;  %v2847_v31 = vrot.slane %v2777_v55, 1  ;;  %v2848_v60 = vrot.slane %v2779_v34, 1 }
 0x1f0   : > { %v2850_v23 = vrot.slane %v2778_v41, 1  ;;  %v2851_v14 = vrot.slane %v2780_v52, 1  ;;  %v2853_v2 = vrot.slane %v2781_v37, 1  ;;  %v2854_v36 = vrot.slane %v2783_v54, 1  ;;  %v7133_v54 = vld [vmem:[#allocation21_spill] sm:$0xff] }
 0x1f1   : > { %v2856_v5 = vrot.slane %v2782_v48, 1  ;;  %v2857_v3 = vrot.slane %v2784_v49, 1  ;;  %v2859_v17 = vrot.slane %v2785_v9, 1  ;;  %v2860_v7 = vrot.slane %v2787_v16, 1 }
 0x1f2   : > { %v2862_v57 = vrot.slane %v2786_v59, 1  ;;  %v2863_v35 = vrot.slane %v2788_v26, 1  ;;  %v2865_v1 = vrot.slane %v2789_v18, 1  ;;  %v2866_v27 = vrot.slane %v2791_v58, 1 }
 0x1f3   : > { %v2868_v8 = vrot.slane %v2790_v20, 1  ;;  %v2869_v47 = vrot.slane %v2792_v42, 1  ;;  %v2843_v50 = vsel %vm353_vm0, %v2841_v13, %v2842_v62  ;;  %v2846_v10 = vsel %vm353_vm0, %v2844_v28, %v2845_v0 }
 0x1f4   : > { %v2871_v25 = vrot.slane %v2793_v38, 1  ;;  %v2872_v55 = vrot.slane %v2795_v39, 1  ;;  %v2849_v41 = vsel %vm353_vm0, %v2847_v31, %v2848_v60  ;;  %v2852_v34 = vsel %vm353_vm0, %v2850_v23, %v2851_v14 }
 0x1f5   : > { %v2874_v52 = vrot.slane %v2794_v29, 1  ;;  %v2875_v37 = vrot.slane %v2796_v43, 1  ;;  %v2855_v9 = vsel %vm353_vm0, %v2853_v2, %v2854_v36  ;;  %v2858_v26 = vsel %vm353_vm0, %v2856_v5, %v2857_v3  ;;  %v7136_v29 = vld [vmem:[#allocation24_spill] sm:$0xff]  ;;  %v7137_v36 = vld [vmem:[#allocation25_spill] sm:$0xff] }
 0x1f6   : > { %v2861_v58 = vsel %vm353_vm0, %v2859_v17, %v2860_v7  ;;  %v2864_v18 = vsel %vm353_vm0, %v2862_v57, %v2863_v35  ;;  %v2867_v13 = vsel %vm353_vm0, %v2865_v1, %v2866_v27  ;;  %v2870_v20 = vsel %vm353_vm0, %v2868_v8, %v2869_v47  ;;  %v7138_v17 = vld [vmem:[#allocation26_spill] sm:$0xff]  ;;  %v7140_v2 = vld [vmem:[#allocation28_spill] sm:$0xff]  ;;  %v7141_v7 = vld [vmem:[#allocation29_spill] sm:$0xff] }
 0x1f7   : > { %v5837_v62 = vadd.f32 %v2831_v46, %v5726_v11  ;;  %v5840_v28 = vadd.f32 %v2834_v51, %v5728_v4  ;;  %v2873_v14 = vsel %vm353_vm0, %v2871_v25, %v2872_v55  ;;  %v5844_v23 = vadd.f32 %v2837_v53, %v5730_v61  ;;  %v7126_v61 = vld [vmem:[#allocation3_spill] sm:$0xff]  ;;  %v7142_v35 = vld [vmem:[#allocation30_spill] sm:$0xff]  ;;  %v7144_v47 = vld [vmem:[#allocation32_spill] sm:$0xff] }
 0x1f8   : > { %v5847_v60 = vadd.f32 %v2840_v12, %v5732_v40  ;;  %v5850_v5 = vadd.f32 %v2843_v50, %v5734_v44  ;;  %v2876_v31 = vsel %vm353_vm0, %v2874_v52, %v2875_v37  ;;  %v5854_v0 = vadd.f32 %v2846_v10, %v5736_v63  ;;  %v7127_v44 = vld [vmem:[#allocation56_spill] sm:$0xff]  ;;  %v7139_v46 = vld [vmem:[#allocation27_spill] sm:$0xff]  ;;  %v7145_v10 = vld [vmem:[#allocation33_spill] sm:$0xff] }
 0x1f9   : > { %v5857_v11 = vadd.f32 %v2849_v41, %v5738_v33  ;;  %v5860_v4 = vadd.f32 %v2852_v34, %v5740_v22  ;;  %v5863_v53 = vadd.f32 %v2855_v9, %v5742_v56  ;;  %v5866_v12 = vadd.f32 %v2858_v26, %v5744_v30  ;;  %v7128_v30 = vld [vmem:[#allocation6_spill] sm:$0xff]  ;;  %v7143_v27 = vld [vmem:[#allocation31_spill] sm:$0xff]  ;;  %v7148_v37 = vld [vmem:[#allocation36_spill] sm:$0xff] }
 0x1fa   : > { %v2909_v40 = vperm.slane %v7126_v61, 2  ;;  %v2910_v42 = vperm.slane %v7127_v44, 2  ;;  %v5871_v59 = vadd.f32 %v2861_v58, %v5746_v6  ;;  %v5874_v63 = vadd.f32 %v2864_v18, %v5748_v19  ;;  %v7132_v19 = vld [vmem:[#allocation20_spill] sm:$0xff]  ;;  %v7146_v55 = vld [vmem:[#allocation34_spill] sm:$0xff]  ;;  %v7147_v34 = vld [vmem:[#allocation35_spill] sm:$0xff] }
 0x1fb   : > { %v5877_v33 = vadd.f32 %v2867_v13, %v5750_v21  ;;  %v5880_v22 = vadd.f32 %v2870_v20, %v5752_v45  ;;  %v5883_v56 = vadd.f32 %v2873_v14, %v5754_v15  ;;  %v5886_v16 = vadd.f32 %v2876_v31, %v7128_v30  ;;  %v7135_v45 = vld [vmem:[#allocation23_spill] sm:$0xff]  ;;  %v7149_v26 = vld [vmem:[#allocation37_spill] sm:$0xff]  ;;  %v7150_v18 = vld [vmem:[#allocation38_spill] sm:$0xff] }
 0x1fc   : > { %v5889_v48 = vperm.slane %v7126_v61, 3  ;;  %v5892_v6 = vperm.slane %v7127_v44, 3  ;;  %v2911_v32 = vmul.f32 %v2909_v40, %v7132_v19  ;;  %v2912_v21 = vmul.f32 %v2910_v42, %v7133_v54  ;;  %v7151_v20 = vld [vmem:[#allocation39_spill] sm:$0xff]  ;;  %v7152_v31 = vld [vmem:[#allocation40_spill] sm:$0xff]  ;;  %v7153_v44 = vld [vmem:[#allocation41_spill] sm:$0xff] }
 0x1fd   : > { %7129 = vst [vmem:[#allocation7_spill] sm:$0xff] %v5886_v16  ;;  %v2913_v49 = vmul.f32 %v2909_v40, %v7134_v24  ;;  %v2914_v38 = vmul.f32 %v2910_v42, %v7135_v45  ;;  %v2915_v15 = vmul.f32 %v2909_v40, %v7136_v29  ;;  %v2916_v39 = vmul.f32 %v2910_v42, %v7137_v36  ;;  %v7161_v54 = vld [vmem:[#allocation49_spill] sm:$0xff]  ;;  %v7162_v19 = vld [vmem:[#allocation50_spill] sm:$0xff]  ;;  %v7163_v16 = vld [vmem:[#allocation51_spill] sm:$0xff] }
 0x1fe   : > { %7130 = vst [vmem:[#allocation55_spill] sm:$0xff] %v5889_v48  ;;  %v2917_v43 = vmul.f32 %v2909_v40, %v7138_v17  ;;  %v2918_v51 = vmul.f32 %v2910_v42, %v7139_v46  ;;  %v2919_v3 = vmul.f32 %v2909_v40, %v7140_v2  ;;  %v2920_v57 = vmul.f32 %v2910_v42, %v7141_v7  ;;  %v7156_v7 = vld [vmem:[#allocation44_spill] sm:$0xff]  ;;  %v7157_v2 = vld [vmem:[#allocation45_spill] sm:$0xff]  ;;  %v7158_v46 = vld [vmem:[#allocation46_spill] sm:$0xff] }
 0x1ff   : > { %7131 = vst [vmem:[#allocation2_spill] sm:$0xff] %v5892_v6  ;;  %v2921_v1 = vmul.f32 %v2909_v40, %v7142_v35  ;;  %v2922_v8 = vmul.f32 %v2910_v42, %v7143_v27  ;;  %v2923_v50 = vmul.f32 %v2909_v40, %v7144_v47  ;;  %v2924_v25 = vmul.f32 %v2910_v42, %v7145_v10  ;;  %v7154_v27 = vld [vmem:[#allocation42_spill] sm:$0xff]  ;;  %v7155_v35 = vld [vmem:[#allocation43_spill] sm:$0xff]  ;;  %v7160_v6 = vld [vmem:[#allocation48_spill] sm:$0xff] }
 0x200   : > { %v2925_v41 = vmul.f32 %v2909_v40, %v7146_v55  ;;  %v2926_v52 = vmul.f32 %v2910_v42, %v7147_v34  ;;  %v2927_v9 = vmul.f32 %v2909_v40, %v7148_v37  ;;  %v2928_v58 = vmul.f32 %v2910_v42, %v7149_v26  ;;  %v7159_v17 = vld [vmem:[#allocation47_spill] sm:$0xff] }
 0x201   : > { %v2929_v13 = vmul.f32 %v2909_v40, %v7150_v18  ;;  %v2930_v14 = vmul.f32 %v2910_v42, %v7151_v20  ;;  %v2931_v30 = vmul.f32 %v2909_v40, %v7152_v31  ;;  %v2932_v61 = vmul.f32 %v2910_v42, %v7153_v44 }
 0x202   : > { %v2933_v47 = vmul.f32 %v2909_v40, %v7154_v27  ;;  %v2934_v10 = vmul.f32 %v2910_v42, %v7155_v35  ;;  %v2935_v55 = vmul.f32 %v2909_v40, %v7156_v7  ;;  %v2936_v34 = vmul.f32 %v2910_v42, %v7157_v2 }
 0x203   : > { %v2937_v37 = vmul.f32 %v2909_v40, %v7158_v46  ;;  %v2938_v26 = vmul.f32 %v2910_v42, %v7159_v17  ;;  %v2975_v36 = vrot.slane %v2911_v32, 2  ;;  %v2976_v18 = vrot.slane %v2913_v49, 2 }
 0x204   : > { %v2978_v29 = vrot.slane %v2912_v21, 2  ;;  %v2979_v20 = vrot.slane %v2914_v38, 2  ;;  %v2981_v45 = vrot.slane %v2915_v15, 2  ;;  %v2982_v31 = vrot.slane %v2917_v43, 2 }
 0x205   : > { %v2984_v24 = vrot.slane %v2916_v39, 2  ;;  %v2985_v44 = vrot.slane %v2918_v51, 2  ;;  %v2939_v27 = vmul.f32 %v2909_v40, %v7160_v6  ;;  %v2940_v35 = vmul.f32 %v2910_v42, %v7161_v54 }
 0x206   : > { %v2987_v48 = vrot.slane %v2919_v3, 2  ;;  %v2988_v7 = vrot.slane %v2921_v1, 2  ;;  %v2941_v2 = vmul.f32 %v2909_v40, %v7162_v19  ;;  %v2942_v46 = vmul.f32 %v2910_v42, %v7163_v16 }
 0x207   : > { %v2977_v17 = vsel %vm500_vm1, %v2975_v36, %v2976_v18  ;;  %v2980_v32 = vsel %vm500_vm1, %v2978_v29, %v2979_v20  ;;  %v2983_v21 = vsel %vm500_vm1, %v2981_v45, %v2982_v31  ;;  %v2986_v49 = vsel %vm500_vm1, %v2984_v24, %v2985_v44 }
 0x208   : > { %v2990_v38 = vrot.slane %v2920_v57, 2  ;;  %v2991_v15 = vrot.slane %v2922_v8, 2  ;;  %v2989_v39 = vsel %vm500_vm1, %v2987_v48, %v2988_v7  ;;  %v2993_v43 = vrot.slane %v2923_v50, 2 }
 0x209   : > { %v2994_v51 = vrot.slane %v2925_v41, 2  ;;  %v2996_v3 = vrot.slane %v2924_v25, 2  ;;  %v2997_v1 = vrot.slane %v2926_v52, 2  ;;  %v2999_v54 = vrot.slane %v2927_v9, 2 }
 0x20a   : > { %v3000_v40 = vrot.slane %v2929_v13, 2  ;;  %v3002_v19 = vrot.slane %v2928_v58, 2  ;;  %v3003_v42 = vrot.slane %v2930_v14, 2  ;;  %v3005_v16 = vrot.slane %v2931_v30, 2  ;;  %v7168_v13 = vld [vmem:[#allocation2_spill] sm:$0xff] }
 0x20b   : > { %v3006_v36 = vrot.slane %v2933_v47, 2  ;;  %v3008_v18 = vrot.slane %v2932_v61, 2  ;;  %v2992_v29 = vsel %vm500_vm1, %v2990_v38, %v2991_v15  ;;  %v3009_v45 = vrot.slane %v2934_v10, 2  ;;  %v7174_v15 = vld [vmem:[#allocation27_spill] sm:$0xff] }
 0x20c   : > { %v3011_v20 = vrot.slane %v2935_v55, 2  ;;  %v3012_v44 = vrot.slane %v2937_v37, 2  ;;  %v2995_v24 = vsel %vm500_vm1, %v2993_v43, %v2994_v51  ;;  %v3014_v57 = vrot.slane %v2936_v34, 2  ;;  %v7175_v43 = vld [vmem:[#allocation28_spill] sm:$0xff] }
 0x20d   : > { %v3015_v48 = vrot.slane %v2938_v26, 2  ;;  %v3017_v7 = vrot.slane %v2939_v27, 2  ;;  %v2998_v8 = vsel %vm500_vm1, %v2996_v3, %v2997_v1  ;;  %v3001_v50 = vsel %vm500_vm1, %v2999_v54, %v3000_v40  ;;  %v7166_v26 = vld [vmem:[#allocation55_spill] sm:$0xff]  ;;  %v7176_v3 = vld [vmem:[#allocation29_spill] sm:$0xff]  ;;  %v7177_v40 = vld [vmem:[#allocation30_spill] sm:$0xff] }
 0x20e   : > { %v3018_v25 = vrot.slane %v2941_v2, 2  ;;  %v3020_v41 = vrot.slane %v2940_v35, 2  ;;  %v3004_v52 = vsel %vm500_vm1, %v3002_v19, %v3003_v42  ;;  %v3007_v61 = vsel %vm500_vm1, %v3005_v16, %v3006_v36  ;;  %v7178_v36 = vld [vmem:[#allocation31_spill] sm:$0xff] }
 0x20f   : > { %v3010_v47 = vsel %vm500_vm1, %v3008_v18, %v3009_v45  ;;  %v3021_v10 = vrot.slane %v2942_v46, 2  ;;  %v3013_v55 = vsel %vm500_vm1, %v3011_v20, %v3012_v44  ;;  %v3016_v37 = vsel %vm500_vm1, %v3014_v57, %v3015_v48  ;;  %v7180_v20 = vld [vmem:[#allocation33_spill] sm:$0xff]  ;;  %v7182_v48 = vld [vmem:[#allocation35_spill] sm:$0xff] }
 0x210   : > { %v5941_v34 = vadd.f32 %v2977_v17, %v5837_v62  ;;  %v5944_v27 = vadd.f32 %v2980_v32, %v5840_v28  ;;  %v3019_v54 = vsel %vm500_vm1, %v3017_v7, %v3018_v25  ;;  %v5949_v19 = vadd.f32 %v2983_v21, %v5844_v23  ;;  %v7184_v25 = vld [vmem:[#allocation37_spill] sm:$0xff] }
 0x211   : > { %v3022_v2 = vsel %vm500_vm1, %v3020_v41, %v3021_v10  ;;  %v5952_v16 = vadd.f32 %v2986_v49, %v5847_v60  ;;  %v5955_v46 = vadd.f32 %v2989_v39, %v5850_v5  ;;  %v5958_v35 = vadd.f32 %v2992_v29, %v5854_v0  ;;  %v7173_v49 = vld [vmem:[#allocation26_spill] sm:$0xff]  ;;  %v7179_v29 = vld [vmem:[#allocation32_spill] sm:$0xff] }
 0x212   : > { %v5961_v62 = vadd.f32 %v2995_v24, %v5857_v11  ;;  %v5964_v28 = vadd.f32 %v2998_v8, %v5860_v4  ;;  %v5967_v17 = vadd.f32 %v3001_v50, %v5863_v53  ;;  %v5970_v23 = vadd.f32 %v3004_v52, %v5866_v12  ;;  %v7164_v53 = vld [vmem:[#allocation7_spill] sm:$0xff]  ;;  %v7165_v12 = vld [vmem:[#allocation20_spill] sm:$0xff]  ;;  %v7181_v24 = vld [vmem:[#allocation34_spill] sm:$0xff] }
 0x213   : > { %v5973_v60 = vadd.f32 %v3007_v61, %v5871_v59  ;;  %v5976_v5 = vadd.f32 %v3010_v47, %v5874_v63  ;;  %v5979_v0 = vadd.f32 %v3013_v55, %v5877_v33  ;;  %v5982_v11 = vadd.f32 %v3016_v37, %v5880_v22  ;;  %v7167_v59 = vld [vmem:[#allocation21_spill] sm:$0xff]  ;;  %v7169_v63 = vld [vmem:[#allocation22_spill] sm:$0xff]  ;;  %v7170_v33 = vld [vmem:[#allocation23_spill] sm:$0xff] }
 0x214   : > { %v5985_v4 = vadd.f32 %v3019_v54, %v5883_v56  ;;  %v5988_v9 = vadd.f32 %v3022_v2, %v7164_v53  ;;  %v3057_v58 = vmul.f32 %v7166_v26, %v7165_v12  ;;  %v3058_v14 = vmul.f32 %v7168_v13, %v7167_v59  ;;  %v7171_v22 = vld [vmem:[#allocation24_spill] sm:$0xff]  ;;  %v7172_v56 = vld [vmem:[#allocation25_spill] sm:$0xff]  ;;  %v7185_v52 = vld [vmem:[#allocation38_spill] sm:$0xff] }
 0x215   : > { %v3059_v31 = vmul.f32 %v7166_v26, %v7169_v63  ;;  %v3060_v30 = vmul.f32 %v7168_v13, %v7170_v33  ;;  %v3061_v32 = vmul.f32 %v7166_v26, %v7171_v22  ;;  %v3062_v21 = vmul.f32 %v7168_v13, %v7172_v56  ;;  %v7183_v8 = vld [vmem:[#allocation36_spill] sm:$0xff]  ;;  %v7186_v47 = vld [vmem:[#allocation39_spill] sm:$0xff]  ;;  %v7188_v54 = vld [vmem:[#allocation41_spill] sm:$0xff] }
 0x216   : > { %v3063_v38 = vmul.f32 %v7166_v26, %v7173_v49  ;;  %v3064_v39 = vmul.f32 %v7168_v13, %v7174_v15  ;;  %v3065_v51 = vmul.f32 %v7166_v26, %v7175_v43  ;;  %v3066_v1 = vmul.f32 %v7168_v13, %v7176_v3  ;;  %v7187_v55 = vld [vmem:[#allocation40_spill] sm:$0xff]  ;;  %v7189_v53 = vld [vmem:[#allocation42_spill] sm:$0xff]  ;;  %v7195_v22 = vld [vmem:[#allocation49_spill] sm:$0xff] }
 0x217   : > { %v3067_v42 = vmul.f32 %v7166_v26, %v7177_v40  ;;  %v3068_v18 = vmul.f32 %v7168_v13, %v7178_v36  ;;  %v3069_v45 = vmul.f32 %v7166_v26, %v7179_v29  ;;  %v3070_v44 = vmul.f32 %v7168_v13, %v7180_v20  ;;  %v7191_v20 = vld [vmem:[#allocation44_spill] sm:$0xff]  ;;  %v7192_v29 = vld [vmem:[#allocation45_spill] sm:$0xff]  ;;  %v7193_v36 = vld [vmem:[#allocation46_spill] sm:$0xff] }
 0x218   : > { %v3071_v57 = vmul.f32 %v7166_v26, %v7181_v24  ;;  %v3072_v7 = vmul.f32 %v7168_v13, %v7182_v48  ;;  %v3073_v50 = vmul.f32 %v7166_v26, %v7183_v8  ;;  %v3074_v41 = vmul.f32 %v7168_v13, %v7184_v25  ;;  %v7190_v24 = vld [vmem:[#allocation43_spill] sm:$0xff] }
 0x219   : > { %v3075_v61 = vmul.f32 %v7166_v26, %v7185_v52  ;;  %v3076_v10 = vmul.f32 %v7168_v13, %v7186_v47  ;;  %v3077_v37 = vmul.f32 %v7166_v26, %v7187_v55  ;;  %v3078_v2 = vmul.f32 %v7168_v13, %v7188_v54  ;;  %v7194_v40 = vld [vmem:[#allocation47_spill] sm:$0xff] }
 0x21a   : > { %v3079_v48 = vmul.f32 %v7166_v26, %v7189_v53  ;;  %v3080_v8 = vmul.f32 %v7168_v13, %v7190_v24  ;;  %v3081_v25 = vmul.f32 %v7166_v26, %v7191_v20  ;;  %v3082_v52 = vmul.f32 %v7168_v13, %v7192_v29 }
 0x21b   : > { %v3083_v47 = vmul.f32 %v7166_v26, %v7193_v36  ;;  %v3084_v55 = vmul.f32 %v7168_v13, %v7194_v40  ;;  %v3121_v3 = vrot.slane %v3057_v58, 3  ;;  %v3122_v54 = vrot.slane %v3059_v31, 3  ;;  %v7196_v36 = vld [vmem:[#allocation50_spill] sm:$0xff]  ;;  %v7197_v40 = vld [vmem:[#allocation51_spill] sm:$0xff] }
 0x21c   : > { %v3124_v43 = vrot.slane %v3058_v14, 3  ;;  %v3125_v15 = vrot.slane %v3060_v30, 3  ;;  %v3127_v53 = vrot.slane %v3061_v32, 3  ;;  %v3128_v49 = vrot.slane %v3063_v38, 3 }
 0x21d   : > { %v3130_v56 = vrot.slane %v3062_v21, 3  ;;  %v3131_v24 = vrot.slane %v3064_v39, 3  ;;  %v3085_v20 = vmul.f32 %v7166_v26, %v7160_v6  ;;  %v3086_v29 = vmul.f32 %v7168_v13, %v7195_v22 }
 0x21e   : > { %v3133_v33 = vrot.slane %v3065_v51, 3  ;;  %v3134_v63 = vrot.slane %v3067_v42, 3  ;;  %v3087_v59 = vmul.f32 %v7166_v26, %v7196_v36  ;;  %v3088_v58 = vmul.f32 %v7168_v13, %v7197_v40 }
 0x21f   : > { %v3123_v14 = vsel %vm647_vm2, %v3121_v3, %v3122_v54  ;;  %v3126_v31 = vsel %vm647_vm2, %v3124_v43, %v3125_v15  ;;  %v3129_v30 = vsel %vm647_vm2, %v3127_v53, %v3128_v49  ;;  %v3132_v32 = vsel %vm647_vm2, %v3130_v56, %v3131_v24 }
 0x220   : > { %v3136_v21 = vrot.slane %v3066_v1, 3  ;;  %v3137_v38 = vrot.slane %v3068_v18, 3  ;;  %v3135_v39 = vsel %vm647_vm2, %v3133_v33, %v3134_v63  ;;  %v3139_v51 = vrot.slane %v3069_v45, 3 }
 0x221   : > { %v3140_v42 = vrot.slane %v3071_v57, 3  ;;  %v3142_v22 = vrot.slane %v3070_v44, 3  ;;  %v3143_v6 = vrot.slane %v3072_v7, 3  ;;  %v3145_v26 = vrot.slane %v3073_v50, 3 }
 0x222   : > { %v3146_v36 = vrot.slane %v3075_v61, 3  ;;  %v3148_v12 = vrot.slane %v3074_v41, 3  ;;  %v3149_v13 = vrot.slane %v3076_v10, 3  ;;  %v3151_v40 = vrot.slane %v3077_v37, 3  ;;  %v7198_v61 = vld [vmem:[#allocation3_spill] sm:$0xff]  ;;  %v7199_v10 = vld [vmem:[#allocation56_spill] sm:$0xff] }
 0x223   : > { %v3152_v3 = vrot.slane %v3079_v48, 3  ;;  %v3154_v54 = vrot.slane %v3078_v2, 3  ;;  %v3138_v15 = vsel %vm647_vm2, %v3136_v21, %v3137_v38  ;;  %v3155_v49 = vrot.slane %v3080_v8, 3  ;;  %v7203_v37 = vld [vmem:[#allocation20_spill] sm:$0xff]  ;;  %v7204_v2 = vld [vmem:[#allocation21_spill] sm:$0xff]  ;;  %v7209_v38 = vld [vmem:[#allocation26_spill] sm:$0xff] }
 0x224   : > { %v3157_v43 = vrot.slane %v3081_v25, 3  ;;  %v3158_v56 = vrot.slane %v3083_v47, 3  ;;  %v3141_v1 = vsel %vm647_vm2, %v3139_v51, %v3140_v42  ;;  %v3160_v18 = vrot.slane %v3082_v52, 3  ;;  %v7208_v21 = vld [vmem:[#allocation25_spill] sm:$0xff]  ;;  %v7211_v42 = vld [vmem:[#allocation28_spill] sm:$0xff] }
 0x225   : > { %v3161_v63 = vrot.slane %v3084_v55, 3  ;;  %v3163_v33 = vrot.slane %v3085_v20, 3  ;;  %v3144_v45 = vsel %vm647_vm2, %v3142_v22, %v3143_v6  ;;  %v3147_v44 = vsel %vm647_vm2, %v3145_v26, %v3146_v36 }
 0x226   : > { %v3164_v24 = vrot.slane %v3087_v59, 3  ;;  %v3166_v57 = vrot.slane %v3086_v29, 3  ;;  %v3150_v7 = vsel %vm647_vm2, %v3148_v12, %v3149_v13  ;;  %v3153_v48 = vsel %vm647_vm2, %v3151_v40, %v3152_v3  ;;  %v7212_v13 = vld [vmem:[#allocation29_spill] sm:$0xff] }
 0x227   : > { %v3156_v50 = vsel %vm647_vm2, %v3154_v54, %v3155_v49  ;;  %v3167_v8 = vrot.slane %v3088_v58, 3  ;;  %v3159_v25 = vsel %vm647_vm2, %v3157_v43, %v3158_v56  ;;  %v3162_v41 = vsel %vm647_vm2, %v3160_v18, %v3161_v63  ;;  %v7213_v54 = vld [vmem:[#allocation30_spill] sm:$0xff]  ;;  %v7214_v49 = vld [vmem:[#allocation31_spill] sm:$0xff]  ;;  %v7215_v56 = vld [vmem:[#allocation32_spill] sm:$0xff] }
 0x228   : > { %v6069_v52 = vadd.f32 %v3123_v14, %v5941_v34  ;;  %v6072_v6 = vadd.f32 %v3126_v31, %v5944_v27  ;;  %v3165_v59 = vsel %vm647_vm2, %v3163_v33, %v3164_v24  ;;  %v6076_v22 = vadd.f32 %v3129_v30, %v5949_v19  ;;  %v3347_v19 = vld [vmem:[%s6216_s2] sm:$0x3]  ;;  %v7206_v14 = vld [vmem:[#allocation23_spill] sm:$0xff]  ;;  %v7207_v30 = vld [vmem:[#allocation24_spill] sm:$0xff] }
 0x229   : > { %v6079_v12 = vadd.f32 %v3132_v32, %v5952_v16  ;;  %v6082_v40 = vadd.f32 %v3135_v39, %v5955_v46  ;;  %v3168_v36 = vsel %vm647_vm2, %v3166_v57, %v3167_v8  ;;  %v6086_v29 = vadd.f32 %v3138_v15, %v5958_v35  ;;  %v7216_v18 = vld [vmem:[#allocation33_spill] sm:$0xff]  ;;  %v7217_v33 = vld [vmem:[#allocation34_spill] sm:$0xff]  ;;  %v7219_v57 = vld [vmem:[#allocation36_spill] sm:$0xff] }
 0x22a   : > { %v6089_v34 = vadd.f32 %v3141_v1, %v5961_v62  ;;  %v6092_v27 = vadd.f32 %v3144_v45, %v5964_v28  ;;  %v6098_v16 = vadd.f32 %v3147_v44, %v5967_v17  ;;  %v6101_v46 = vadd.f32 %v3150_v7, %v5970_v23  ;;  %v7218_v44 = vld [vmem:[#allocation35_spill] sm:$0xff]  ;;  %v7221_v8 = vld [vmem:[#allocation38_spill] sm:$0xff] }
 0x22b   : > { %v6104_v20 = vadd.f32 %v3153_v48, %v5973_v60  ;;  %v6107_v35 = vadd.f32 %v3156_v50, %v5976_v5  ;;  %v6110_v62 = vadd.f32 %v3159_v25, %v5979_v0  ;;  %v6113_v28 = vadd.f32 %v3162_v41, %v5982_v11  ;;  %v7205_v11 = vld [vmem:[#allocation22_spill] sm:$0xff]  ;;  %v7220_v48 = vld [vmem:[#allocation37_spill] sm:$0xff]  ;;  %v7222_v41 = vld [vmem:[#allocation39_spill] sm:$0xff] }
 0x22c   : > { %v3201_v47 = vperm.slane %v7198_v61, 4  ;;  %v3202_v17 = vperm.slane %v7199_v10, 4  ;;  %v6118_v55 = vadd.f32 %v3165_v59, %v5985_v4  ;;  %v6121_v23 = vadd.f32 %v3168_v36, %v5988_v9  ;;  %v7210_v9 = vld [vmem:[#allocation27_spill] sm:$0xff]  ;;  %v7223_v36 = vld [vmem:[#allocation40_spill] sm:$0xff]  ;;  %v7224_v61 = vld [vmem:[#allocation41_spill] sm:$0xff] }
 0x22d   : > { %v6123_v60 = vperm.slane %v3347_v19, 0  ;;  %v6125_v5 = vperm.slane %v3347_v19, 1 }
 0x22e   : > { %7200 = vst [vmem:[#allocation8_spill] sm:$0xff] %v6121_v23  ;;  %v3203_v0 = vmul.f32 %v3201_v47, %v7203_v37  ;;  %v3204_v53 = vmul.f32 %v3202_v17, %v7204_v2  ;;  %v3205_v58 = vmul.f32 %v3201_v47, %v7205_v11  ;;  %v3206_v31 = vmul.f32 %v3202_v17, %v7206_v14  ;;  %v7225_v37 = vld [vmem:[#allocation42_spill] sm:$0xff]  ;;  %v7226_v11 = vld [vmem:[#allocation43_spill] sm:$0xff] }
 0x22f   : > { %7201 = vst [vmem:[#allocation12_spill] sm:$0xff] %v6123_v60  ;;  %v3207_v32 = vmul.f32 %v3201_v47, %v7207_v30  ;;  %v3208_v4 = vmul.f32 %v3202_v17, %v7208_v21  ;;  %v3209_v39 = vmul.f32 %v3201_v47, %v7209_v38  ;;  %v3210_v51 = vmul.f32 %v3202_v17, %v7210_v9  ;;  %v7227_v30 = vld [vmem:[#allocation44_spill] sm:$0xff]  ;;  %v7228_v38 = vld [vmem:[#allocation45_spill] sm:$0xff] }
 0x230   : > { %7202 = vst [vmem:[#allocation13_spill] sm:$0xff] %v6125_v5  ;;  %v3211_v26 = vmul.f32 %v3201_v47, %v7211_v42  ;;  %v3212_v3 = vmul.f32 %v3202_v17, %v7212_v13  ;;  %v3213_v15 = vmul.f32 %v3201_v47, %v7213_v54  ;;  %v3214_v43 = vmul.f32 %v3202_v17, %v7214_v49  ;;  %v7229_v42 = vld [vmem:[#allocation46_spill] sm:$0xff]  ;;  %v7230_v54 = vld [vmem:[#allocation47_spill] sm:$0xff] }
 0x231   : > { %v3215_v1 = vmul.f32 %v3201_v47, %v7215_v56  ;;  %v3216_v63 = vmul.f32 %v3202_v17, %v7216_v18  ;;  %v3217_v45 = vmul.f32 %v3201_v47, %v7217_v33  ;;  %v3218_v24 = vmul.f32 %v3202_v17, %v7218_v44  ;;  %v7231_v56 = vld [vmem:[#allocation48_spill] sm:$0xff]  ;;  %v7232_v33 = vld [vmem:[#allocation49_spill] sm:$0xff] }
 0x232   : > { %v3219_v7 = vmul.f32 %v3201_v47, %v7219_v57  ;;  %v3220_v50 = vmul.f32 %v3202_v17, %v7220_v48  ;;  %v3221_v25 = vmul.f32 %v3201_v47, %v7221_v8  ;;  %v3222_v59 = vmul.f32 %v3202_v17, %v7222_v41  ;;  %v7233_v57 = vld [vmem:[#allocation50_spill] sm:$0xff]  ;;  %v7234_v8 = vld [vmem:[#allocation51_spill] sm:$0xff] }
 0x233   : > { %v3223_v19 = vmul.f32 %v3201_v47, %v7223_v36  ;;  %v3224_v10 = vmul.f32 %v3202_v17, %v7224_v61  ;;  %v3225_v2 = vmul.f32 %v3201_v47, %v7225_v37  ;;  %v3226_v14 = vmul.f32 %v3202_v17, %v7226_v11 }
 0x234   : > { %v3227_v21 = vmul.f32 %v3201_v47, %v7227_v30  ;;  %v3228_v9 = vmul.f32 %v3202_v17, %v7228_v38  ;;  %v3229_v13 = vmul.f32 %v3201_v47, %v7229_v42  ;;  %v3230_v49 = vmul.f32 %v3202_v17, %v7230_v54 }
 0x235   : > { %v3231_v18 = vmul.f32 %v3201_v47, %v7231_v56  ;;  %v3232_v44 = vmul.f32 %v3202_v17, %v7232_v33  ;;  %v3233_v48 = vmul.f32 %v3201_v47, %v7233_v57  ;;  %v3234_v41 = vmul.f32 %v3202_v17, %v7234_v8 }
 0x236   : > { %v3267_v36 = vrot.slane %v3203_v0, 4  ;;  %v3268_v61 = vrot.slane %v3205_v58, 4  ;;  %v3270_v37 = vrot.slane %v3204_v53, 4  ;;  %v3271_v11 = vrot.slane %v3206_v31, 4 }
 0x237   : > { %v3273_v5 = vrot.slane %v3207_v32, 4  ;;  %v3274_v30 = vrot.slane %v3209_v39, 4  ;;  %v3276_v60 = vrot.slane %v3208_v4, 4  ;;  %v3277_v38 = vrot.slane %v3210_v51, 4 }
 0x238   : > { %v3269_v42 = vsel %vm794_vm3, %v3267_v36, %v3268_v61  ;;  %v3272_v54 = vsel %vm794_vm3, %v3270_v37, %v3271_v11  ;;  %v3279_v23 = vrot.slane %v3211_v26, 4  ;;  %v3280_v56 = vrot.slane %v3213_v15, 4 }
 0x239   : > { %v3275_v33 = vsel %vm794_vm3, %v3273_v5, %v3274_v30  ;;  %v3278_v47 = vsel %vm794_vm3, %v3276_v60, %v3277_v38  ;;  %v3282_v57 = vrot.slane %v3212_v3, 4  ;;  %v3283_v17 = vrot.slane %v3214_v43, 4 }
 0x23a   : > { %v3281_v0 = vsel %vm794_vm3, %v3279_v23, %v3280_v56  ;;  %v3285_v53 = vrot.slane %v3215_v1, 4  ;;  %v3286_v58 = vrot.slane %v3217_v45, 4  ;;  %v3288_v31 = vrot.slane %v3216_v63, 4 }
 0x23b   : > { %v3284_v32 = vsel %vm794_vm3, %v3282_v57, %v3283_v17  ;;  %v3289_v4 = vrot.slane %v3218_v24, 4  ;;  %v3291_v39 = vrot.slane %v3219_v7, 4  ;;  %v3292_v51 = vrot.slane %v3221_v25, 4 }
 0x23c   : > { %v3287_v8 = vsel %vm794_vm3, %v3285_v53, %v3286_v58  ;;  %v3294_v26 = vrot.slane %v3220_v50, 4  ;;  %v3295_v15 = vrot.slane %v3222_v59, 4  ;;  %v3297_v36 = vrot.slane %v3223_v19, 4 }
 0x23d   : > { %v3290_v5 = vsel %vm794_vm3, %v3288_v31, %v3289_v4  ;;  %v3293_v60 = vsel %vm794_vm3, %v3291_v39, %v3292_v51  ;;  %v3298_v3 = vrot.slane %v3225_v2, 4  ;;  %v3300_v43 = vrot.slane %v3224_v10, 4 }
 0x23e   : > { %v3296_v23 = vsel %vm794_vm3, %v3294_v26, %v3295_v15  ;;  %v3301_v1 = vrot.slane %v3226_v14, 4  ;;  %v3303_v63 = vrot.slane %v3227_v21, 4  ;;  %v3304_v45 = vrot.slane %v3229_v13, 4 }
 0x23f   : > { %v3299_v24 = vsel %vm794_vm3, %v3297_v36, %v3298_v3  ;;  %v3306_v7 = vrot.slane %v3228_v9, 4  ;;  %v3307_v25 = vrot.slane %v3230_v49, 4  ;;  %v3309_v61 = vrot.slane %v3231_v18, 4 }
 0x240   : > { %v3302_v50 = vsel %vm794_vm3, %v3300_v43, %v3301_v1  ;;  %v3305_v59 = vsel %vm794_vm3, %v3303_v63, %v3304_v45  ;;  %v3310_v19 = vrot.slane %v3233_v48, 4  ;;  %v3312_v37 = vrot.slane %v3232_v44, 4 }
 0x241   : > { %v3308_v11 = vsel %vm794_vm3, %v3306_v7, %v3307_v25  ;;  %v3313_v2 = vrot.slane %v3234_v41, 4  ;;  %v3331_v10 = vadd.f32 %v3269_v42, %v6069_v52  ;;  %v3332_v14 = vadd.f32 %v3272_v54, %v6072_v6  ;;  %v7235_v42 = vld [vmem:[#allocation8_spill] sm:$0xff] }
 0x242   : > { %v3311_v21 = vsel %vm794_vm3, %v3309_v61, %v3310_v19  ;;  %v3333_v9 = vadd.f32 %v3275_v33, %v6076_v22  ;;  %v3334_v13 = vadd.f32 %v3278_v47, %v6079_v12  ;;  %v3335_v49 = vadd.f32 %v3281_v0, %v6082_v40 }
 0x243   : > { %v3314_v18 = vsel %vm794_vm3, %v3312_v37, %v3313_v2  ;;  %v3336_v44 = vadd.f32 %v3284_v32, %v6086_v29  ;;  %v3337_v48 = vadd.f32 %v3287_v8, %v6089_v34  ;;  %v3338_v41 = vadd.f32 %v3290_v5, %v6092_v27  ;;  %v7236_v34 = vld [vmem:[#allocation12_spill] sm:$0xff]  ;;  %v7237_v27 = vld [vmem:[#allocation13_spill] sm:$0xff] }
 0x244   : > { %v3339_v52 = vadd.f32 %v3293_v60, %v6098_v16  ;;  %v3340_v6 = vadd.f32 %v3296_v23, %v6101_v46  ;;  %v3341_v30 = vadd.f32 %v3299_v24, %v6104_v20  ;;  %v3342_v22 = vadd.f32 %v3302_v50, %v6107_v35 }
 0x245   : > { %v3343_v12 = vadd.f32 %v3305_v59, %v6110_v62  ;;  %v3344_v40 = vadd.f32 %v3308_v11, %v6113_v28  ;;  %v3345_v38 = vadd.f32 %v3311_v21, %v6118_v55  ;;  %v3346_v29 = vadd.f32 %v3314_v18, %v7235_v42 }
 0x246   : > { %v3353_v54 = vadd.f32 %v7236_v34, %v3331_v10  ;;  %v3354_v56 = vadd.f32 %v7237_v27, %v3332_v14  ;;  %v3355_v16 = vadd.f32 %v7236_v34, %v3333_v9  ;;  %v3356_v46 = vadd.f32 %v7237_v27, %v3334_v13 }
 0x247   : > { %v3357_v20 = vadd.f32 %v7236_v34, %v3335_v49  ;;  %v3358_v35 = vadd.f32 %v7237_v27, %v3336_v44  ;;  %v3359_v62 = vadd.f32 %v7236_v34, %v3337_v48  ;;  %v3360_v28 = vadd.f32 %v7237_v27, %v3338_v41 }
 0x248   : > { %v3361_v55 = vadd.f32 %v7236_v34, %v3339_v52  ;;  %v3362_v33 = vadd.f32 %v7237_v27, %v3340_v6  ;;  %v3363_v47 = vadd.f32 %v7236_v34, %v3341_v30  ;;  %v3364_v57 = vadd.f32 %v7237_v27, %v3342_v22 }
 0x249   : > { %v3365_v17 = vadd.f32 %v7236_v34, %v3343_v12  ;;  %v3366_v0 = vadd.f32 %v7237_v27, %v3344_v40  ;;  %v3369_v53 = vpack.c.bf16 %v3354_v56, %v3353_v54  ;;  %v3370_v58 = vpack.c.bf16 %v3356_v46, %v3355_v16 }
 0x24a   : > { %v3371_v31 = vpack.c.bf16 %v3358_v35, %v3357_v20  ;;  %v3367_v32 = vadd.f32 %v7236_v34, %v3345_v38  ;;  %v3368_v4 = vadd.f32 %v7237_v27, %v3346_v29  ;;  %v3372_v39 = vpack.c.bf16 %v3360_v28, %v3359_v62 }
 0x24b   : > { %v3373_v51 = vpack.c.bf16 %v3362_v33, %v3361_v55  ;;  %3377 = vst [vmem:[%s170_s17] sm:$0xff] %v3369_v53  ;;  %v3374_v8 = vpack.c.bf16 %v3364_v57, %v3363_v47  ;;  %v3375_v26 = vpack.c.bf16 %v3366_v0, %v3365_v17 }
 0x24c   : > { %3378 = vst [vmem:[%s170_s17 + $0x8] sm:$0xff] %v3370_v58  ;;  %v3376_v15 = vpack.c.bf16 %v3368_v4, %v3367_v32 }
 0x24d   : > { %3379 = vst [vmem:[%s170_s17 + $0x10] sm:$0xff] %v3371_v31 }
 0x24e   : > { %3380 = vst [vmem:[%s170_s17 + $0x18] sm:$0xff] %v3372_v39 }
 0x24f   : > { %3381 = vst [vmem:[%s170_s17 + $0x20] sm:$0xff] %v3373_v51 }
 0x250   : > { %3382 = vst [vmem:[%s170_s17 + $0x28] sm:$0xff] %v3374_v8 }
 0x251   : > { %3383 = vst [vmem:[%s170_s17 + $0x30] sm:$0xff] %v3375_v26 }
 0x252   : > { %3384 = vst [vmem:[%s170_s17 + $0x38] sm:$0xff] %v3376_v15 }
 0x253 PF: > { %s13_s12 = sadd.s32 1, %s3466_s12  }
 0x254   : > { %p10_p4 = scmp.ge.s32.totalorder %s13_s12, 4  }
 0x256   :  { %12 = sbr.rel (!%p10_p4) target bundleno = 1 (0x1), region = 62 }

</bundles_post_ra>
